<compile_context>
chip_gen: v7x
topology: tpu7x:2x2x1
jax: 0.10.0
libtpu: 0.0.40
codegen_flags: <defaults>
</compile_context>

<pallas_src>
import functools

import jax
import jax.numpy as jnp
from jax.experimental import pallas as pl
from jax.experimental.pallas import tpu as pltpu


# ----------------------------------------------------------------------------
# Tiling helpers (all compile-time Python ints)
# ----------------------------------------------------------------------------
def _divisor_tile(n, preferred):
    """Largest divisor of n that is <= preferred and a multiple of 8; else n."""
    best = None
    for d in range(8, min(n, preferred) + 1, 8):
        if n % d == 0:
            best = d
    return best if best is not None else n


def _row_tile(m, in_width, out_width, budget_bytes=8 * 1024 * 1024):
    """Row-tile for a parallel matmul kernel, sized against a VMEM budget."""
    per_row = max(1, (in_width + out_width) * 4 * 2)      # f32, double-buffered
    cap = max(8, budget_bytes // per_row)
    return _divisor_tile(m, int(min(cap, 2048)))


def _seq_chunk(s, n_rows, h, budget_bytes=6 * 1024 * 1024):
    """Sequence chunk (must divide s) sized against a VMEM budget."""
    per_t = max(1, n_rows * (4 * h + h) * 4 * 2 * 2)       # gx + out, 2 dirs, 2 bufs
    cap = max(1, budget_bytes // per_t)
    best = 1
    for d in range(1, s + 1):
        if s % d == 0 and d <= cap:
            best = d
    return best


# ----------------------------------------------------------------------------
# Kernel 1: hoisted gate-input projection  gx_dir = sum_i x_i @ W_ih_dir_i + b_dir
# ----------------------------------------------------------------------------
def _gates_proj_kernel(num_in, *refs):
    x_refs = refs[:num_in]
    wf_refs = refs[num_in:2 * num_in]
    wb_refs = refs[2 * num_in:3 * num_in]
    bf_ref, bb_ref, outf_ref, outb_ref = refs[3 * num_in:]

    gf = bf_ref[...]
    gb = bb_ref[...]
    for i in range(num_in):
        xi = x_refs[i][...]
        gf = gf + jnp.dot(xi, wf_refs[i][...], preferred_element_type=jnp.float32)
        gb = gb + jnp.dot(xi, wb_refs[i][...], preferred_element_type=jnp.float32)
    outf_ref[...] = gf
    outb_ref[...] = gb


def gates_proj_pallas(xs, w_fs, w_bs, b_f, b_b):
    """xs: list of [M, D_i]; w_*s: list of [D_i, 4H]; b_*: [4H] -> (gx_f, gx_b) [M, 4H]."""
    M = int(xs[0].shape[0])
    G = int(w_fs[0].shape[1])
    in_width = sum(int(x.shape[1]) for x in xs)
    tile_m = _row_tile(M, in_width, 2 * G)

    in_specs = []
    for x in xs:
        in_specs.append(pl.BlockSpec((tile_m, int(x.shape[1])), lambda m: (m, 0)))
    for w in list(w_fs) + list(w_bs):
        in_specs.append(pl.BlockSpec(tuple(int(d) for d in w.shape), lambda m: (0, 0)))
    in_specs.append(pl.BlockSpec((1, G), lambda m: (0, 0)))
    in_specs.append(pl.BlockSpec((1, G), lambda m: (0, 0)))

    out_specs = [pl.BlockSpec((tile_m, G), lambda m: (m, 0)),
                 pl.BlockSpec((tile_m, G), lambda m: (m, 0))]

    kernel = functools.partial(_gates_proj_kernel, len(xs))
    gx_f, gx_b = pl.pallas_call(
        kernel,
        out_shape=[jax.ShapeDtypeStruct((M, G), jnp.float32)] * 2,
        grid_spec=pltpu.PrefetchScalarGridSpec(
            num_scalar_prefetch=0,
            grid=(M // tile_m,),
            in_specs=in_specs,
            out_specs=out_specs,
        ),
        compiler_params=pltpu.CompilerParams(
            dimension_semantics=("parallel",),
            vmem_limit_bytes=64 * 1024 * 1024,
        ),
    )(*xs, *w_fs, *w_bs, b_f.reshape(1, G), b_b.reshape(1, G))
    return gx_f, gx_b


# ----------------------------------------------------------------------------
# Kernel 2: fused bidirectional LSTM recurrence (input projection pre-computed)
# ----------------------------------------------------------------------------
def _bilstm_rec_kernel(Tc, H, has_c0, *refs):
    if has_c0:
        (gxf_ref, gxb_ref, whhf_ref, whhb_ref, c0_ref,
         outf_ref, outb_ref, hf, cf, hb, cb) = refs
    else:
        (gxf_ref, gxb_ref, whhf_ref, whhb_ref,
         outf_ref, outb_ref, hf, cf, hb, cb) = refs

    c_idx = pl.program_id(1)          # sequence-chunk index (sequential axis)

    @pl.when(c_idx == 0)
    def _():
        hf[...] = jnp.zeros_like(hf)
        hb[...] = jnp.zeros_like(hb)
        if has_c0:                    # layer-1: DoA-conditioned initial cell state
            cf[...] = c0_ref[...]
            cb[...] = c0_ref[...]
        else:                         # layer-2: zero init in-kernel (no HBM zeros)
            cf[...] = jnp.zeros_like(cf)
            cb[...] = jnp.zeros_like(cb)

    whh_f = whhf_ref[...]
    whh_b = whhb_ref[...]

    def cell(gx, h, c, whh):
        gates = gx + jnp.dot(h, whh, preferred_element_type=jnp.float32)
        i = jax.nn.sigmoid(gates[:, 0:H])
        f = jax.nn.sigmoid(gates[:, H:2 * H])
        g = jnp.tanh(gates[:, 2 * H:3 * H])
        o = jax.nn.sigmoid(gates[:, 3 * H:4 * H])
        c_new = f * c + i * g
        h_new = o * jnp.tanh(c_new)
        return h_new, c_new

    # Fully unrolled inner loop over the chunk (Tc is a small compile-time
    # constant): forward walks the chunk left->right, backward right->left.
    # Two independent chains per step keep VPU/EUP/MXU slots busier.
    for i in range(Tc):
        h_new, c_new = cell(gxf_ref[i], hf[...], cf[...], whh_f)
        hf[...] = h_new
        cf[...] = c_new
        outf_ref[i] = h_new.astype(outf_ref.dtype)

        j = Tc - 1 - i
        h_new, c_new = cell(gxb_ref[j], hb[...], cb[...], whh_b)
        hb[...] = h_new
        cb[...] = c_new
        outb_ref[j] = h_new.astype(outb_ref.dtype)


def bilstm_recurrence_pallas(gx_f, gx_b, whh_f, whh_b, c0=None):
    """gx_*: [S, N, 4H] pre-projected gates; whh_*: [H, 4H]; c0: [N, H] or None."""
    S, N, G = (int(d) for d in gx_f.shape)
    H = int(whh_f.shape[0])

    # Row-split parallel axis: lets v7x's two TensorCores each take half the
    # batch rows; harmless on single-core chips.
    R = 2 if (N % 2 == 0 and (N // 2) % 8 == 0) else 1
    Nr = N // R
    Tc = _seq_chunk(S, Nr, H)
    nc = S // Tc

    fwd_idx = lambda r, c: (c, r, 0)
    bwd_idx = lambda r, c: (nc - 1 - c, r, 0)

    in_specs = [
        pl.BlockSpec((Tc, Nr, G), fwd_idx),
        pl.BlockSpec((Tc, Nr, G), bwd_idx),
        pl.BlockSpec((H, G), lambda r, c: (0, 0)),
        pl.BlockSpec((H, G), lambda r, c: (0, 0)),
    ]
    args = [gx_f, gx_b, whh_f, whh_b]
    if c0 is not None:
        in_specs.append(pl.BlockSpec((Nr, H), lambda r, c: (r, 0)))
        args.append(c0)

    out_specs = [
        pl.BlockSpec((Tc, Nr, H), fwd_idx),
        pl.BlockSpec((Tc, Nr, H), bwd_idx),
    ]

    kernel = functools.partial(_bilstm_rec_kernel, Tc, H, c0 is not None)
    out_f, out_b = pl.pallas_call(
        kernel,
        out_shape=[jax.ShapeDtypeStruct((S, N, H), jnp.float32)] * 2,
        grid_spec=pltpu.PrefetchScalarGridSpec(
            num_scalar_prefetch=0,
            grid=(R, nc),
            in_specs=in_specs,
            out_specs=out_specs,
            scratch_shapes=[pltpu.VMEM((Nr, H), jnp.float32)] * 4,
        ),
        compiler_params=pltpu.CompilerParams(
            dimension_semantics=("parallel", "arbitrary"),
            vmem_limit_bytes=64 * 1024 * 1024,
        ),
    )(*args)
    return out_f, out_b


# ----------------------------------------------------------------------------
# Kernel 3: final FF + sigmoid (split weight -> no HBM concat of y2_f / y2_b)
# ----------------------------------------------------------------------------
def _linear_sigmoid_kernel(xf_ref, xb_ref, wf_ref, wb_ref, b_ref, o_ref):
    y = (jnp.dot(xf_ref[...], wf_ref[...], preferred_element_type=jnp.float32)
         + jnp.dot(xb_ref[...], wb_ref[...], preferred_element_type=jnp.float32)
         + b_ref[...])
    o_ref[...] = jax.nn.sigmoid(y).astype(o_ref.dtype)


def linear_sigmoid_pallas(x_f, x_b, w_f, w_b, b):
    M, H = (int(d) for d in x_f.shape)
    O = int(w_f.shape[1])
    tile_m = _row_tile(M, 2 * H, O)
    return pl.pallas_call(
        _linear_sigmoid_kernel,
        out_shape=jax.ShapeDtypeStruct((M, O), jnp.float32),
        grid_spec=pltpu.PrefetchScalarGridSpec(
            num_scalar_prefetch=0,
            grid=(M // tile_m,),
            in_specs=[
                pl.BlockSpec((tile_m, H), lambda m: (m, 0)),
                pl.BlockSpec((tile_m, H), lambda m: (m, 0)),
                pl.BlockSpec((H, O), lambda m: (0, 0)),
                pl.BlockSpec((H, O), lambda m: (0, 0)),
                pl.BlockSpec((1, O), lambda m: (0, 0)),
            ],
            out_specs=pl.BlockSpec((tile_m, O), lambda m: (m, 0)),
        ),
        compiler_params=pltpu.CompilerParams(
            dimension_semantics=("parallel",),
            vmem_limit_bytes=64 * 1024 * 1024,
        ),
    )(x_f, x_b, w_f, w_b, b.reshape(1, O))


# ----------------------------------------------------------------------------
# Full JNF_SSF forward (bidirectional=True, output_type='IRM',
# output_activation='sigmoid', causal=False, condition_wb_only=True, eval mode)
# ----------------------------------------------------------------------------
def jnf_ssf_forward(x, target_dirs, params):
    B, C, F, T = (int(d) for d in x.shape)
    wih1_f, whh1_f, b1_f = params["lstm1_fwd"]
    wih1_b, whh1_b, b1_b = params["lstm1_bwd"]
    wih2_f, whh2_f, b2_f = params["lstm2_fwd"]
    wih2_b, whh2_b, b2_b = params["lstm2_bwd"]
    H1 = int(whh1_f.shape[0])
    H2 = int(whh2_f.shape[0])

    # ---- layer 1: wideband BiLSTM over frequency, conditioned on DoA via c0 ----
    N1 = B * T
    x1 = jnp.transpose(x, (2, 0, 3, 1)).reshape(F, N1, C)

    gx1_f, gx1_b = gates_proj_pallas([x1.reshape(F * N1, C)],
                                     [wih1_f], [wih1_b], b1_f, b1_b)
    gx1_f = gx1_f.reshape(F, N1, 4 * H1)
    gx1_b = gx1_b.reshape(F, N1, 4 * H1)

    emb1 = target_dirs @ params["cond_w"].T + params["cond_b"]        # [B, H1]
    c0 = jnp.tile(emb1[:, None, :], (1, T, 1)).reshape(N1, H1)        # [B*T, H1]

    y1_f, y1_b = bilstm_recurrence_pallas(gx1_f, gx1_b, whh1_f, whh1_b, c0=c0)
    # dropout p=0 (eval) -> identity

    # ---- layer 2: narrowband BiLSTM over time (unconditioned) ----
    N2 = B * F

    def to_l2(y):  # [F, B*T, H1] -> [T*B*F, H1]  (layout glue, XLA transpose)
        return y.reshape(F, B, T, H1).transpose(2, 1, 0, 3).reshape(T * N2, H1)

    x2_f = to_l2(y1_f)
    x2_b = to_l2(y1_b)

    # Split-weight projection avoids materializing concat([y1_f, y1_b], -1).
    gx2_f, gx2_b = gates_proj_pallas(
        [x2_f, x2_b],
        [wih2_f[:H1], wih2_f[H1:]],
        [wih2_b[:H1], wih2_b[H1:]],
        b2_f, b2_b)
    gx2_f = gx2_f.reshape(T, N2, 4 * H2)
    gx2_b = gx2_b.reshape(T, N2, 4 * H2)

    y2_f, y2_b = bilstm_recurrence_pallas(gx2_f, gx2_b, whh2_f, whh2_b, c0=None)

    # ---- output projection + sigmoid mask ----
    O = int(params["ff_w"].shape[1])
    y3 = linear_sigmoid_pallas(y2_f.reshape(T * N2, H2),
                               y2_b.reshape(T * N2, H2),
                               params["ff_w"][:H2], params["ff_w"][H2:],
                               params["ff_b"])
    mask = y3.reshape(T, B, F, O).transpose(1, 3, 2, 0)               # [B, O, F, T]
    return mask


# ----------------------------------------------------------------------------
# Pure-JAX reference (lax.scan) for validation
# ----------------------------------------------------------------------------
def lstm_layer_ref(x, w_ih, w_hh, b, h0, c0, *, reverse=False):
    if reverse:
        x = x[::-1]

    def step(carry, xt):
        h, c = carry
        gates = xt @ w_ih + h @ w_hh + b
        i, f, g, o = jnp.split(gates, 4, axis=-1)
        c = jax.nn.sigmoid(f) * c + jax.nn.sigmoid(i) * jnp.tanh(g)
        h = jax.nn.sigmoid(o) * jnp.tanh(c)
        return (h, c), h

    _, hs = jax.lax.scan(step, (h0, c0), x)
    if reverse:
        hs = hs[::-1]
    return hs


def jnf_ssf_forward_ref(x, target_dirs, params):
    B, C, F, T = x.shape
    H1 = params["lstm1_fwd"][1].shape[0]
    H2 = params["lstm2_fwd"][1].shape[0]
    L1, L2 = 2 * H1, 2 * H2

    x1 = jnp.transpose(x, (2, 0, 3, 1)).reshape(F, B * T, C)
    emb1 = target_dirs @ params["cond_w"].T + params["cond_b"]
    c0_dir = jnp.tile(emb1[:, None, :], (1, T, 1)).reshape(B * T, H1)
    h0 = jnp.zeros((B * T, H1), jnp.float32)
    y1 = jnp.concatenate([
        lstm_layer_ref(x1, *params["lstm1_fwd"], h0, c0_dir, reverse=False),
        lstm_layer_ref(x1, *params["lstm1_bwd"], h0, c0_dir, reverse=True),
    ], axis=-1)

    x2 = y1.reshape(F, B, T, L1).transpose(2, 1, 0, 3).reshape(T, B * F, L1)
    z = jnp.zeros((B * F, H2), jnp.float32)
    y2 = jnp.concatenate([
        lstm_layer_ref(x2, *params["lstm2_fwd"], z, z, reverse=False),
        lstm_layer_ref(x2, *params["lstm2_bwd"], z, z, reverse=True),
    ], axis=-1)

    O = params["ff_w"].shape[1]
    y3 = jax.nn.sigmoid(y2.reshape(T * B * F, L2) @ params["ff_w"]
                        + params["ff_b"])
    return y3.reshape(T, B, F, O).transpose(1, 3, 2, 0)


# ----------------------------------------------------------------------------
# Deterministic parameter init + run
# ----------------------------------------------------------------------------
def init_params(key, c_in, h1, h2, cond_dim, out_features):
    ks = iter(jax.random.split(key, 32))

    def lin(d_in, d_out):
        return (0.1 * jax.random.normal(next(ks), (d_out, d_in), jnp.float32),
                0.1 * jax.random.normal(next(ks), (d_out,), jnp.float32))

    def lstm_dir(d_in, h):
        # stored pre-transposed for the kernels: w_ih [d_in, 4h], w_hh [h, 4h]
        w_ih = 0.1 * jax.random.normal(next(ks), (d_in, 4 * h), jnp.float32)
        w_hh = 0.1 * jax.random.normal(next(ks), (h, 4 * h), jnp.float32)
        b_ih = 0.1 * jax.random.normal(next(ks), (4 * h,), jnp.float32)
        b_hh = 0.1 * jax.random.normal(next(ks), (4 * h,), jnp.float32)
        return (w_ih, w_hh, b_ih + b_hh)

    cond_w, cond_b = lin(cond_dim, h1)
    ff_w_t, ff_b = lin(2 * h2, out_features)     # torch layout [out, in]
    return {
        "cond_w": cond_w, "cond_b": cond_b,
        "lstm1_fwd": lstm_dir(c_in, h1), "lstm1_bwd": lstm_dir(c_in, h1),
        "lstm2_fwd": lstm_dir(2 * h1, h2), "lstm2_bwd": lstm_dir(2 * h1, h2),
        "ff_w": ff_w_t.T, "ff_b": ff_b,
    }


if __name__ == "__main__":
    # Small config: n_channels=2 -> lstm_input = 2*n_channels = 4 input channels.
    B, n_channels, F, T = 2, 2, 8, 8
    C = 2 * n_channels
    H1, H2, COND = 16, 16, 8
    OUT = 1                       # 'IRM'

    key = jax.random.PRNGKey(0)
    k_x, k_p = jax.random.split(key)
    x = jax.random.normal(k_x, (B, C, F, T), jnp.float32)
    # one-hot DoA vectors [B, n_cond_emb_dim]
    target_dirs = jax.nn.one_hot(jnp.array([1, 3]), COND, dtype=jnp.float32)

    params = init_params(k_p, C, H1, H2, COND, OUT)

    fwd = jax.jit(jnf_ssf_forward)
    mask = jax.block_until_ready(fwd(x, target_dirs, params))
    assert mask.shape == (B, OUT, F, T), mask.shape

    ref = jax.block_until_ready(jnf_ssf_forward_ref(x, target_dirs, params))
    assert jnp.allclose(mask, ref, atol=1e-4, rtol=1e-4), \
        float(jnp.max(jnp.abs(mask - ref)))

    print("KERNEL_OK")
</pallas_src>

<mosaic_0001>
module attributes {stable_mosaic.version = 11 : i64} {
  func.func @_gates_proj_kernel(%arg0: i32, %arg1: memref<128x4xf32, #tpu.memory_space<vmem>>, %arg2: memref<4x64xf32, #tpu.memory_space<vmem>>, %arg3: memref<4x64xf32, #tpu.memory_space<vmem>>, %arg4: memref<1x64xf32, #tpu.memory_space<vmem>>, %arg5: memref<1x64xf32, #tpu.memory_space<vmem>>, %arg6: memref<128x64xf32, #tpu.memory_space<vmem>>, %arg7: memref<128x64xf32, #tpu.memory_space<vmem>>) attributes {dimension_semantics = [#tpu.dimension_semantics<parallel>], iteration_bounds = array<i64: 1>, scalar_prefetch = 0 : i64, scratch_operands = 0 : i64, tpu.core_type = #tpu.core_type<tc>, window_params = [{transform_indices = @transform_0, window_bounds = array<i64: 128, 4>}, {pipeline_mode = #tpu.pipeline_mode<synchronous>, transform_indices = @transform_1, window_bounds = array<i64: 4, 64>}, {pipeline_mode = #tpu.pipeline_mode<synchronous>, transform_indices = @transform_2, window_bounds = array<i64: 4, 64>}, {pipeline_mode = #tpu.pipeline_mode<synchronous>, transform_indices = @transform_3, window_bounds = array<i64: 1, 64>}, {pipeline_mode = #tpu.pipeline_mode<synchronous>, transform_indices = @transform_4, window_bounds = array<i64: 1, 64>}, {transform_indices = @transform_5, window_bounds = array<i64: 128, 64>}, {transform_indices = @transform_6, window_bounds = array<i64: 128, 64>}]} {
    %c0 = arith.constant 0 : index
    %c0_0 = arith.constant 0 : index
    %0 = vector.load %arg4[%c0, %c0_0] : memref<1x64xf32, #tpu.memory_space<vmem>>, vector<1x64xf32>
    %c0_1 = arith.constant 0 : index
    %c0_2 = arith.constant 0 : index
    %1 = vector.load %arg5[%c0_1, %c0_2] : memref<1x64xf32, #tpu.memory_space<vmem>>, vector<1x64xf32>
    %c0_3 = arith.constant 0 : index
    %c0_4 = arith.constant 0 : index
    %2 = vector.load %arg1[%c0_3, %c0_4] : memref<128x4xf32, #tpu.memory_space<vmem>>, vector<128x4xf32>
    %c0_5 = arith.constant 0 : index
    %c0_6 = arith.constant 0 : index
    %3 = vector.load %arg2[%c0_5, %c0_6] : memref<4x64xf32, #tpu.memory_space<vmem>>, vector<4x64xf32>
    %cst = arith.constant dense<0.000000e+00> : vector<128x64xf32>
    %4 = tpu.matmul %2, %3, %cst {dimension_numbers = #tpu.dot_dimension_numbers<[1], [0], [0], [1], [0, 0, 1, 1], [], []>} : vector<128x4xf32>, vector<4x64xf32>, vector<128x64xf32> -> vector<128x64xf32>
    %5 = vector.broadcast %0 : vector<1x64xf32> to vector<128x64xf32>
    %6 = arith.addf %5, %4 : vector<128x64xf32>
    %c0_7 = arith.constant 0 : index
    %c0_8 = arith.constant 0 : index
    %7 = vector.load %arg3[%c0_7, %c0_8] : memref<4x64xf32, #tpu.memory_space<vmem>>, vector<4x64xf32>
    %cst_9 = arith.constant dense<0.000000e+00> : vector<128x64xf32>
    %8 = tpu.matmul %2, %7, %cst_9 {dimension_numbers = #tpu.dot_dimension_numbers<[1], [0], [0], [1], [0, 0, 1, 1], [], []>} : vector<128x4xf32>, vector<4x64xf32>, vector<128x64xf32> -> vector<128x64xf32>
    %9 = vector.broadcast %1 : vector<1x64xf32> to vector<128x64xf32>
    %10 = arith.addf %9, %8 : vector<128x64xf32>
    %c0_10 = arith.constant 0 : index
    %c0_11 = arith.constant 0 : index
    %11 = vector.load %arg6[%c0_10, %c0_11] : memref<128x64xf32, #tpu.memory_space<vmem>>, vector<128x64xf32>
    tpu.vector_store %arg6[%c0_10, %c0_11], %6 {strides = array<i32>} : memref<128x64xf32, #tpu.memory_space<vmem>>, vector<128x64xf32>,
    %c0_12 = arith.constant 0 : index
    %c0_13 = arith.constant 0 : index
    %12 = vector.load %arg7[%c0_12, %c0_13] : memref<128x64xf32, #tpu.memory_space<vmem>>, vector<128x64xf32>
    tpu.vector_store %arg7[%c0_12, %c0_13], %10 {strides = array<i32>} : memref<128x64xf32, #tpu.memory_space<vmem>>, vector<128x64xf32>,
    return
  }
  func.func @transform_0(%arg0: i32) -> (i32, i32) {
    %c0_i32 = arith.constant 0 : i32
    %c0_i32_0 = arith.constant 0 : i32
    return %arg0, %c0_i32 : i32, i32
  }
  func.func @transform_1(%arg0: i32) -> (i32, i32) {
    %c0_i32 = arith.constant 0 : i32
    %c0_i32_0 = arith.constant 0 : i32
    %c0_i32_1 = arith.constant 0 : i32
    return %c0_i32, %c0_i32_0 : i32, i32
  }
  func.func @transform_2(%arg0: i32) -> (i32, i32) {
    %c0_i32 = arith.constant 0 : i32
    %c0_i32_0 = arith.constant 0 : i32
    %c0_i32_1 = arith.constant 0 : i32
    return %c0_i32, %c0_i32_0 : i32, i32
  }
  func.func @transform_3(%arg0: i32) -> (i32, i32) {
    %c0_i32 = arith.constant 0 : i32
    %c0_i32_0 = arith.constant 0 : i32
    %c0_i32_1 = arith.constant 0 : i32
    return %c0_i32, %c0_i32_0 : i32, i32
  }
  func.func @transform_4(%arg0: i32) -> (i32, i32) {
    %c0_i32 = arith.constant 0 : i32
    %c0_i32_0 = arith.constant 0 : i32
    %c0_i32_1 = arith.constant 0 : i32
    return %c0_i32, %c0_i32_0 : i32, i32
  }
  func.func @transform_5(%arg0: i32) -> (i32, i32) {
    %c0_i32 = arith.constant 0 : i32
    %c0_i32_0 = arith.constant 0 : i32
    return %arg0, %c0_i32 : i32, i32
  }
  func.func @transform_6(%arg0: i32) -> (i32, i32) {
    %c0_i32 = arith.constant 0 : i32
    %c0_i32_0 = arith.constant 0 : i32
    return %arg0, %c0_i32 : i32, i32
  }
}

module attributes {stable_mosaic.version = 11 : i64} {
  func.func @_bilstm_rec_kernel(%arg0: i32, %arg1: i32, %arg2: memref<8x8x64xf32, #tpu.memory_space<vmem>>, %arg3: memref<8x8x64xf32, #tpu.memory_space<vmem>>, %arg4: memref<16x64xf32, #tpu.memory_space<vmem>>, %arg5: memref<16x64xf32, #tpu.memory_space<vmem>>, %arg6: memref<8x16xf32, #tpu.memory_space<vmem>>, %arg7: memref<8x8x16xf32, #tpu.memory_space<vmem>>, %arg8: memref<8x8x16xf32, #tpu.memory_space<vmem>>, %arg9: memref<8x16xf32, #tpu.memory_space<vmem>>, %arg10: memref<8x16xf32, #tpu.memory_space<vmem>>, %arg11: memref<8x16xf32, #tpu.memory_space<vmem>>, %arg12: memref<8x16xf32, #tpu.memory_space<vmem>>) attributes {dimension_semantics = [#tpu.dimension_semantics<parallel>, #tpu.dimension_semantics<arbitrary>], iteration_bounds = array<i64: 2, 1>, scalar_prefetch = 0 : i64, scratch_operands = 4 : i64, tpu.core_type = #tpu.core_type<tc>, window_params = [{transform_indices = @transform_0, window_bounds = array<i64: 8, 8, 64>}, {transform_indices = @transform_1, window_bounds = array<i64: 8, 8, 64>}, {pipeline_mode = #tpu.pipeline_mode<synchronous>, transform_indices = @transform_2, window_bounds = array<i64: 16, 64>}, {pipeline_mode = #tpu.pipeline_mode<synchronous>, transform_indices = @transform_3, window_bounds = array<i64: 16, 64>}, {transform_indices = @transform_4, window_bounds = array<i64: 8, 16>}, {transform_indices = @transform_5, window_bounds = array<i64: 8, 8, 16>}, {transform_indices = @transform_6, window_bounds = array<i64: 8, 8, 16>}]} {
    %c0_i32 = arith.constant 0 : i32
    %0 = arith.cmpi eq, %arg1, %c0_i32 : i32
    %1 = arith.extui %0 : i1 to i32
    %c0_i32_0 = arith.constant 0 : i32
    %2 = arith.cmpi ne, %1, %c0_i32_0 : i32
    scf.if %2 {
      %cst_284 = arith.constant 0.000000e+00 : f32
      %581 = vector.broadcast %cst_284 : f32 to vector<8x16xf32>
      %c0_285 = arith.constant 0 : index
      %c0_286 = arith.constant 0 : index
      %582 = vector.load %arg9[%c0_285, %c0_286] : memref<8x16xf32, #tpu.memory_space<vmem>>, vector<8x16xf32>
      tpu.vector_store %arg9[%c0_285, %c0_286], %581 {strides = array<i32>} : memref<8x16xf32, #tpu.memory_space<vmem>>, vector<8x16xf32>,
      %cst_287 = arith.constant 0.000000e+00 : f32
      %583 = vector.broadcast %cst_287 : f32 to vector<8x16xf32>
      %c0_288 = arith.constant 0 : index
      %c0_289 = arith.constant 0 : index
      %584 = vector.load %arg11[%c0_288, %c0_289] : memref<8x16xf32, #tpu.memory_space<vmem>>, vector<8x16xf32>
      tpu.vector_store %arg11[%c0_288, %c0_289], %583 {strides = array<i32>} : memref<8x16xf32, #tpu.memory_space<vmem>>, vector<8x16xf32>,
      %c0_290 = arith.constant 0 : index
      %c0_291 = arith.constant 0 : index
      %585 = vector.load %arg6[%c0_290, %c0_291] : memref<8x16xf32, #tpu.memory_space<vmem>>, vector<8x16xf32>
      %c0_292 = arith.constant 0 : index
      %c0_293 = arith.constant 0 : index
      %586 = vector.load %arg10[%c0_292, %c0_293] : memref<8x16xf32, #tpu.memory_space<vmem>>, vector<8x16xf32>
      tpu.vector_store %arg10[%c0_292, %c0_293], %585 {strides = array<i32>} : memref<8x16xf32, #tpu.memory_space<vmem>>, vector<8x16xf32>,
      %c0_294 = arith.constant 0 : index
      %c0_295 = arith.constant 0 : index
      %587 = vector.load %arg6[%c0_294, %c0_295] : memref<8x16xf32, #tpu.memory_space<vmem>>, vector<8x16xf32>
      %c0_296 = arith.constant 0 : index
      %c0_297 = arith.constant 0 : index
      %588 = vector.load %arg12[%c0_296, %c0_297] : memref<8x16xf32, #tpu.memory_space<vmem>>, vector<8x16xf32>
      tpu.vector_store %arg12[%c0_296, %c0_297], %587 {strides = array<i32>} : memref<8x16xf32, #tpu.memory_space<vmem>>, vector<8x16xf32>,
    } else {
    }
    %c0 = arith.constant 0 : index
    %c0_1 = arith.constant 0 : index
    %3 = vector.load %arg4[%c0, %c0_1] : memref<16x64xf32, #tpu.memory_space<vmem>>, vector<16x64xf32>
    %c0_2 = arith.constant 0 : index
    %c0_3 = arith.constant 0 : index
    %4 = vector.load %arg5[%c0_2, %c0_3] : memref<16x64xf32, #tpu.memory_space<vmem>>, vector<16x64xf32>
    %c0_4 = arith.constant 0 : index
    %c0_5 = arith.constant 0 : index
    %c0_6 = arith.constant 0 : index
    %5 = vector.load %arg2[%c0_4, %c0_5, %c0_6] : memref<8x8x64xf32, #tpu.memory_space<vmem>>, vector<1x8x64xf32>
    %6 = vector.shape_cast %5 : vector<1x8x64xf32> to vector<8x64xf32>
    %c0_7 = arith.constant 0 : index
    %c0_8 = arith.constant 0 : index
    %7 = vector.load %arg9[%c0_7, %c0_8] : memref<8x16xf32, #tpu.memory_space<vmem>>, vector<8x16xf32>
    %c0_9 = arith.constant 0 : index
    %c0_10 = arith.constant 0 : index
    %8 = vector.load %arg10[%c0_9, %c0_10] : memref<8x16xf32, #tpu.memory_space<vmem>>, vector<8x16xf32>
    %cst = arith.constant dense<0.000000e+00> : vector<8x64xf32>
    %9 = tpu.matmul %7, %3, %cst {dimension_numbers = #tpu.dot_dimension_numbers<[1], [0], [0], [1], [0, 0, 1, 1], [], []>} : vector<8x16xf32>, vector<16x64xf32>, vector<8x64xf32> -> vector<8x64xf32>
    %10 = arith.addf %6, %9 : vector<8x64xf32>
    %11 = vector.extract_strided_slice %10 {offsets = [0, 0], sizes = [8, 16], strides = [1, 1]} : vector<8x64xf32> to vector<8x16xf32>
    %12 = arith.negf %11 : vector<8x16xf32>
    %13 = math.exp %12 : vector<8x16xf32>
    %cst_11 = arith.constant 1.000000e+00 : f32
    %14 = vector.broadcast %cst_11 : f32 to vector<8x16xf32>
    %15 = arith.addf %14, %13 : vector<8x16xf32>
    %16 = arith.divf %14, %15 : vector<8x16xf32>
    %17 = vector.extract_strided_slice %10 {offsets = [0, 16], sizes = [8, 16], strides = [1, 1]} : vector<8x64xf32> to vector<8x16xf32>
    %18 = arith.negf %17 : vector<8x16xf32>
    %19 = math.exp %18 : vector<8x16xf32>
    %cst_12 = arith.constant 1.000000e+00 : f32
    %20 = vector.broadcast %cst_12 : f32 to vector<8x16xf32>
    %21 = arith.addf %20, %19 : vector<8x16xf32>
    %22 = arith.divf %20, %21 : vector<8x16xf32>
    %23 = vector.extract_strided_slice %10 {offsets = [0, 32], sizes = [8, 16], strides = [1, 1]} : vector<8x64xf32> to vector<8x16xf32>
    %24 = math.tanh %23 : vector<8x16xf32>
    %25 = vector.extract_strided_slice %10 {offsets = [0, 48], sizes = [8, 16], strides = [1, 1]} : vector<8x64xf32> to vector<8x16xf32>
    %26 = arith.negf %25 : vector<8x16xf32>
    %27 = math.exp %26 : vector<8x16xf32>
    %cst_13 = arith.constant 1.000000e+00 : f32
    %28 = vector.broadcast %cst_13 : f32 to vector<8x16xf32>
    %29 = arith.addf %28, %27 : vector<8x16xf32>
    %30 = arith.divf %28, %29 : vector<8x16xf32>
    %31 = arith.mulf %22, %8 : vector<8x16xf32>
    %32 = arith.mulf %16, %24 : vector<8x16xf32>
    %33 = arith.addf %31, %32 : vector<8x16xf32>
    %34 = math.tanh %33 : vector<8x16xf32>
    %35 = arith.mulf %30, %34 : vector<8x16xf32>
    %c0_14 = arith.constant 0 : index
    %c0_15 = arith.constant 0 : index
    %36 = vector.load %arg9[%c0_14, %c0_15] : memref<8x16xf32, #tpu.memory_space<vmem>>, vector<8x16xf32>
    tpu.vector_store %arg9[%c0_14, %c0_15], %35 {strides = array<i32>} : memref<8x16xf32, #tpu.memory_space<vmem>>, vector<8x16xf32>,
    %c0_16 = arith.constant 0 : index
    %c0_17 = arith.constant 0 : index
    %37 = vector.load %arg10[%c0_16, %c0_17] : memref<8x16xf32, #tpu.memory_space<vmem>>, vector<8x16xf32>
    tpu.vector_store %arg10[%c0_16, %c0_17], %33 {strides = array<i32>} : memref<8x16xf32, #tpu.memory_space<vmem>>, vector<8x16xf32>,
    %c0_18 = arith.constant 0 : index
    %c0_19 = arith.constant 0 : index
    %c0_20 = arith.constant 0 : index
    %38 = vector.load %arg7[%c0_18, %c0_19, %c0_20] : memref<8x8x16xf32, #tpu.memory_space<vmem>>, vector<1x8x16xf32>
    %39 = vector.shape_cast %38 : vector<1x8x16xf32> to vector<8x16xf32>
    %40 = vector.shape_cast %35 : vector<8x16xf32> to vector<1x8x16xf32>
    tpu.vector_store %arg7[%c0_18, %c0_19, %c0_20], %40 {strides = array<i32>} : memref<8x8x16xf32, #tpu.memory_space<vmem>>, vector<1x8x16xf32>,
    %c7 = arith.constant 7 : index
    %c0_21 = arith.constant 0 : index
    %c0_22 = arith.constant 0 : index
    %41 = vector.load %arg3[%c7, %c0_21, %c0_22] : memref<8x8x64xf32, #tpu.memory_space<vmem>>, vector<1x8x64xf32>
    %42 = vector.shape_cast %41 : vector<1x8x64xf32> to vector<8x64xf32>
    %c0_23 = arith.constant 0 : index
    %c0_24 = arith.constant 0 : index
    %43 = vector.load %arg11[%c0_23, %c0_24] : memref<8x16xf32, #tpu.memory_space<vmem>>, vector<8x16xf32>
    %c0_25 = arith.constant 0 : index
    %c0_26 = arith.constant 0 : index
    %44 = vector.load %arg12[%c0_25, %c0_26] : memref<8x16xf32, #tpu.memory_space<vmem>>, vector<8x16xf32>
    %cst_27 = arith.constant dense<0.000000e+00> : vector<8x64xf32>
    %45 = tpu.matmul %43, %4, %cst_27 {dimension_numbers = #tpu.dot_dimension_numbers<[1], [0], [0], [1], [0, 0, 1, 1], [], []>} : vector<8x16xf32>, vector<16x64xf32>, vector<8x64xf32> -> vector<8x64xf32>
    %46 = arith.addf %42, %45 : vector<8x64xf32>
    %47 = vector.extract_strided_slice %46 {offsets = [0, 0], sizes = [8, 16], strides = [1, 1]} : vector<8x64xf32> to vector<8x16xf32>
    %48 = arith.negf %47 : vector<8x16xf32>
    %49 = math.exp %48 : vector<8x16xf32>
    %cst_28 = arith.constant 1.000000e+00 : f32
    %50 = vector.broadcast %cst_28 : f32 to vector<8x16xf32>
    %51 = arith.addf %50, %49 : vector<8x16xf32>
    %52 = arith.divf %50, %51 : vector<8x16xf32>
    %53 = vector.extract_strided_slice %46 {offsets = [0, 16], sizes = [8, 16], strides = [1, 1]} : vector<8x64xf32> to vector<8x16xf32>
    %54 = arith.negf %53 : vector<8x16xf32>
    %55 = math.exp %54 : vector<8x16xf32>
    %cst_29 = arith.constant 1.000000e+00 : f32
    %56 = vector.broadcast %cst_29 : f32 to vector<8x16xf32>
    %57 = arith.addf %56, %55 : vector<8x16xf32>
    %58 = arith.divf %56, %57 : vector<8x16xf32>
    %59 = vector.extract_strided_slice %46 {offsets = [0, 32], sizes = [8, 16], strides = [1, 1]} : vector<8x64xf32> to vector<8x16xf32>
    %60 = math.tanh %59 : vector<8x16xf32>
    %61 = vector.extract_strided_slice %46 {offsets = [0, 48], sizes = [8, 16], strides = [1, 1]} : vector<8x64xf32> to vector<8x16xf32>
    %62 = arith.negf %61 : vector<8x16xf32>
    %63 = math.exp %62 : vector<8x16xf32>
    %cst_30 = arith.constant 1.000000e+00 : f32
    %64 = vector.broadcast %cst_30 : f32 to vector<8x16xf32>
    %65 = arith.addf %64, %63 : vector<8x16xf32>
    %66 = arith.divf %64, %65 : vector<8x16xf32>
    %67 = arith.mulf %58, %44 : vector<8x16xf32>
    %68 = arith.mulf %52, %60 : vector<8x16xf32>
    %69 = arith.addf %67, %68 : vector<8x16xf32>
    %70 = math.tanh %69 : vector<8x16xf32>
    %71 = arith.mulf %66, %70 : vector<8x16xf32>
    %c0_31 = arith.constant 0 : index
    %c0_32 = arith.constant 0 : index
    %72 = vector.load %arg11[%c0_31, %c0_32] : memref<8x16xf32, #tpu.memory_space<vmem>>, vector<8x16xf32>
    tpu.vector_store %arg11[%c0_31, %c0_32], %71 {strides = array<i32>} : memref<8x16xf32, #tpu.memory_space<vmem>>, vector<8x16xf32>,
    %c0_33 = arith.constant 0 : index
    %c0_34 = arith.constant 0 : index
    %73 = vector.load %arg12[%c0_33, %c0_34] : memref<8x16xf32, #tpu.memory_space<vmem>>, vector<8x16xf32>
    tpu.vector_store %arg12[%c0_33, %c0_34], %69 {strides = array<i32>} : memref<8x16xf32, #tpu.memory_space<vmem>>, vector<8x16xf32>,
    %c7_35 = arith.constant 7 : index
    %c0_36 = arith.constant 0 : index
    %c0_37 = arith.constant 0 : index
    %74 = vector.load %arg8[%c7_35, %c0_36, %c0_37] : memref<8x8x16xf32, #tpu.memory_space<vmem>>, vector<1x8x16xf32>
    %75 = vector.shape_cast %74 : vector<1x8x16xf32> to vector<8x16xf32>
    %76 = vector.shape_cast %71 : vector<8x16xf32> to vector<1x8x16xf32>
    tpu.vector_store %arg8[%c7_35, %c0_36, %c0_37], %76 {strides = array<i32>} : memref<8x8x16xf32, #tpu.memory_space<vmem>>, vector<1x8x16xf32>,
    %c1 = arith.constant 1 : index
    %c0_38 = arith.constant 0 : index
    %c0_39 = arith.constant 0 : index
    %77 = vector.load %arg2[%c1, %c0_38, %c0_39] : memref<8x8x64xf32, #tpu.memory_space<vmem>>, vector<1x8x64xf32>
    %78 = vector.shape_cast %77 : vector<1x8x64xf32> to vector<8x64xf32>
    %c0_40 = arith.constant 0 : index
    %c0_41 = arith.constant 0 : index
    %79 = vector.load %arg9[%c0_40, %c0_41] : memref<8x16xf32, #tpu.memory_space<vmem>>, vector<8x16xf32>
    %c0_42 = arith.constant 0 : index
    %c0_43 = arith.constant 0 : index
    %80 = vector.load %arg10[%c0_42, %c0_43] : memref<8x16xf32, #tpu.memory_space<vmem>>, vector<8x16xf32>
    %cst_44 = arith.constant dense<0.000000e+00> : vector<8x64xf32>
    %81 = tpu.matmul %79, %3, %cst_44 {dimension_numbers = #tpu.dot_dimension_numbers<[1], [0], [0], [1], [0, 0, 1, 1], [], []>} : vector<8x16xf32>, vector<16x64xf32>, vector<8x64xf32> -> vector<8x64xf32>
    %82 = arith.addf %78, %81 : vector<8x64xf32>
    %83 = vector.extract_strided_slice %82 {offsets = [0, 0], sizes = [8, 16], strides = [1, 1]} : vector<8x64xf32> to vector<8x16xf32>
    %84 = arith.negf %83 : vector<8x16xf32>
    %85 = math.exp %84 : vector<8x16xf32>
    %cst_45 = arith.constant 1.000000e+00 : f32
    %86 = vector.broadcast %cst_45 : f32 to vector<8x16xf32>
    %87 = arith.addf %86, %85 : vector<8x16xf32>
    %88 = arith.divf %86, %87 : vector<8x16xf32>
    %89 = vector.extract_strided_slice %82 {offsets = [0, 16], sizes = [8, 16], strides = [1, 1]} : vector<8x64xf32> to vector<8x16xf32>
    %90 = arith.negf %89 : vector<8x16xf32>
    %91 = math.exp %90 : vector<8x16xf32>
    %cst_46 = arith.constant 1.000000e+00 : f32
    %92 = vector.broadcast %cst_46 : f32 to vector<8x16xf32>
    %93 = arith.addf %92, %91 : vector<8x16xf32>
    %94 = arith.divf %92, %93 : vector<8x16xf32>
    %95 = vector.extract_strided_slice %82 {offsets = [0, 32], sizes = [8, 16], strides = [1, 1]} : vector<8x64xf32> to vector<8x16xf32>
    %96 = math.tanh %95 : vector<8x16xf32>
    %97 = vector.extract_strided_slice %82 {offsets = [0, 48], sizes = [8, 16], strides = [1, 1]} : vector<8x64xf32> to vector<8x16xf32>
    %98 = arith.negf %97 : vector<8x16xf32>
    %99 = math.exp %98 : vector<8x16xf32>
    %cst_47 = arith.constant 1.000000e+00 : f32
    %100 = vector.broadcast %cst_47 : f32 to vector<8x16xf32>
    %101 = arith.addf %100, %99 : vector<8x16xf32>
    %102 = arith.divf %100, %101 : vector<8x16xf32>
    %103 = arith.mulf %94, %80 : vector<8x16xf32>
    %104 = arith.mulf %88, %96 : vector<8x16xf32>
    %105 = arith.addf %103, %104 : vector<8x16xf32>
    %106 = math.tanh %105 : vector<8x16xf32>
    %107 = arith.mulf %102, %106 : vector<8x16xf32>
    %c0_48 = arith.constant 0 : index
    %c0_49 = arith.constant 0 : index
    %108 = vector.load %arg9[%c0_48, %c0_49] : memref<8x16xf32, #tpu.memory_space<vmem>>, vector<8x16xf32>
    tpu.vector_store %arg9[%c0_48, %c0_49], %107 {strides = array<i32>} : memref<8x16xf32, #tpu.memory_space<vmem>>, vector<8x16xf32>,
    %c0_50 = arith.constant 0 : index
    %c0_51 = arith.constant 0 : index
    %109 = vector.load %arg10[%c0_50, %c0_51] : memref<8x16xf32, #tpu.memory_space<vmem>>, vector<8x16xf32>
    tpu.vector_store %arg10[%c0_50, %c0_51], %105 {strides = array<i32>} : memref<8x16xf32, #tpu.memory_space<vmem>>, vector<8x16xf32>,
    %c1_52 = arith.constant 1 : index
    %c0_53 = arith.constant 0 : index
    %c0_54 = arith.constant 0 : index
    %110 = vector.load %arg7[%c1_52, %c0_53, %c0_54] : memref<8x8x16xf32, #tpu.memory_space<vmem>>, vector<1x8x16xf32>
    %111 = vector.shape_cast %110 : vector<1x8x16xf32> to vector<8x16xf32>
    %112 = vector.shape_cast %107 : vector<8x16xf32> to vector<1x8x16xf32>
    tpu.vector_store %arg7[%c1_52, %c0_53, %c0_54], %112 {strides = array<i32>} : memref<8x8x16xf32, #tpu.memory_space<vmem>>, vector<1x8x16xf32>,
    %c6 = arith.constant 6 : index
    %c0_55 = arith.constant 0 : index
    %c0_56 = arith.constant 0 : index
    %113 = vector.load %arg3[%c6, %c0_55, %c0_56] : memref<8x8x64xf32, #tpu.memory_space<vmem>>, vector<1x8x64xf32>
    %114 = vector.shape_cast %113 : vector<1x8x64xf32> to vector<8x64xf32>
    %c0_57 = arith.constant 0 : index
    %c0_58 = arith.constant 0 : index
    %115 = vector.load %arg11[%c0_57, %c0_58] : memref<8x16xf32, #tpu.memory_space<vmem>>, vector<8x16xf32>
    %c0_59 = arith.constant 0 : index
    %c0_60 = arith.constant 0 : index
    %116 = vector.load %arg12[%c0_59, %c0_60] : memref<8x16xf32, #tpu.memory_space<vmem>>, vector<8x16xf32>
    %cst_61 = arith.constant dense<0.000000e+00> : vector<8x64xf32>
    %117 = tpu.matmul %115, %4, %cst_61 {dimension_numbers = #tpu.dot_dimension_numbers<[1], [0], [0], [1], [0, 0, 1, 1], [], []>} : vector<8x16xf32>, vector<16x64xf32>, vector<8x64xf32> -> vector<8x64xf32>
    %118 = arith.addf %114, %117 : vector<8x64xf32>
    %119 = vector.extract_strided_slice %118 {offsets = [0, 0], sizes = [8, 16], strides = [1, 1]} : vector<8x64xf32> to vector<8x16xf32>
    %120 = arith.negf %119 : vector<8x16xf32>
    %121 = math.exp %120 : vector<8x16xf32>
    %cst_62 = arith.constant 1.000000e+00 : f32
    %122 = vector.broadcast %cst_62 : f32 to vector<8x16xf32>
    %123 = arith.addf %122, %121 : vector<8x16xf32>
    %124 = arith.divf %122, %123 : vector<8x16xf32>
    %125 = vector.extract_strided_slice %118 {offsets = [0, 16], sizes = [8, 16], strides = [1, 1]} : vector<8x64xf32> to vector<8x16xf32>
    %126 = arith.negf %125 : vector<8x16xf32>
    %127 = math.exp %126 : vector<8x16xf32>
    %cst_63 = arith.constant 1.000000e+00 : f32
    %128 = vector.broadcast %cst_63 : f32 to vector<8x16xf32>
    %129 = arith.addf %128, %127 : vector<8x16xf32>
    %130 = arith.divf %128, %129 : vector<8x16xf32>
    %131 = vector.extract_strided_slice %118 {offsets = [0, 32], sizes = [8, 16], strides = [1, 1]} : vector<8x64xf32> to vector<8x16xf32>
    %132 = math.tanh %131 : vector<8x16xf32>
    %133 = vector.extract_strided_slice %118 {offsets = [0, 48], sizes = [8, 16], strides = [1, 1]} : vector<8x64xf32> to vector<8x16xf32>
    %134 = arith.negf %133 : vector<8x16xf32>
    %135 = math.exp %134 : vector<8x16xf32>
    %cst_64 = arith.constant 1.000000e+00 : f32
    %136 = vector.broadcast %cst_64 : f32 to vector<8x16xf32>
    %137 = arith.addf %136, %135 : vector<8x16xf32>
    %138 = arith.divf %136, %137 : vector<8x16xf32>
    %139 = arith.mulf %130, %116 : vector<8x16xf32>
    %140 = arith.mulf %124, %132 : vector<8x16xf32>
    %141 = arith.addf %139, %140 : vector<8x16xf32>
    %142 = math.tanh %141 : vector<8x16xf32>
    %143 = arith.mulf %138, %142 : vector<8x16xf32>
    %c0_65 = arith.constant 0 : index
    %c0_66 = arith.constant 0 : index
    %144 = vector.load %arg11[%c0_65, %c0_66] : memref<8x16xf32, #tpu.memory_space<vmem>>, vector<8x16xf32>
    tpu.vector_store %arg11[%c0_65, %c0_66], %143 {strides = array<i32>} : memref<8x16xf32, #tpu.memory_space<vmem>>, vector<8x16xf32>,
    %c0_67 = arith.constant 0 : index
    %c0_68 = arith.constant 0 : index
    %145 = vector.load %arg12[%c0_67, %c0_68] : memref<8x16xf32, #tpu.memory_space<vmem>>, vector<8x16xf32>
    tpu.vector_store %arg12[%c0_67, %c0_68], %141 {strides = array<i32>} : memref<8x16xf32, #tpu.memory_space<vmem>>, vector<8x16xf32>,
    %c6_69 = arith.constant 6 : index
    %c0_70 = arith.constant 0 : index
    %c0_71 = arith.constant 0 : index
    %146 = vector.load %arg8[%c6_69, %c0_70, %c0_71] : memref<8x8x16xf32, #tpu.memory_space<vmem>>, vector<1x8x16xf32>
    %147 = vector.shape_cast %146 : vector<1x8x16xf32> to vector<8x16xf32>
    %148 = vector.shape_cast %143 : vector<8x16xf32> to vector<1x8x16xf32>
    tpu.vector_store %arg8[%c6_69, %c0_70, %c0_71], %148 {strides = array<i32>} : memref<8x8x16xf32, #tpu.memory_space<vmem>>, vector<1x8x16xf32>,
    %c2 = arith.constant 2 : index
    %c0_72 = arith.constant 0 : index
    %c0_73 = arith.constant 0 : index
    %149 = vector.load %arg2[%c2, %c0_72, %c0_73] : memref<8x8x64xf32, #tpu.memory_space<vmem>>, vector<1x8x64xf32>
    %150 = vector.shape_cast %149 : vector<1x8x64xf32> to vector<8x64xf32>
    %c0_74 = arith.constant 0 : index
    %c0_75 = arith.constant 0 : index
    %151 = vector.load %arg9[%c0_74, %c0_75] : memref<8x16xf32, #tpu.memory_space<vmem>>, vector<8x16xf32>
    %c0_76 = arith.constant 0 : index
    %c0_77 = arith.constant 0 : index
    %152 = vector.load %arg10[%c0_76, %c0_77] : memref<8x16xf32, #tpu.memory_space<vmem>>, vector<8x16xf32>
    %cst_78 = arith.constant dense<0.000000e+00> : vector<8x64xf32>
    %153 = tpu.matmul %151, %3, %cst_78 {dimension_numbers = #tpu.dot_dimension_numbers<[1], [0], [0], [1], [0, 0, 1, 1], [], []>} : vector<8x16xf32>, vector<16x64xf32>, vector<8x64xf32> -> vector<8x64xf32>
    %154 = arith.addf %150, %153 : vector<8x64xf32>
    %155 = vector.extract_strided_slice %154 {offsets = [0, 0], sizes = [8, 16], strides = [1, 1]} : vector<8x64xf32> to vector<8x16xf32>
    %156 = arith.negf %155 : vector<8x16xf32>
    %157 = math.exp %156 : vector<8x16xf32>
    %cst_79 = arith.constant 1.000000e+00 : f32
    %158 = vector.broadcast %cst_79 : f32 to vector<8x16xf32>
    %159 = arith.addf %158, %157 : vector<8x16xf32>
    %160 = arith.divf %158, %159 : vector<8x16xf32>
    %161 = vector.extract_strided_slice %154 {offsets = [0, 16], sizes = [8, 16], strides = [1, 1]} : vector<8x64xf32> to vector<8x16xf32>
    %162 = arith.negf %161 : vector<8x16xf32>
    %163 = math.exp %162 : vector<8x16xf32>
    %cst_80 = arith.constant 1.000000e+00 : f32
    %164 = vector.broadcast %cst_80 : f32 to vector<8x16xf32>
    %165 = arith.addf %164, %163 : vector<8x16xf32>
    %166 = arith.divf %164, %165 : vector<8x16xf32>
    %167 = vector.extract_strided_slice %154 {offsets = [0, 32], sizes = [8, 16], strides = [1, 1]} : vector<8x64xf32> to vector<8x16xf32>
    %168 = math.tanh %167 : vector<8x16xf32>
    %169 = vector.extract_strided_slice %154 {offsets = [0, 48], sizes = [8, 16], strides = [1, 1]} : vector<8x64xf32> to vector<8x16xf32>
    %170 = arith.negf %169 : vector<8x16xf32>
    %171 = math.exp %170 : vector<8x16xf32>
    %cst_81 = arith.constant 1.000000e+00 : f32
    %172 = vector.broadcast %cst_81 : f32 to vector<8x16xf32>
    %173 = arith.addf %172, %171 : vector<8x16xf32>
    %174 = arith.divf %172, %173 : vector<8x16xf32>
    %175 = arith.mulf %166, %152 : vector<8x16xf32>
    %176 = arith.mulf %160, %168 : vector<8x16xf32>
    %177 = arith.addf %175, %176 : vector<8x16xf32>
    %178 = math.tanh %177 : vector<8x16xf32>
    %179 = arith.mulf %174, %178 : vector<8x16xf32>
    %c0_82 = arith.constant 0 : index
    %c0_83 = arith.constant 0 : index
    %180 = vector.load %arg9[%c0_82, %c0_83] : memref<8x16xf32, #tpu.memory_space<vmem>>, vector<8x16xf32>
    tpu.vector_store %arg9[%c0_82, %c0_83], %179 {strides = array<i32>} : memref<8x16xf32, #tpu.memory_space<vmem>>, vector<8x16xf32>,
    %c0_84 = arith.constant 0 : index
    %c0_85 = arith.constant 0 : index
    %181 = vector.load %arg10[%c0_84, %c0_85] : memref<8x16xf32, #tpu.memory_space<vmem>>, vector<8x16xf32>
    tpu.vector_store %arg10[%c0_84, %c0_85], %177 {strides = array<i32>} : memref<8x16xf32, #tpu.memory_space<vmem>>, vector<8x16xf32>,
    %c2_86 = arith.constant 2 : index
    %c0_87 = arith.constant 0 : index
    %c0_88 = arith.constant 0 : index
    %182 = vector.load %arg7[%c2_86, %c0_87, %c0_88] : memref<8x8x16xf32, #tpu.memory_space<vmem>>, vector<1x8x16xf32>
    %183 = vector.shape_cast %182 : vector<1x8x16xf32> to vector<8x16xf32>
    %184 = vector.shape_cast %179 : vector<8x16xf32> to vector<1x8x16xf32>
    tpu.vector_store %arg7[%c2_86, %c0_87, %c0_88], %184 {strides = array<i32>} : memref<8x8x16xf32, #tpu.memory_space<vmem>>, vector<1x8x16xf32>,
    %c5 = arith.constant 5 : index
    %c0_89 = arith.constant 0 : index
    %c0_90 = arith.constant 0 : index
    %185 = vector.load %arg3[%c5, %c0_89, %c0_90] : memref<8x8x64xf32, #tpu.memory_space<vmem>>, vector<1x8x64xf32>
    %186 = vector.shape_cast %185 : vector<1x8x64xf32> to vector<8x64xf32>
    %c0_91 = arith.constant 0 : index
    %c0_92 = arith.constant 0 : index
    %187 = vector.load %arg11[%c0_91, %c0_92] : memref<8x16xf32, #tpu.memory_space<vmem>>, vector<8x16xf32>
    %c0_93 = arith.constant 0 : index
    %c0_94 = arith.constant 0 : index
    %188 = vector.load %arg12[%c0_93, %c0_94] : memref<8x16xf32, #tpu.memory_space<vmem>>, vector<8x16xf32>
    %cst_95 = arith.constant dense<0.000000e+00> : vector<8x64xf32>
    %189 = tpu.matmul %187, %4, %cst_95 {dimension_numbers = #tpu.dot_dimension_numbers<[1], [0], [0], [1], [0, 0, 1, 1], [], []>} : vector<8x16xf32>, vector<16x64xf32>, vector<8x64xf32> -> vector<8x64xf32>
    %190 = arith.addf %186, %189 : vector<8x64xf32>
    %191 = vector.extract_strided_slice %190 {offsets = [0, 0], sizes = [8, 16], strides = [1, 1]} : vector<8x64xf32> to vector<8x16xf32>
    %192 = arith.negf %191 : vector<8x16xf32>
    %193 = math.exp %192 : vector<8x16xf32>
    %cst_96 = arith.constant 1.000000e+00 : f32
    %194 = vector.broadcast %cst_96 : f32 to vector<8x16xf32>
    %195 = arith.addf %194, %193 : vector<8x16xf32>
    %196 = arith.divf %194, %195 : vector<8x16xf32>
    %197 = vector.extract_strided_slice %190 {offsets = [0, 16], sizes = [8, 16], strides = [1, 1]} : vector<8x64xf32> to vector<8x16xf32>
    %198 = arith.negf %197 : vector<8x16xf32>
    %199 = math.exp %198 : vector<8x16xf32>
    %cst_97 = arith.constant 1.000000e+00 : f32
    %200 = vector.broadcast %cst_97 : f32 to vector<8x16xf32>
    %201 = arith.addf %200, %199 : vector<8x16xf32>
    %202 = arith.divf %200, %201 : vector<8x16xf32>
    %203 = vector.extract_strided_slice %190 {offsets = [0, 32], sizes = [8, 16], strides = [1, 1]} : vector<8x64xf32> to vector<8x16xf32>
    %204 = math.tanh %203 : vector<8x16xf32>
    %205 = vector.extract_strided_slice %190 {offsets = [0, 48], sizes = [8, 16], strides = [1, 1]} : vector<8x64xf32> to vector<8x16xf32>
    %206 = arith.negf %205 : vector<8x16xf32>
    %207 = math.exp %206 : vector<8x16xf32>
    %cst_98 = arith.constant 1.000000e+00 : f32
    %208 = vector.broadcast %cst_98 : f32 to vector<8x16xf32>
    %209 = arith.addf %208, %207 : vector<8x16xf32>
    %210 = arith.divf %208, %209 : vector<8x16xf32>
    %211 = arith.mulf %202, %188 : vector<8x16xf32>
    %212 = arith.mulf %196, %204 : vector<8x16xf32>
    %213 = arith.addf %211, %212 : vector<8x16xf32>
    %214 = math.tanh %213 : vector<8x16xf32>
    %215 = arith.mulf %210, %214 : vector<8x16xf32>
    %c0_99 = arith.constant 0 : index
    %c0_100 = arith.constant 0 : index
    %216 = vector.load %arg11[%c0_99, %c0_100] : memref<8x16xf32, #tpu.memory_space<vmem>>, vector<8x16xf32>
    tpu.vector_store %arg11[%c0_99, %c0_100], %215 {strides = array<i32>} : memref<8x16xf32, #tpu.memory_space<vmem>>, vector<8x16xf32>,
    %c0_101 = arith.constant 0 : index
    %c0_102 = arith.constant 0 : index
    %217 = vector.load %arg12[%c0_101, %c0_102] : memref<8x16xf32, #tpu.memory_space<vmem>>, vector<8x16xf32>
    tpu.vector_store %arg12[%c0_101, %c0_102], %213 {strides = array<i32>} : memref<8x16xf32, #tpu.memory_space<vmem>>, vector<8x16xf32>,
    %c5_103 = arith.constant 5 : index
    %c0_104 = arith.constant 0 : index
    %c0_105 = arith.constant 0 : index
    %218 = vector.load %arg8[%c5_103, %c0_104, %c0_105] : memref<8x8x16xf32, #tpu.memory_space<vmem>>, vector<1x8x16xf32>
    %219 = vector.shape_cast %218 : vector<1x8x16xf32> to vector<8x16xf32>
    %220 = vector.shape_cast %215 : vector<8x16xf32> to vector<1x8x16xf32>
    tpu.vector_store %arg8[%c5_103, %c0_104, %c0_105], %220 {strides = array<i32>} : memref<8x8x16xf32, #tpu.memory_space<vmem>>, vector<1x8x16xf32>,
    %c3 = arith.constant 3 : index
    %c0_106 = arith.constant 0 : index
    %c0_107 = arith.constant 0 : index
    %221 = vector.load %arg2[%c3, %c0_106, %c0_107] : memref<8x8x64xf32, #tpu.memory_space<vmem>>, vector<1x8x64xf32>
    %222 = vector.shape_cast %221 : vector<1x8x64xf32> to vector<8x64xf32>
    %c0_108 = arith.constant 0 : index
    %c0_109 = arith.constant 0 : index
    %223 = vector.load %arg9[%c0_108, %c0_109] : memref<8x16xf32, #tpu.memory_space<vmem>>, vector<8x16xf32>
    %c0_110 = arith.constant 0 : index
    %c0_111 = arith.constant 0 : index
    %224 = vector.load %arg10[%c0_110, %c0_111] : memref<8x16xf32, #tpu.memory_space<vmem>>, vector<8x16xf32>
    %cst_112 = arith.constant dense<0.000000e+00> : vector<8x64xf32>
    %225 = tpu.matmul %223, %3, %cst_112 {dimension_numbers = #tpu.dot_dimension_numbers<[1], [0], [0], [1], [0, 0, 1, 1], [], []>} : vector<8x16xf32>, vector<16x64xf32>, vector<8x64xf32> -> vector<8x64xf32>
    %226 = arith.addf %222, %225 : vector<8x64xf32>
    %227 = vector.extract_strided_slice %226 {offsets = [0, 0], sizes = [8, 16], strides = [1, 1]} : vector<8x64xf32> to vector<8x16xf32>
    %228 = arith.negf %227 : vector<8x16xf32>
    %229 = math.exp %228 : vector<8x16xf32>
    %cst_113 = arith.constant 1.000000e+00 : f32
    %230 = vector.broadcast %cst_113 : f32 to vector<8x16xf32>
    %231 = arith.addf %230, %229 : vector<8x16xf32>
    %232 = arith.divf %230, %231 : vector<8x16xf32>
    %233 = vector.extract_strided_slice %226 {offsets = [0, 16], sizes = [8, 16], strides = [1, 1]} : vector<8x64xf32> to vector<8x16xf32>
    %234 = arith.negf %233 : vector<8x16xf32>
    %235 = math.exp %234 : vector<8x16xf32>
    %cst_114 = arith.constant 1.000000e+00 : f32
    %236 = vector.broadcast %cst_114 : f32 to vector<8x16xf32>
    %237 = arith.addf %236, %235 : vector<8x16xf32>
    %238 = arith.divf %236, %237 : vector<8x16xf32>
    %239 = vector.extract_strided_slice %226 {offsets = [0, 32], sizes = [8, 16], strides = [1, 1]} : vector<8x64xf32> to vector<8x16xf32>
    %240 = math.tanh %239 : vector<8x16xf32>
    %241 = vector.extract_strided_slice %226 {offsets = [0, 48], sizes = [8, 16], strides = [1, 1]} : vector<8x64xf32> to vector<8x16xf32>
    %242 = arith.negf %241 : vector<8x16xf32>
    %243 = math.exp %242 : vector<8x16xf32>
    %cst_115 = arith.constant 1.000000e+00 : f32
    %244 = vector.broadcast %cst_115 : f32 to vector<8x16xf32>
    %245 = arith.addf %244, %243 : vector<8x16xf32>
    %246 = arith.divf %244, %245 : vector<8x16xf32>
    %247 = arith.mulf %238, %224 : vector<8x16xf32>
    %248 = arith.mulf %232, %240 : vector<8x16xf32>
    %249 = arith.addf %247, %248 : vector<8x16xf32>
    %250 = math.tanh %249 : vector<8x16xf32>
    %251 = arith.mulf %246, %250 : vector<8x16xf32>
    %c0_116 = arith.constant 0 : index
    %c0_117 = arith.constant 0 : index
    %252 = vector.load %arg9[%c0_116, %c0_117] : memref<8x16xf32, #tpu.memory_space<vmem>>, vector<8x16xf32>
    tpu.vector_store %arg9[%c0_116, %c0_117], %251 {strides = array<i32>} : memref<8x16xf32, #tpu.memory_space<vmem>>, vector<8x16xf32>,
    %c0_118 = arith.constant 0 : index
    %c0_119 = arith.constant 0 : index
    %253 = vector.load %arg10[%c0_118, %c0_119] : memref<8x16xf32, #tpu.memory_space<vmem>>, vector<8x16xf32>
    tpu.vector_store %arg10[%c0_118, %c0_119], %249 {strides = array<i32>} : memref<8x16xf32, #tpu.memory_space<vmem>>, vector<8x16xf32>,
    %c3_120 = arith.constant 3 : index
    %c0_121 = arith.constant 0 : index
    %c0_122 = arith.constant 0 : index
    %254 = vector.load %arg7[%c3_120, %c0_121, %c0_122] : memref<8x8x16xf32, #tpu.memory_space<vmem>>, vector<1x8x16xf32>
    %255 = vector.shape_cast %254 : vector<1x8x16xf32> to vector<8x16xf32>
    %256 = vector.shape_cast %251 : vector<8x16xf32> to vector<1x8x16xf32>
    tpu.vector_store %arg7[%c3_120, %c0_121, %c0_122], %256 {strides = array<i32>} : memref<8x8x16xf32, #tpu.memory_space<vmem>>, vector<1x8x16xf32>,
    %c4 = arith.constant 4 : index
    %c0_123 = arith.constant 0 : index
    %c0_124 = arith.constant 0 : index
    %257 = vector.load %arg3[%c4, %c0_123, %c0_124] : memref<8x8x64xf32, #tpu.memory_space<vmem>>, vector<1x8x64xf32>
    %258 = vector.shape_cast %257 : vector<1x8x64xf32> to vector<8x64xf32>
    %c0_125 = arith.constant 0 : index
    %c0_126 = arith.constant 0 : index
    %259 = vector.load %arg11[%c0_125, %c0_126] : memref<8x16xf32, #tpu.memory_space<vmem>>, vector<8x16xf32>
    %c0_127 = arith.constant 0 : index
    %c0_128 = arith.constant 0 : index
    %260 = vector.load %arg12[%c0_127, %c0_128] : memref<8x16xf32, #tpu.memory_space<vmem>>, vector<8x16xf32>
    %cst_129 = arith.constant dense<0.000000e+00> : vector<8x64xf32>
    %261 = tpu.matmul %259, %4, %cst_129 {dimension_numbers = #tpu.dot_dimension_numbers<[1], [0], [0], [1], [0, 0, 1, 1], [], []>} : vector<8x16xf32>, vector<16x64xf32>, vector<8x64xf32> -> vector<8x64xf32>
    %262 = arith.addf %258, %261 : vector<8x64xf32>
    %263 = vector.extract_strided_slice %262 {offsets = [0, 0], sizes = [8, 16], strides = [1, 1]} : vector<8x64xf32> to vector<8x16xf32>
    %264 = arith.negf %263 : vector<8x16xf32>
    %265 = math.exp %264 : vector<8x16xf32>
    %cst_130 = arith.constant 1.000000e+00 : f32
    %266 = vector.broadcast %cst_130 : f32 to vector<8x16xf32>
    %267 = arith.addf %266, %265 : vector<8x16xf32>
    %268 = arith.divf %266, %267 : vector<8x16xf32>
    %269 = vector.extract_strided_slice %262 {offsets = [0, 16], sizes = [8, 16], strides = [1, 1]} : vector<8x64xf32> to vector<8x16xf32>
    %270 = arith.negf %269 : vector<8x16xf32>
    %271 = math.exp %270 : vector<8x16xf32>
    %cst_131 = arith.constant 1.000000e+00 : f32
    %272 = vector.broadcast %cst_131 : f32 to vector<8x16xf32>
    %273 = arith.addf %272, %271 : vector<8x16xf32>
    %274 = arith.divf %272, %273 : vector<8x16xf32>
    %275 = vector.extract_strided_slice %262 {offsets = [0, 32], sizes = [8, 16], strides = [1, 1]} : vector<8x64xf32> to vector<8x16xf32>
    %276 = math.tanh %275 : vector<8x16xf32>
    %277 = vector.extract_strided_slice %262 {offsets = [0, 48], sizes = [8, 16], strides = [1, 1]} : vector<8x64xf32> to vector<8x16xf32>
    %278 = arith.negf %277 : vector<8x16xf32>
    %279 = math.exp %278 : vector<8x16xf32>
    %cst_132 = arith.constant 1.000000e+00 : f32
    %280 = vector.broadcast %cst_132 : f32 to vector<8x16xf32>
    %281 = arith.addf %280, %279 : vector<8x16xf32>
    %282 = arith.divf %280, %281 : vector<8x16xf32>
    %283 = arith.mulf %274, %260 : vector<8x16xf32>
    %284 = arith.mulf %268, %276 : vector<8x16xf32>
    %285 = arith.addf %283, %284 : vector<8x16xf32>
    %286 = math.tanh %285 : vector<8x16xf32>
    %287 = arith.mulf %282, %286 : vector<8x16xf32>
    %c0_133 = arith.constant 0 : index
    %c0_134 = arith.constant 0 : index
    %288 = vector.load %arg11[%c0_133, %c0_134] : memref<8x16xf32, #tpu.memory_space<vmem>>, vector<8x16xf32>
    tpu.vector_store %arg11[%c0_133, %c0_134], %287 {strides = array<i32>} : memref<8x16xf32, #tpu.memory_space<vmem>>, vector<8x16xf32>,
    %c0_135 = arith.constant 0 : index
    %c0_136 = arith.constant 0 : index
    %289 = vector.load %arg12[%c0_135, %c0_136] : memref<8x16xf32, #tpu.memory_space<vmem>>, vector<8x16xf32>
    tpu.vector_store %arg12[%c0_135, %c0_136], %285 {strides = array<i32>} : memref<8x16xf32, #tpu.memory_space<vmem>>, vector<8x16xf32>,
    %c4_137 = arith.constant 4 : index
    %c0_138 = arith.constant 0 : index
    %c0_139 = arith.constant 0 : index
    %290 = vector.load %arg8[%c4_137, %c0_138, %c0_139] : memref<8x8x16xf32, #tpu.memory_space<vmem>>, vector<1x8x16xf32>
    %291 = vector.shape_cast %290 : vector<1x8x16xf32> to vector<8x16xf32>
    %292 = vector.shape_cast %287 : vector<8x16xf32> to vector<1x8x16xf32>
    tpu.vector_store %arg8[%c4_137, %c0_138, %c0_139], %292 {strides = array<i32>} : memref<8x8x16xf32, #tpu.memory_space<vmem>>, vector<1x8x16xf32>,
    %c4_140 = arith.constant 4 : index
    %c0_141 = arith.constant 0 : index
    %c0_142 = arith.constant 0 : index
    %293 = vector.load %arg2[%c4_140, %c0_141, %c0_142] : memref<8x8x64xf32, #tpu.memory_space<vmem>>, vector<1x8x64xf32>
    %294 = vector.shape_cast %293 : vector<1x8x64xf32> to vector<8x64xf32>
    %c0_143 = arith.constant 0 : index
    %c0_144 = arith.constant 0 : index
    %295 = vector.load %arg9[%c0_143, %c0_144] : memref<8x16xf32, #tpu.memory_space<vmem>>, vector<8x16xf32>
    %c0_145 = arith.constant 0 : index
    %c0_146 = arith.constant 0 : index
    %296 = vector.load %arg10[%c0_145, %c0_146] : memref<8x16xf32, #tpu.memory_space<vmem>>, vector<8x16xf32>
    %cst_147 = arith.constant dense<0.000000e+00> : vector<8x64xf32>
    %297 = tpu.matmul %295, %3, %cst_147 {dimension_numbers = #tpu.dot_dimension_numbers<[1], [0], [0], [1], [0, 0, 1, 1], [], []>} : vector<8x16xf32>, vector<16x64xf32>, vector<8x64xf32> -> vector<8x64xf32>
    %298 = arith.addf %294, %297 : vector<8x64xf32>
    %299 = vector.extract_strided_slice %298 {offsets = [0, 0], sizes = [8, 16], strides = [1, 1]} : vector<8x64xf32> to vector<8x16xf32>
    %300 = arith.negf %299 : vector<8x16xf32>
    %301 = math.exp %300 : vector<8x16xf32>
    %cst_148 = arith.constant 1.000000e+00 : f32
    %302 = vector.broadcast %cst_148 : f32 to vector<8x16xf32>
    %303 = arith.addf %302, %301 : vector<8x16xf32>
    %304 = arith.divf %302, %303 : vector<8x16xf32>
    %305 = vector.extract_strided_slice %298 {offsets = [0, 16], sizes = [8, 16], strides = [1, 1]} : vector<8x64xf32> to vector<8x16xf32>
    %306 = arith.negf %305 : vector<8x16xf32>
    %307 = math.exp %306 : vector<8x16xf32>
    %cst_149 = arith.constant 1.000000e+00 : f32
    %308 = vector.broadcast %cst_149 : f32 to vector<8x16xf32>
    %309 = arith.addf %308, %307 : vector<8x16xf32>
    %310 = arith.divf %308, %309 : vector<8x16xf32>
    %311 = vector.extract_strided_slice %298 {offsets = [0, 32], sizes = [8, 16], strides = [1, 1]} : vector<8x64xf32> to vector<8x16xf32>
    %312 = math.tanh %311 : vector<8x16xf32>
    %313 = vector.extract_strided_slice %298 {offsets = [0, 48], sizes = [8, 16], strides = [1, 1]} : vector<8x64xf32> to vector<8x16xf32>
    %314 = arith.negf %313 : vector<8x16xf32>
    %315 = math.exp %314 : vector<8x16xf32>
    %cst_150 = arith.constant 1.000000e+00 : f32
    %316 = vector.broadcast %cst_150 : f32 to vector<8x16xf32>
    %317 = arith.addf %316, %315 : vector<8x16xf32>
    %318 = arith.divf %316, %317 : vector<8x16xf32>
    %319 = arith.mulf %310, %296 : vector<8x16xf32>
    %320 = arith.mulf %304, %312 : vector<8x16xf32>
    %321 = arith.addf %319, %320 : vector<8x16xf32>
    %322 = math.tanh %321 : vector<8x16xf32>
    %323 = arith.mulf %318, %322 : vector<8x16xf32>
    %c0_151 = arith.constant 0 : index
    %c0_152 = arith.constant 0 : index
    %324 = vector.load %arg9[%c0_151, %c0_152] : memref<8x16xf32, #tpu.memory_space<vmem>>, vector<8x16xf32>
    tpu.vector_store %arg9[%c0_151, %c0_152], %323 {strides = array<i32>} : memref<8x16xf32, #tpu.memory_space<vmem>>, vector<8x16xf32>,
    %c0_153 = arith.constant 0 : index
    %c0_154 = arith.constant 0 : index
    %325 = vector.load %arg10[%c0_153, %c0_154] : memref<8x16xf32, #tpu.memory_space<vmem>>, vector<8x16xf32>
    tpu.vector_store %arg10[%c0_153, %c0_154], %321 {strides = array<i32>} : memref<8x16xf32, #tpu.memory_space<vmem>>, vector<8x16xf32>,
    %c4_155 = arith.constant 4 : index
    %c0_156 = arith.constant 0 : index
    %c0_157 = arith.constant 0 : index
    %326 = vector.load %arg7[%c4_155, %c0_156, %c0_157] : memref<8x8x16xf32, #tpu.memory_space<vmem>>, vector<1x8x16xf32>
    %327 = vector.shape_cast %326 : vector<1x8x16xf32> to vector<8x16xf32>
    %328 = vector.shape_cast %323 : vector<8x16xf32> to vector<1x8x16xf32>
    tpu.vector_store %arg7[%c4_155, %c0_156, %c0_157], %328 {strides = array<i32>} : memref<8x8x16xf32, #tpu.memory_space<vmem>>, vector<1x8x16xf32>,
    %c3_158 = arith.constant 3 : index
    %c0_159 = arith.constant 0 : index
    %c0_160 = arith.constant 0 : index
    %329 = vector.load %arg3[%c3_158, %c0_159, %c0_160] : memref<8x8x64xf32, #tpu.memory_space<vmem>>, vector<1x8x64xf32>
    %330 = vector.shape_cast %329 : vector<1x8x64xf32> to vector<8x64xf32>
    %c0_161 = arith.constant 0 : index
    %c0_162 = arith.constant 0 : index
    %331 = vector.load %arg11[%c0_161, %c0_162] : memref<8x16xf32, #tpu.memory_space<vmem>>, vector<8x16xf32>
    %c0_163 = arith.constant 0 : index
    %c0_164 = arith.constant 0 : index
    %332 = vector.load %arg12[%c0_163, %c0_164] : memref<8x16xf32, #tpu.memory_space<vmem>>, vector<8x16xf32>
    %cst_165 = arith.constant dense<0.000000e+00> : vector<8x64xf32>
    %333 = tpu.matmul %331, %4, %cst_165 {dimension_numbers = #tpu.dot_dimension_numbers<[1], [0], [0], [1], [0, 0, 1, 1], [], []>} : vector<8x16xf32>, vector<16x64xf32>, vector<8x64xf32> -> vector<8x64xf32>
    %334 = arith.addf %330, %333 : vector<8x64xf32>
    %335 = vector.extract_strided_slice %334 {offsets = [0, 0], sizes = [8, 16], strides = [1, 1]} : vector<8x64xf32> to vector<8x16xf32>
    %336 = arith.negf %335 : vector<8x16xf32>
    %337 = math.exp %336 : vector<8x16xf32>
    %cst_166 = arith.constant 1.000000e+00 : f32
    %338 = vector.broadcast %cst_166 : f32 to vector<8x16xf32>
    %339 = arith.addf %338, %337 : vector<8x16xf32>
    %340 = arith.divf %338, %339 : vector<8x16xf32>
    %341 = vector.extract_strided_slice %334 {offsets = [0, 16], sizes = [8, 16], strides = [1, 1]} : vector<8x64xf32> to vector<8x16xf32>
    %342 = arith.negf %341 : vector<8x16xf32>
    %343 = math.exp %342 : vector<8x16xf32>
    %cst_167 = arith.constant 1.000000e+00 : f32
    %344 = vector.broadcast %cst_167 : f32 to vector<8x16xf32>
    %345 = arith.addf %344, %343 : vector<8x16xf32>
    %346 = arith.divf %344, %345 : vector<8x16xf32>
    %347 = vector.extract_strided_slice %334 {offsets = [0, 32], sizes = [8, 16], strides = [1, 1]} : vector<8x64xf32> to vector<8x16xf32>
    %348 = math.tanh %347 : vector<8x16xf32>
    %349 = vector.extract_strided_slice %334 {offsets = [0, 48], sizes = [8, 16], strides = [1, 1]} : vector<8x64xf32> to vector<8x16xf32>
    %350 = arith.negf %349 : vector<8x16xf32>
    %351 = math.exp %350 : vector<8x16xf32>
    %cst_168 = arith.constant 1.000000e+00 : f32
    %352 = vector.broadcast %cst_168 : f32 to vector<8x16xf32>
    %353 = arith.addf %352, %351 : vector<8x16xf32>
    %354 = arith.divf %352, %353 : vector<8x16xf32>
    %355 = arith.mulf %346, %332 : vector<8x16xf32>
    %356 = arith.mulf %340, %348 : vector<8x16xf32>
    %357 = arith.addf %355, %356 : vector<8x16xf32>
    %358 = math.tanh %357 : vector<8x16xf32>
    %359 = arith.mulf %354, %358 : vector<8x16xf32>
    %c0_169 = arith.constant 0 : index
    %c0_170 = arith.constant 0 : index
    %360 = vector.load %arg11[%c0_169, %c0_170] : memref<8x16xf32, #tpu.memory_space<vmem>>, vector<8x16xf32>
    tpu.vector_store %arg11[%c0_169, %c0_170], %359 {strides = array<i32>} : memref<8x16xf32, #tpu.memory_space<vmem>>, vector<8x16xf32>,
    %c0_171 = arith.constant 0 : index
    %c0_172 = arith.constant 0 : index
    %361 = vector.load %arg12[%c0_171, %c0_172] : memref<8x16xf32, #tpu.memory_space<vmem>>, vector<8x16xf32>
    tpu.vector_store %arg12[%c0_171, %c0_172], %357 {strides = array<i32>} : memref<8x16xf32, #tpu.memory_space<vmem>>, vector<8x16xf32>,
    %c3_173 = arith.constant 3 : index
    %c0_174 = arith.constant 0 : index
    %c0_175 = arith.constant 0 : index
    %362 = vector.load %arg8[%c3_173, %c0_174, %c0_175] : memref<8x8x16xf32, #tpu.memory_space<vmem>>, vector<1x8x16xf32>
    %363 = vector.shape_cast %362 : vector<1x8x16xf32> to vector<8x16xf32>
    %364 = vector.shape_cast %359 : vector<8x16xf32> to vector<1x8x16xf32>
    tpu.vector_store %arg8[%c3_173, %c0_174, %c0_175], %364 {strides = array<i32>} : memref<8x8x16xf32, #tpu.memory_space<vmem>>, vector<1x8x16xf32>,
    %c5_176 = arith.constant 5 : index
    %c0_177 = arith.constant 0 : index
    %c0_178 = arith.constant 0 : index
    %365 = vector.load %arg2[%c5_176, %c0_177, %c0_178] : memref<8x8x64xf32, #tpu.memory_space<vmem>>, vector<1x8x64xf32>
    %366 = vector.shape_cast %365 : vector<1x8x64xf32> to vector<8x64xf32>
    %c0_179 = arith.constant 0 : index
    %c0_180 = arith.constant 0 : index
    %367 = vector.load %arg9[%c0_179, %c0_180] : memref<8x16xf32, #tpu.memory_space<vmem>>, vector<8x16xf32>
    %c0_181 = arith.constant 0 : index
    %c0_182 = arith.constant 0 : index
    %368 = vector.load %arg10[%c0_181, %c0_182] : memref<8x16xf32, #tpu.memory_space<vmem>>, vector<8x16xf32>
    %cst_183 = arith.constant dense<0.000000e+00> : vector<8x64xf32>
    %369 = tpu.matmul %367, %3, %cst_183 {dimension_numbers = #tpu.dot_dimension_numbers<[1], [0], [0], [1], [0, 0, 1, 1], [], []>} : vector<8x16xf32>, vector<16x64xf32>, vector<8x64xf32> -> vector<8x64xf32>
    %370 = arith.addf %366, %369 : vector<8x64xf32>
    %371 = vector.extract_strided_slice %370 {offsets = [0, 0], sizes = [8, 16], strides = [1, 1]} : vector<8x64xf32> to vector<8x16xf32>
    %372 = arith.negf %371 : vector<8x16xf32>
    %373 = math.exp %372 : vector<8x16xf32>
    %cst_184 = arith.constant 1.000000e+00 : f32
    %374 = vector.broadcast %cst_184 : f32 to vector<8x16xf32>
    %375 = arith.addf %374, %373 : vector<8x16xf32>
    %376 = arith.divf %374, %375 : vector<8x16xf32>
    %377 = vector.extract_strided_slice %370 {offsets = [0, 16], sizes = [8, 16], strides = [1, 1]} : vector<8x64xf32> to vector<8x16xf32>
    %378 = arith.negf %377 : vector<8x16xf32>
    %379 = math.exp %378 : vector<8x16xf32>
    %cst_185 = arith.constant 1.000000e+00 : f32
    %380 = vector.broadcast %cst_185 : f32 to vector<8x16xf32>
    %381 = arith.addf %380, %379 : vector<8x16xf32>
    %382 = arith.divf %380, %381 : vector<8x16xf32>
    %383 = vector.extract_strided_slice %370 {offsets = [0, 32], sizes = [8, 16], strides = [1, 1]} : vector<8x64xf32> to vector<8x16xf32>
    %384 = math.tanh %383 : vector<8x16xf32>
    %385 = vector.extract_strided_slice %370 {offsets = [0, 48], sizes = [8, 16], strides = [1, 1]} : vector<8x64xf32> to vector<8x16xf32>
    %386 = arith.negf %385 : vector<8x16xf32>
    %387 = math.exp %386 : vector<8x16xf32>
    %cst_186 = arith.constant 1.000000e+00 : f32
    %388 = vector.broadcast %cst_186 : f32 to vector<8x16xf32>
    %389 = arith.addf %388, %387 : vector<8x16xf32>
    %390 = arith.divf %388, %389 : vector<8x16xf32>
    %391 = arith.mulf %382, %368 : vector<8x16xf32>
    %392 = arith.mulf %376, %384 : vector<8x16xf32>
    %393 = arith.addf %391, %392 : vector<8x16xf32>
    %394 = math.tanh %393 : vector<8x16xf32>
    %395 = arith.mulf %390, %394 : vector<8x16xf32>
    %c0_187 = arith.constant 0 : index
    %c0_188 = arith.constant 0 : index
    %396 = vector.load %arg9[%c0_187, %c0_188] : memref<8x16xf32, #tpu.memory_space<vmem>>, vector<8x16xf32>
    tpu.vector_store %arg9[%c0_187, %c0_188], %395 {strides = array<i32>} : memref<8x16xf32, #tpu.memory_space<vmem>>, vector<8x16xf32>,
    %c0_189 = arith.constant 0 : index
    %c0_190 = arith.constant 0 : index
    %397 = vector.load %arg10[%c0_189, %c0_190] : memref<8x16xf32, #tpu.memory_space<vmem>>, vector<8x16xf32>
    tpu.vector_store %arg10[%c0_189, %c0_190], %393 {strides = array<i32>} : memref<8x16xf32, #tpu.memory_space<vmem>>, vector<8x16xf32>,
    %c5_191 = arith.constant 5 : index
    %c0_192 = arith.constant 0 : index
    %c0_193 = arith.constant 0 : index
    %398 = vector.load %arg7[%c5_191, %c0_192, %c0_193] : memref<8x8x16xf32, #tpu.memory_space<vmem>>, vector<1x8x16xf32>
    %399 = vector.shape_cast %398 : vector<1x8x16xf32> to vector<8x16xf32>
    %400 = vector.shape_cast %395 : vector<8x16xf32> to vector<1x8x16xf32>
    tpu.vector_store %arg7[%c5_191, %c0_192, %c0_193], %400 {strides = array<i32>} : memref<8x8x16xf32, #tpu.memory_space<vmem>>, vector<1x8x16xf32>,
    %c2_194 = arith.constant 2 : index
    %c0_195 = arith.constant 0 : index
    %c0_196 = arith.constant 0 : index
    %401 = vector.load %arg3[%c2_194, %c0_195, %c0_196] : memref<8x8x64xf32, #tpu.memory_space<vmem>>, vector<1x8x64xf32>
    %402 = vector.shape_cast %401 : vector<1x8x64xf32> to vector<8x64xf32>
    %c0_197 = arith.constant 0 : index
    %c0_198 = arith.constant 0 : index
    %403 = vector.load %arg11[%c0_197, %c0_198] : memref<8x16xf32, #tpu.memory_space<vmem>>, vector<8x16xf32>
    %c0_199 = arith.constant 0 : index
    %c0_200 = arith.constant 0 : index
    %404 = vector.load %arg12[%c0_199, %c0_200] : memref<8x16xf32, #tpu.memory_space<vmem>>, vector<8x16xf32>
    %cst_201 = arith.constant dense<0.000000e+00> : vector<8x64xf32>
    %405 = tpu.matmul %403, %4, %cst_201 {dimension_numbers = #tpu.dot_dimension_numbers<[1], [0], [0], [1], [0, 0, 1, 1], [], []>} : vector<8x16xf32>, vector<16x64xf32>, vector<8x64xf32> -> vector<8x64xf32>
    %406 = arith.addf %402, %405 : vector<8x64xf32>
    %407 = vector.extract_strided_slice %406 {offsets = [0, 0], sizes = [8, 16], strides = [1, 1]} : vector<8x64xf32> to vector<8x16xf32>
    %408 = arith.negf %407 : vector<8x16xf32>
    %409 = math.exp %408 : vector<8x16xf32>
    %cst_202 = arith.constant 1.000000e+00 : f32
    %410 = vector.broadcast %cst_202 : f32 to vector<8x16xf32>
    %411 = arith.addf %410, %409 : vector<8x16xf32>
    %412 = arith.divf %410, %411 : vector<8x16xf32>
    %413 = vector.extract_strided_slice %406 {offsets = [0, 16], sizes = [8, 16], strides = [1, 1]} : vector<8x64xf32> to vector<8x16xf32>
    %414 = arith.negf %413 : vector<8x16xf32>
    %415 = math.exp %414 : vector<8x16xf32>
    %cst_203 = arith.constant 1.000000e+00 : f32
    %416 = vector.broadcast %cst_203 : f32 to vector<8x16xf32>
    %417 = arith.addf %416, %415 : vector<8x16xf32>
    %418 = arith.divf %416, %417 : vector<8x16xf32>
    %419 = vector.extract_strided_slice %406 {offsets = [0, 32], sizes = [8, 16], strides = [1, 1]} : vector<8x64xf32> to vector<8x16xf32>
    %420 = math.tanh %419 : vector<8x16xf32>
    %421 = vector.extract_strided_slice %406 {offsets = [0, 48], sizes = [8, 16], strides = [1, 1]} : vector<8x64xf32> to vector<8x16xf32>
    %422 = arith.negf %421 : vector<8x16xf32>
    %423 = math.exp %422 : vector<8x16xf32>
    %cst_204 = arith.constant 1.000000e+00 : f32
    %424 = vector.broadcast %cst_204 : f32 to vector<8x16xf32>
    %425 = arith.addf %424, %423 : vector<8x16xf32>
    %426 = arith.divf %424, %425 : vector<8x16xf32>
    %427 = arith.mulf %418, %404 : vector<8x16xf32>
    %428 = arith.mulf %412, %420 : vector<8x16xf32>
    %429 = arith.addf %427, %428 : vector<8x16xf32>
    %430 = math.tanh %429 : vector<8x16xf32>
    %431 = arith.mulf %426, %430 : vector<8x16xf32>
    %c0_205 = arith.constant 0 : index
    %c0_206 = arith.constant 0 : index
    %432 = vector.load %arg11[%c0_205, %c0_206] : memref<8x16xf32, #tpu.memory_space<vmem>>, vector<8x16xf32>
    tpu.vector_store %arg11[%c0_205, %c0_206], %431 {strides = array<i32>} : memref<8x16xf32, #tpu.memory_space<vmem>>, vector<8x16xf32>,
    %c0_207 = arith.constant 0 : index
    %c0_208 = arith.constant 0 : index
    %433 = vector.load %arg12[%c0_207, %c0_208] : memref<8x16xf32, #tpu.memory_space<vmem>>, vector<8x16xf32>
    tpu.vector_store %arg12[%c0_207, %c0_208], %429 {strides = array<i32>} : memref<8x16xf32, #tpu.memory_space<vmem>>, vector<8x16xf32>,
    %c2_209 = arith.constant 2 : index
    %c0_210 = arith.constant 0 : index
    %c0_211 = arith.constant 0 : index
    %434 = vector.load %arg8[%c2_209, %c0_210, %c0_211] : memref<8x8x16xf32, #tpu.memory_space<vmem>>, vector<1x8x16xf32>
    %435 = vector.shape_cast %434 : vector<1x8x16xf32> to vector<8x16xf32>
    %436 = vector.shape_cast %431 : vector<8x16xf32> to vector<1x8x16xf32>
    tpu.vector_store %arg8[%c2_209, %c0_210, %c0_211], %436 {strides = array<i32>} : memref<8x8x16xf32, #tpu.memory_space<vmem>>, vector<1x8x16xf32>,
    %c6_212 = arith.constant 6 : index
    %c0_213 = arith.constant 0 : index
    %c0_214 = arith.constant 0 : index
    %437 = vector.load %arg2[%c6_212, %c0_213, %c0_214] : memref<8x8x64xf32, #tpu.memory_space<vmem>>, vector<1x8x64xf32>
    %438 = vector.shape_cast %437 : vector<1x8x64xf32> to vector<8x64xf32>
    %c0_215 = arith.constant 0 : index
    %c0_216 = arith.constant 0 : index
    %439 = vector.load %arg9[%c0_215, %c0_216] : memref<8x16xf32, #tpu.memory_space<vmem>>, vector<8x16xf32>
    %c0_217 = arith.constant 0 : index
    %c0_218 = arith.constant 0 : index
    %440 = vector.load %arg10[%c0_217, %c0_218] : memref<8x16xf32, #tpu.memory_space<vmem>>, vector<8x16xf32>
    %cst_219 = arith.constant dense<0.000000e+00> : vector<8x64xf32>
    %441 = tpu.matmul %439, %3, %cst_219 {dimension_numbers = #tpu.dot_dimension_numbers<[1], [0], [0], [1], [0, 0, 1, 1], [], []>} : vector<8x16xf32>, vector<16x64xf32>, vector<8x64xf32> -> vector<8x64xf32>
    %442 = arith.addf %438, %441 : vector<8x64xf32>
    %443 = vector.extract_strided_slice %442 {offsets = [0, 0], sizes = [8, 16], strides = [1, 1]} : vector<8x64xf32> to vector<8x16xf32>
    %444 = arith.negf %443 : vector<8x16xf32>
    %445 = math.exp %444 : vector<8x16xf32>
    %cst_220 = arith.constant 1.000000e+00 : f32
    %446 = vector.broadcast %cst_220 : f32 to vector<8x16xf32>
    %447 = arith.addf %446, %445 : vector<8x16xf32>
    %448 = arith.divf %446, %447 : vector<8x16xf32>
    %449 = vector.extract_strided_slice %442 {offsets = [0, 16], sizes = [8, 16], strides = [1, 1]} : vector<8x64xf32> to vector<8x16xf32>
    %450 = arith.negf %449 : vector<8x16xf32>
    %451 = math.exp %450 : vector<8x16xf32>
    %cst_221 = arith.constant 1.000000e+00 : f32
    %452 = vector.broadcast %cst_221 : f32 to vector<8x16xf32>
    %453 = arith.addf %452, %451 : vector<8x16xf32>
    %454 = arith.divf %452, %453 : vector<8x16xf32>
    %455 = vector.extract_strided_slice %442 {offsets = [0, 32], sizes = [8, 16], strides = [1, 1]} : vector<8x64xf32> to vector<8x16xf32>
    %456 = math.tanh %455 : vector<8x16xf32>
    %457 = vector.extract_strided_slice %442 {offsets = [0, 48], sizes = [8, 16], strides = [1, 1]} : vector<8x64xf32> to vector<8x16xf32>
    %458 = arith.negf %457 : vector<8x16xf32>
    %459 = math.exp %458 : vector<8x16xf32>
    %cst_222 = arith.constant 1.000000e+00 : f32
    %460 = vector.broadcast %cst_222 : f32 to vector<8x16xf32>
    %461 = arith.addf %460, %459 : vector<8x16xf32>
    %462 = arith.divf %460, %461 : vector<8x16xf32>
    %463 = arith.mulf %454, %440 : vector<8x16xf32>
    %464 = arith.mulf %448, %456 : vector<8x16xf32>
    %465 = arith.addf %463, %464 : vector<8x16xf32>
    %466 = math.tanh %465 : vector<8x16xf32>
    %467 = arith.mulf %462, %466 : vector<8x16xf32>
    %c0_223 = arith.constant 0 : index
    %c0_224 = arith.constant 0 : index
    %468 = vector.load %arg9[%c0_223, %c0_224] : memref<8x16xf32, #tpu.memory_space<vmem>>, vector<8x16xf32>
    tpu.vector_store %arg9[%c0_223, %c0_224], %467 {strides = array<i32>} : memref<8x16xf32, #tpu.memory_space<vmem>>, vector<8x16xf32>,
    %c0_225 = arith.constant 0 : index
    %c0_226 = arith.constant 0 : index
    %469 = vector.load %arg10[%c0_225, %c0_226] : memref<8x16xf32, #tpu.memory_space<vmem>>, vector<8x16xf32>
    tpu.vector_store %arg10[%c0_225, %c0_226], %465 {strides = array<i32>} : memref<8x16xf32, #tpu.memory_space<vmem>>, vector<8x16xf32>,
    %c6_227 = arith.constant 6 : index
    %c0_228 = arith.constant 0 : index
    %c0_229 = arith.constant 0 : index
    %470 = vector.load %arg7[%c6_227, %c0_228, %c0_229] : memref<8x8x16xf32, #tpu.memory_space<vmem>>, vector<1x8x16xf32>
    %471 = vector.shape_cast %470 : vector<1x8x16xf32> to vector<8x16xf32>
    %472 = vector.shape_cast %467 : vector<8x16xf32> to vector<1x8x16xf32>
    tpu.vector_store %arg7[%c6_227, %c0_228, %c0_229], %472 {strides = array<i32>} : memref<8x8x16xf32, #tpu.memory_space<vmem>>, vector<1x8x16xf32>,
    %c1_230 = arith.constant 1 : index
    %c0_231 = arith.constant 0 : index
    %c0_232 = arith.constant 0 : index
    %473 = vector.load %arg3[%c1_230, %c0_231, %c0_232] : memref<8x8x64xf32, #tpu.memory_space<vmem>>, vector<1x8x64xf32>
    %474 = vector.shape_cast %473 : vector<1x8x64xf32> to vector<8x64xf32>
    %c0_233 = arith.constant 0 : index
    %c0_234 = arith.constant 0 : index
    %475 = vector.load %arg11[%c0_233, %c0_234] : memref<8x16xf32, #tpu.memory_space<vmem>>, vector<8x16xf32>
    %c0_235 = arith.constant 0 : index
    %c0_236 = arith.constant 0 : index
    %476 = vector.load %arg12[%c0_235, %c0_236] : memref<8x16xf32, #tpu.memory_space<vmem>>, vector<8x16xf32>
    %cst_237 = arith.constant dense<0.000000e+00> : vector<8x64xf32>
    %477 = tpu.matmul %475, %4, %cst_237 {dimension_numbers = #tpu.dot_dimension_numbers<[1], [0], [0], [1], [0, 0, 1, 1], [], []>} : vector<8x16xf32>, vector<16x64xf32>, vector<8x64xf32> -> vector<8x64xf32>
    %478 = arith.addf %474, %477 : vector<8x64xf32>
    %479 = vector.extract_strided_slice %478 {offsets = [0, 0], sizes = [8, 16], strides = [1, 1]} : vector<8x64xf32> to vector<8x16xf32>
    %480 = arith.negf %479 : vector<8x16xf32>
    %481 = math.exp %480 : vector<8x16xf32>
    %cst_238 = arith.constant 1.000000e+00 : f32
    %482 = vector.broadcast %cst_238 : f32 to vector<8x16xf32>
    %483 = arith.addf %482, %481 : vector<8x16xf32>
    %484 = arith.divf %482, %483 : vector<8x16xf32>
    %485 = vector.extract_strided_slice %478 {offsets = [0, 16], sizes = [8, 16], strides = [1, 1]} : vector<8x64xf32> to vector<8x16xf32>
    %486 = arith.negf %485 : vector<8x16xf32>
    %487 = math.exp %486 : vector<8x16xf32>
    %cst_239 = arith.constant 1.000000e+00 : f32
    %488 = vector.broadcast %cst_239 : f32 to vector<8x16xf32>
    %489 = arith.addf %488, %487 : vector<8x16xf32>
    %490 = arith.divf %488, %489 : vector<8x16xf32>
    %491 = vector.extract_strided_slice %478 {offsets = [0, 32], sizes = [8, 16], strides = [1, 1]} : vector<8x64xf32> to vector<8x16xf32>
    %492 = math.tanh %491 : vector<8x16xf32>
    %493 = vector.extract_strided_slice %478 {offsets = [0, 48], sizes = [8, 16], strides = [1, 1]} : vector<8x64xf32> to vector<8x16xf32>
    %494 = arith.negf %493 : vector<8x16xf32>
    %495 = math.exp %494 : vector<8x16xf32>
    %cst_240 = arith.constant 1.000000e+00 : f32
    %496 = vector.broadcast %cst_240 : f32 to vector<8x16xf32>
    %497 = arith.addf %496, %495 : vector<8x16xf32>
    %498 = arith.divf %496, %497 : vector<8x16xf32>
    %499 = arith.mulf %490, %476 : vector<8x16xf32>
    %500 = arith.mulf %484, %492 : vector<8x16xf32>
    %501 = arith.addf %499, %500 : vector<8x16xf32>
    %502 = math.tanh %501 : vector<8x16xf32>
    %503 = arith.mulf %498, %502 : vector<8x16xf32>
    %c0_241 = arith.constant 0 : index
    %c0_242 = arith.constant 0 : index
    %504 = vector.load %arg11[%c0_241, %c0_242] : memref<8x16xf32, #tpu.memory_space<vmem>>, vector<8x16xf32>
    tpu.vector_store %arg11[%c0_241, %c0_242], %503 {strides = array<i32>} : memref<8x16xf32, #tpu.memory_space<vmem>>, vector<8x16xf32>,
    %c0_243 = arith.constant 0 : index
    %c0_244 = arith.constant 0 : index
    %505 = vector.load %arg12[%c0_243, %c0_244] : memref<8x16xf32, #tpu.memory_space<vmem>>, vector<8x16xf32>
    tpu.vector_store %arg12[%c0_243, %c0_244], %501 {strides = array<i32>} : memref<8x16xf32, #tpu.memory_space<vmem>>, vector<8x16xf32>,
    %c1_245 = arith.constant 1 : index
    %c0_246 = arith.constant 0 : index
    %c0_247 = arith.constant 0 : index
    %506 = vector.load %arg8[%c1_245, %c0_246, %c0_247] : memref<8x8x16xf32, #tpu.memory_space<vmem>>, vector<1x8x16xf32>
    %507 = vector.shape_cast %506 : vector<1x8x16xf32> to vector<8x16xf32>
    %508 = vector.shape_cast %503 : vector<8x16xf32> to vector<1x8x16xf32>
    tpu.vector_store %arg8[%c1_245, %c0_246, %c0_247], %508 {strides = array<i32>} : memref<8x8x16xf32, #tpu.memory_space<vmem>>, vector<1x8x16xf32>,
    %c7_248 = arith.constant 7 : index
    %c0_249 = arith.constant 0 : index
    %c0_250 = arith.constant 0 : index
    %509 = vector.load %arg2[%c7_248, %c0_249, %c0_250] : memref<8x8x64xf32, #tpu.memory_space<vmem>>, vector<1x8x64xf32>
    %510 = vector.shape_cast %509 : vector<1x8x64xf32> to vector<8x64xf32>
    %c0_251 = arith.constant 0 : index
    %c0_252 = arith.constant 0 : index
    %511 = vector.load %arg9[%c0_251, %c0_252] : memref<8x16xf32, #tpu.memory_space<vmem>>, vector<8x16xf32>
    %c0_253 = arith.constant 0 : index
    %c0_254 = arith.constant 0 : index
    %512 = vector.load %arg10[%c0_253, %c0_254] : memref<8x16xf32, #tpu.memory_space<vmem>>, vector<8x16xf32>
    %cst_255 = arith.constant dense<0.000000e+00> : vector<8x64xf32>
    %513 = tpu.matmul %511, %3, %cst_255 {dimension_numbers = #tpu.dot_dimension_numbers<[1], [0], [0], [1], [0, 0, 1, 1], [], []>} : vector<8x16xf32>, vector<16x64xf32>, vector<8x64xf32> -> vector<8x64xf32>
    %514 = arith.addf %510, %513 : vector<8x64xf32>
    %515 = vector.extract_strided_slice %514 {offsets = [0, 0], sizes = [8, 16], strides = [1, 1]} : vector<8x64xf32> to vector<8x16xf32>
    %516 = arith.negf %515 : vector<8x16xf32>
    %517 = math.exp %516 : vector<8x16xf32>
    %cst_256 = arith.constant 1.000000e+00 : f32
    %518 = vector.broadcast %cst_256 : f32 to vector<8x16xf32>
    %519 = arith.addf %518, %517 : vector<8x16xf32>
    %520 = arith.divf %518, %519 : vector<8x16xf32>
    %521 = vector.extract_strided_slice %514 {offsets = [0, 16], sizes = [8, 16], strides = [1, 1]} : vector<8x64xf32> to vector<8x16xf32>
    %522 = arith.negf %521 : vector<8x16xf32>
    %523 = math.exp %522 : vector<8x16xf32>
    %cst_257 = arith.constant 1.000000e+00 : f32
    %524 = vector.broadcast %cst_257 : f32 to vector<8x16xf32>
    %525 = arith.addf %524, %523 : vector<8x16xf32>
    %526 = arith.divf %524, %525 : vector<8x16xf32>
    %527 = vector.extract_strided_slice %514 {offsets = [0, 32], sizes = [8, 16], strides = [1, 1]} : vector<8x64xf32> to vector<8x16xf32>
    %528 = math.tanh %527 : vector<8x16xf32>
    %529 = vector.extract_strided_slice %514 {offsets = [0, 48], sizes = [8, 16], strides = [1, 1]} : vector<8x64xf32> to vector<8x16xf32>
    %530 = arith.negf %529 : vector<8x16xf32>
    %531 = math.exp %530 : vector<8x16xf32>
    %cst_258 = arith.constant 1.000000e+00 : f32
    %532 = vector.broadcast %cst_258 : f32 to vector<8x16xf32>
    %533 = arith.addf %532, %531 : vector<8x16xf32>
    %534 = arith.divf %532, %533 : vector<8x16xf32>
    %535 = arith.mulf %526, %512 : vector<8x16xf32>
    %536 = arith.mulf %520, %528 : vector<8x16xf32>
    %537 = arith.addf %535, %536 : vector<8x16xf32>
    %538 = math.tanh %537 : vector<8x16xf32>
    %539 = arith.mulf %534, %538 : vector<8x16xf32>
    %c0_259 = arith.constant 0 : index
    %c0_260 = arith.constant 0 : index
    %540 = vector.load %arg9[%c0_259, %c0_260] : memref<8x16xf32, #tpu.memory_space<vmem>>, vector<8x16xf32>
    tpu.vector_store %arg9[%c0_259, %c0_260], %539 {strides = array<i32>} : memref<8x16xf32, #tpu.memory_space<vmem>>, vector<8x16xf32>,
    %c0_261 = arith.constant 0 : index
    %c0_262 = arith.constant 0 : index
    %541 = vector.load %arg10[%c0_261, %c0_262] : memref<8x16xf32, #tpu.memory_space<vmem>>, vector<8x16xf32>
    tpu.vector_store %arg10[%c0_261, %c0_262], %537 {strides = array<i32>} : memref<8x16xf32, #tpu.memory_space<vmem>>, vector<8x16xf32>,
    %c7_263 = arith.constant 7 : index
    %c0_264 = arith.constant 0 : index
    %c0_265 = arith.constant 0 : index
    %542 = vector.load %arg7[%c7_263, %c0_264, %c0_265] : memref<8x8x16xf32, #tpu.memory_space<vmem>>, vector<1x8x16xf32>
    %543 = vector.shape_cast %542 : vector<1x8x16xf32> to vector<8x16xf32>
    %544 = vector.shape_cast %539 : vector<8x16xf32> to vector<1x8x16xf32>
    tpu.vector_store %arg7[%c7_263, %c0_264, %c0_265], %544 {strides = array<i32>} : memref<8x8x16xf32, #tpu.memory_space<vmem>>, vector<1x8x16xf32>,
    %c0_266 = arith.constant 0 : index
    %c0_267 = arith.constant 0 : index
    %c0_268 = arith.constant 0 : index
    %545 = vector.load %arg3[%c0_266, %c0_267, %c0_268] : memref<8x8x64xf32, #tpu.memory_space<vmem>>, vector<1x8x64xf32>
    %546 = vector.shape_cast %545 : vector<1x8x64xf32> to vector<8x64xf32>
    %c0_269 = arith.constant 0 : index
    %c0_270 = arith.constant 0 : index
    %547 = vector.load %arg11[%c0_269, %c0_270] : memref<8x16xf32, #tpu.memory_space<vmem>>, vector<8x16xf32>
    %c0_271 = arith.constant 0 : index
    %c0_272 = arith.constant 0 : index
    %548 = vector.load %arg12[%c0_271, %c0_272] : memref<8x16xf32, #tpu.memory_space<vmem>>, vector<8x16xf32>
    %cst_273 = arith.constant dense<0.000000e+00> : vector<8x64xf32>
    %549 = tpu.matmul %547, %4, %cst_273 {dimension_numbers = #tpu.dot_dimension_numbers<[1], [0], [0], [1], [0, 0, 1, 1], [], []>} : vector<8x16xf32>, vector<16x64xf32>, vector<8x64xf32> -> vector<8x64xf32>
    %550 = arith.addf %546, %549 : vector<8x64xf32>
    %551 = vector.extract_strided_slice %550 {offsets = [0, 0], sizes = [8, 16], strides = [1, 1]} : vector<8x64xf32> to vector<8x16xf32>
    %552 = arith.negf %551 : vector<8x16xf32>
    %553 = math.exp %552 : vector<8x16xf32>
    %cst_274 = arith.constant 1.000000e+00 : f32
    %554 = vector.broadcast %cst_274 : f32 to vector<8x16xf32>
    %555 = arith.addf %554, %553 : vector<8x16xf32>
    %556 = arith.divf %554, %555 : vector<8x16xf32>
    %557 = vector.extract_strided_slice %550 {offsets = [0, 16], sizes = [8, 16], strides = [1, 1]} : vector<8x64xf32> to vector<8x16xf32>
    %558 = arith.negf %557 : vector<8x16xf32>
    %559 = math.exp %558 : vector<8x16xf32>
    %cst_275 = arith.constant 1.000000e+00 : f32
    %560 = vector.broadcast %cst_275 : f32 to vector<8x16xf32>
    %561 = arith.addf %560, %559 : vector<8x16xf32>
    %562 = arith.divf %560, %561 : vector<8x16xf32>
    %563 = vector.extract_strided_slice %550 {offsets = [0, 32], sizes = [8, 16], strides = [1, 1]} : vector<8x64xf32> to vector<8x16xf32>
    %564 = math.tanh %563 : vector<8x16xf32>
    %565 = vector.extract_strided_slice %550 {offsets = [0, 48], sizes = [8, 16], strides = [1, 1]} : vector<8x64xf32> to vector<8x16xf32>
    %566 = arith.negf %565 : vector<8x16xf32>
    %567 = math.exp %566 : vector<8x16xf32>
    %cst_276 = arith.constant 1.000000e+00 : f32
    %568 = vector.broadcast %cst_276 : f32 to vector<8x16xf32>
    %569 = arith.addf %568, %567 : vector<8x16xf32>
    %570 = arith.divf %568, %569 : vector<8x16xf32>
    %571 = arith.mulf %562, %548 : vector<8x16xf32>
    %572 = arith.mulf %556, %564 : vector<8x16xf32>
    %573 = arith.addf %571, %572 : vector<8x16xf32>
    %574 = math.tanh %573 : vector<8x16xf32>
    %575 = arith.mulf %570, %574 : vector<8x16xf32>
    %c0_277 = arith.constant 0 : index
    %c0_278 = arith.constant 0 : index
    %576 = vector.load %arg11[%c0_277, %c0_278] : memref<8x16xf32, #tpu.memory_space<vmem>>, vector<8x16xf32>
    tpu.vector_store %arg11[%c0_277, %c0_278], %575 {strides = array<i32>} : memref<8x16xf32, #tpu.memory_space<vmem>>, vector<8x16xf32>,
    %c0_279 = arith.constant 0 : index
    %c0_280 = arith.constant 0 : index
    %577 = vector.load %arg12[%c0_279, %c0_280] : memref<8x16xf32, #tpu.memory_space<vmem>>, vector<8x16xf32>
    tpu.vector_store %arg12[%c0_279, %c0_280], %573 {strides = array<i32>} : memref<8x16xf32, #tpu.memory_space<vmem>>, vector<8x16xf32>,
    %c0_281 = arith.constant 0 : index
    %c0_282 = arith.constant 0 : index
    %c0_283 = arith.constant 0 : index
    %578 = vector.load %arg8[%c0_281, %c0_282, %c0_283] : memref<8x8x16xf32, #tpu.memory_space<vmem>>, vector<1x8x16xf32>
    %579 = vector.shape_cast %578 : vector<1x8x16xf32> to vector<8x16xf32>
    %580 = vector.shape_cast %575 : vector<8x16xf32> to vector<1x8x16xf32>
    tpu.vector_store %arg8[%c0_281, %c0_282, %c0_283], %580 {strides = array<i32>} : memref<8x8x16xf32, #tpu.memory_space<vmem>>, vector<1x8x16xf32>,
    return
  }
  func.func @transform_0(%arg0: i32, %arg1: i32) -> (i32, i32, i32) {
    %c0_i32 = arith.constant 0 : i32
    %c0_i32_0 = arith.constant 0 : i32
    return %arg1, %arg0, %c0_i32 : i32, i32, i32
  }
  func.func @transform_1(%arg0: i32, %arg1: i32) -> (i32, i32, i32) {
    %c0_i32 = arith.constant 0 : i32
    %0 = arith.subi %c0_i32, %arg1 : i32
    %c0_i32_0 = arith.constant 0 : i32
    %c0_i32_1 = arith.constant 0 : i32
    return %0, %arg0, %c0_i32_0 : i32, i32, i32
  }
  func.func @transform_2(%arg0: i32, %arg1: i32) -> (i32, i32) {
    %c0_i32 = arith.constant 0 : i32
    %c0_i32_0 = arith.constant 0 : i32
    %c0_i32_1 = arith.constant 0 : i32
    return %c0_i32, %c0_i32_0 : i32, i32
  }
  func.func @transform_3(%arg0: i32, %arg1: i32) -> (i32, i32) {
    %c0_i32 = arith.constant 0 : i32
    %c0_i32_0 = arith.constant 0 : i32
    %c0_i32_1 = arith.constant 0 : i32
    return %c0_i32, %c0_i32_0 : i32, i32
  }
  func.func @transform_4(%arg0: i32, %arg1: i32) -> (i32, i32) {
    %c0_i32 = arith.constant 0 : i32
    %c0_i32_0 = arith.constant 0 : i32
    return %arg0, %c0_i32 : i32, i32
  }
  func.func @transform_5(%arg0: i32, %arg1: i32) -> (i32, i32, i32) {
    %c0_i32 = arith.constant 0 : i32
    %c0_i32_0 = arith.constant 0 : i32
    return %arg1, %arg0, %c0_i32 : i32, i32, i32
  }
  func.func @transform_6(%arg0: i32, %arg1: i32) -> (i32, i32, i32) {
    %c0_i32 = arith.constant 0 : i32
    %0 = arith.subi %c0_i32, %arg1 : i32
    %c0_i32_0 = arith.constant 0 : i32
    %c0_i32_1 = arith.constant 0 : i32
    return %0, %arg0, %c0_i32_0 : i32, i32, i32
  }
}

module attributes {stable_mosaic.version = 11 : i64} {
  func.func @_gates_proj_kernel(%arg0: i32, %arg1: memref<128x16xf32, #tpu.memory_space<vmem>>, %arg2: memref<128x16xf32, #tpu.memory_space<vmem>>, %arg3: memref<16x64xf32, #tpu.memory_space<vmem>>, %arg4: memref<16x64xf32, #tpu.memory_space<vmem>>, %arg5: memref<16x64xf32, #tpu.memory_space<vmem>>, %arg6: memref<16x64xf32, #tpu.memory_space<vmem>>, %arg7: memref<1x64xf32, #tpu.memory_space<vmem>>, %arg8: memref<1x64xf32, #tpu.memory_space<vmem>>, %arg9: memref<128x64xf32, #tpu.memory_space<vmem>>, %arg10: memref<128x64xf32, #tpu.memory_space<vmem>>) attributes {dimension_semantics = [#tpu.dimension_semantics<parallel>], iteration_bounds = array<i64: 1>, scalar_prefetch = 0 : i64, scratch_operands = 0 : i64, tpu.core_type = #tpu.core_type<tc>, window_params = [{transform_indices = @transform_0, window_bounds = array<i64: 128, 16>}, {transform_indices = @transform_1, window_bounds = array<i64: 128, 16>}, {pipeline_mode = #tpu.pipeline_mode<synchronous>, transform_indices = @transform_2, window_bounds = array<i64: 16, 64>}, {pipeline_mode = #tpu.pipeline_mode<synchronous>, transform_indices = @transform_3, window_bounds = array<i64: 16, 64>}, {pipeline_mode = #tpu.pipeline_mode<synchronous>, transform_indices = @transform_4, window_bounds = array<i64: 16, 64>}, {pipeline_mode = #tpu.pipeline_mode<synchronous>, transform_indices = @transform_5, window_bounds = array<i64: 16, 64>}, {pipeline_mode = #tpu.pipeline_mode<synchronous>, transform_indices = @transform_6, window_bounds = array<i64: 1, 64>}, {pipeline_mode = #tpu.pipeline_mode<synchronous>, transform_indices = @transform_7, window_bounds = array<i64: 1, 64>}, {transform_indices = @transform_8, window_bounds = array<i64: 128, 64>}, {transform_indices = @transform_9, window_bounds = array<i64: 128, 64>}]} {
    %c0 = arith.constant 0 : index
    %c0_0 = arith.constant 0 : index
    %0 = vector.load %arg7[%c0, %c0_0] : memref<1x64xf32, #tpu.memory_space<vmem>>, vector<1x64xf32>
    %c0_1 = arith.constant 0 : index
    %c0_2 = arith.constant 0 : index
    %1 = vector.load %arg8[%c0_1, %c0_2] : memref<1x64xf32, #tpu.memory_space<vmem>>, vector<1x64xf32>
    %c0_3 = arith.constant 0 : index
    %c0_4 = arith.constant 0 : index
    %2 = vector.load %arg1[%c0_3, %c0_4] : memref<128x16xf32, #tpu.memory_space<vmem>>, vector<128x16xf32>
    %c0_5 = arith.constant 0 : index
    %c0_6 = arith.constant 0 : index
    %3 = vector.load %arg3[%c0_5, %c0_6] : memref<16x64xf32, #tpu.memory_space<vmem>>, vector<16x64xf32>
    %cst = arith.constant dense<0.000000e+00> : vector<128x64xf32>
    %4 = tpu.matmul %2, %3, %cst {dimension_numbers = #tpu.dot_dimension_numbers<[1], [0], [0], [1], [0, 0, 1, 1], [], []>} : vector<128x16xf32>, vector<16x64xf32>, vector<128x64xf32> -> vector<128x64xf32>
    %5 = vector.broadcast %0 : vector<1x64xf32> to vector<128x64xf32>
    %6 = arith.addf %5, %4 : vector<128x64xf32>
    %c0_7 = arith.constant 0 : index
    %c0_8 = arith.constant 0 : index
    %7 = vector.load %arg5[%c0_7, %c0_8] : memref<16x64xf32, #tpu.memory_space<vmem>>, vector<16x64xf32>
    %cst_9 = arith.constant dense<0.000000e+00> : vector<128x64xf32>
    %8 = tpu.matmul %2, %7, %cst_9 {dimension_numbers = #tpu.dot_dimension_numbers<[1], [0], [0], [1], [0, 0, 1, 1], [], []>} : vector<128x16xf32>, vector<16x64xf32>, vector<128x64xf32> -> vector<128x64xf32>
    %9 = vector.broadcast %1 : vector<1x64xf32> to vector<128x64xf32>
    %10 = arith.addf %9, %8 : vector<128x64xf32>
    %c0_10 = arith.constant 0 : index
    %c0_11 = arith.constant 0 : index
    %11 = vector.load %arg2[%c0_10, %c0_11] : memref<128x16xf32, #tpu.memory_space<vmem>>, vector<128x16xf32>
    %c0_12 = arith.constant 0 : index
    %c0_13 = arith.constant 0 : index
    %12 = vector.load %arg4[%c0_12, %c0_13] : memref<16x64xf32, #tpu.memory_space<vmem>>, vector<16x64xf32>
    %cst_14 = arith.constant dense<0.000000e+00> : vector<128x64xf32>
    %13 = tpu.matmul %11, %12, %cst_14 {dimension_numbers = #tpu.dot_dimension_numbers<[1], [0], [0], [1], [0, 0, 1, 1], [], []>} : vector<128x16xf32>, vector<16x64xf32>, vector<128x64xf32> -> vector<128x64xf32>
    %14 = arith.addf %6, %13 : vector<128x64xf32>
    %c0_15 = arith.constant 0 : index
    %c0_16 = arith.constant 0 : index
    %15 = vector.load %arg6[%c0_15, %c0_16] : memref<16x64xf32, #tpu.memory_space<vmem>>, vector<16x64xf32>
    %cst_17 = arith.constant dense<0.000000e+00> : vector<128x64xf32>
    %16 = tpu.matmul %11, %15, %cst_17 {dimension_numbers = #tpu.dot_dimension_numbers<[1], [0], [0], [1], [0, 0, 1, 1], [], []>} : vector<128x16xf32>, vector<16x64xf32>, vector<128x64xf32> -> vector<128x64xf32>
    %17 = arith.addf %10, %16 : vector<128x64xf32>
    %c0_18 = arith.constant 0 : index
    %c0_19 = arith.constant 0 : index
    %18 = vector.load %arg9[%c0_18, %c0_19] : memref<128x64xf32, #tpu.memory_space<vmem>>, vector<128x64xf32>
    tpu.vector_store %arg9[%c0_18, %c0_19], %14 {strides = array<i32>} : memref<128x64xf32, #tpu.memory_space<vmem>>, vector<128x64xf32>,
    %c0_20 = arith.constant 0 : index
    %c0_21 = arith.constant 0 : index
    %19 = vector.load %arg10[%c0_20, %c0_21] : memref<128x64xf32, #tpu.memory_space<vmem>>, vector<128x64xf32>
    tpu.vector_store %arg10[%c0_20, %c0_21], %17 {strides = array<i32>} : memref<128x64xf32, #tpu.memory_space<vmem>>, vector<128x64xf32>,
    return
  }
  func.func @transform_0(%arg0: i32) -> (i32, i32) {
    %c0_i32 = arith.constant 0 : i32
    %c0_i32_0 = arith.constant 0 : i32
    return %arg0, %c0_i32 : i32, i32
  }
  func.func @transform_1(%arg0: i32) -> (i32, i32) {
    %c0_i32 = arith.constant 0 : i32
    %c0_i32_0 = arith.constant 0 : i32
    return %arg0, %c0_i32 : i32, i32
  }
  func.func @transform_2(%arg0: i32) -> (i32, i32) {
    %c0_i32 = arith.constant 0 : i32
    %c0_i32_0 = arith.constant 0 : i32
    %c0_i32_1 = arith.constant 0 : i32
    return %c0_i32, %c0_i32_0 : i32, i32
  }
  func.func @transform_3(%arg0: i32) -> (i32, i32) {
    %c0_i32 = arith.constant 0 : i32
    %c0_i32_0 = arith.constant 0 : i32
    %c0_i32_1 = arith.constant 0 : i32
    return %c0_i32, %c0_i32_0 : i32, i32
  }
  func.func @transform_4(%arg0: i32) -> (i32, i32) {
    %c0_i32 = arith.constant 0 : i32
    %c0_i32_0 = arith.constant 0 : i32
    %c0_i32_1 = arith.constant 0 : i32
    return %c0_i32, %c0_i32_0 : i32, i32
  }
  func.func @transform_5(%arg0: i32) -> (i32, i32) {
    %c0_i32 = arith.constant 0 : i32
    %c0_i32_0 = arith.constant 0 : i32
    %c0_i32_1 = arith.constant 0 : i32
    return %c0_i32, %c0_i32_0 : i32, i32
  }
  func.func @transform_6(%arg0: i32) -> (i32, i32) {
    %c0_i32 = arith.constant 0 : i32
    %c0_i32_0 = arith.constant 0 : i32
    %c0_i32_1 = arith.constant 0 : i32
    return %c0_i32, %c0_i32_0 : i32, i32
  }
  func.func @transform_7(%arg0: i32) -> (i32, i32) {
    %c0_i32 = arith.constant 0 : i32
    %c0_i32_0 = arith.constant 0 : i32
    %c0_i32_1 = arith.constant 0 : i32
    return %c0_i32, %c0_i32_0 : i32, i32
  }
  func.func @transform_8(%arg0: i32) -> (i32, i32) {
    %c0_i32 = arith.constant 0 : i32
    %c0_i32_0 = arith.constant 0 : i32
    return %arg0, %c0_i32 : i32, i32
  }
  func.func @transform_9(%arg0: i32) -> (i32, i32) {
    %c0_i32 = arith.constant 0 : i32
    %c0_i32_0 = arith.constant 0 : i32
    return %arg0, %c0_i32 : i32, i32
  }
}

module attributes {stable_mosaic.version = 11 : i64} {
  func.func @_bilstm_rec_kernel(%arg0: i32, %arg1: i32, %arg2: memref<8x8x64xf32, #tpu.memory_space<vmem>>, %arg3: memref<8x8x64xf32, #tpu.memory_space<vmem>>, %arg4: memref<16x64xf32, #tpu.memory_space<vmem>>, %arg5: memref<16x64xf32, #tpu.memory_space<vmem>>, %arg6: memref<8x8x16xf32, #tpu.memory_space<vmem>>, %arg7: memref<8x8x16xf32, #tpu.memory_space<vmem>>, %arg8: memref<8x16xf32, #tpu.memory_space<vmem>>, %arg9: memref<8x16xf32, #tpu.memory_space<vmem>>, %arg10: memref<8x16xf32, #tpu.memory_space<vmem>>, %arg11: memref<8x16xf32, #tpu.memory_space<vmem>>) attributes {dimension_semantics = [#tpu.dimension_semantics<parallel>, #tpu.dimension_semantics<arbitrary>], iteration_bounds = array<i64: 2, 1>, scalar_prefetch = 0 : i64, scratch_operands = 4 : i64, tpu.core_type = #tpu.core_type<tc>, window_params = [{transform_indices = @transform_0, window_bounds = array<i64: 8, 8, 64>}, {transform_indices = @transform_1, window_bounds = array<i64: 8, 8, 64>}, {pipeline_mode = #tpu.pipeline_mode<synchronous>, transform_indices = @transform_2, window_bounds = array<i64: 16, 64>}, {pipeline_mode = #tpu.pipeline_mode<synchronous>, transform_indices = @transform_3, window_bounds = array<i64: 16, 64>}, {transform_indices = @transform_4, window_bounds = array<i64: 8, 8, 16>}, {transform_indices = @transform_5, window_bounds = array<i64: 8, 8, 16>}]} {
    %c0_i32 = arith.constant 0 : i32
    %0 = arith.cmpi eq, %arg1, %c0_i32 : i32
    %1 = arith.extui %0 : i1 to i32
    %c0_i32_0 = arith.constant 0 : i32
    %2 = arith.cmpi ne, %1, %c0_i32_0 : i32
    scf.if %2 {
      %cst_284 = arith.constant 0.000000e+00 : f32
      %581 = vector.broadcast %cst_284 : f32 to vector<8x16xf32>
      %c0_285 = arith.constant 0 : index
      %c0_286 = arith.constant 0 : index
      %582 = vector.load %arg8[%c0_285, %c0_286] : memref<8x16xf32, #tpu.memory_space<vmem>>, vector<8x16xf32>
      tpu.vector_store %arg8[%c0_285, %c0_286], %581 {strides = array<i32>} : memref<8x16xf32, #tpu.memory_space<vmem>>, vector<8x16xf32>,
      %cst_287 = arith.constant 0.000000e+00 : f32
      %583 = vector.broadcast %cst_287 : f32 to vector<8x16xf32>
      %c0_288 = arith.constant 0 : index
      %c0_289 = arith.constant 0 : index
      %584 = vector.load %arg10[%c0_288, %c0_289] : memref<8x16xf32, #tpu.memory_space<vmem>>, vector<8x16xf32>
      tpu.vector_store %arg10[%c0_288, %c0_289], %583 {strides = array<i32>} : memref<8x16xf32, #tpu.memory_space<vmem>>, vector<8x16xf32>,
      %cst_290 = arith.constant 0.000000e+00 : f32
      %585 = vector.broadcast %cst_290 : f32 to vector<8x16xf32>
      %c0_291 = arith.constant 0 : index
      %c0_292 = arith.constant 0 : index
      %586 = vector.load %arg9[%c0_291, %c0_292] : memref<8x16xf32, #tpu.memory_space<vmem>>, vector<8x16xf32>
      tpu.vector_store %arg9[%c0_291, %c0_292], %585 {strides = array<i32>} : memref<8x16xf32, #tpu.memory_space<vmem>>, vector<8x16xf32>,
      %cst_293 = arith.constant 0.000000e+00 : f32
      %587 = vector.broadcast %cst_293 : f32 to vector<8x16xf32>
      %c0_294 = arith.constant 0 : index
      %c0_295 = arith.constant 0 : index
      %588 = vector.load %arg11[%c0_294, %c0_295] : memref<8x16xf32, #tpu.memory_space<vmem>>, vector<8x16xf32>
      tpu.vector_store %arg11[%c0_294, %c0_295], %587 {strides = array<i32>} : memref<8x16xf32, #tpu.memory_space<vmem>>, vector<8x16xf32>,
    } else {
    }
    %c0 = arith.constant 0 : index
    %c0_1 = arith.constant 0 : index
    %3 = vector.load %arg4[%c0, %c0_1] : memref<16x64xf32, #tpu.memory_space<vmem>>, vector<16x64xf32>
    %c0_2 = arith.constant 0 : index
    %c0_3 = arith.constant 0 : index
    %4 = vector.load %arg5[%c0_2, %c0_3] : memref<16x64xf32, #tpu.memory_space<vmem>>, vector<16x64xf32>
    %c0_4 = arith.constant 0 : index
    %c0_5 = arith.constant 0 : index
    %c0_6 = arith.constant 0 : index
    %5 = vector.load %arg2[%c0_4, %c0_5, %c0_6] : memref<8x8x64xf32, #tpu.memory_space<vmem>>, vector<1x8x64xf32>
    %6 = vector.shape_cast %5 : vector<1x8x64xf32> to vector<8x64xf32>
    %c0_7 = arith.constant 0 : index
    %c0_8 = arith.constant 0 : index
    %7 = vector.load %arg8[%c0_7, %c0_8] : memref<8x16xf32, #tpu.memory_space<vmem>>, vector<8x16xf32>
    %c0_9 = arith.constant 0 : index
    %c0_10 = arith.constant 0 : index
    %8 = vector.load %arg9[%c0_9, %c0_10] : memref<8x16xf32, #tpu.memory_space<vmem>>, vector<8x16xf32>
    %cst = arith.constant dense<0.000000e+00> : vector<8x64xf32>
    %9 = tpu.matmul %7, %3, %cst {dimension_numbers = #tpu.dot_dimension_numbers<[1], [0], [0], [1], [0, 0, 1, 1], [], []>} : vector<8x16xf32>, vector<16x64xf32>, vector<8x64xf32> -> vector<8x64xf32>
    %10 = arith.addf %6, %9 : vector<8x64xf32>
    %11 = vector.extract_strided_slice %10 {offsets = [0, 0], sizes = [8, 16], strides = [1, 1]} : vector<8x64xf32> to vector<8x16xf32>
    %12 = arith.negf %11 : vector<8x16xf32>
    %13 = math.exp %12 : vector<8x16xf32>
    %cst_11 = arith.constant 1.000000e+00 : f32
    %14 = vector.broadcast %cst_11 : f32 to vector<8x16xf32>
    %15 = arith.addf %14, %13 : vector<8x16xf32>
    %16 = arith.divf %14, %15 : vector<8x16xf32>
    %17 = vector.extract_strided_slice %10 {offsets = [0, 16], sizes = [8, 16], strides = [1, 1]} : vector<8x64xf32> to vector<8x16xf32>
    %18 = arith.negf %17 : vector<8x16xf32>
    %19 = math.exp %18 : vector<8x16xf32>
    %cst_12 = arith.constant 1.000000e+00 : f32
    %20 = vector.broadcast %cst_12 : f32 to vector<8x16xf32>
    %21 = arith.addf %20, %19 : vector<8x16xf32>
    %22 = arith.divf %20, %21 : vector<8x16xf32>
    %23 = vector.extract_strided_slice %10 {offsets = [0, 32], sizes = [8, 16], strides = [1, 1]} : vector<8x64xf32> to vector<8x16xf32>
    %24 = math.tanh %23 : vector<8x16xf32>
    %25 = vector.extract_strided_slice %10 {offsets = [0, 48], sizes = [8, 16], strides = [1, 1]} : vector<8x64xf32> to vector<8x16xf32>
    %26 = arith.negf %25 : vector<8x16xf32>
    %27 = math.exp %26 : vector<8x16xf32>
    %cst_13 = arith.constant 1.000000e+00 : f32
    %28 = vector.broadcast %cst_13 : f32 to vector<8x16xf32>
    %29 = arith.addf %28, %27 : vector<8x16xf32>
    %30 = arith.divf %28, %29 : vector<8x16xf32>
    %31 = arith.mulf %22, %8 : vector<8x16xf32>
    %32 = arith.mulf %16, %24 : vector<8x16xf32>
    %33 = arith.addf %31, %32 : vector<8x16xf32>
    %34 = math.tanh %33 : vector<8x16xf32>
    %35 = arith.mulf %30, %34 : vector<8x16xf32>
    %c0_14 = arith.constant 0 : index
    %c0_15 = arith.constant 0 : index
    %36 = vector.load %arg8[%c0_14, %c0_15] : memref<8x16xf32, #tpu.memory_space<vmem>>, vector<8x16xf32>
    tpu.vector_store %arg8[%c0_14, %c0_15], %35 {strides = array<i32>} : memref<8x16xf32, #tpu.memory_space<vmem>>, vector<8x16xf32>,
    %c0_16 = arith.constant 0 : index
    %c0_17 = arith.constant 0 : index
    %37 = vector.load %arg9[%c0_16, %c0_17] : memref<8x16xf32, #tpu.memory_space<vmem>>, vector<8x16xf32>
    tpu.vector_store %arg9[%c0_16, %c0_17], %33 {strides = array<i32>} : memref<8x16xf32, #tpu.memory_space<vmem>>, vector<8x16xf32>,
    %c0_18 = arith.constant 0 : index
    %c0_19 = arith.constant 0 : index
    %c0_20 = arith.constant 0 : index
    %38 = vector.load %arg6[%c0_18, %c0_19, %c0_20] : memref<8x8x16xf32, #tpu.memory_space<vmem>>, vector<1x8x16xf32>
    %39 = vector.shape_cast %38 : vector<1x8x16xf32> to vector<8x16xf32>
    %40 = vector.shape_cast %35 : vector<8x16xf32> to vector<1x8x16xf32>
    tpu.vector_store %arg6[%c0_18, %c0_19, %c0_20], %40 {strides = array<i32>} : memref<8x8x16xf32, #tpu.memory_space<vmem>>, vector<1x8x16xf32>,
    %c7 = arith.constant 7 : index
    %c0_21 = arith.constant 0 : index
    %c0_22 = arith.constant 0 : index
    %41 = vector.load %arg3[%c7, %c0_21, %c0_22] : memref<8x8x64xf32, #tpu.memory_space<vmem>>, vector<1x8x64xf32>
    %42 = vector.shape_cast %41 : vector<1x8x64xf32> to vector<8x64xf32>
    %c0_23 = arith.constant 0 : index
    %c0_24 = arith.constant 0 : index
    %43 = vector.load %arg10[%c0_23, %c0_24] : memref<8x16xf32, #tpu.memory_space<vmem>>, vector<8x16xf32>
    %c0_25 = arith.constant 0 : index
    %c0_26 = arith.constant 0 : index
    %44 = vector.load %arg11[%c0_25, %c0_26] : memref<8x16xf32, #tpu.memory_space<vmem>>, vector<8x16xf32>
    %cst_27 = arith.constant dense<0.000000e+00> : vector<8x64xf32>
    %45 = tpu.matmul %43, %4, %cst_27 {dimension_numbers = #tpu.dot_dimension_numbers<[1], [0], [0], [1], [0, 0, 1, 1], [], []>} : vector<8x16xf32>, vector<16x64xf32>, vector<8x64xf32> -> vector<8x64xf32>
    %46 = arith.addf %42, %45 : vector<8x64xf32>
    %47 = vector.extract_strided_slice %46 {offsets = [0, 0], sizes = [8, 16], strides = [1, 1]} : vector<8x64xf32> to vector<8x16xf32>
    %48 = arith.negf %47 : vector<8x16xf32>
    %49 = math.exp %48 : vector<8x16xf32>
    %cst_28 = arith.constant 1.000000e+00 : f32
    %50 = vector.broadcast %cst_28 : f32 to vector<8x16xf32>
    %51 = arith.addf %50, %49 : vector<8x16xf32>
    %52 = arith.divf %50, %51 : vector<8x16xf32>
    %53 = vector.extract_strided_slice %46 {offsets = [0, 16], sizes = [8, 16], strides = [1, 1]} : vector<8x64xf32> to vector<8x16xf32>
    %54 = arith.negf %53 : vector<8x16xf32>
    %55 = math.exp %54 : vector<8x16xf32>
    %cst_29 = arith.constant 1.000000e+00 : f32
    %56 = vector.broadcast %cst_29 : f32 to vector<8x16xf32>
    %57 = arith.addf %56, %55 : vector<8x16xf32>
    %58 = arith.divf %56, %57 : vector<8x16xf32>
    %59 = vector.extract_strided_slice %46 {offsets = [0, 32], sizes = [8, 16], strides = [1, 1]} : vector<8x64xf32> to vector<8x16xf32>
    %60 = math.tanh %59 : vector<8x16xf32>
    %61 = vector.extract_strided_slice %46 {offsets = [0, 48], sizes = [8, 16], strides = [1, 1]} : vector<8x64xf32> to vector<8x16xf32>
    %62 = arith.negf %61 : vector<8x16xf32>
    %63 = math.exp %62 : vector<8x16xf32>
    %cst_30 = arith.constant 1.000000e+00 : f32
    %64 = vector.broadcast %cst_30 : f32 to vector<8x16xf32>
    %65 = arith.addf %64, %63 : vector<8x16xf32>
    %66 = arith.divf %64, %65 : vector<8x16xf32>
    %67 = arith.mulf %58, %44 : vector<8x16xf32>
    %68 = arith.mulf %52, %60 : vector<8x16xf32>
    %69 = arith.addf %67, %68 : vector<8x16xf32>
    %70 = math.tanh %69 : vector<8x16xf32>
    %71 = arith.mulf %66, %70 : vector<8x16xf32>
    %c0_31 = arith.constant 0 : index
    %c0_32 = arith.constant 0 : index
    %72 = vector.load %arg10[%c0_31, %c0_32] : memref<8x16xf32, #tpu.memory_space<vmem>>, vector<8x16xf32>
    tpu.vector_store %arg10[%c0_31, %c0_32], %71 {strides = array<i32>} : memref<8x16xf32, #tpu.memory_space<vmem>>, vector<8x16xf32>,
    %c0_33 = arith.constant 0 : index
    %c0_34 = arith.constant 0 : index
    %73 = vector.load %arg11[%c0_33, %c0_34] : memref<8x16xf32, #tpu.memory_space<vmem>>, vector<8x16xf32>
    tpu.vector_store %arg11[%c0_33, %c0_34], %69 {strides = array<i32>} : memref<8x16xf32, #tpu.memory_space<vmem>>, vector<8x16xf32>,
    %c7_35 = arith.constant 7 : index
    %c0_36 = arith.constant 0 : index
    %c0_37 = arith.constant 0 : index
    %74 = vector.load %arg7[%c7_35, %c0_36, %c0_37] : memref<8x8x16xf32, #tpu.memory_space<vmem>>, vector<1x8x16xf32>
    %75 = vector.shape_cast %74 : vector<1x8x16xf32> to vector<8x16xf32>
    %76 = vector.shape_cast %71 : vector<8x16xf32> to vector<1x8x16xf32>
    tpu.vector_store %arg7[%c7_35, %c0_36, %c0_37], %76 {strides = array<i32>} : memref<8x8x16xf32, #tpu.memory_space<vmem>>, vector<1x8x16xf32>,
    %c1 = arith.constant 1 : index
    %c0_38 = arith.constant 0 : index
    %c0_39 = arith.constant 0 : index
    %77 = vector.load %arg2[%c1, %c0_38, %c0_39] : memref<8x8x64xf32, #tpu.memory_space<vmem>>, vector<1x8x64xf32>
    %78 = vector.shape_cast %77 : vector<1x8x64xf32> to vector<8x64xf32>
    %c0_40 = arith.constant 0 : index
    %c0_41 = arith.constant 0 : index
    %79 = vector.load %arg8[%c0_40, %c0_41] : memref<8x16xf32, #tpu.memory_space<vmem>>, vector<8x16xf32>
    %c0_42 = arith.constant 0 : index
    %c0_43 = arith.constant 0 : index
    %80 = vector.load %arg9[%c0_42, %c0_43] : memref<8x16xf32, #tpu.memory_space<vmem>>, vector<8x16xf32>
    %cst_44 = arith.constant dense<0.000000e+00> : vector<8x64xf32>
    %81 = tpu.matmul %79, %3, %cst_44 {dimension_numbers = #tpu.dot_dimension_numbers<[1], [0], [0], [1], [0, 0, 1, 1], [], []>} : vector<8x16xf32>, vector<16x64xf32>, vector<8x64xf32> -> vector<8x64xf32>
    %82 = arith.addf %78, %81 : vector<8x64xf32>
    %83 = vector.extract_strided_slice %82 {offsets = [0, 0], sizes = [8, 16], strides = [1, 1]} : vector<8x64xf32> to vector<8x16xf32>
    %84 = arith.negf %83 : vector<8x16xf32>
    %85 = math.exp %84 : vector<8x16xf32>
    %cst_45 = arith.constant 1.000000e+00 : f32
    %86 = vector.broadcast %cst_45 : f32 to vector<8x16xf32>
    %87 = arith.addf %86, %85 : vector<8x16xf32>
    %88 = arith.divf %86, %87 : vector<8x16xf32>
    %89 = vector.extract_strided_slice %82 {offsets = [0, 16], sizes = [8, 16], strides = [1, 1]} : vector<8x64xf32> to vector<8x16xf32>
    %90 = arith.negf %89 : vector<8x16xf32>
    %91 = math.exp %90 : vector<8x16xf32>
    %cst_46 = arith.constant 1.000000e+00 : f32
    %92 = vector.broadcast %cst_46 : f32 to vector<8x16xf32>
    %93 = arith.addf %92, %91 : vector<8x16xf32>
    %94 = arith.divf %92, %93 : vector<8x16xf32>
    %95 = vector.extract_strided_slice %82 {offsets = [0, 32], sizes = [8, 16], strides = [1, 1]} : vector<8x64xf32> to vector<8x16xf32>
    %96 = math.tanh %95 : vector<8x16xf32>
    %97 = vector.extract_strided_slice %82 {offsets = [0, 48], sizes = [8, 16], strides = [1, 1]} : vector<8x64xf32> to vector<8x16xf32>
    %98 = arith.negf %97 : vector<8x16xf32>
    %99 = math.exp %98 : vector<8x16xf32>
    %cst_47 = arith.constant 1.000000e+00 : f32
    %100 = vector.broadcast %cst_47 : f32 to vector<8x16xf32>
    %101 = arith.addf %100, %99 : vector<8x16xf32>
    %102 = arith.divf %100, %101 : vector<8x16xf32>
    %103 = arith.mulf %94, %80 : vector<8x16xf32>
    %104 = arith.mulf %88, %96 : vector<8x16xf32>
    %105 = arith.addf %103, %104 : vector<8x16xf32>
    %106 = math.tanh %105 : vector<8x16xf32>
    %107 = arith.mulf %102, %106 : vector<8x16xf32>
    %c0_48 = arith.constant 0 : index
    %c0_49 = arith.constant 0 : index
    %108 = vector.load %arg8[%c0_48, %c0_49] : memref<8x16xf32, #tpu.memory_space<vmem>>, vector<8x16xf32>
    tpu.vector_store %arg8[%c0_48, %c0_49], %107 {strides = array<i32>} : memref<8x16xf32, #tpu.memory_space<vmem>>, vector<8x16xf32>,
    %c0_50 = arith.constant 0 : index
    %c0_51 = arith.constant 0 : index
    %109 = vector.load %arg9[%c0_50, %c0_51] : memref<8x16xf32, #tpu.memory_space<vmem>>, vector<8x16xf32>
    tpu.vector_store %arg9[%c0_50, %c0_51], %105 {strides = array<i32>} : memref<8x16xf32, #tpu.memory_space<vmem>>, vector<8x16xf32>,
    %c1_52 = arith.constant 1 : index
    %c0_53 = arith.constant 0 : index
    %c0_54 = arith.constant 0 : index
    %110 = vector.load %arg6[%c1_52, %c0_53, %c0_54] : memref<8x8x16xf32, #tpu.memory_space<vmem>>, vector<1x8x16xf32>
    %111 = vector.shape_cast %110 : vector<1x8x16xf32> to vector<8x16xf32>
    %112 = vector.shape_cast %107 : vector<8x16xf32> to vector<1x8x16xf32>
    tpu.vector_store %arg6[%c1_52, %c0_53, %c0_54], %112 {strides = array<i32>} : memref<8x8x16xf32, #tpu.memory_space<vmem>>, vector<1x8x16xf32>,
    %c6 = arith.constant 6 : index
    %c0_55 = arith.constant 0 : index
    %c0_56 = arith.constant 0 : index
    %113 = vector.load %arg3[%c6, %c0_55, %c0_56] : memref<8x8x64xf32, #tpu.memory_space<vmem>>, vector<1x8x64xf32>
    %114 = vector.shape_cast %113 : vector<1x8x64xf32> to vector<8x64xf32>
    %c0_57 = arith.constant 0 : index
    %c0_58 = arith.constant 0 : index
    %115 = vector.load %arg10[%c0_57, %c0_58] : memref<8x16xf32, #tpu.memory_space<vmem>>, vector<8x16xf32>
    %c0_59 = arith.constant 0 : index
    %c0_60 = arith.constant 0 : index
    %116 = vector.load %arg11[%c0_59, %c0_60] : memref<8x16xf32, #tpu.memory_space<vmem>>, vector<8x16xf32>
    %cst_61 = arith.constant dense<0.000000e+00> : vector<8x64xf32>
    %117 = tpu.matmul %115, %4, %cst_61 {dimension_numbers = #tpu.dot_dimension_numbers<[1], [0], [0], [1], [0, 0, 1, 1], [], []>} : vector<8x16xf32>, vector<16x64xf32>, vector<8x64xf32> -> vector<8x64xf32>
    %118 = arith.addf %114, %117 : vector<8x64xf32>
    %119 = vector.extract_strided_slice %118 {offsets = [0, 0], sizes = [8, 16], strides = [1, 1]} : vector<8x64xf32> to vector<8x16xf32>
    %120 = arith.negf %119 : vector<8x16xf32>
    %121 = math.exp %120 : vector<8x16xf32>
    %cst_62 = arith.constant 1.000000e+00 : f32
    %122 = vector.broadcast %cst_62 : f32 to vector<8x16xf32>
    %123 = arith.addf %122, %121 : vector<8x16xf32>
    %124 = arith.divf %122, %123 : vector<8x16xf32>
    %125 = vector.extract_strided_slice %118 {offsets = [0, 16], sizes = [8, 16], strides = [1, 1]} : vector<8x64xf32> to vector<8x16xf32>
    %126 = arith.negf %125 : vector<8x16xf32>
    %127 = math.exp %126 : vector<8x16xf32>
    %cst_63 = arith.constant 1.000000e+00 : f32
    %128 = vector.broadcast %cst_63 : f32 to vector<8x16xf32>
    %129 = arith.addf %128, %127 : vector<8x16xf32>
    %130 = arith.divf %128, %129 : vector<8x16xf32>
    %131 = vector.extract_strided_slice %118 {offsets = [0, 32], sizes = [8, 16], strides = [1, 1]} : vector<8x64xf32> to vector<8x16xf32>
    %132 = math.tanh %131 : vector<8x16xf32>
    %133 = vector.extract_strided_slice %118 {offsets = [0, 48], sizes = [8, 16], strides = [1, 1]} : vector<8x64xf32> to vector<8x16xf32>
    %134 = arith.negf %133 : vector<8x16xf32>
    %135 = math.exp %134 : vector<8x16xf32>
    %cst_64 = arith.constant 1.000000e+00 : f32
    %136 = vector.broadcast %cst_64 : f32 to vector<8x16xf32>
    %137 = arith.addf %136, %135 : vector<8x16xf32>
    %138 = arith.divf %136, %137 : vector<8x16xf32>
    %139 = arith.mulf %130, %116 : vector<8x16xf32>
    %140 = arith.mulf %124, %132 : vector<8x16xf32>
    %141 = arith.addf %139, %140 : vector<8x16xf32>
    %142 = math.tanh %141 : vector<8x16xf32>
    %143 = arith.mulf %138, %142 : vector<8x16xf32>
    %c0_65 = arith.constant 0 : index
    %c0_66 = arith.constant 0 : index
    %144 = vector.load %arg10[%c0_65, %c0_66] : memref<8x16xf32, #tpu.memory_space<vmem>>, vector<8x16xf32>
    tpu.vector_store %arg10[%c0_65, %c0_66], %143 {strides = array<i32>} : memref<8x16xf32, #tpu.memory_space<vmem>>, vector<8x16xf32>,
    %c0_67 = arith.constant 0 : index
    %c0_68 = arith.constant 0 : index
    %145 = vector.load %arg11[%c0_67, %c0_68] : memref<8x16xf32, #tpu.memory_space<vmem>>, vector<8x16xf32>
    tpu.vector_store %arg11[%c0_67, %c0_68], %141 {strides = array<i32>} : memref<8x16xf32, #tpu.memory_space<vmem>>, vector<8x16xf32>,
    %c6_69 = arith.constant 6 : index
    %c0_70 = arith.constant 0 : index
    %c0_71 = arith.constant 0 : index
    %146 = vector.load %arg7[%c6_69, %c0_70, %c0_71] : memref<8x8x16xf32, #tpu.memory_space<vmem>>, vector<1x8x16xf32>
    %147 = vector.shape_cast %146 : vector<1x8x16xf32> to vector<8x16xf32>
    %148 = vector.shape_cast %143 : vector<8x16xf32> to vector<1x8x16xf32>
    tpu.vector_store %arg7[%c6_69, %c0_70, %c0_71], %148 {strides = array<i32>} : memref<8x8x16xf32, #tpu.memory_space<vmem>>, vector<1x8x16xf32>,
    %c2 = arith.constant 2 : index
    %c0_72 = arith.constant 0 : index
    %c0_73 = arith.constant 0 : index
    %149 = vector.load %arg2[%c2, %c0_72, %c0_73] : memref<8x8x64xf32, #tpu.memory_space<vmem>>, vector<1x8x64xf32>
    %150 = vector.shape_cast %149 : vector<1x8x64xf32> to vector<8x64xf32>
    %c0_74 = arith.constant 0 : index
    %c0_75 = arith.constant 0 : index
    %151 = vector.load %arg8[%c0_74, %c0_75] : memref<8x16xf32, #tpu.memory_space<vmem>>, vector<8x16xf32>
    %c0_76 = arith.constant 0 : index
    %c0_77 = arith.constant 0 : index
    %152 = vector.load %arg9[%c0_76, %c0_77] : memref<8x16xf32, #tpu.memory_space<vmem>>, vector<8x16xf32>
    %cst_78 = arith.constant dense<0.000000e+00> : vector<8x64xf32>
    %153 = tpu.matmul %151, %3, %cst_78 {dimension_numbers = #tpu.dot_dimension_numbers<[1], [0], [0], [1], [0, 0, 1, 1], [], []>} : vector<8x16xf32>, vector<16x64xf32>, vector<8x64xf32> -> vector<8x64xf32>
    %154 = arith.addf %150, %153 : vector<8x64xf32>
    %155 = vector.extract_strided_slice %154 {offsets = [0, 0], sizes = [8, 16], strides = [1, 1]} : vector<8x64xf32> to vector<8x16xf32>
    %156 = arith.negf %155 : vector<8x16xf32>
    %157 = math.exp %156 : vector<8x16xf32>
    %cst_79 = arith.constant 1.000000e+00 : f32
    %158 = vector.broadcast %cst_79 : f32 to vector<8x16xf32>
    %159 = arith.addf %158, %157 : vector<8x16xf32>
    %160 = arith.divf %158, %159 : vector<8x16xf32>
    %161 = vector.extract_strided_slice %154 {offsets = [0, 16], sizes = [8, 16], strides = [1, 1]} : vector<8x64xf32> to vector<8x16xf32>
    %162 = arith.negf %161 : vector<8x16xf32>
    %163 = math.exp %162 : vector<8x16xf32>
    %cst_80 = arith.constant 1.000000e+00 : f32
    %164 = vector.broadcast %cst_80 : f32 to vector<8x16xf32>
    %165 = arith.addf %164, %163 : vector<8x16xf32>
    %166 = arith.divf %164, %165 : vector<8x16xf32>
    %167 = vector.extract_strided_slice %154 {offsets = [0, 32], sizes = [8, 16], strides = [1, 1]} : vector<8x64xf32> to vector<8x16xf32>
    %168 = math.tanh %167 : vector<8x16xf32>
    %169 = vector.extract_strided_slice %154 {offsets = [0, 48], sizes = [8, 16], strides = [1, 1]} : vector<8x64xf32> to vector<8x16xf32>
    %170 = arith.negf %169 : vector<8x16xf32>
    %171 = math.exp %170 : vector<8x16xf32>
    %cst_81 = arith.constant 1.000000e+00 : f32
    %172 = vector.broadcast %cst_81 : f32 to vector<8x16xf32>
    %173 = arith.addf %172, %171 : vector<8x16xf32>
    %174 = arith.divf %172, %173 : vector<8x16xf32>
    %175 = arith.mulf %166, %152 : vector<8x16xf32>
    %176 = arith.mulf %160, %168 : vector<8x16xf32>
    %177 = arith.addf %175, %176 : vector<8x16xf32>
    %178 = math.tanh %177 : vector<8x16xf32>
    %179 = arith.mulf %174, %178 : vector<8x16xf32>
    %c0_82 = arith.constant 0 : index
    %c0_83 = arith.constant 0 : index
    %180 = vector.load %arg8[%c0_82, %c0_83] : memref<8x16xf32, #tpu.memory_space<vmem>>, vector<8x16xf32>
    tpu.vector_store %arg8[%c0_82, %c0_83], %179 {strides = array<i32>} : memref<8x16xf32, #tpu.memory_space<vmem>>, vector<8x16xf32>,
    %c0_84 = arith.constant 0 : index
    %c0_85 = arith.constant 0 : index
    %181 = vector.load %arg9[%c0_84, %c0_85] : memref<8x16xf32, #tpu.memory_space<vmem>>, vector<8x16xf32>
    tpu.vector_store %arg9[%c0_84, %c0_85], %177 {strides = array<i32>} : memref<8x16xf32, #tpu.memory_space<vmem>>, vector<8x16xf32>,
    %c2_86 = arith.constant 2 : index
    %c0_87 = arith.constant 0 : index
    %c0_88 = arith.constant 0 : index
    %182 = vector.load %arg6[%c2_86, %c0_87, %c0_88] : memref<8x8x16xf32, #tpu.memory_space<vmem>>, vector<1x8x16xf32>
    %183 = vector.shape_cast %182 : vector<1x8x16xf32> to vector<8x16xf32>
    %184 = vector.shape_cast %179 : vector<8x16xf32> to vector<1x8x16xf32>
    tpu.vector_store %arg6[%c2_86, %c0_87, %c0_88], %184 {strides = array<i32>} : memref<8x8x16xf32, #tpu.memory_space<vmem>>, vector<1x8x16xf32>,
    %c5 = arith.constant 5 : index
    %c0_89 = arith.constant 0 : index
    %c0_90 = arith.constant 0 : index
    %185 = vector.load %arg3[%c5, %c0_89, %c0_90] : memref<8x8x64xf32, #tpu.memory_space<vmem>>, vector<1x8x64xf32>
    %186 = vector.shape_cast %185 : vector<1x8x64xf32> to vector<8x64xf32>
    %c0_91 = arith.constant 0 : index
    %c0_92 = arith.constant 0 : index
    %187 = vector.load %arg10[%c0_91, %c0_92] : memref<8x16xf32, #tpu.memory_space<vmem>>, vector<8x16xf32>
    %c0_93 = arith.constant 0 : index
    %c0_94 = arith.constant 0 : index
    %188 = vector.load %arg11[%c0_93, %c0_94] : memref<8x16xf32, #tpu.memory_space<vmem>>, vector<8x16xf32>
    %cst_95 = arith.constant dense<0.000000e+00> : vector<8x64xf32>
    %189 = tpu.matmul %187, %4, %cst_95 {dimension_numbers = #tpu.dot_dimension_numbers<[1], [0], [0], [1], [0, 0, 1, 1], [], []>} : vector<8x16xf32>, vector<16x64xf32>, vector<8x64xf32> -> vector<8x64xf32>
    %190 = arith.addf %186, %189 : vector<8x64xf32>
    %191 = vector.extract_strided_slice %190 {offsets = [0, 0], sizes = [8, 16], strides = [1, 1]} : vector<8x64xf32> to vector<8x16xf32>
    %192 = arith.negf %191 : vector<8x16xf32>
    %193 = math.exp %192 : vector<8x16xf32>
    %cst_96 = arith.constant 1.000000e+00 : f32
    %194 = vector.broadcast %cst_96 : f32 to vector<8x16xf32>
    %195 = arith.addf %194, %193 : vector<8x16xf32>
    %196 = arith.divf %194, %195 : vector<8x16xf32>
    %197 = vector.extract_strided_slice %190 {offsets = [0, 16], sizes = [8, 16], strides = [1, 1]} : vector<8x64xf32> to vector<8x16xf32>
    %198 = arith.negf %197 : vector<8x16xf32>
    %199 = math.exp %198 : vector<8x16xf32>
    %cst_97 = arith.constant 1.000000e+00 : f32
    %200 = vector.broadcast %cst_97 : f32 to vector<8x16xf32>
    %201 = arith.addf %200, %199 : vector<8x16xf32>
    %202 = arith.divf %200, %201 : vector<8x16xf32>
    %203 = vector.extract_strided_slice %190 {offsets = [0, 32], sizes = [8, 16], strides = [1, 1]} : vector<8x64xf32> to vector<8x16xf32>
    %204 = math.tanh %203 : vector<8x16xf32>
    %205 = vector.extract_strided_slice %190 {offsets = [0, 48], sizes = [8, 16], strides = [1, 1]} : vector<8x64xf32> to vector<8x16xf32>
    %206 = arith.negf %205 : vector<8x16xf32>
    %207 = math.exp %206 : vector<8x16xf32>
    %cst_98 = arith.constant 1.000000e+00 : f32
    %208 = vector.broadcast %cst_98 : f32 to vector<8x16xf32>
    %209 = arith.addf %208, %207 : vector<8x16xf32>
    %210 = arith.divf %208, %209 : vector<8x16xf32>
    %211 = arith.mulf %202, %188 : vector<8x16xf32>
    %212 = arith.mulf %196, %204 : vector<8x16xf32>
    %213 = arith.addf %211, %212 : vector<8x16xf32>
    %214 = math.tanh %213 : vector<8x16xf32>
    %215 = arith.mulf %210, %214 : vector<8x16xf32>
    %c0_99 = arith.constant 0 : index
    %c0_100 = arith.constant 0 : index
    %216 = vector.load %arg10[%c0_99, %c0_100] : memref<8x16xf32, #tpu.memory_space<vmem>>, vector<8x16xf32>
    tpu.vector_store %arg10[%c0_99, %c0_100], %215 {strides = array<i32>} : memref<8x16xf32, #tpu.memory_space<vmem>>, vector<8x16xf32>,
    %c0_101 = arith.constant 0 : index
    %c0_102 = arith.constant 0 : index
    %217 = vector.load %arg11[%c0_101, %c0_102] : memref<8x16xf32, #tpu.memory_space<vmem>>, vector<8x16xf32>
    tpu.vector_store %arg11[%c0_101, %c0_102], %213 {strides = array<i32>} : memref<8x16xf32, #tpu.memory_space<vmem>>, vector<8x16xf32>,
    %c5_103 = arith.constant 5 : index
    %c0_104 = arith.constant 0 : index
    %c0_105 = arith.constant 0 : index
    %218 = vector.load %arg7[%c5_103, %c0_104, %c0_105] : memref<8x8x16xf32, #tpu.memory_space<vmem>>, vector<1x8x16xf32>
    %219 = vector.shape_cast %218 : vector<1x8x16xf32> to vector<8x16xf32>
    %220 = vector.shape_cast %215 : vector<8x16xf32> to vector<1x8x16xf32>
    tpu.vector_store %arg7[%c5_103, %c0_104, %c0_105], %220 {strides = array<i32>} : memref<8x8x16xf32, #tpu.memory_space<vmem>>, vector<1x8x16xf32>,
    %c3 = arith.constant 3 : index
    %c0_106 = arith.constant 0 : index
    %c0_107 = arith.constant 0 : index
    %221 = vector.load %arg2[%c3, %c0_106, %c0_107] : memref<8x8x64xf32, #tpu.memory_space<vmem>>, vector<1x8x64xf32>
    %222 = vector.shape_cast %221 : vector<1x8x64xf32> to vector<8x64xf32>
    %c0_108 = arith.constant 0 : index
    %c0_109 = arith.constant 0 : index
    %223 = vector.load %arg8[%c0_108, %c0_109] : memref<8x16xf32, #tpu.memory_space<vmem>>, vector<8x16xf32>
    %c0_110 = arith.constant 0 : index
    %c0_111 = arith.constant 0 : index
    %224 = vector.load %arg9[%c0_110, %c0_111] : memref<8x16xf32, #tpu.memory_space<vmem>>, vector<8x16xf32>
    %cst_112 = arith.constant dense<0.000000e+00> : vector<8x64xf32>
    %225 = tpu.matmul %223, %3, %cst_112 {dimension_numbers = #tpu.dot_dimension_numbers<[1], [0], [0], [1], [0, 0, 1, 1], [], []>} : vector<8x16xf32>, vector<16x64xf32>, vector<8x64xf32> -> vector<8x64xf32>
    %226 = arith.addf %222, %225 : vector<8x64xf32>
    %227 = vector.extract_strided_slice %226 {offsets = [0, 0], sizes = [8, 16], strides = [1, 1]} : vector<8x64xf32> to vector<8x16xf32>
    %228 = arith.negf %227 : vector<8x16xf32>
    %229 = math.exp %228 : vector<8x16xf32>
    %cst_113 = arith.constant 1.000000e+00 : f32
    %230 = vector.broadcast %cst_113 : f32 to vector<8x16xf32>
    %231 = arith.addf %230, %229 : vector<8x16xf32>
    %232 = arith.divf %230, %231 : vector<8x16xf32>
    %233 = vector.extract_strided_slice %226 {offsets = [0, 16], sizes = [8, 16], strides = [1, 1]} : vector<8x64xf32> to vector<8x16xf32>
    %234 = arith.negf %233 : vector<8x16xf32>
    %235 = math.exp %234 : vector<8x16xf32>
    %cst_114 = arith.constant 1.000000e+00 : f32
    %236 = vector.broadcast %cst_114 : f32 to vector<8x16xf32>
    %237 = arith.addf %236, %235 : vector<8x16xf32>
    %238 = arith.divf %236, %237 : vector<8x16xf32>
    %239 = vector.extract_strided_slice %226 {offsets = [0, 32], sizes = [8, 16], strides = [1, 1]} : vector<8x64xf32> to vector<8x16xf32>
    %240 = math.tanh %239 : vector<8x16xf32>
    %241 = vector.extract_strided_slice %226 {offsets = [0, 48], sizes = [8, 16], strides = [1, 1]} : vector<8x64xf32> to vector<8x16xf32>
    %242 = arith.negf %241 : vector<8x16xf32>
    %243 = math.exp %242 : vector<8x16xf32>
    %cst_115 = arith.constant 1.000000e+00 : f32
    %244 = vector.broadcast %cst_115 : f32 to vector<8x16xf32>
    %245 = arith.addf %244, %243 : vector<8x16xf32>
    %246 = arith.divf %244, %245 : vector<8x16xf32>
    %247 = arith.mulf %238, %224 : vector<8x16xf32>
    %248 = arith.mulf %232, %240 : vector<8x16xf32>
    %249 = arith.addf %247, %248 : vector<8x16xf32>
    %250 = math.tanh %249 : vector<8x16xf32>
    %251 = arith.mulf %246, %250 : vector<8x16xf32>
    %c0_116 = arith.constant 0 : index
    %c0_117 = arith.constant 0 : index
    %252 = vector.load %arg8[%c0_116, %c0_117] : memref<8x16xf32, #tpu.memory_space<vmem>>, vector<8x16xf32>
    tpu.vector_store %arg8[%c0_116, %c0_117], %251 {strides = array<i32>} : memref<8x16xf32, #tpu.memory_space<vmem>>, vector<8x16xf32>,
    %c0_118 = arith.constant 0 : index
    %c0_119 = arith.constant 0 : index
    %253 = vector.load %arg9[%c0_118, %c0_119] : memref<8x16xf32, #tpu.memory_space<vmem>>, vector<8x16xf32>
    tpu.vector_store %arg9[%c0_118, %c0_119], %249 {strides = array<i32>} : memref<8x16xf32, #tpu.memory_space<vmem>>, vector<8x16xf32>,
    %c3_120 = arith.constant 3 : index
    %c0_121 = arith.constant 0 : index
    %c0_122 = arith.constant 0 : index
    %254 = vector.load %arg6[%c3_120, %c0_121, %c0_122] : memref<8x8x16xf32, #tpu.memory_space<vmem>>, vector<1x8x16xf32>
    %255 = vector.shape_cast %254 : vector<1x8x16xf32> to vector<8x16xf32>
    %256 = vector.shape_cast %251 : vector<8x16xf32> to vector<1x8x16xf32>
    tpu.vector_store %arg6[%c3_120, %c0_121, %c0_122], %256 {strides = array<i32>} : memref<8x8x16xf32, #tpu.memory_space<vmem>>, vector<1x8x16xf32>,
    %c4 = arith.constant 4 : index
    %c0_123 = arith.constant 0 : index
    %c0_124 = arith.constant 0 : index
    %257 = vector.load %arg3[%c4, %c0_123, %c0_124] : memref<8x8x64xf32, #tpu.memory_space<vmem>>, vector<1x8x64xf32>
    %258 = vector.shape_cast %257 : vector<1x8x64xf32> to vector<8x64xf32>
    %c0_125 = arith.constant 0 : index
    %c0_126 = arith.constant 0 : index
    %259 = vector.load %arg10[%c0_125, %c0_126] : memref<8x16xf32, #tpu.memory_space<vmem>>, vector<8x16xf32>
    %c0_127 = arith.constant 0 : index
    %c0_128 = arith.constant 0 : index
    %260 = vector.load %arg11[%c0_127, %c0_128] : memref<8x16xf32, #tpu.memory_space<vmem>>, vector<8x16xf32>
    %cst_129 = arith.constant dense<0.000000e+00> : vector<8x64xf32>
    %261 = tpu.matmul %259, %4, %cst_129 {dimension_numbers = #tpu.dot_dimension_numbers<[1], [0], [0], [1], [0, 0, 1, 1], [], []>} : vector<8x16xf32>, vector<16x64xf32>, vector<8x64xf32> -> vector<8x64xf32>
    %262 = arith.addf %258, %261 : vector<8x64xf32>
    %263 = vector.extract_strided_slice %262 {offsets = [0, 0], sizes = [8, 16], strides = [1, 1]} : vector<8x64xf32> to vector<8x16xf32>
    %264 = arith.negf %263 : vector<8x16xf32>
    %265 = math.exp %264 : vector<8x16xf32>
    %cst_130 = arith.constant 1.000000e+00 : f32
    %266 = vector.broadcast %cst_130 : f32 to vector<8x16xf32>
    %267 = arith.addf %266, %265 : vector<8x16xf32>
    %268 = arith.divf %266, %267 : vector<8x16xf32>
    %269 = vector.extract_strided_slice %262 {offsets = [0, 16], sizes = [8, 16], strides = [1, 1]} : vector<8x64xf32> to vector<8x16xf32>
    %270 = arith.negf %269 : vector<8x16xf32>
    %271 = math.exp %270 : vector<8x16xf32>
    %cst_131 = arith.constant 1.000000e+00 : f32
    %272 = vector.broadcast %cst_131 : f32 to vector<8x16xf32>
    %273 = arith.addf %272, %271 : vector<8x16xf32>
    %274 = arith.divf %272, %273 : vector<8x16xf32>
    %275 = vector.extract_strided_slice %262 {offsets = [0, 32], sizes = [8, 16], strides = [1, 1]} : vector<8x64xf32> to vector<8x16xf32>
    %276 = math.tanh %275 : vector<8x16xf32>
    %277 = vector.extract_strided_slice %262 {offsets = [0, 48], sizes = [8, 16], strides = [1, 1]} : vector<8x64xf32> to vector<8x16xf32>
    %278 = arith.negf %277 : vector<8x16xf32>
    %279 = math.exp %278 : vector<8x16xf32>
    %cst_132 = arith.constant 1.000000e+00 : f32
    %280 = vector.broadcast %cst_132 : f32 to vector<8x16xf32>
    %281 = arith.addf %280, %279 : vector<8x16xf32>
    %282 = arith.divf %280, %281 : vector<8x16xf32>
    %283 = arith.mulf %274, %260 : vector<8x16xf32>
    %284 = arith.mulf %268, %276 : vector<8x16xf32>
    %285 = arith.addf %283, %284 : vector<8x16xf32>
    %286 = math.tanh %285 : vector<8x16xf32>
    %287 = arith.mulf %282, %286 : vector<8x16xf32>
    %c0_133 = arith.constant 0 : index
    %c0_134 = arith.constant 0 : index
    %288 = vector.load %arg10[%c0_133, %c0_134] : memref<8x16xf32, #tpu.memory_space<vmem>>, vector<8x16xf32>
    tpu.vector_store %arg10[%c0_133, %c0_134], %287 {strides = array<i32>} : memref<8x16xf32, #tpu.memory_space<vmem>>, vector<8x16xf32>,
    %c0_135 = arith.constant 0 : index
    %c0_136 = arith.constant 0 : index
    %289 = vector.load %arg11[%c0_135, %c0_136] : memref<8x16xf32, #tpu.memory_space<vmem>>, vector<8x16xf32>
    tpu.vector_store %arg11[%c0_135, %c0_136], %285 {strides = array<i32>} : memref<8x16xf32, #tpu.memory_space<vmem>>, vector<8x16xf32>,
    %c4_137 = arith.constant 4 : index
    %c0_138 = arith.constant 0 : index
    %c0_139 = arith.constant 0 : index
    %290 = vector.load %arg7[%c4_137, %c0_138, %c0_139] : memref<8x8x16xf32, #tpu.memory_space<vmem>>, vector<1x8x16xf32>
    %291 = vector.shape_cast %290 : vector<1x8x16xf32> to vector<8x16xf32>
    %292 = vector.shape_cast %287 : vector<8x16xf32> to vector<1x8x16xf32>
    tpu.vector_store %arg7[%c4_137, %c0_138, %c0_139], %292 {strides = array<i32>} : memref<8x8x16xf32, #tpu.memory_space<vmem>>, vector<1x8x16xf32>,
    %c4_140 = arith.constant 4 : index
    %c0_141 = arith.constant 0 : index
    %c0_142 = arith.constant 0 : index
    %293 = vector.load %arg2[%c4_140, %c0_141, %c0_142] : memref<8x8x64xf32, #tpu.memory_space<vmem>>, vector<1x8x64xf32>
    %294 = vector.shape_cast %293 : vector<1x8x64xf32> to vector<8x64xf32>
    %c0_143 = arith.constant 0 : index
    %c0_144 = arith.constant 0 : index
    %295 = vector.load %arg8[%c0_143, %c0_144] : memref<8x16xf32, #tpu.memory_space<vmem>>, vector<8x16xf32>
    %c0_145 = arith.constant 0 : index
    %c0_146 = arith.constant 0 : index
    %296 = vector.load %arg9[%c0_145, %c0_146] : memref<8x16xf32, #tpu.memory_space<vmem>>, vector<8x16xf32>
    %cst_147 = arith.constant dense<0.000000e+00> : vector<8x64xf32>
    %297 = tpu.matmul %295, %3, %cst_147 {dimension_numbers = #tpu.dot_dimension_numbers<[1], [0], [0], [1], [0, 0, 1, 1], [], []>} : vector<8x16xf32>, vector<16x64xf32>, vector<8x64xf32> -> vector<8x64xf32>
    %298 = arith.addf %294, %297 : vector<8x64xf32>
    %299 = vector.extract_strided_slice %298 {offsets = [0, 0], sizes = [8, 16], strides = [1, 1]} : vector<8x64xf32> to vector<8x16xf32>
    %300 = arith.negf %299 : vector<8x16xf32>
    %301 = math.exp %300 : vector<8x16xf32>
    %cst_148 = arith.constant 1.000000e+00 : f32
    %302 = vector.broadcast %cst_148 : f32 to vector<8x16xf32>
    %303 = arith.addf %302, %301 : vector<8x16xf32>
    %304 = arith.divf %302, %303 : vector<8x16xf32>
    %305 = vector.extract_strided_slice %298 {offsets = [0, 16], sizes = [8, 16], strides = [1, 1]} : vector<8x64xf32> to vector<8x16xf32>
    %306 = arith.negf %305 : vector<8x16xf32>
    %307 = math.exp %306 : vector<8x16xf32>
    %cst_149 = arith.constant 1.000000e+00 : f32
    %308 = vector.broadcast %cst_149 : f32 to vector<8x16xf32>
    %309 = arith.addf %308, %307 : vector<8x16xf32>
    %310 = arith.divf %308, %309 : vector<8x16xf32>
    %311 = vector.extract_strided_slice %298 {offsets = [0, 32], sizes = [8, 16], strides = [1, 1]} : vector<8x64xf32> to vector<8x16xf32>
    %312 = math.tanh %311 : vector<8x16xf32>
    %313 = vector.extract_strided_slice %298 {offsets = [0, 48], sizes = [8, 16], strides = [1, 1]} : vector<8x64xf32> to vector<8x16xf32>
    %314 = arith.negf %313 : vector<8x16xf32>
    %315 = math.exp %314 : vector<8x16xf32>
    %cst_150 = arith.constant 1.000000e+00 : f32
    %316 = vector.broadcast %cst_150 : f32 to vector<8x16xf32>
    %317 = arith.addf %316, %315 : vector<8x16xf32>
    %318 = arith.divf %316, %317 : vector<8x16xf32>
    %319 = arith.mulf %310, %296 : vector<8x16xf32>
    %320 = arith.mulf %304, %312 : vector<8x16xf32>
    %321 = arith.addf %319, %320 : vector<8x16xf32>
    %322 = math.tanh %321 : vector<8x16xf32>
    %323 = arith.mulf %318, %322 : vector<8x16xf32>
    %c0_151 = arith.constant 0 : index
    %c0_152 = arith.constant 0 : index
    %324 = vector.load %arg8[%c0_151, %c0_152] : memref<8x16xf32, #tpu.memory_space<vmem>>, vector<8x16xf32>
    tpu.vector_store %arg8[%c0_151, %c0_152], %323 {strides = array<i32>} : memref<8x16xf32, #tpu.memory_space<vmem>>, vector<8x16xf32>,
    %c0_153 = arith.constant 0 : index
    %c0_154 = arith.constant 0 : index
    %325 = vector.load %arg9[%c0_153, %c0_154] : memref<8x16xf32, #tpu.memory_space<vmem>>, vector<8x16xf32>
    tpu.vector_store %arg9[%c0_153, %c0_154], %321 {strides = array<i32>} : memref<8x16xf32, #tpu.memory_space<vmem>>, vector<8x16xf32>,
    %c4_155 = arith.constant 4 : index
    %c0_156 = arith.constant 0 : index
    %c0_157 = arith.constant 0 : index
    %326 = vector.load %arg6[%c4_155, %c0_156, %c0_157] : memref<8x8x16xf32, #tpu.memory_space<vmem>>, vector<1x8x16xf32>
    %327 = vector.shape_cast %326 : vector<1x8x16xf32> to vector<8x16xf32>
    %328 = vector.shape_cast %323 : vector<8x16xf32> to vector<1x8x16xf32>
    tpu.vector_store %arg6[%c4_155, %c0_156, %c0_157], %328 {strides = array<i32>} : memref<8x8x16xf32, #tpu.memory_space<vmem>>, vector<1x8x16xf32>,
    %c3_158 = arith.constant 3 : index
    %c0_159 = arith.constant 0 : index
    %c0_160 = arith.constant 0 : index
    %329 = vector.load %arg3[%c3_158, %c0_159, %c0_160] : memref<8x8x64xf32, #tpu.memory_space<vmem>>, vector<1x8x64xf32>
    %330 = vector.shape_cast %329 : vector<1x8x64xf32> to vector<8x64xf32>
    %c0_161 = arith.constant 0 : index
    %c0_162 = arith.constant 0 : index
    %331 = vector.load %arg10[%c0_161, %c0_162] : memref<8x16xf32, #tpu.memory_space<vmem>>, vector<8x16xf32>
    %c0_163 = arith.constant 0 : index
    %c0_164 = arith.constant 0 : index
    %332 = vector.load %arg11[%c0_163, %c0_164] : memref<8x16xf32, #tpu.memory_space<vmem>>, vector<8x16xf32>
    %cst_165 = arith.constant dense<0.000000e+00> : vector<8x64xf32>
    %333 = tpu.matmul %331, %4, %cst_165 {dimension_numbers = #tpu.dot_dimension_numbers<[1], [0], [0], [1], [0, 0, 1, 1], [], []>} : vector<8x16xf32>, vector<16x64xf32>, vector<8x64xf32> -> vector<8x64xf32>
    %334 = arith.addf %330, %333 : vector<8x64xf32>
    %335 = vector.extract_strided_slice %334 {offsets = [0, 0], sizes = [8, 16], strides = [1, 1]} : vector<8x64xf32> to vector<8x16xf32>
    %336 = arith.negf %335 : vector<8x16xf32>
    %337 = math.exp %336 : vector<8x16xf32>
    %cst_166 = arith.constant 1.000000e+00 : f32
    %338 = vector.broadcast %cst_166 : f32 to vector<8x16xf32>
    %339 = arith.addf %338, %337 : vector<8x16xf32>
    %340 = arith.divf %338, %339 : vector<8x16xf32>
    %341 = vector.extract_strided_slice %334 {offsets = [0, 16], sizes = [8, 16], strides = [1, 1]} : vector<8x64xf32> to vector<8x16xf32>
    %342 = arith.negf %341 : vector<8x16xf32>
    %343 = math.exp %342 : vector<8x16xf32>
    %cst_167 = arith.constant 1.000000e+00 : f32
    %344 = vector.broadcast %cst_167 : f32 to vector<8x16xf32>
    %345 = arith.addf %344, %343 : vector<8x16xf32>
    %346 = arith.divf %344, %345 : vector<8x16xf32>
    %347 = vector.extract_strided_slice %334 {offsets = [0, 32], sizes = [8, 16], strides = [1, 1]} : vector<8x64xf32> to vector<8x16xf32>
    %348 = math.tanh %347 : vector<8x16xf32>
    %349 = vector.extract_strided_slice %334 {offsets = [0, 48], sizes = [8, 16], strides = [1, 1]} : vector<8x64xf32> to vector<8x16xf32>
    %350 = arith.negf %349 : vector<8x16xf32>
    %351 = math.exp %350 : vector<8x16xf32>
    %cst_168 = arith.constant 1.000000e+00 : f32
    %352 = vector.broadcast %cst_168 : f32 to vector<8x16xf32>
    %353 = arith.addf %352, %351 : vector<8x16xf32>
    %354 = arith.divf %352, %353 : vector<8x16xf32>
    %355 = arith.mulf %346, %332 : vector<8x16xf32>
    %356 = arith.mulf %340, %348 : vector<8x16xf32>
    %357 = arith.addf %355, %356 : vector<8x16xf32>
    %358 = math.tanh %357 : vector<8x16xf32>
    %359 = arith.mulf %354, %358 : vector<8x16xf32>
    %c0_169 = arith.constant 0 : index
    %c0_170 = arith.constant 0 : index
    %360 = vector.load %arg10[%c0_169, %c0_170] : memref<8x16xf32, #tpu.memory_space<vmem>>, vector<8x16xf32>
    tpu.vector_store %arg10[%c0_169, %c0_170], %359 {strides = array<i32>} : memref<8x16xf32, #tpu.memory_space<vmem>>, vector<8x16xf32>,
    %c0_171 = arith.constant 0 : index
    %c0_172 = arith.constant 0 : index
    %361 = vector.load %arg11[%c0_171, %c0_172] : memref<8x16xf32, #tpu.memory_space<vmem>>, vector<8x16xf32>
    tpu.vector_store %arg11[%c0_171, %c0_172], %357 {strides = array<i32>} : memref<8x16xf32, #tpu.memory_space<vmem>>, vector<8x16xf32>,
    %c3_173 = arith.constant 3 : index
    %c0_174 = arith.constant 0 : index
    %c0_175 = arith.constant 0 : index
    %362 = vector.load %arg7[%c3_173, %c0_174, %c0_175] : memref<8x8x16xf32, #tpu.memory_space<vmem>>, vector<1x8x16xf32>
    %363 = vector.shape_cast %362 : vector<1x8x16xf32> to vector<8x16xf32>
    %364 = vector.shape_cast %359 : vector<8x16xf32> to vector<1x8x16xf32>
    tpu.vector_store %arg7[%c3_173, %c0_174, %c0_175], %364 {strides = array<i32>} : memref<8x8x16xf32, #tpu.memory_space<vmem>>, vector<1x8x16xf32>,
    %c5_176 = arith.constant 5 : index
    %c0_177 = arith.constant 0 : index
    %c0_178 = arith.constant 0 : index
    %365 = vector.load %arg2[%c5_176, %c0_177, %c0_178] : memref<8x8x64xf32, #tpu.memory_space<vmem>>, vector<1x8x64xf32>
    %366 = vector.shape_cast %365 : vector<1x8x64xf32> to vector<8x64xf32>
    %c0_179 = arith.constant 0 : index
    %c0_180 = arith.constant 0 : index
    %367 = vector.load %arg8[%c0_179, %c0_180] : memref<8x16xf32, #tpu.memory_space<vmem>>, vector<8x16xf32>
    %c0_181 = arith.constant 0 : index
    %c0_182 = arith.constant 0 : index
    %368 = vector.load %arg9[%c0_181, %c0_182] : memref<8x16xf32, #tpu.memory_space<vmem>>, vector<8x16xf32>
    %cst_183 = arith.constant dense<0.000000e+00> : vector<8x64xf32>
    %369 = tpu.matmul %367, %3, %cst_183 {dimension_numbers = #tpu.dot_dimension_numbers<[1], [0], [0], [1], [0, 0, 1, 1], [], []>} : vector<8x16xf32>, vector<16x64xf32>, vector<8x64xf32> -> vector<8x64xf32>
    %370 = arith.addf %366, %369 : vector<8x64xf32>
    %371 = vector.extract_strided_slice %370 {offsets = [0, 0], sizes = [8, 16], strides = [1, 1]} : vector<8x64xf32> to vector<8x16xf32>
    %372 = arith.negf %371 : vector<8x16xf32>
    %373 = math.exp %372 : vector<8x16xf32>
    %cst_184 = arith.constant 1.000000e+00 : f32
    %374 = vector.broadcast %cst_184 : f32 to vector<8x16xf32>
    %375 = arith.addf %374, %373 : vector<8x16xf32>
    %376 = arith.divf %374, %375 : vector<8x16xf32>
    %377 = vector.extract_strided_slice %370 {offsets = [0, 16], sizes = [8, 16], strides = [1, 1]} : vector<8x64xf32> to vector<8x16xf32>
    %378 = arith.negf %377 : vector<8x16xf32>
    %379 = math.exp %378 : vector<8x16xf32>
    %cst_185 = arith.constant 1.000000e+00 : f32
    %380 = vector.broadcast %cst_185 : f32 to vector<8x16xf32>
    %381 = arith.addf %380, %379 : vector<8x16xf32>
    %382 = arith.divf %380, %381 : vector<8x16xf32>
    %383 = vector.extract_strided_slice %370 {offsets = [0, 32], sizes = [8, 16], strides = [1, 1]} : vector<8x64xf32> to vector<8x16xf32>
    %384 = math.tanh %383 : vector<8x16xf32>
    %385 = vector.extract_strided_slice %370 {offsets = [0, 48], sizes = [8, 16], strides = [1, 1]} : vector<8x64xf32> to vector<8x16xf32>
    %386 = arith.negf %385 : vector<8x16xf32>
    %387 = math.exp %386 : vector<8x16xf32>
    %cst_186 = arith.constant 1.000000e+00 : f32
    %388 = vector.broadcast %cst_186 : f32 to vector<8x16xf32>
    %389 = arith.addf %388, %387 : vector<8x16xf32>
    %390 = arith.divf %388, %389 : vector<8x16xf32>
    %391 = arith.mulf %382, %368 : vector<8x16xf32>
    %392 = arith.mulf %376, %384 : vector<8x16xf32>
    %393 = arith.addf %391, %392 : vector<8x16xf32>
    %394 = math.tanh %393 : vector<8x16xf32>
    %395 = arith.mulf %390, %394 : vector<8x16xf32>
    %c0_187 = arith.constant 0 : index
    %c0_188 = arith.constant 0 : index
    %396 = vector.load %arg8[%c0_187, %c0_188] : memref<8x16xf32, #tpu.memory_space<vmem>>, vector<8x16xf32>
    tpu.vector_store %arg8[%c0_187, %c0_188], %395 {strides = array<i32>} : memref<8x16xf32, #tpu.memory_space<vmem>>, vector<8x16xf32>,
    %c0_189 = arith.constant 0 : index
    %c0_190 = arith.constant 0 : index
    %397 = vector.load %arg9[%c0_189, %c0_190] : memref<8x16xf32, #tpu.memory_space<vmem>>, vector<8x16xf32>
    tpu.vector_store %arg9[%c0_189, %c0_190], %393 {strides = array<i32>} : memref<8x16xf32, #tpu.memory_space<vmem>>, vector<8x16xf32>,
    %c5_191 = arith.constant 5 : index
    %c0_192 = arith.constant 0 : index
    %c0_193 = arith.constant 0 : index
    %398 = vector.load %arg6[%c5_191, %c0_192, %c0_193] : memref<8x8x16xf32, #tpu.memory_space<vmem>>, vector<1x8x16xf32>
    %399 = vector.shape_cast %398 : vector<1x8x16xf32> to vector<8x16xf32>
    %400 = vector.shape_cast %395 : vector<8x16xf32> to vector<1x8x16xf32>
    tpu.vector_store %arg6[%c5_191, %c0_192, %c0_193], %400 {strides = array<i32>} : memref<8x8x16xf32, #tpu.memory_space<vmem>>, vector<1x8x16xf32>,
    %c2_194 = arith.constant 2 : index
    %c0_195 = arith.constant 0 : index
    %c0_196 = arith.constant 0 : index
    %401 = vector.load %arg3[%c2_194, %c0_195, %c0_196] : memref<8x8x64xf32, #tpu.memory_space<vmem>>, vector<1x8x64xf32>
    %402 = vector.shape_cast %401 : vector<1x8x64xf32> to vector<8x64xf32>
    %c0_197 = arith.constant 0 : index
    %c0_198 = arith.constant 0 : index
    %403 = vector.load %arg10[%c0_197, %c0_198] : memref<8x16xf32, #tpu.memory_space<vmem>>, vector<8x16xf32>
    %c0_199 = arith.constant 0 : index
    %c0_200 = arith.constant 0 : index
    %404 = vector.load %arg11[%c0_199, %c0_200] : memref<8x16xf32, #tpu.memory_space<vmem>>, vector<8x16xf32>
    %cst_201 = arith.constant dense<0.000000e+00> : vector<8x64xf32>
    %405 = tpu.matmul %403, %4, %cst_201 {dimension_numbers = #tpu.dot_dimension_numbers<[1], [0], [0], [1], [0, 0, 1, 1], [], []>} : vector<8x16xf32>, vector<16x64xf32>, vector<8x64xf32> -> vector<8x64xf32>
    %406 = arith.addf %402, %405 : vector<8x64xf32>
    %407 = vector.extract_strided_slice %406 {offsets = [0, 0], sizes = [8, 16], strides = [1, 1]} : vector<8x64xf32> to vector<8x16xf32>
    %408 = arith.negf %407 : vector<8x16xf32>
    %409 = math.exp %408 : vector<8x16xf32>
    %cst_202 = arith.constant 1.000000e+00 : f32
    %410 = vector.broadcast %cst_202 : f32 to vector<8x16xf32>
    %411 = arith.addf %410, %409 : vector<8x16xf32>
    %412 = arith.divf %410, %411 : vector<8x16xf32>
    %413 = vector.extract_strided_slice %406 {offsets = [0, 16], sizes = [8, 16], strides = [1, 1]} : vector<8x64xf32> to vector<8x16xf32>
    %414 = arith.negf %413 : vector<8x16xf32>
    %415 = math.exp %414 : vector<8x16xf32>
    %cst_203 = arith.constant 1.000000e+00 : f32
    %416 = vector.broadcast %cst_203 : f32 to vector<8x16xf32>
    %417 = arith.addf %416, %415 : vector<8x16xf32>
    %418 = arith.divf %416, %417 : vector<8x16xf32>
    %419 = vector.extract_strided_slice %406 {offsets = [0, 32], sizes = [8, 16], strides = [1, 1]} : vector<8x64xf32> to vector<8x16xf32>
    %420 = math.tanh %419 : vector<8x16xf32>
    %421 = vector.extract_strided_slice %406 {offsets = [0, 48], sizes = [8, 16], strides = [1, 1]} : vector<8x64xf32> to vector<8x16xf32>
    %422 = arith.negf %421 : vector<8x16xf32>
    %423 = math.exp %422 : vector<8x16xf32>
    %cst_204 = arith.constant 1.000000e+00 : f32
    %424 = vector.broadcast %cst_204 : f32 to vector<8x16xf32>
    %425 = arith.addf %424, %423 : vector<8x16xf32>
    %426 = arith.divf %424, %425 : vector<8x16xf32>
    %427 = arith.mulf %418, %404 : vector<8x16xf32>
    %428 = arith.mulf %412, %420 : vector<8x16xf32>
    %429 = arith.addf %427, %428 : vector<8x16xf32>
    %430 = math.tanh %429 : vector<8x16xf32>
    %431 = arith.mulf %426, %430 : vector<8x16xf32>
    %c0_205 = arith.constant 0 : index
    %c0_206 = arith.constant 0 : index
    %432 = vector.load %arg10[%c0_205, %c0_206] : memref<8x16xf32, #tpu.memory_space<vmem>>, vector<8x16xf32>
    tpu.vector_store %arg10[%c0_205, %c0_206], %431 {strides = array<i32>} : memref<8x16xf32, #tpu.memory_space<vmem>>, vector<8x16xf32>,
    %c0_207 = arith.constant 0 : index
    %c0_208 = arith.constant 0 : index
    %433 = vector.load %arg11[%c0_207, %c0_208] : memref<8x16xf32, #tpu.memory_space<vmem>>, vector<8x16xf32>
    tpu.vector_store %arg11[%c0_207, %c0_208], %429 {strides = array<i32>} : memref<8x16xf32, #tpu.memory_space<vmem>>, vector<8x16xf32>,
    %c2_209 = arith.constant 2 : index
    %c0_210 = arith.constant 0 : index
    %c0_211 = arith.constant 0 : index
    %434 = vector.load %arg7[%c2_209, %c0_210, %c0_211] : memref<8x8x16xf32, #tpu.memory_space<vmem>>, vector<1x8x16xf32>
    %435 = vector.shape_cast %434 : vector<1x8x16xf32> to vector<8x16xf32>
    %436 = vector.shape_cast %431 : vector<8x16xf32> to vector<1x8x16xf32>
    tpu.vector_store %arg7[%c2_209, %c0_210, %c0_211], %436 {strides = array<i32>} : memref<8x8x16xf32, #tpu.memory_space<vmem>>, vector<1x8x16xf32>,
    %c6_212 = arith.constant 6 : index
    %c0_213 = arith.constant 0 : index
    %c0_214 = arith.constant 0 : index
    %437 = vector.load %arg2[%c6_212, %c0_213, %c0_214] : memref<8x8x64xf32, #tpu.memory_space<vmem>>, vector<1x8x64xf32>
    %438 = vector.shape_cast %437 : vector<1x8x64xf32> to vector<8x64xf32>
    %c0_215 = arith.constant 0 : index
    %c0_216 = arith.constant 0 : index
    %439 = vector.load %arg8[%c0_215, %c0_216] : memref<8x16xf32, #tpu.memory_space<vmem>>, vector<8x16xf32>
    %c0_217 = arith.constant 0 : index
    %c0_218 = arith.constant 0 : index
    %440 = vector.load %arg9[%c0_217, %c0_218] : memref<8x16xf32, #tpu.memory_space<vmem>>, vector<8x16xf32>
    %cst_219 = arith.constant dense<0.000000e+00> : vector<8x64xf32>
    %441 = tpu.matmul %439, %3, %cst_219 {dimension_numbers = #tpu.dot_dimension_numbers<[1], [0], [0], [1], [0, 0, 1, 1], [], []>} : vector<8x16xf32>, vector<16x64xf32>, vector<8x64xf32> -> vector<8x64xf32>
    %442 = arith.addf %438, %441 : vector<8x64xf32>
    %443 = vector.extract_strided_slice %442 {offsets = [0, 0], sizes = [8, 16], strides = [1, 1]} : vector<8x64xf32> to vector<8x16xf32>
    %444 = arith.negf %443 : vector<8x16xf32>
    %445 = math.exp %444 : vector<8x16xf32>
    %cst_220 = arith.constant 1.000000e+00 : f32
    %446 = vector.broadcast %cst_220 : f32 to vector<8x16xf32>
    %447 = arith.addf %446, %445 : vector<8x16xf32>
    %448 = arith.divf %446, %447 : vector<8x16xf32>
    %449 = vector.extract_strided_slice %442 {offsets = [0, 16], sizes = [8, 16], strides = [1, 1]} : vector<8x64xf32> to vector<8x16xf32>
    %450 = arith.negf %449 : vector<8x16xf32>
    %451 = math.exp %450 : vector<8x16xf32>
    %cst_221 = arith.constant 1.000000e+00 : f32
    %452 = vector.broadcast %cst_221 : f32 to vector<8x16xf32>
    %453 = arith.addf %452, %451 : vector<8x16xf32>
    %454 = arith.divf %452, %453 : vector<8x16xf32>
    %455 = vector.extract_strided_slice %442 {offsets = [0, 32], sizes = [8, 16], strides = [1, 1]} : vector<8x64xf32> to vector<8x16xf32>
    %456 = math.tanh %455 : vector<8x16xf32>
    %457 = vector.extract_strided_slice %442 {offsets = [0, 48], sizes = [8, 16], strides = [1, 1]} : vector<8x64xf32> to vector<8x16xf32>
    %458 = arith.negf %457 : vector<8x16xf32>
    %459 = math.exp %458 : vector<8x16xf32>
    %cst_222 = arith.constant 1.000000e+00 : f32
    %460 = vector.broadcast %cst_222 : f32 to vector<8x16xf32>
    %461 = arith.addf %460, %459 : vector<8x16xf32>
    %462 = arith.divf %460, %461 : vector<8x16xf32>
    %463 = arith.mulf %454, %440 : vector<8x16xf32>
    %464 = arith.mulf %448, %456 : vector<8x16xf32>
    %465 = arith.addf %463, %464 : vector<8x16xf32>
    %466 = math.tanh %465 : vector<8x16xf32>
    %467 = arith.mulf %462, %466 : vector<8x16xf32>
    %c0_223 = arith.constant 0 : index
    %c0_224 = arith.constant 0 : index
    %468 = vector.load %arg8[%c0_223, %c0_224] : memref<8x16xf32, #tpu.memory_space<vmem>>, vector<8x16xf32>
    tpu.vector_store %arg8[%c0_223, %c0_224], %467 {strides = array<i32>} : memref<8x16xf32, #tpu.memory_space<vmem>>, vector<8x16xf32>,
    %c0_225 = arith.constant 0 : index
    %c0_226 = arith.constant 0 : index
    %469 = vector.load %arg9[%c0_225, %c0_226] : memref<8x16xf32, #tpu.memory_space<vmem>>, vector<8x16xf32>
    tpu.vector_store %arg9[%c0_225, %c0_226], %465 {strides = array<i32>} : memref<8x16xf32, #tpu.memory_space<vmem>>, vector<8x16xf32>,
    %c6_227 = arith.constant 6 : index
    %c0_228 = arith.constant 0 : index
    %c0_229 = arith.constant 0 : index
    %470 = vector.load %arg6[%c6_227, %c0_228, %c0_229] : memref<8x8x16xf32, #tpu.memory_space<vmem>>, vector<1x8x16xf32>
    %471 = vector.shape_cast %470 : vector<1x8x16xf32> to vector<8x16xf32>
    %472 = vector.shape_cast %467 : vector<8x16xf32> to vector<1x8x16xf32>
    tpu.vector_store %arg6[%c6_227, %c0_228, %c0_229], %472 {strides = array<i32>} : memref<8x8x16xf32, #tpu.memory_space<vmem>>, vector<1x8x16xf32>,
    %c1_230 = arith.constant 1 : index
    %c0_231 = arith.constant 0 : index
    %c0_232 = arith.constant 0 : index
    %473 = vector.load %arg3[%c1_230, %c0_231, %c0_232] : memref<8x8x64xf32, #tpu.memory_space<vmem>>, vector<1x8x64xf32>
    %474 = vector.shape_cast %473 : vector<1x8x64xf32> to vector<8x64xf32>
    %c0_233 = arith.constant 0 : index
    %c0_234 = arith.constant 0 : index
    %475 = vector.load %arg10[%c0_233, %c0_234] : memref<8x16xf32, #tpu.memory_space<vmem>>, vector<8x16xf32>
    %c0_235 = arith.constant 0 : index
    %c0_236 = arith.constant 0 : index
    %476 = vector.load %arg11[%c0_235, %c0_236] : memref<8x16xf32, #tpu.memory_space<vmem>>, vector<8x16xf32>
    %cst_237 = arith.constant dense<0.000000e+00> : vector<8x64xf32>
    %477 = tpu.matmul %475, %4, %cst_237 {dimension_numbers = #tpu.dot_dimension_numbers<[1], [0], [0], [1], [0, 0, 1, 1], [], []>} : vector<8x16xf32>, vector<16x64xf32>, vector<8x64xf32> -> vector<8x64xf32>
    %478 = arith.addf %474, %477 : vector<8x64xf32>
    %479 = vector.extract_strided_slice %478 {offsets = [0, 0], sizes = [8, 16], strides = [1, 1]} : vector<8x64xf32> to vector<8x16xf32>
    %480 = arith.negf %479 : vector<8x16xf32>
    %481 = math.exp %480 : vector<8x16xf32>
    %cst_238 = arith.constant 1.000000e+00 : f32
    %482 = vector.broadcast %cst_238 : f32 to vector<8x16xf32>
    %483 = arith.addf %482, %481 : vector<8x16xf32>
    %484 = arith.divf %482, %483 : vector<8x16xf32>
    %485 = vector.extract_strided_slice %478 {offsets = [0, 16], sizes = [8, 16], strides = [1, 1]} : vector<8x64xf32> to vector<8x16xf32>
    %486 = arith.negf %485 : vector<8x16xf32>
    %487 = math.exp %486 : vector<8x16xf32>
    %cst_239 = arith.constant 1.000000e+00 : f32
    %488 = vector.broadcast %cst_239 : f32 to vector<8x16xf32>
    %489 = arith.addf %488, %487 : vector<8x16xf32>
    %490 = arith.divf %488, %489 : vector<8x16xf32>
    %491 = vector.extract_strided_slice %478 {offsets = [0, 32], sizes = [8, 16], strides = [1, 1]} : vector<8x64xf32> to vector<8x16xf32>
    %492 = math.tanh %491 : vector<8x16xf32>
    %493 = vector.extract_strided_slice %478 {offsets = [0, 48], sizes = [8, 16], strides = [1, 1]} : vector<8x64xf32> to vector<8x16xf32>
    %494 = arith.negf %493 : vector<8x16xf32>
    %495 = math.exp %494 : vector<8x16xf32>
    %cst_240 = arith.constant 1.000000e+00 : f32
    %496 = vector.broadcast %cst_240 : f32 to vector<8x16xf32>
    %497 = arith.addf %496, %495 : vector<8x16xf32>
    %498 = arith.divf %496, %497 : vector<8x16xf32>
    %499 = arith.mulf %490, %476 : vector<8x16xf32>
    %500 = arith.mulf %484, %492 : vector<8x16xf32>
    %501 = arith.addf %499, %500 : vector<8x16xf32>
    %502 = math.tanh %501 : vector<8x16xf32>
    %503 = arith.mulf %498, %502 : vector<8x16xf32>
    %c0_241 = arith.constant 0 : index
    %c0_242 = arith.constant 0 : index
    %504 = vector.load %arg10[%c0_241, %c0_242] : memref<8x16xf32, #tpu.memory_space<vmem>>, vector<8x16xf32>
    tpu.vector_store %arg10[%c0_241, %c0_242], %503 {strides = array<i32>} : memref<8x16xf32, #tpu.memory_space<vmem>>, vector<8x16xf32>,
    %c0_243 = arith.constant 0 : index
    %c0_244 = arith.constant 0 : index
    %505 = vector.load %arg11[%c0_243, %c0_244] : memref<8x16xf32, #tpu.memory_space<vmem>>, vector<8x16xf32>
    tpu.vector_store %arg11[%c0_243, %c0_244], %501 {strides = array<i32>} : memref<8x16xf32, #tpu.memory_space<vmem>>, vector<8x16xf32>,
    %c1_245 = arith.constant 1 : index
    %c0_246 = arith.constant 0 : index
    %c0_247 = arith.constant 0 : index
    %506 = vector.load %arg7[%c1_245, %c0_246, %c0_247] : memref<8x8x16xf32, #tpu.memory_space<vmem>>, vector<1x8x16xf32>
    %507 = vector.shape_cast %506 : vector<1x8x16xf32> to vector<8x16xf32>
    %508 = vector.shape_cast %503 : vector<8x16xf32> to vector<1x8x16xf32>
    tpu.vector_store %arg7[%c1_245, %c0_246, %c0_247], %508 {strides = array<i32>} : memref<8x8x16xf32, #tpu.memory_space<vmem>>, vector<1x8x16xf32>,
    %c7_248 = arith.constant 7 : index
    %c0_249 = arith.constant 0 : index
    %c0_250 = arith.constant 0 : index
    %509 = vector.load %arg2[%c7_248, %c0_249, %c0_250] : memref<8x8x64xf32, #tpu.memory_space<vmem>>, vector<1x8x64xf32>
    %510 = vector.shape_cast %509 : vector<1x8x64xf32> to vector<8x64xf32>
    %c0_251 = arith.constant 0 : index
    %c0_252 = arith.constant 0 : index
    %511 = vector.load %arg8[%c0_251, %c0_252] : memref<8x16xf32, #tpu.memory_space<vmem>>, vector<8x16xf32>
    %c0_253 = arith.constant 0 : index
    %c0_254 = arith.constant 0 : index
    %512 = vector.load %arg9[%c0_253, %c0_254] : memref<8x16xf32, #tpu.memory_space<vmem>>, vector<8x16xf32>
    %cst_255 = arith.constant dense<0.000000e+00> : vector<8x64xf32>
    %513 = tpu.matmul %511, %3, %cst_255 {dimension_numbers = #tpu.dot_dimension_numbers<[1], [0], [0], [1], [0, 0, 1, 1], [], []>} : vector<8x16xf32>, vector<16x64xf32>, vector<8x64xf32> -> vector<8x64xf32>
    %514 = arith.addf %510, %513 : vector<8x64xf32>
    %515 = vector.extract_strided_slice %514 {offsets = [0, 0], sizes = [8, 16], strides = [1, 1]} : vector<8x64xf32> to vector<8x16xf32>
    %516 = arith.negf %515 : vector<8x16xf32>
    %517 = math.exp %516 : vector<8x16xf32>
    %cst_256 = arith.constant 1.000000e+00 : f32
    %518 = vector.broadcast %cst_256 : f32 to vector<8x16xf32>
    %519 = arith.addf %518, %517 : vector<8x16xf32>
    %520 = arith.divf %518, %519 : vector<8x16xf32>
    %521 = vector.extract_strided_slice %514 {offsets = [0, 16], sizes = [8, 16], strides = [1, 1]} : vector<8x64xf32> to vector<8x16xf32>
    %522 = arith.negf %521 : vector<8x16xf32>
    %523 = math.exp %522 : vector<8x16xf32>
    %cst_257 = arith.constant 1.000000e+00 : f32
    %524 = vector.broadcast %cst_257 : f32 to vector<8x16xf32>
    %525 = arith.addf %524, %523 : vector<8x16xf32>
    %526 = arith.divf %524, %525 : vector<8x16xf32>
    %527 = vector.extract_strided_slice %514 {offsets = [0, 32], sizes = [8, 16], strides = [1, 1]} : vector<8x64xf32> to vector<8x16xf32>
    %528 = math.tanh %527 : vector<8x16xf32>
    %529 = vector.extract_strided_slice %514 {offsets = [0, 48], sizes = [8, 16], strides = [1, 1]} : vector<8x64xf32> to vector<8x16xf32>
    %530 = arith.negf %529 : vector<8x16xf32>
    %531 = math.exp %530 : vector<8x16xf32>
    %cst_258 = arith.constant 1.000000e+00 : f32
    %532 = vector.broadcast %cst_258 : f32 to vector<8x16xf32>
    %533 = arith.addf %532, %531 : vector<8x16xf32>
    %534 = arith.divf %532, %533 : vector<8x16xf32>
    %535 = arith.mulf %526, %512 : vector<8x16xf32>
    %536 = arith.mulf %520, %528 : vector<8x16xf32>
    %537 = arith.addf %535, %536 : vector<8x16xf32>
    %538 = math.tanh %537 : vector<8x16xf32>
    %539 = arith.mulf %534, %538 : vector<8x16xf32>
    %c0_259 = arith.constant 0 : index
    %c0_260 = arith.constant 0 : index
    %540 = vector.load %arg8[%c0_259, %c0_260] : memref<8x16xf32, #tpu.memory_space<vmem>>, vector<8x16xf32>
    tpu.vector_store %arg8[%c0_259, %c0_260], %539 {strides = array<i32>} : memref<8x16xf32, #tpu.memory_space<vmem>>, vector<8x16xf32>,
    %c0_261 = arith.constant 0 : index
    %c0_262 = arith.constant 0 : index
    %541 = vector.load %arg9[%c0_261, %c0_262] : memref<8x16xf32, #tpu.memory_space<vmem>>, vector<8x16xf32>
    tpu.vector_store %arg9[%c0_261, %c0_262], %537 {strides = array<i32>} : memref<8x16xf32, #tpu.memory_space<vmem>>, vector<8x16xf32>,
    %c7_263 = arith.constant 7 : index
    %c0_264 = arith.constant 0 : index
    %c0_265 = arith.constant 0 : index
    %542 = vector.load %arg6[%c7_263, %c0_264, %c0_265] : memref<8x8x16xf32, #tpu.memory_space<vmem>>, vector<1x8x16xf32>
    %543 = vector.shape_cast %542 : vector<1x8x16xf32> to vector<8x16xf32>
    %544 = vector.shape_cast %539 : vector<8x16xf32> to vector<1x8x16xf32>
    tpu.vector_store %arg6[%c7_263, %c0_264, %c0_265], %544 {strides = array<i32>} : memref<8x8x16xf32, #tpu.memory_space<vmem>>, vector<1x8x16xf32>,
    %c0_266 = arith.constant 0 : index
    %c0_267 = arith.constant 0 : index
    %c0_268 = arith.constant 0 : index
    %545 = vector.load %arg3[%c0_266, %c0_267, %c0_268] : memref<8x8x64xf32, #tpu.memory_space<vmem>>, vector<1x8x64xf32>
    %546 = vector.shape_cast %545 : vector<1x8x64xf32> to vector<8x64xf32>
    %c0_269 = arith.constant 0 : index
    %c0_270 = arith.constant 0 : index
    %547 = vector.load %arg10[%c0_269, %c0_270] : memref<8x16xf32, #tpu.memory_space<vmem>>, vector<8x16xf32>
    %c0_271 = arith.constant 0 : index
    %c0_272 = arith.constant 0 : index
    %548 = vector.load %arg11[%c0_271, %c0_272] : memref<8x16xf32, #tpu.memory_space<vmem>>, vector<8x16xf32>
    %cst_273 = arith.constant dense<0.000000e+00> : vector<8x64xf32>
    %549 = tpu.matmul %547, %4, %cst_273 {dimension_numbers = #tpu.dot_dimension_numbers<[1], [0], [0], [1], [0, 0, 1, 1], [], []>} : vector<8x16xf32>, vector<16x64xf32>, vector<8x64xf32> -> vector<8x64xf32>
    %550 = arith.addf %546, %549 : vector<8x64xf32>
    %551 = vector.extract_strided_slice %550 {offsets = [0, 0], sizes = [8, 16], strides = [1, 1]} : vector<8x64xf32> to vector<8x16xf32>
    %552 = arith.negf %551 : vector<8x16xf32>
    %553 = math.exp %552 : vector<8x16xf32>
    %cst_274 = arith.constant 1.000000e+00 : f32
    %554 = vector.broadcast %cst_274 : f32 to vector<8x16xf32>
    %555 = arith.addf %554, %553 : vector<8x16xf32>
    %556 = arith.divf %554, %555 : vector<8x16xf32>
    %557 = vector.extract_strided_slice %550 {offsets = [0, 16], sizes = [8, 16], strides = [1, 1]} : vector<8x64xf32> to vector<8x16xf32>
    %558 = arith.negf %557 : vector<8x16xf32>
    %559 = math.exp %558 : vector<8x16xf32>
    %cst_275 = arith.constant 1.000000e+00 : f32
    %560 = vector.broadcast %cst_275 : f32 to vector<8x16xf32>
    %561 = arith.addf %560, %559 : vector<8x16xf32>
    %562 = arith.divf %560, %561 : vector<8x16xf32>
    %563 = vector.extract_strided_slice %550 {offsets = [0, 32], sizes = [8, 16], strides = [1, 1]} : vector<8x64xf32> to vector<8x16xf32>
    %564 = math.tanh %563 : vector<8x16xf32>
    %565 = vector.extract_strided_slice %550 {offsets = [0, 48], sizes = [8, 16], strides = [1, 1]} : vector<8x64xf32> to vector<8x16xf32>
    %566 = arith.negf %565 : vector<8x16xf32>
    %567 = math.exp %566 : vector<8x16xf32>
    %cst_276 = arith.constant 1.000000e+00 : f32
    %568 = vector.broadcast %cst_276 : f32 to vector<8x16xf32>
    %569 = arith.addf %568, %567 : vector<8x16xf32>
    %570 = arith.divf %568, %569 : vector<8x16xf32>
    %571 = arith.mulf %562, %548 : vector<8x16xf32>
    %572 = arith.mulf %556, %564 : vector<8x16xf32>
    %573 = arith.addf %571, %572 : vector<8x16xf32>
    %574 = math.tanh %573 : vector<8x16xf32>
    %575 = arith.mulf %570, %574 : vector<8x16xf32>
    %c0_277 = arith.constant 0 : index
    %c0_278 = arith.constant 0 : index
    %576 = vector.load %arg10[%c0_277, %c0_278] : memref<8x16xf32, #tpu.memory_space<vmem>>, vector<8x16xf32>
    tpu.vector_store %arg10[%c0_277, %c0_278], %575 {strides = array<i32>} : memref<8x16xf32, #tpu.memory_space<vmem>>, vector<8x16xf32>,
    %c0_279 = arith.constant 0 : index
    %c0_280 = arith.constant 0 : index
    %577 = vector.load %arg11[%c0_279, %c0_280] : memref<8x16xf32, #tpu.memory_space<vmem>>, vector<8x16xf32>
    tpu.vector_store %arg11[%c0_279, %c0_280], %573 {strides = array<i32>} : memref<8x16xf32, #tpu.memory_space<vmem>>, vector<8x16xf32>,
    %c0_281 = arith.constant 0 : index
    %c0_282 = arith.constant 0 : index
    %c0_283 = arith.constant 0 : index
    %578 = vector.load %arg7[%c0_281, %c0_282, %c0_283] : memref<8x8x16xf32, #tpu.memory_space<vmem>>, vector<1x8x16xf32>
    %579 = vector.shape_cast %578 : vector<1x8x16xf32> to vector<8x16xf32>
    %580 = vector.shape_cast %575 : vector<8x16xf32> to vector<1x8x16xf32>
    tpu.vector_store %arg7[%c0_281, %c0_282, %c0_283], %580 {strides = array<i32>} : memref<8x8x16xf32, #tpu.memory_space<vmem>>, vector<1x8x16xf32>,
    return
  }
  func.func @transform_0(%arg0: i32, %arg1: i32) -> (i32, i32, i32) {
    %c0_i32 = arith.constant 0 : i32
    %c0_i32_0 = arith.constant 0 : i32
    return %arg1, %arg0, %c0_i32 : i32, i32, i32
  }
  func.func @transform_1(%arg0: i32, %arg1: i32) -> (i32, i32, i32) {
    %c0_i32 = arith.constant 0 : i32
    %0 = arith.subi %c0_i32, %arg1 : i32
    %c0_i32_0 = arith.constant 0 : i32
    %c0_i32_1 = arith.constant 0 : i32
    return %0, %arg0, %c0_i32_0 : i32, i32, i32
  }
  func.func @transform_2(%arg0: i32, %arg1: i32) -> (i32, i32) {
    %c0_i32 = arith.constant 0 : i32
    %c0_i32_0 = arith.constant 0 : i32
    %c0_i32_1 = arith.constant 0 : i32
    return %c0_i32, %c0_i32_0 : i32, i32
  }
  func.func @transform_3(%arg0: i32, %arg1: i32) -> (i32, i32) {
    %c0_i32 = arith.constant 0 : i32
    %c0_i32_0 = arith.constant 0 : i32
    %c0_i32_1 = arith.constant 0 : i32
    return %c0_i32, %c0_i32_0 : i32, i32
  }
  func.func @transform_4(%arg0: i32, %arg1: i32) -> (i32, i32, i32) {
    %c0_i32 = arith.constant 0 : i32
    %c0_i32_0 = arith.constant 0 : i32
    return %arg1, %arg0, %c0_i32 : i32, i32, i32
  }
  func.func @transform_5(%arg0: i32, %arg1: i32) -> (i32, i32, i32) {
    %c0_i32 = arith.constant 0 : i32
    %0 = arith.subi %c0_i32, %arg1 : i32
    %c0_i32_0 = arith.constant 0 : i32
    %c0_i32_1 = arith.constant 0 : i32
    return %0, %arg0, %c0_i32_0 : i32, i32, i32
  }
}

module attributes {stable_mosaic.version = 11 : i64} {
  func.func @_linear_sigmoid_kernel(%arg0: i32, %arg1: memref<128x16xf32, #tpu.memory_space<vmem>>, %arg2: memref<128x16xf32, #tpu.memory_space<vmem>>, %arg3: memref<16x1xf32, #tpu.memory_space<vmem>>, %arg4: memref<16x1xf32, #tpu.memory_space<vmem>>, %arg5: memref<1x1xf32, #tpu.memory_space<vmem>>, %arg6: memref<128x1xf32, #tpu.memory_space<vmem>>) attributes {dimension_semantics = [#tpu.dimension_semantics<parallel>], iteration_bounds = array<i64: 1>, scalar_prefetch = 0 : i64, scratch_operands = 0 : i64, tpu.core_type = #tpu.core_type<tc>, window_params = [{transform_indices = @transform_0, window_bounds = array<i64: 128, 16>}, {transform_indices = @transform_1, window_bounds = array<i64: 128, 16>}, {pipeline_mode = #tpu.pipeline_mode<synchronous>, transform_indices = @transform_2, window_bounds = array<i64: 16, 1>}, {pipeline_mode = #tpu.pipeline_mode<synchronous>, transform_indices = @transform_3, window_bounds = array<i64: 16, 1>}, {pipeline_mode = #tpu.pipeline_mode<synchronous>, transform_indices = @transform_4, window_bounds = array<i64: 1, 1>}, {transform_indices = @transform_5, window_bounds = array<i64: 128, 1>}]} {
    %c0 = arith.constant 0 : index
    %c0_0 = arith.constant 0 : index
    %0 = vector.load %arg1[%c0, %c0_0] : memref<128x16xf32, #tpu.memory_space<vmem>>, vector<128x16xf32>
    %c0_1 = arith.constant 0 : index
    %c0_2 = arith.constant 0 : index
    %1 = vector.load %arg3[%c0_1, %c0_2] : memref<16x1xf32, #tpu.memory_space<vmem>>, vector<16x1xf32>
    %cst = arith.constant dense<0.000000e+00> : vector<128x1xf32>
    %2 = tpu.matmul %0, %1, %cst {dimension_numbers = #tpu.dot_dimension_numbers<[1], [0], [0], [1], [0, 0, 1, 1], [], []>} : vector<128x16xf32>, vector<16x1xf32>, vector<128x1xf32> -> vector<128x1xf32>
    %c0_3 = arith.constant 0 : index
    %c0_4 = arith.constant 0 : index
    %3 = vector.load %arg2[%c0_3, %c0_4] : memref<128x16xf32, #tpu.memory_space<vmem>>, vector<128x16xf32>
    %c0_5 = arith.constant 0 : index
    %c0_6 = arith.constant 0 : index
    %4 = vector.load %arg4[%c0_5, %c0_6] : memref<16x1xf32, #tpu.memory_space<vmem>>, vector<16x1xf32>
    %cst_7 = arith.constant dense<0.000000e+00> : vector<128x1xf32>
    %5 = tpu.matmul %3, %4, %cst_7 {dimension_numbers = #tpu.dot_dimension_numbers<[1], [0], [0], [1], [0, 0, 1, 1], [], []>} : vector<128x16xf32>, vector<16x1xf32>, vector<128x1xf32> -> vector<128x1xf32>
    %6 = arith.addf %2, %5 : vector<128x1xf32>
    %c0_8 = arith.constant 0 : index
    %c0_9 = arith.constant 0 : index
    %7 = vector.load %arg5[%c0_8, %c0_9] : memref<1x1xf32, #tpu.memory_space<vmem>>, vector<1x1xf32>
    %8 = vector.broadcast %7 : vector<1x1xf32> to vector<128x1xf32>
    %9 = arith.addf %6, %8 : vector<128x1xf32>
    %10 = arith.negf %9 : vector<128x1xf32>
    %11 = math.exp %10 : vector<128x1xf32>
    %cst_10 = arith.constant 1.000000e+00 : f32
    %12 = vector.broadcast %cst_10 : f32 to vector<128x1xf32>
    %13 = arith.addf %12, %11 : vector<128x1xf32>
    %14 = arith.divf %12, %13 : vector<128x1xf32>
    %c0_11 = arith.constant 0 : index
    %c0_12 = arith.constant 0 : index
    %15 = vector.load %arg6[%c0_11, %c0_12] : memref<128x1xf32, #tpu.memory_space<vmem>>, vector<128x1xf32>
    tpu.vector_store %arg6[%c0_11, %c0_12], %14 {strides = array<i32>} : memref<128x1xf32, #tpu.memory_space<vmem>>, vector<128x1xf32>,
    return
  }
  func.func @transform_0(%arg0: i32) -> (i32, i32) {
    %c0_i32 = arith.constant 0 : i32
    %c0_i32_0 = arith.constant 0 : i32
    return %arg0, %c0_i32 : i32, i32
  }
  func.func @transform_1(%arg0: i32) -> (i32, i32) {
    %c0_i32 = arith.constant 0 : i32
    %c0_i32_0 = arith.constant 0 : i32
    return %arg0, %c0_i32 : i32, i32
  }
  func.func @transform_2(%arg0: i32) -> (i32, i32) {
    %c0_i32 = arith.constant 0 : i32
    %c0_i32_0 = arith.constant 0 : i32
    %c0_i32_1 = arith.constant 0 : i32
    return %c0_i32, %c0_i32_0 : i32, i32
  }
  func.func @transform_3(%arg0: i32) -> (i32, i32) {
    %c0_i32 = arith.constant 0 : i32
    %c0_i32_0 = arith.constant 0 : i32
    %c0_i32_1 = arith.constant 0 : i32
    return %c0_i32, %c0_i32_0 : i32, i32
  }
  func.func @transform_4(%arg0: i32) -> (i32, i32) {
    %c0_i32 = arith.constant 0 : i32
    %c0_i32_0 = arith.constant 0 : i32
    %c0_i32_1 = arith.constant 0 : i32
    return %c0_i32, %c0_i32_0 : i32, i32
  }
  func.func @transform_5(%arg0: i32) -> (i32, i32) {
    %c0_i32 = arith.constant 0 : i32
    %c0_i32_0 = arith.constant 0 : i32
    return %arg0, %c0_i32 : i32, i32
  }
}

</mosaic_0001>

<bundles_post_ra>
// kernel: jnf_ssf_forward.5
= control target key start
LH: loop header
LB: loop body
LE: loop exit
PB: predicated region body
PF: predicated region fallthrough
CT: control target
= control target key end

     0   :  { %12 = vsyncpa [#allocation3], 0  ;;  %s1101_s0 = inlined_call_operand.hbm [shape: f32[128,4], index: 0, kind: input, shape index: {}]   ;;  %s1102_s1 = inlined_call_operand.hbm [shape: f32[4,64], index: 1, kind: input, shape index: {}]   ;;  %s1103_s2 = inlined_call_operand.hbm [shape: f32[4,64], index: 2, kind: input, shape index: {}]   ;;  %s1104_s3 = inlined_call_operand.hbm [shape: f32[1,64], index: 3, kind: input, shape index: {}]   ;;  %s1105_s4 = inlined_call_operand.hbm [shape: f32[1,64], index: 4, kind: input, shape index: {}]   ;;  %s1106_s5 = inlined_call_operand.hbm [shape: f32[128,64], index: 5, kind: output, shape index: {0}]   ;;  %s1107_s6 = inlined_call_operand.hbm [shape: f32[128,64], index: 6, kind: output, shape index: {1}]  }
   0x1   :  { %13 = vsyncpa [#allocation6], 0 }
   0x2   :  { %14 = vsyncpa [#allocation9], 0 }
   0x3   :  { %15 = vsyncpa [#allocation4], 0 }
   0x4   :  { %16 = vsyncpa [#allocation13], 0  ;;  %s857_s21 = smov [#allocation5]   ;;  %s858_s23 = smov [#allocation8]  }
   0x5   :  { %s35_s22 = sshll.u32 %s857_s21, 4  ;;  %s55_s24 = sshll.u32 %s858_s23, 4  ;;  %s36_s22 = int_to_ptr.vmem [resolvable:$true] %s35_s22  ;;  %s56_s24 = int_to_ptr.vmem [resolvable:$true] %s55_s24 }
   0x6   :  { %s693_s27 = scalar_lea.hbm %s1102_s1, 64 }
   0x7   :  { %p694_p0 = scmp.ne.s32.totalorder %s1102_s1, %s693_s27  ;;  %p697_p1 = scmp.lt.u32.totalorder %s693_s27, %s1102_s1 }
   0x9   :  { %p699_p2 = pnand %p697_p1, %p694_p0 }
   0xb   :  { %702 = shalt.err (!%p699_p2)
}
   0xc   :  { %s703_s8 = scalar_lea.vmem %s36_s22, 64  ;;  %p708_p4 = scmp.lt.s32.totalorder %s36_s22, %s36_s22 }
   0xd   :  { %p704_p3 = scmp.ne.s32.totalorder %s36_s22, %s703_s8  ;;  %p709_p5 = scmp.lt.s32.totalorder %s703_s8, %s703_s8 }
   0xf   :  { %p710_p6 = por %p709_p5, %p708_p4 }
  0x11   :  { %p711_p7 = pnand %p710_p6, %p704_p3 }
  0x13   :  { %714 = shalt.err (!%p711_p7)
}
  0x14   :  { %38 = dma.hbm_to_vmem [thread:$0]  %s1102_s1, 64, %s36_s22, [#allocation6]  }
  0x15   :  { %s715_s13 = scalar_lea.hbm %s1104_s3, 16 }
  0x16   :  { %p716_p8 = scmp.ne.s32.totalorder %s1104_s3, %s715_s13  ;;  %p719_p9 = scmp.lt.u32.totalorder %s715_s13, %s1104_s3 }
  0x18   :  { %p721_p10 = pnand %p719_p9, %p716_p8 }
  0x1a   :  { %724 = shalt.err (!%p721_p10)
}
  0x1b   :  { %s725_s18 = scalar_lea.vmem %s56_s24, 16  ;;  %s729_s19 = scalar_lea.vmem %s56_s24, 32 }
  0x1c   :  { %p726_p11 = scmp.ne.s32.totalorder %s56_s24, %s725_s18  ;;  %p730_p12 = scmp.lt.s32.totalorder %s56_s24, %s56_s24 }
  0x1d   :  { %p731_p13 = scmp.lt.s32.totalorder %s729_s19, %s725_s18 }
  0x1f   :  { %p732_p0 = por %p731_p13, %p730_p12 }
  0x21   :  { %p733_p1 = pnand %p732_p0, %p726_p11 }
  0x23   :  { %736 = shalt.err (!%p733_p1)
}
  0x24   :  { %58 = dma.hbm_to_vmem [thread:$0]  %s1104_s3, 16, %s56_s24, [#allocation9]  }
  0x25   :  { %s859_s21 = smov [#allocation2]   ;;  %s737_s26 = scalar_lea.hbm %s1101_s0, 2048 }
  0x26   :  { %s22_s22 = sshll.u32 %s859_s21, 4  ;;  %p738_p2 = scmp.ne.s32.totalorder %s1101_s0, %s737_s26  ;;  %s23_s22 = int_to_ptr.vmem [resolvable:$true] %s22_s22 }
  0x27   :  { %p741_p3 = scmp.lt.u32.totalorder %s737_s26, %s1101_s0 }
  0x29   :  { %p743_p4 = pnand %p741_p3, %p738_p2 }
  0x2b   :  { %746 = shalt.err (!%p743_p4)
}
  0x2c   :  { %s747_s7 = scalar_lea.vmem %s23_s22, 2048  ;;  %p752_p6 = scmp.lt.s32.totalorder %s23_s22, %s23_s22 }
  0x2d   :  { %p748_p5 = scmp.ne.s32.totalorder %s23_s22, %s747_s7  ;;  %p753_p7 = scmp.lt.s32.totalorder %s747_s7, %s747_s7 }
  0x2f   :  { %p754_p8 = por %p753_p7, %p752_p6 }
  0x31   :  { %p755_p9 = pnand %p754_p8, %p748_p5 }
  0x33   :  { %758 = shalt.err (!%p755_p9)
}
  0x34   :  { %s860_s3 = smov 128   ;;  %s861_s24 = smov 8  }
  0x35   :  { %28 = dma.hbm_to_vmem [thread:$0]  %s1101_s0, 2048, %s23_s22, [#allocation3], %s860_s3, %s860_s3, %s861_s24  }
  0x36   :  { %s862_s10 = smov [#allocation7]   ;;  %s863_s12 = smov [#allocation10]  }
  0x37   :  { %s45_s11 = sshll.u32 %s862_s10, 4  ;;  %s65_s13 = sshll.u32 %s863_s12, 4  ;;  %s46_s11 = int_to_ptr.vmem [resolvable:$true] %s45_s11  ;;  %s66_s13 = int_to_ptr.vmem [resolvable:$true] %s65_s13 }
  0x38   :  { %s759_s16 = scalar_lea.hbm %s1103_s2, 64 }
  0x39   :  { %p760_p10 = scmp.ne.s32.totalorder %s1103_s2, %s759_s16  ;;  %p763_p11 = scmp.lt.u32.totalorder %s759_s16, %s1103_s2 }
  0x3b   :  { %p765_p12 = pnand %p763_p11, %p760_p10 }
  0x3d   :  { %768 = shalt.err (!%p765_p12)
}
  0x3e   :  { %s769_s0 = scalar_lea.vmem %s46_s11, 64  ;;  %p774_p0 = scmp.lt.s32.totalorder %s46_s11, %s46_s11 }
  0x3f   :  { %p770_p13 = scmp.ne.s32.totalorder %s46_s11, %s769_s0  ;;  %p775_p1 = scmp.lt.s32.totalorder %s769_s0, %s769_s0 }
  0x41   :  { %p776_p2 = por %p775_p1, %p774_p0 }
  0x43   :  { %p777_p3 = pnand %p776_p2, %p770_p13 }
  0x45   :  { %780 = shalt.err (!%p777_p3)
}
  0x46   :  { %48 = dma.hbm_to_vmem [thread:$0]  %s1103_s2, 64, %s46_s11, [#allocation6]  }
  0x47   :  { %s781_s25 = scalar_lea.hbm %s1105_s4, 16 }
  0x48   :  { %p782_p4 = scmp.ne.s32.totalorder %s1105_s4, %s781_s25  ;;  %p785_p5 = scmp.lt.u32.totalorder %s781_s25, %s1105_s4 }
  0x4a   :  { %p787_p6 = pnand %p785_p5, %p782_p4 }
  0x4c   :  { %790 = shalt.err (!%p787_p6)
}
  0x4d   :  { %s791_s30 = scalar_lea.vmem %s66_s13, 16  ;;  %s795_s7 = scalar_lea.vmem %s66_s13, 32 }
  0x4e   :  { %p792_p7 = scmp.ne.s32.totalorder %s66_s13, %s791_s30  ;;  %p796_p8 = scmp.lt.s32.totalorder %s66_s13, %s66_s13 }
  0x4f   :  { %p797_p9 = scmp.lt.s32.totalorder %s795_s7, %s791_s30 }
  0x51   :  { %p798_p10 = por %p797_p9, %p796_p8 }
  0x53   :  { %p799_p11 = pnand %p798_p10, %p792_p7 }
  0x55   :  { %802 = shalt.err (!%p799_p11)
}
  0x56   :  { %68 = dma.hbm_to_vmem [thread:$0]  %s1105_s4, 16, %s66_s13, [#allocation9]  }
  0x57   :  { %847 = dma.done.wait [#allocation3], 2048  }
  0x58   :  { %848 = vsyncadd [#allocation3], 4294965248 }
  0x59   :  { %849 = dma.done.wait [#allocation6], 128  }
  0x5a   :  { %850 = vsyncadd [#allocation6], 4294967168 }
  0x5b   :  { %851 = dma.done.wait [#allocation9], 32  }
  0x5c   :  { %852 = vsyncadd [#allocation9], 4294967264  ;;  %vm152_vm0 = vcmask 1043456   ;;  %vm103_vm1 = vcmask 31744   ;;  %v102_v0 = vld [vmem:[#allocation5] sm:$0xf] }
  0x5d   :  { %v323_v1 = vld [vmem:[#allocation7] sm:$0xf]  ;;  %632 = vmatprep.subr.msk.mxu0 %vm152_vm0, %v102_v0  ;;  %v87_v3 = vld [vmem:[#allocation2 + $0x8] sm:$0xff]  ;;  %v88_v4 = vld [vmem:[#allocation2 + $0x10] sm:$0xff]  ;;  %vm494_vm2 = vcmask 523264   ;;  %s864_s4 = smov [#allocation11]  }
  0x5e   :  { %v86_v2 = vld [vmem:[#allocation2] sm:$0xff]  ;;  %658 = vmatprep.subr.msk.mxu1 %vm152_vm0, %v323_v1  ;;  %633 = vmatpush3.msk.msra.mxu0 %vm152_vm0, %v102_v0  ;;  %v89_v5 = vld [vmem:[#allocation2 + $0x18] sm:$0xff]  ;;  %v91_v7 = vld [vmem:[#allocation2 + $0x28] sm:$0xff]  ;;  %s532_s9 = sshll.u32 %s864_s4, 4  ;;  %s865_s10 = smov [#allocation12]   ;;  %s533_s9 = int_to_ptr.vmem [resolvable:$true] %s532_s9 }
  0x5f   :  { %634 = vmatprep.mubr.msk.f32.mxu0 %vm103_vm1, %v86_v2  ;;  %659 = vmatpush3.msk.msra.mxu1 %vm152_vm0, %v323_v1  ;;  %v90_v6 = vld [vmem:[#allocation2 + $0x20] sm:$0xff]  ;;  %v92_v8 = vld [vmem:[#allocation2 + $0x30] sm:$0xff]  ;;  %v93_v9 = vld [vmem:[#allocation2 + $0x38] sm:$0xff]  ;;  %s544_s11 = sshll.u32 %s865_s10, 4  ;;  %s803_s12 = scalar_lea.vmem %s533_s9, 2048  ;;  %s1062_s11 = int_to_ptr.vmem [resolvable:$true] %s544_s11 }
  0x60   :  { %660 = vmatprep.mubr.msk.f32.mxu1 %vm103_vm1, %v86_v2  ;;  %635 = vmatmul.mubr.msk.f32.vlgmr.msra.gmra.mrb[0].mxu0 %vm103_vm1, %v87_v3  ;;  %v94_v10 = vld [vmem:[#allocation2 + $0x40] sm:$0xff]  ;;  %v95_v11 = vld [vmem:[#allocation2 + $0x48] sm:$0xff]  ;;  %v96_v12 = vld [vmem:[#allocation2 + $0x50] sm:$0xff]  ;;  %p804_p12 = scmp.ne.s32.totalorder %s533_s9, %s803_s12  ;;  %p808_p13 = scmp.lt.s32.totalorder %s533_s9, %s533_s9 }
  0x61   :  { %661 = vmatmul.mubr.msk.f32.vlgmr.msra.gmra.mrb[0].mxu1 %vm103_vm1, %v87_v3  ;;  %637 = vmatprep.mubr.msk.f32.mxu0 %vm103_vm1, %v88_v4  ;;  %v97_v13 = vld [vmem:[#allocation2 + $0x58] sm:$0xff]  ;;  %v98_v14 = vld [vmem:[#allocation2 + $0x60] sm:$0xff]  ;;  %v99_v15 = vld [vmem:[#allocation2 + $0x68] sm:$0xff]  ;;  %p809_p0 = scmp.lt.s32.totalorder %s803_s12, %s803_s12 }
  0x62   :  { %663 = vmatprep.mubr.msk.f32.mxu1 %vm103_vm1, %v88_v4  ;;  %v100_v16 = vld [vmem:[#allocation2 + $0x70] sm:$0xff]  ;;  %v101_v17 = vld [vmem:[#allocation2 + $0x78] sm:$0xff]  ;;  %v996_v18 = vld [vmem:[#allocation8] ss:$0 sm:$0xff] }
  0x63   :  { %v998_v19 = vld [vmem:[#allocation10] ss:$0 sm:$0xff]  ;;  %p810_p1 = por %p809_p0, %p808_p13 }
  0x64   :  { %638 = vmatmul.mubr.msk.f32.gmra.mrb[2].mxu0 %vm103_vm1, %v89_v5 }
  0x65   :  { %664 = vmatmul.mubr.msk.f32.gmra.mrb[2].mxu1 %vm103_vm1, %v89_v5  ;;  %640 = vmatprep.mubr.msk.f32.mxu0 %vm103_vm1, %v90_v6  ;;  %p811_p2 = pnand %p810_p1, %p804_p12 }
  0x66   :  { %666 = vmatprep.mubr.msk.f32.mxu1 %vm103_vm1, %v90_v6 }
  0x68   :  { %641 = vmatmul.mubr.msk.f32.gmra.mrb[4].mxu0 %vm103_vm1, %v91_v7 }
  0x69   :  { %667 = vmatmul.mubr.msk.f32.gmra.mrb[4].mxu1 %vm103_vm1, %v91_v7  ;;  %643 = vmatprep.mubr.msk.f32.mxu0 %vm103_vm1, %v92_v8 }
  0x6a   :  { %669 = vmatprep.mubr.msk.f32.mxu1 %vm103_vm1, %v92_v8 }
  0x6c   :  { %644 = vmatmul.mubr.msk.f32.gmra.mrb[6].mxu0 %vm103_vm1, %v93_v9 }
  0x6d   :  { %670 = vmatmul.mubr.msk.f32.gmra.mrb[6].mxu1 %vm103_vm1, %v93_v9  ;;  %646 = vmatprep.mubr.msk.f32.mxu0 %vm103_vm1, %v94_v10 }
  0x6e   :  { %672 = vmatprep.mubr.msk.f32.mxu1 %vm103_vm1, %v94_v10 }
  0x70   :  { %647 = vmatmul.mubr.msk.f32.gmra.mrb[8].mxu0 %vm103_vm1, %v95_v11 }
  0x71   :  { %673 = vmatmul.mubr.msk.f32.gmra.mrb[8].mxu1 %vm103_vm1, %v95_v11  ;;  %649 = vmatprep.mubr.msk.f32.mxu0 %vm103_vm1, %v96_v12 }
  0x72   :  { %675 = vmatprep.mubr.msk.f32.mxu1 %vm103_vm1, %v96_v12 }
  0x74   :  { %650 = vmatmul.mubr.msk.f32.gmra.mrb[10].mxu0 %vm103_vm1, %v97_v13 }
  0x75   :  { %676 = vmatmul.mubr.msk.f32.gmra.mrb[10].mxu1 %vm103_vm1, %v97_v13  ;;  %652 = vmatprep.mubr.msk.f32.mxu0 %vm103_vm1, %v98_v14 }
  0x76   :  { %678 = vmatprep.mubr.msk.f32.mxu1 %vm103_vm1, %v98_v14 }
  0x78   :  { %653 = vmatmul.mubr.msk.f32.gmra.mrb[12].mxu0 %vm103_vm1, %v99_v15 }
  0x79   :  { %679 = vmatmul.mubr.msk.f32.gmra.mrb[12].mxu1 %vm103_vm1, %v99_v15  ;;  %655 = vmatprep.mubr.msk.f32.mxu0 %vm103_vm1, %v100_v16 }
  0x7a   :  { %681 = vmatprep.mubr.msk.f32.mxu1 %vm103_vm1, %v100_v16 }
  0x7c   :  { %656 = vmatmul.mubr.msk.f32.gmra.mrb[14].mxu0 %vm103_vm1, %v101_v17 }
  0x7d   :  { %682 = vmatmul.mubr.msk.f32.gmra.mrb[14].mxu1 %vm103_vm1, %v101_v17 }
 0x133   :  { %v636_v20 = vpop.f32.mrb[0].mxu0 }
 0x134   :  { %v662_v21 = vpop.f32.mrb[0].mxu1  ;;  %v308_v22 = vadd.f32 %v636_v20, %v996_v18  ;;  %v222_v24 = vpop.f32.mrb[1].mxu0 }
 0x135   :  { %v479_v23 = vadd.f32 %v662_v21, %v998_v19  ;;  %v393_v25 = vpop.f32.mrb[1].mxu1  ;;  %v307_v26 = vadd.f32 %v996_v18, %v222_v24 }
 0x136   :  { %v478_v27 = vadd.f32 %v998_v19, %v393_v25  ;;  %496 = vst.msk [vmem:[#allocation11 + $0x8] sm:$0xff] %vm494_vm2, %v308_v22 }
 0x137   :  { %512 = vst.msk [vmem:[#allocation12 + $0x8] sm:$0xff] %vm494_vm2, %v479_v23  ;;  %495 = vst.msk [vmem:[#allocation11] sm:$0xff] %vm494_vm2, %v307_v26  ;;  %v639_v28 = vpop.f32.mrb[2].mxu0 }
 0x138   :  { %511 = vst.msk [vmem:[#allocation12] sm:$0xff] %vm494_vm2, %v478_v27  ;;  %v665_v29 = vpop.f32.mrb[2].mxu1  ;;  %v310_v30 = vadd.f32 %v639_v28, %v996_v18  ;;  %v232_v32 = vpop.f32.mrb[3].mxu0 }
 0x139   :  { %v481_v31 = vadd.f32 %v665_v29, %v998_v19  ;;  %v403_v33 = vpop.f32.mrb[3].mxu1  ;;  %v309_v34 = vadd.f32 %v996_v18, %v232_v32 }
 0x13a   :  { %v480_v35 = vadd.f32 %v998_v19, %v403_v33  ;;  %498 = vst.msk [vmem:[#allocation11 + $0x18] sm:$0xff] %vm494_vm2, %v310_v30 }
 0x13b   :  { %514 = vst.msk [vmem:[#allocation12 + $0x18] sm:$0xff] %vm494_vm2, %v481_v31  ;;  %497 = vst.msk [vmem:[#allocation11 + $0x10] sm:$0xff] %vm494_vm2, %v309_v34  ;;  %v642_v36 = vpop.f32.mrb[4].mxu0 }
 0x13c   :  { %513 = vst.msk [vmem:[#allocation12 + $0x10] sm:$0xff] %vm494_vm2, %v480_v35  ;;  %v668_v37 = vpop.f32.mrb[4].mxu1  ;;  %v312_v38 = vadd.f32 %v642_v36, %v996_v18  ;;  %v242_v40 = vpop.f32.mrb[5].mxu0 }
 0x13d   :  { %v483_v39 = vadd.f32 %v668_v37, %v998_v19  ;;  %v413_v41 = vpop.f32.mrb[5].mxu1  ;;  %v311_v42 = vadd.f32 %v996_v18, %v242_v40 }
 0x13e   :  { %v482_v43 = vadd.f32 %v998_v19, %v413_v41  ;;  %500 = vst.msk [vmem:[#allocation11 + $0x28] sm:$0xff] %vm494_vm2, %v312_v38 }
 0x13f   :  { %516 = vst.msk [vmem:[#allocation12 + $0x28] sm:$0xff] %vm494_vm2, %v483_v39  ;;  %499 = vst.msk [vmem:[#allocation11 + $0x20] sm:$0xff] %vm494_vm2, %v311_v42  ;;  %v645_v44 = vpop.f32.mrb[6].mxu0 }
 0x140   :  { %515 = vst.msk [vmem:[#allocation12 + $0x20] sm:$0xff] %vm494_vm2, %v482_v43  ;;  %v671_v45 = vpop.f32.mrb[6].mxu1  ;;  %v314_v46 = vadd.f32 %v645_v44, %v996_v18  ;;  %v252_v48 = vpop.f32.mrb[7].mxu0 }
 0x141   :  { %v485_v47 = vadd.f32 %v671_v45, %v998_v19  ;;  %v423_v49 = vpop.f32.mrb[7].mxu1  ;;  %v313_v50 = vadd.f32 %v996_v18, %v252_v48 }
 0x142   :  { %v484_v51 = vadd.f32 %v998_v19, %v423_v49  ;;  %502 = vst.msk [vmem:[#allocation11 + $0x38] sm:$0xff] %vm494_vm2, %v314_v46 }
 0x143   :  { %518 = vst.msk [vmem:[#allocation12 + $0x38] sm:$0xff] %vm494_vm2, %v485_v47  ;;  %501 = vst.msk [vmem:[#allocation11 + $0x30] sm:$0xff] %vm494_vm2, %v313_v50  ;;  %v648_v52 = vpop.f32.mrb[8].mxu0 }
 0x144   :  { %517 = vst.msk [vmem:[#allocation12 + $0x30] sm:$0xff] %vm494_vm2, %v484_v51  ;;  %v674_v53 = vpop.f32.mrb[8].mxu1  ;;  %v316_v54 = vadd.f32 %v648_v52, %v996_v18  ;;  %v262_v56 = vpop.f32.mrb[9].mxu0 }
 0x145   :  { %v487_v55 = vadd.f32 %v674_v53, %v998_v19  ;;  %v433_v57 = vpop.f32.mrb[9].mxu1  ;;  %v315_v58 = vadd.f32 %v996_v18, %v262_v56 }
 0x146   :  { %v486_v59 = vadd.f32 %v998_v19, %v433_v57  ;;  %504 = vst.msk [vmem:[#allocation11 + $0x48] sm:$0xff] %vm494_vm2, %v316_v54 }
 0x147   :  { %520 = vst.msk [vmem:[#allocation12 + $0x48] sm:$0xff] %vm494_vm2, %v487_v55  ;;  %503 = vst.msk [vmem:[#allocation11 + $0x40] sm:$0xff] %vm494_vm2, %v315_v58  ;;  %v651_v60 = vpop.f32.mrb[10].mxu0 }
 0x148   :  { %519 = vst.msk [vmem:[#allocation12 + $0x40] sm:$0xff] %vm494_vm2, %v486_v59  ;;  %v677_v61 = vpop.f32.mrb[10].mxu1  ;;  %v318_v62 = vadd.f32 %v651_v60, %v996_v18  ;;  %v272_v0 = vpop.f32.mrb[11].mxu0 }
 0x149   :  { %v489_v63 = vadd.f32 %v677_v61, %v998_v19  ;;  %v443_v1 = vpop.f32.mrb[11].mxu1  ;;  %v317_v2 = vadd.f32 %v996_v18, %v272_v0 }
 0x14a   :  { %v488_v3 = vadd.f32 %v998_v19, %v443_v1  ;;  %506 = vst.msk [vmem:[#allocation11 + $0x58] sm:$0xff] %vm494_vm2, %v318_v62 }
 0x14b   :  { %522 = vst.msk [vmem:[#allocation12 + $0x58] sm:$0xff] %vm494_vm2, %v489_v63  ;;  %505 = vst.msk [vmem:[#allocation11 + $0x50] sm:$0xff] %vm494_vm2, %v317_v2  ;;  %v654_v4 = vpop.f32.mrb[12].mxu0 }
 0x14c   :  { %521 = vst.msk [vmem:[#allocation12 + $0x50] sm:$0xff] %vm494_vm2, %v488_v3  ;;  %v680_v5 = vpop.f32.mrb[12].mxu1  ;;  %v320_v6 = vadd.f32 %v654_v4, %v996_v18  ;;  %v282_v8 = vpop.f32.mrb[13].mxu0 }
 0x14d   :  { %v491_v7 = vadd.f32 %v680_v5, %v998_v19  ;;  %v453_v9 = vpop.f32.mrb[13].mxu1  ;;  %v319_v10 = vadd.f32 %v996_v18, %v282_v8 }
 0x14e   :  { %v490_v11 = vadd.f32 %v998_v19, %v453_v9  ;;  %508 = vst.msk [vmem:[#allocation11 + $0x68] sm:$0xff] %vm494_vm2, %v320_v6 }
 0x14f   :  { %524 = vst.msk [vmem:[#allocation12 + $0x68] sm:$0xff] %vm494_vm2, %v491_v7  ;;  %507 = vst.msk [vmem:[#allocation11 + $0x60] sm:$0xff] %vm494_vm2, %v319_v10  ;;  %v657_v12 = vpop.f32.mrb[14].mxu0 }
 0x150   :  { %523 = vst.msk [vmem:[#allocation12 + $0x60] sm:$0xff] %vm494_vm2, %v490_v11  ;;  %v683_v13 = vpop.f32.mrb[14].mxu1  ;;  %v322_v14 = vadd.f32 %v657_v12, %v996_v18  ;;  %v292_v16 = vpop.f32.mrb[15].mxu0 }
 0x151   :  { %v493_v15 = vadd.f32 %v683_v13, %v998_v19  ;;  %v463_v17 = vpop.f32.mrb[15].mxu1  ;;  %v321_v20 = vadd.f32 %v996_v18, %v292_v16 }
 0x152   :  { %v492_v21 = vadd.f32 %v998_v19, %v463_v17  ;;  %510 = vst.msk [vmem:[#allocation11 + $0x78] sm:$0xff] %vm494_vm2, %v322_v14 }
 0x153   :  { %526 = vst.msk [vmem:[#allocation12 + $0x78] sm:$0xff] %vm494_vm2, %v493_v15  ;;  %509 = vst.msk [vmem:[#allocation11 + $0x70] sm:$0xff] %vm494_vm2, %v321_v20 }
 0x154   :  { %525 = vst.msk [vmem:[#allocation12 + $0x70] sm:$0xff] %vm494_vm2, %v492_v21 }
 0x155   :  { %814 = shalt.err (!%p811_p2)
}
 0x156   :  { %s815_s15 = scalar_lea.hbm %s1106_s5, 2048 }
 0x157   :  { %p816_p3 = scmp.ne.s32.totalorder %s1106_s5, %s815_s15  ;;  %p819_p4 = scmp.lt.u32.totalorder %s815_s15, %s1106_s5 }
 0x159   :  { %p821_p5 = pnand %p819_p4, %p816_p3 }
 0x15b   :  { %824 = shalt.err (!%p821_p5)
}
 0x15c   :  { %538 = dma.vmem_to_hbm [thread:$0]  %s533_s9, 2048, %s1106_s5, [#allocation4], %s860_s3, %s860_s3, %s861_s24  }
 0x15d   :  { %s825_s20 = scalar_lea.vmem %s1062_s11, 2048  ;;  %p830_p7 = scmp.lt.s32.totalorder %s1062_s11, %s1062_s11 }
 0x15e   :  { %p826_p6 = scmp.ne.s32.totalorder %s1062_s11, %s825_s20  ;;  %p831_p8 = scmp.lt.s32.totalorder %s825_s20, %s825_s20 }
 0x160   :  { %p832_p9 = por %p831_p8, %p830_p7 }
 0x162   :  { %p833_p10 = pnand %p832_p9, %p826_p6 }
 0x164   :  { %836 = shalt.err (!%p833_p10)
}
 0x165   :  { %s837_s23 = scalar_lea.hbm %s1107_s6, 2048 }
 0x166   :  { %p838_p11 = scmp.ne.s32.totalorder %s1107_s6, %s837_s23  ;;  %p841_p12 = scmp.lt.u32.totalorder %s837_s23, %s1107_s6 }
 0x168   :  { %p843_p13 = pnand %p841_p12, %p838_p11 }
 0x16a   :  { %846 = shalt.err (!%p843_p13)
}
 0x16b   :  { %550 = dma.vmem_to_hbm [thread:$0]  %s1062_s11, 2048, %s1107_s6, [#allocation13], %s860_s3, %s860_s3, %s861_s24  }
 0x16c   :  { %853 = dma.done.wait [#allocation4], 2048  }
 0x16d   :  { %854 = vsyncadd [#allocation4], 4294965248 }
 0x16e   :  { %855 = dma.done.wait [#allocation13], 2048  }
 0x16f   :  { %856 = vsyncadd [#allocation13], 4294965248 }
 0x170   :  { %557 = vsyncpa [#allocation3], 1 }
 0x171   :  { %558 = vsyncpa [#allocation6], 1 }
 0x172   :  { %559 = vsyncpa [#allocation9], 1 }
 0x173   :  { %560 = vsyncpa [#allocation4], 1 }
 0x174   :  { %561 = vsyncpa [#allocation13], 1 }

// kernel: jnf_ssf_forward.7
= control target key start
LH: loop header
LB: loop body
LE: loop exit
PB: predicated region body
PF: predicated region fallthrough
CT: control target
= control target key end

     0   :  { %15 = vsyncpa [#allocation3], 0  ;;  %s1945_s0 = inlined_call_operand.hbm [shape: f32[128,16], index: 0, kind: input, shape index: {}]   ;;  %s1946_s1 = inlined_call_operand.hbm [shape: f32[128,16], index: 1, kind: input, shape index: {}]   ;;  %s1947_s2 = inlined_call_operand.hbm [shape: f32[16,64], index: 2, kind: input, shape index: {}]   ;;  %s1948_s3 = inlined_call_operand.hbm [shape: f32[16,64], index: 3, kind: input, shape index: {}]   ;;  %s1949_s4 = inlined_call_operand.hbm [shape: f32[16,64], index: 4, kind: input, shape index: {}]   ;;  %s1950_s5 = inlined_call_operand.hbm [shape: f32[16,64], index: 5, kind: input, shape index: {}]   ;;  %s1951_s6 = inlined_call_operand.hbm [shape: f32[1,64], index: 6, kind: input, shape index: {}]   ;;  %s1952_s7 = inlined_call_operand.hbm [shape: f32[1,64], index: 7, kind: input, shape index: {}]   ;;  %s1953_s8 = inlined_call_operand.hbm [shape: f32[128,64], index: 8, kind: output, shape index: {0}]   ;;  %s1954_s9 = inlined_call_operand.hbm [shape: f32[128,64], index: 9, kind: output, shape index: {1}]  }
   0x1   :  { %16 = vsyncpa [#allocation6], 0 }
   0x2   :  { %17 = vsyncpa [#allocation9], 0 }
   0x3   :  { %18 = vsyncpa [#allocation12], 0 }
   0x4   :  { %19 = vsyncpa [#allocation15], 0 }
   0x5   :  { %20 = vsyncpa [#allocation4], 0 }
   0x6   :  { %21 = vsyncpa [#allocation18], 0  ;;  %s1579_s30 = smov [#allocation5]   ;;  %s1580_s11 = smov [#allocation8]  }
   0x7   :  { %s39_s10 = sshll.u32 %s1579_s30, 4  ;;  %s63_s12 = sshll.u32 %s1580_s11, 4  ;;  %s40_s10 = int_to_ptr.vmem [resolvable:$true] %s39_s10  ;;  %s1641_s12 = int_to_ptr.vmem [resolvable:$true] %s63_s12 }
   0x8   :  { %s1345_s15 = scalar_lea.hbm %s1946_s1, 2048 }
   0x9   :  { %p1346_p0 = scmp.ne.s32.totalorder %s1946_s1, %s1345_s15  ;;  %p1349_p1 = scmp.lt.u32.totalorder %s1345_s15, %s1946_s1 }
   0xb   :  { %p1351_p2 = pnand %p1349_p1, %p1346_p0 }
   0xd   :  { %1354 = shalt.err (!%p1351_p2)
}
   0xe   :  { %s1355_s20 = scalar_lea.vmem %s40_s10, 2048  ;;  %p1360_p4 = scmp.lt.s32.totalorder %s40_s10, %s40_s10 }
   0xf   :  { %p1356_p3 = scmp.ne.s32.totalorder %s40_s10, %s1355_s20  ;;  %p1361_p5 = scmp.lt.s32.totalorder %s1355_s20, %s1355_s20 }
  0x11   :  { %p1362_p6 = por %p1361_p5, %p1360_p4 }
  0x13   :  { %p1363_p7 = pnand %p1362_p6, %p1356_p3 }
  0x15   :  { %1366 = shalt.err (!%p1363_p7)
}
  0x16   :  { %s1581_s21 = smov 128   ;;  %s1582_s22 = smov 8  }
  0x17   :  { %45 = dma.hbm_to_vmem [thread:$0]  %s1946_s1, 2048, %s40_s10, [#allocation6], %s1581_s21, %s1581_s21, %s1582_s22  }
  0x18   :  { %s1367_s27 = scalar_lea.hbm %s1948_s3, 256 }
  0x19   :  { %p1368_p8 = scmp.ne.s32.totalorder %s1948_s3, %s1367_s27  ;;  %p1371_p9 = scmp.lt.u32.totalorder %s1367_s27, %s1948_s3 }
  0x1b   :  { %p1373_p10 = pnand %p1371_p9, %p1368_p8 }
  0x1d   :  { %1376 = shalt.err (!%p1373_p10)
}
  0x1e   :  { %s1377_s13 = scalar_lea.vmem %s1641_s12, 256  ;;  %p1382_p12 = scmp.lt.s32.totalorder %s1641_s12, %s1641_s12 }
  0x1f   :  { %p1378_p11 = scmp.ne.s32.totalorder %s1641_s12, %s1377_s13  ;;  %p1383_p13 = scmp.lt.s32.totalorder %s1377_s13, %s1377_s13 }
  0x21   :  { %p1384_p0 = por %p1383_p13, %p1382_p12 }
  0x23   :  { %p1385_p1 = pnand %p1384_p0, %p1378_p11 }
  0x25   :  { %1388 = shalt.err (!%p1385_p1)
}
  0x26   :  { %69 = dma.hbm_to_vmem [thread:$0]  %s1948_s3, 256, %s1641_s12, [#allocation9], %s1581_s21, %s1581_s21, %s1582_s22  }
  0x27   :  { %s1583_s14 = smov [#allocation11]   ;;  %s1584_s16 = smov [#allocation2]  }
  0x28   :  { %s87_s15 = sshll.u32 %s1583_s14, 4  ;;  %s27_s17 = sshll.u32 %s1584_s16, 4  ;;  %s88_s15 = int_to_ptr.vmem [resolvable:$true] %s87_s15  ;;  %s1678_s17 = int_to_ptr.vmem [resolvable:$true] %s27_s17 }
  0x29   :  { %s1389_s20 = scalar_lea.hbm %s1950_s5, 256 }
  0x2a   :  { %p1390_p2 = scmp.ne.s32.totalorder %s1950_s5, %s1389_s20  ;;  %p1393_p3 = scmp.lt.u32.totalorder %s1389_s20, %s1950_s5 }
  0x2c   :  { %p1395_p4 = pnand %p1393_p3, %p1390_p2 }
  0x2e   :  { %1398 = shalt.err (!%p1395_p4)
}
  0x2f   :  { %s1399_s3 = scalar_lea.vmem %s88_s15, 256  ;;  %p1404_p6 = scmp.lt.s32.totalorder %s88_s15, %s88_s15 }
  0x30   :  { %p1400_p5 = scmp.ne.s32.totalorder %s88_s15, %s1399_s3  ;;  %p1405_p7 = scmp.lt.s32.totalorder %s1399_s3, %s1399_s3 }
  0x32   :  { %p1406_p8 = por %p1405_p7, %p1404_p6 }
  0x34   :  { %p1407_p9 = pnand %p1406_p8, %p1400_p5 }
  0x36   :  { %1410 = shalt.err (!%p1407_p9)
}
  0x37   :  { %93 = dma.hbm_to_vmem [thread:$0]  %s1950_s5, 256, %s88_s15, [#allocation12], %s1581_s21, %s1581_s21, %s1582_s22  }
  0x38   :  { %s1411_s30 = scalar_lea.hbm %s1945_s0, 2048 }
  0x39   :  { %p1412_p10 = scmp.ne.s32.totalorder %s1945_s0, %s1411_s30  ;;  %p1415_p11 = scmp.lt.u32.totalorder %s1411_s30, %s1945_s0 }
  0x3b   :  { %p1417_p12 = pnand %p1415_p11, %p1412_p10 }
  0x3d   :  { %1420 = shalt.err (!%p1417_p12)
}
  0x3e   :  { %s1421_s14 = scalar_lea.vmem %s1678_s17, 2048  ;;  %p1426_p0 = scmp.lt.s32.totalorder %s1678_s17, %s1678_s17 }
  0x3f   :  { %p1422_p13 = scmp.ne.s32.totalorder %s1678_s17, %s1421_s14  ;;  %p1427_p1 = scmp.lt.s32.totalorder %s1421_s14, %s1421_s14 }
  0x41   :  { %p1428_p2 = por %p1427_p1, %p1426_p0 }
  0x43   :  { %p1429_p3 = pnand %p1428_p2, %p1422_p13 }
  0x45   :  { %1432 = shalt.err (!%p1429_p3)
}
  0x46   :  { %33 = dma.hbm_to_vmem [thread:$0]  %s1945_s0, 2048, %s1678_s17, [#allocation3], %s1581_s21, %s1581_s21, %s1582_s22  }
  0x47   :  { %s1585_s16 = smov [#allocation7]   ;;  %s1586_s19 = smov [#allocation10]  }
  0x48   :  { %s51_s18 = sshll.u32 %s1585_s16, 4  ;;  %s75_s20 = sshll.u32 %s1586_s19, 4  ;;  %s52_s18 = int_to_ptr.vmem [resolvable:$true] %s51_s18  ;;  %s1715_s20 = int_to_ptr.vmem [resolvable:$true] %s75_s20 }
  0x49   :  { %s1433_s25 = scalar_lea.hbm %s1947_s2, 256 }
  0x4a   :  { %p1434_p4 = scmp.ne.s32.totalorder %s1947_s2, %s1433_s25  ;;  %p1437_p5 = scmp.lt.u32.totalorder %s1433_s25, %s1947_s2 }
  0x4c   :  { %p1439_p6 = pnand %p1437_p5, %p1434_p4 }
  0x4e   :  { %1442 = shalt.err (!%p1439_p6)
}
  0x4f   :  { %s1443_s0 = scalar_lea.vmem %s52_s18, 256  ;;  %p1448_p8 = scmp.lt.s32.totalorder %s52_s18, %s52_s18 }
  0x50   :  { %p1444_p7 = scmp.ne.s32.totalorder %s52_s18, %s1443_s0  ;;  %p1449_p9 = scmp.lt.s32.totalorder %s1443_s0, %s1443_s0 }
  0x52   :  { %p1450_p10 = por %p1449_p9, %p1448_p8 }
  0x54   :  { %p1451_p11 = pnand %p1450_p10, %p1444_p7 }
  0x56   :  { %1454 = shalt.err (!%p1451_p11)
}
  0x57   :  { %57 = dma.hbm_to_vmem [thread:$0]  %s1947_s2, 256, %s52_s18, [#allocation6], %s1581_s21, %s1581_s21, %s1582_s22  }
  0x58   :  { %s1455_s11 = scalar_lea.hbm %s1949_s4, 256 }
  0x59   :  { %p1456_p12 = scmp.ne.s32.totalorder %s1949_s4, %s1455_s11  ;;  %p1459_p13 = scmp.lt.u32.totalorder %s1455_s11, %s1949_s4 }
  0x5b   :  { %p1461_p0 = pnand %p1459_p13, %p1456_p12 }
  0x5d   :  { %1464 = shalt.err (!%p1461_p0)
}
  0x5e   :  { %s1465_s5 = scalar_lea.vmem %s1715_s20, 256  ;;  %p1470_p2 = scmp.lt.s32.totalorder %s1715_s20, %s1715_s20 }
  0x5f   :  { %p1466_p1 = scmp.ne.s32.totalorder %s1715_s20, %s1465_s5  ;;  %p1471_p3 = scmp.lt.s32.totalorder %s1465_s5, %s1465_s5 }
  0x61   :  { %p1472_p4 = por %p1471_p3, %p1470_p2 }
  0x63   :  { %p1473_p5 = pnand %p1472_p4, %p1466_p1 }
  0x65   :  { %1476 = shalt.err (!%p1473_p5)
}
  0x66   :  { %81 = dma.hbm_to_vmem [thread:$0]  %s1949_s4, 256, %s1715_s20, [#allocation9], %s1581_s21, %s1581_s21, %s1582_s22  }
  0x67   :  { %s1587_s16 = smov [#allocation13]   ;;  %s1588_s19 = smov [#allocation14]  }
  0x68   :  { %s100_s18 = sshll.u32 %s1587_s16, 4  ;;  %s110_s23 = sshll.u32 %s1588_s19, 4  ;;  %s101_s18 = int_to_ptr.vmem [resolvable:$true] %s100_s18  ;;  %s111_s23 = int_to_ptr.vmem [resolvable:$true] %s110_s23 }
  0x69   :  { %s1477_s26 = scalar_lea.hbm %s1951_s6, 16 }
  0x6a   :  { %p1478_p6 = scmp.ne.s32.totalorder %s1951_s6, %s1477_s26  ;;  %p1481_p7 = scmp.lt.u32.totalorder %s1477_s26, %s1951_s6 }
  0x6c   :  { %p1483_p8 = pnand %p1481_p7, %p1478_p6 }
  0x6e   :  { %1486 = shalt.err (!%p1483_p8)
}
  0x6f   :  { %s1487_s4 = scalar_lea.vmem %s101_s18, 16  ;;  %s1491_s20 = scalar_lea.vmem %s101_s18, 32 }
  0x70   :  { %p1488_p9 = scmp.ne.s32.totalorder %s101_s18, %s1487_s4  ;;  %p1492_p10 = scmp.lt.s32.totalorder %s101_s18, %s101_s18 }
  0x71   :  { %p1493_p11 = scmp.lt.s32.totalorder %s1491_s20, %s1487_s4 }
  0x73   :  { %p1494_p12 = por %p1493_p11, %p1492_p10 }
  0x75   :  { %p1495_p13 = pnand %p1494_p12, %p1488_p9 }
  0x77   :  { %1498 = shalt.err (!%p1495_p13)
}
  0x78   :  { %103 = dma.hbm_to_vmem [thread:$0]  %s1951_s6, 16, %s101_s18, [#allocation12]  }
  0x79   :  { %s1499_s11 = scalar_lea.hbm %s1952_s7, 16 }
  0x7a   :  { %p1500_p0 = scmp.ne.s32.totalorder %s1952_s7, %s1499_s11  ;;  %p1503_p1 = scmp.lt.u32.totalorder %s1499_s11, %s1952_s7 }
  0x7c   :  { %p1505_p2 = pnand %p1503_p1, %p1500_p0 }
  0x7e   :  { %1508 = shalt.err (!%p1505_p2)
}
  0x7f   :  { %s1509_s5 = scalar_lea.vmem %s111_s23, 16  ;;  %s1513_s2 = scalar_lea.vmem %s111_s23, 32 }
  0x80   :  { %p1510_p3 = scmp.ne.s32.totalorder %s111_s23, %s1509_s5  ;;  %p1514_p4 = scmp.lt.s32.totalorder %s111_s23, %s111_s23 }
  0x81   :  { %p1515_p5 = scmp.lt.s32.totalorder %s1513_s2, %s1509_s5 }
  0x83   :  { %p1516_p6 = por %p1515_p5, %p1514_p4 }
  0x85   :  { %p1517_p7 = pnand %p1516_p6, %p1510_p3 }
  0x87   :  { %1520 = shalt.err (!%p1517_p7)
}
  0x88   :  { %113 = dma.hbm_to_vmem [thread:$0]  %s1952_s7, 16, %s111_s23, [#allocation15]  }
  0x89   :  { %1565 = dma.done.wait [#allocation3], 2048  }
  0x8a   :  { %1566 = vsyncadd [#allocation3], 4294965248 }
  0x8b   :  { %1567 = dma.done.wait [#allocation6], 2304  }
  0x8c   :  { %1568 = vsyncadd [#allocation6], 4294964992 }
  0x8d   :  { %1569 = dma.done.wait [#allocation9], 512  }
  0x8e   :  { %1570 = vsyncadd [#allocation9], 4294966784 }
  0x8f   :  { %1571 = dma.done.wait [#allocation12], 272  }
  0x90   :  { %1572 = vsyncadd [#allocation12], 4294967024 }
  0x91   :  { %1573 = dma.done.wait [#allocation15], 16  }
  0x92   :  { %1574 = vsyncadd [#allocation15], 4294967280  ;;  %vm158_vm0 = vcmask 130048   ;;  %v156_v0 = vld [vmem:[#allocation7] sm:$0xff]  ;;  %v157_v1 = vld [vmem:[#allocation7 + $0x8] sm:$0xff]  ;;  %vm933_vm1 = vcmask 523264  }
  0x93   :  { %v374_v2 = vld [vmem:[#allocation10] sm:$0xff]  ;;  %v1253_v3 = vpack.c.bf16 %v157_v1, %v156_v0  ;;  %v375_v4 = vld [vmem:[#allocation10 + $0x8] sm:$0xff]  ;;  %v559_v7 = vld [vmem:[#allocation8] sm:$0xff]  ;;  %s1589_s7 = smov [#allocation16]   ;;  %s1590_s18 = smov [#allocation17]  }
  0x94   :  { %v140_v5 = vld [vmem:[#allocation2] sm:$0xff]  ;;  %v1257_v6 = vpack.c.bf16 %v375_v4, %v374_v2  ;;  %v560_v8 = vld [vmem:[#allocation8 + $0x8] sm:$0xff]  ;;  %v770_v9 = vld [vmem:[#allocation11] sm:$0xff]  ;;  %s971_s16 = sshll.u32 %s1589_s7, 4  ;;  %s983_s19 = sshll.u32 %s1590_s18, 4  ;;  %s972_s16 = int_to_ptr.vmem [resolvable:$true] %s971_s16  ;;  %s1905_s19 = int_to_ptr.vmem [resolvable:$true] %s983_s19 }
  0x95   :  { %1145 = vmatprep.mubr.msk.f32.mxu0 %vm158_vm0, %v140_v5  ;;  %1173 = vmatprep.mubr.msk.f32.mxu1 %vm158_vm0, %v140_v5  ;;  %v1261_v10 = vpack.c.bf16 %v560_v8, %v559_v7  ;;  %v771_v11 = vld [vmem:[#allocation11 + $0x8] sm:$0xff]  ;;  %v141_v12 = vld [vmem:[#allocation2 + $0x8] sm:$0xff]  ;;  %v142_v14 = vld [vmem:[#allocation2 + $0x10] sm:$0xff]  ;;  %s1521_s23 = scalar_lea.vmem %s972_s16, 2048  ;;  %p1526_p9 = scmp.lt.s32.totalorder %s972_s16, %s972_s16 }
  0x96   :  { %1254 = vmatprep.subr.bf16.mxu0 %v1253_v3  ;;  %1258 = vmatprep.subr.bf16.mxu1 %v1257_v6  ;;  %v1265_v13 = vpack.c.bf16 %v771_v11, %v770_v9  ;;  %v143_v15 = vld [vmem:[#allocation2 + $0x18] sm:$0xff]  ;;  %v144_v16 = vld [vmem:[#allocation2 + $0x20] sm:$0xff]  ;;  %v145_v17 = vld [vmem:[#allocation2 + $0x28] sm:$0xff]  ;;  %p1522_p8 = scmp.ne.s32.totalorder %s972_s16, %s1521_s23  ;;  %p1527_p10 = scmp.lt.s32.totalorder %s1521_s23, %s1521_s23 }
  0x97   :  { %1256 = vmatpush3.bf16.msra.mxu0 %v1253_v3  ;;  %1260 = vmatpush3.bf16.msra.mxu1 %v1257_v6  ;;  %v146_v18 = vld [vmem:[#allocation2 + $0x30] sm:$0xff]  ;;  %v147_v19 = vld [vmem:[#allocation2 + $0x38] sm:$0xff]  ;;  %v148_v20 = vld [vmem:[#allocation2 + $0x40] sm:$0xff] }
  0x98   :  { %1262 = vmatprep.subr.bf16.mxu0 %v1261_v10  ;;  %1266 = vmatprep.subr.bf16.mxu1 %v1265_v13  ;;  %v149_v21 = vld [vmem:[#allocation2 + $0x48] sm:$0xff]  ;;  %v150_v22 = vld [vmem:[#allocation2 + $0x50] sm:$0xff]  ;;  %v151_v23 = vld [vmem:[#allocation2 + $0x58] sm:$0xff]  ;;  %p1528_p11 = por %p1527_p10, %p1526_p9 }
  0x99   :  { %v152_v24 = vld [vmem:[#allocation2 + $0x60] sm:$0xff]  ;;  %v153_v25 = vld [vmem:[#allocation2 + $0x68] sm:$0xff]  ;;  %v154_v26 = vld [vmem:[#allocation2 + $0x70] sm:$0xff] }
  0x9a   :  { %1146 = vmatmul.mubr.msk.f32.vlgmr.msra.gmra.mrb[0].mxu0 %vm158_vm0, %v141_v12  ;;  %1174 = vmatmul.mubr.msk.f32.vlgmr.msra.gmra.mrb[0].mxu1 %vm158_vm0, %v141_v12  ;;  %v155_v27 = vld [vmem:[#allocation2 + $0x78] sm:$0xff]  ;;  %v543_v28 = vld [vmem:[#allocation5] sm:$0xff]  ;;  %v544_v29 = vld [vmem:[#allocation5 + $0x8] sm:$0xff]  ;;  %p1529_p12 = pnand %p1528_p11, %p1522_p8 }
  0x9b   :  { %1264 = vmatpush3.bf16.msra.mxu0 %v1261_v10  ;;  %1268 = vmatpush3.bf16.msra.mxu1 %v1265_v13  ;;  %v545_v30 = vld [vmem:[#allocation5 + $0x10] sm:$0xff]  ;;  %v546_v31 = vld [vmem:[#allocation5 + $0x18] sm:$0xff]  ;;  %v547_v32 = vld [vmem:[#allocation5 + $0x20] sm:$0xff] }
  0x9c   :  { %1148 = vmatprep.mubr.msk.f32.mxu0 %vm158_vm0, %v142_v14  ;;  %1176 = vmatprep.mubr.msk.f32.mxu1 %vm158_vm0, %v142_v14  ;;  %v548_v33 = vld [vmem:[#allocation5 + $0x28] sm:$0xff]  ;;  %v549_v34 = vld [vmem:[#allocation5 + $0x30] sm:$0xff]  ;;  %v550_v35 = vld [vmem:[#allocation5 + $0x38] sm:$0xff] }
  0x9d   :  { %v551_v36 = vld [vmem:[#allocation5 + $0x40] sm:$0xff]  ;;  %v552_v37 = vld [vmem:[#allocation5 + $0x48] sm:$0xff]  ;;  %v553_v38 = vld [vmem:[#allocation5 + $0x50] sm:$0xff] }
  0x9e   :  { %1149 = vmatmul.mubr.msk.f32.gmra.mrb[2].mxu0 %vm158_vm0, %v143_v15  ;;  %1177 = vmatmul.mubr.msk.f32.gmra.mrb[2].mxu1 %vm158_vm0, %v143_v15  ;;  %v554_v39 = vld [vmem:[#allocation5 + $0x58] sm:$0xff]  ;;  %v555_v40 = vld [vmem:[#allocation5 + $0x60] sm:$0xff]  ;;  %v556_v41 = vld [vmem:[#allocation5 + $0x68] sm:$0xff] }
  0x9f   :  { %1151 = vmatprep.mubr.msk.f32.mxu0 %vm158_vm0, %v144_v16  ;;  %1179 = vmatprep.mubr.msk.f32.mxu1 %vm158_vm0, %v144_v16  ;;  %v557_v42 = vld [vmem:[#allocation5 + $0x70] sm:$0xff]  ;;  %v558_v43 = vld [vmem:[#allocation5 + $0x78] sm:$0xff]  ;;  %v1840_v44 = vld [vmem:[#allocation13] ss:$0 sm:$0xff] }
  0xa0   :  { %v1842_v45 = vld [vmem:[#allocation14] ss:$0 sm:$0xff] }
  0xa2   :  { %1152 = vmatmul.mubr.msk.f32.gmra.mrb[4].mxu0 %vm158_vm0, %v145_v17  ;;  %1180 = vmatmul.mubr.msk.f32.gmra.mrb[4].mxu1 %vm158_vm0, %v145_v17 }
  0xa3   :  { %1154 = vmatprep.mubr.msk.f32.mxu0 %vm158_vm0, %v146_v18  ;;  %1182 = vmatprep.mubr.msk.f32.mxu1 %vm158_vm0, %v146_v18 }
  0xa6   :  { %1155 = vmatmul.mubr.msk.f32.gmra.mrb[6].mxu0 %vm158_vm0, %v147_v19  ;;  %1183 = vmatmul.mubr.msk.f32.gmra.mrb[6].mxu1 %vm158_vm0, %v147_v19 }
  0xa7   :  { %1157 = vmatprep.mubr.msk.f32.mxu0 %vm158_vm0, %v148_v20  ;;  %1185 = vmatprep.mubr.msk.f32.mxu1 %vm158_vm0, %v148_v20 }
  0xaa   :  { %1158 = vmatmul.mubr.msk.f32.gmra.mrb[8].mxu0 %vm158_vm0, %v149_v21  ;;  %1186 = vmatmul.mubr.msk.f32.gmra.mrb[8].mxu1 %vm158_vm0, %v149_v21 }
  0xab   :  { %1160 = vmatprep.mubr.msk.f32.mxu0 %vm158_vm0, %v150_v22  ;;  %1188 = vmatprep.mubr.msk.f32.mxu1 %vm158_vm0, %v150_v22 }
  0xae   :  { %1161 = vmatmul.mubr.msk.f32.gmra.mrb[10].mxu0 %vm158_vm0, %v151_v23  ;;  %1189 = vmatmul.mubr.msk.f32.gmra.mrb[10].mxu1 %vm158_vm0, %v151_v23 }
  0xaf   :  { %1163 = vmatprep.mubr.msk.f32.mxu0 %vm158_vm0, %v152_v24  ;;  %1191 = vmatprep.mubr.msk.f32.mxu1 %vm158_vm0, %v152_v24 }
  0xb2   :  { %1164 = vmatmul.mubr.msk.f32.gmra.mrb[12].mxu0 %vm158_vm0, %v153_v25  ;;  %1192 = vmatmul.mubr.msk.f32.gmra.mrb[12].mxu1 %vm158_vm0, %v153_v25 }
  0xb3   :  { %1166 = vmatprep.mubr.msk.f32.mxu0 %vm158_vm0, %v154_v26  ;;  %1194 = vmatprep.mubr.msk.f32.mxu1 %vm158_vm0, %v154_v26 }
  0xb6   :  { %1167 = vmatmul.mubr.msk.f32.gmra.mrb[14].mxu0 %vm158_vm0, %v155_v27  ;;  %1195 = vmatmul.mubr.msk.f32.gmra.mrb[14].mxu1 %vm158_vm0, %v155_v27 }
  0xb7   :  { %1201 = vmatprep.mubr.msk.f32.mxu0 %vm158_vm0, %v543_v28  ;;  %1229 = vmatprep.mubr.msk.f32.mxu1 %vm158_vm0, %v543_v28 }
  0xba   :  { %1202 = vmatmul.mubr.msk.f32.vlgmr.msra.gmra.mrb[0].mxu0 %vm158_vm0, %v544_v29  ;;  %1230 = vmatmul.mubr.msk.f32.vlgmr.msra.gmra.mrb[0].mxu1 %vm158_vm0, %v544_v29 }
  0xbb   :  { %1204 = vmatprep.mubr.msk.f32.mxu0 %vm158_vm0, %v545_v30  ;;  %1232 = vmatprep.mubr.msk.f32.mxu1 %vm158_vm0, %v545_v30 }
  0xbe   :  { %1205 = vmatmul.mubr.msk.f32.gmra.mrb[2].mxu0 %vm158_vm0, %v546_v31  ;;  %1233 = vmatmul.mubr.msk.f32.gmra.mrb[2].mxu1 %vm158_vm0, %v546_v31 }
  0xbf   :  { %1207 = vmatprep.mubr.msk.f32.mxu0 %vm158_vm0, %v547_v32  ;;  %1235 = vmatprep.mubr.msk.f32.mxu1 %vm158_vm0, %v547_v32 }
  0xc2   :  { %1208 = vmatmul.mubr.msk.f32.gmra.mrb[4].mxu0 %vm158_vm0, %v548_v33  ;;  %1236 = vmatmul.mubr.msk.f32.gmra.mrb[4].mxu1 %vm158_vm0, %v548_v33 }
  0xc3   :  { %1210 = vmatprep.mubr.msk.f32.mxu0 %vm158_vm0, %v549_v34  ;;  %1238 = vmatprep.mubr.msk.f32.mxu1 %vm158_vm0, %v549_v34 }
  0xc6   :  { %1211 = vmatmul.mubr.msk.f32.gmra.mrb[6].mxu0 %vm158_vm0, %v550_v35  ;;  %1239 = vmatmul.mubr.msk.f32.gmra.mrb[6].mxu1 %vm158_vm0, %v550_v35 }
  0xc7   :  { %1213 = vmatprep.mubr.msk.f32.mxu0 %vm158_vm0, %v551_v36  ;;  %1241 = vmatprep.mubr.msk.f32.mxu1 %vm158_vm0, %v551_v36 }
  0xca   :  { %1214 = vmatmul.mubr.msk.f32.gmra.mrb[8].mxu0 %vm158_vm0, %v552_v37  ;;  %1242 = vmatmul.mubr.msk.f32.gmra.mrb[8].mxu1 %vm158_vm0, %v552_v37 }
  0xcb   :  { %1216 = vmatprep.mubr.msk.f32.mxu0 %vm158_vm0, %v553_v38  ;;  %1244 = vmatprep.mubr.msk.f32.mxu1 %vm158_vm0, %v553_v38 }
  0xce   :  { %1217 = vmatmul.mubr.msk.f32.gmra.mrb[10].mxu0 %vm158_vm0, %v554_v39  ;;  %1245 = vmatmul.mubr.msk.f32.gmra.mrb[10].mxu1 %vm158_vm0, %v554_v39 }
  0xcf   :  { %1219 = vmatprep.mubr.msk.f32.mxu0 %vm158_vm0, %v555_v40  ;;  %1247 = vmatprep.mubr.msk.f32.mxu1 %vm158_vm0, %v555_v40 }
  0xd2   :  { %1220 = vmatmul.mubr.msk.f32.gmra.mrb[12].mxu0 %vm158_vm0, %v556_v41  ;;  %1248 = vmatmul.mubr.msk.f32.gmra.mrb[12].mxu1 %vm158_vm0, %v556_v41 }
  0xd3   :  { %1222 = vmatprep.mubr.msk.f32.mxu0 %vm158_vm0, %v557_v42  ;;  %1250 = vmatprep.mubr.msk.f32.mxu1 %vm158_vm0, %v557_v42 }
  0xd6   :  { %1223 = vmatmul.mubr.msk.f32.gmra.mrb[14].mxu0 %vm158_vm0, %v558_v43  ;;  %1251 = vmatmul.mubr.msk.f32.gmra.mrb[14].mxu1 %vm158_vm0, %v558_v43 }
 0x18d   :  { %v1203_v46 = vpop.f32.mrb[0].mxu0  ;;  %v1231_v48 = vpop.f32.mrb[0].mxu1 }
 0x18e   :  { %v1269_v47 = vadd.f32 %v1203_v46, %v1840_v44  ;;  %v675_v49 = vpop.f32.mrb[1].mxu0  ;;  %v1285_v50 = vadd.f32 %v1231_v48, %v1842_v45  ;;  %v838_v52 = vpop.f32.mrb[1].mxu1 }
 0x18f   :  { %v1270_v51 = vadd.f32 %v1840_v44, %v675_v49  ;;  %v1286_v53 = vadd.f32 %v1842_v45, %v838_v52 }
 0x190   :  { %935 = vst.msk [vmem:[#allocation16 + $0x8] sm:$0xff] %vm933_vm1, %v1269_v47  ;;  %951 = vst.msk [vmem:[#allocation17 + $0x8] sm:$0xff] %vm933_vm1, %v1285_v50 }
 0x191   :  { %934 = vst.msk [vmem:[#allocation16] sm:$0xff] %vm933_vm1, %v1270_v51  ;;  %v1206_v54 = vpop.f32.mrb[2].mxu0  ;;  %950 = vst.msk [vmem:[#allocation17] sm:$0xff] %vm933_vm1, %v1286_v53  ;;  %v1234_v56 = vpop.f32.mrb[2].mxu1 }
 0x192   :  { %v1271_v55 = vadd.f32 %v1206_v54, %v1840_v44  ;;  %v685_v57 = vpop.f32.mrb[3].mxu0  ;;  %v1287_v58 = vadd.f32 %v1234_v56, %v1842_v45  ;;  %v848_v60 = vpop.f32.mrb[3].mxu1 }
 0x193   :  { %v1272_v59 = vadd.f32 %v1840_v44, %v685_v57  ;;  %v1288_v61 = vadd.f32 %v1842_v45, %v848_v60 }
 0x194   :  { %937 = vst.msk [vmem:[#allocation16 + $0x18] sm:$0xff] %vm933_vm1, %v1271_v55  ;;  %953 = vst.msk [vmem:[#allocation17 + $0x18] sm:$0xff] %vm933_vm1, %v1287_v58 }
 0x195   :  { %936 = vst.msk [vmem:[#allocation16 + $0x10] sm:$0xff] %vm933_vm1, %v1272_v59  ;;  %v1209_v62 = vpop.f32.mrb[4].mxu0  ;;  %952 = vst.msk [vmem:[#allocation17 + $0x10] sm:$0xff] %vm933_vm1, %v1288_v61  ;;  %v1237_v0 = vpop.f32.mrb[4].mxu1 }
 0x196   :  { %v1273_v63 = vadd.f32 %v1209_v62, %v1840_v44  ;;  %v695_v1 = vpop.f32.mrb[5].mxu0  ;;  %v1289_v2 = vadd.f32 %v1237_v0, %v1842_v45  ;;  %v858_v4 = vpop.f32.mrb[5].mxu1 }
 0x197   :  { %v1274_v3 = vadd.f32 %v1840_v44, %v695_v1  ;;  %v1290_v5 = vadd.f32 %v1842_v45, %v858_v4 }
 0x198   :  { %939 = vst.msk [vmem:[#allocation16 + $0x28] sm:$0xff] %vm933_vm1, %v1273_v63  ;;  %955 = vst.msk [vmem:[#allocation17 + $0x28] sm:$0xff] %vm933_vm1, %v1289_v2 }
 0x199   :  { %938 = vst.msk [vmem:[#allocation16 + $0x20] sm:$0xff] %vm933_vm1, %v1274_v3  ;;  %v1212_v6 = vpop.f32.mrb[6].mxu0  ;;  %954 = vst.msk [vmem:[#allocation17 + $0x20] sm:$0xff] %vm933_vm1, %v1290_v5  ;;  %v1240_v8 = vpop.f32.mrb[6].mxu1 }
 0x19a   :  { %v1275_v7 = vadd.f32 %v1212_v6, %v1840_v44  ;;  %v705_v9 = vpop.f32.mrb[7].mxu0  ;;  %v1291_v10 = vadd.f32 %v1240_v8, %v1842_v45  ;;  %v868_v12 = vpop.f32.mrb[7].mxu1 }
 0x19b   :  { %v1276_v11 = vadd.f32 %v1840_v44, %v705_v9  ;;  %v1292_v13 = vadd.f32 %v1842_v45, %v868_v12 }
 0x19c   :  { %941 = vst.msk [vmem:[#allocation16 + $0x38] sm:$0xff] %vm933_vm1, %v1275_v7  ;;  %957 = vst.msk [vmem:[#allocation17 + $0x38] sm:$0xff] %vm933_vm1, %v1291_v10 }
 0x19d   :  { %940 = vst.msk [vmem:[#allocation16 + $0x30] sm:$0xff] %vm933_vm1, %v1276_v11  ;;  %v1215_v14 = vpop.f32.mrb[8].mxu0  ;;  %956 = vst.msk [vmem:[#allocation17 + $0x30] sm:$0xff] %vm933_vm1, %v1292_v13  ;;  %v1243_v16 = vpop.f32.mrb[8].mxu1 }
 0x19e   :  { %v1277_v15 = vadd.f32 %v1215_v14, %v1840_v44  ;;  %v715_v17 = vpop.f32.mrb[9].mxu0  ;;  %v1293_v18 = vadd.f32 %v1243_v16, %v1842_v45  ;;  %v878_v20 = vpop.f32.mrb[9].mxu1 }
 0x19f   :  { %v1278_v19 = vadd.f32 %v1840_v44, %v715_v17  ;;  %v1294_v21 = vadd.f32 %v1842_v45, %v878_v20 }
 0x1a0   :  { %943 = vst.msk [vmem:[#allocation16 + $0x48] sm:$0xff] %vm933_vm1, %v1277_v15  ;;  %959 = vst.msk [vmem:[#allocation17 + $0x48] sm:$0xff] %vm933_vm1, %v1293_v18 }
 0x1a1   :  { %942 = vst.msk [vmem:[#allocation16 + $0x40] sm:$0xff] %vm933_vm1, %v1278_v19  ;;  %v1218_v22 = vpop.f32.mrb[10].mxu0  ;;  %958 = vst.msk [vmem:[#allocation17 + $0x40] sm:$0xff] %vm933_vm1, %v1294_v21  ;;  %v1246_v24 = vpop.f32.mrb[10].mxu1 }
 0x1a2   :  { %v1279_v23 = vadd.f32 %v1218_v22, %v1840_v44  ;;  %v725_v25 = vpop.f32.mrb[11].mxu0  ;;  %v1295_v26 = vadd.f32 %v1246_v24, %v1842_v45  ;;  %v888_v28 = vpop.f32.mrb[11].mxu1 }
 0x1a3   :  { %v1280_v27 = vadd.f32 %v1840_v44, %v725_v25  ;;  %v1296_v29 = vadd.f32 %v1842_v45, %v888_v28 }
 0x1a4   :  { %945 = vst.msk [vmem:[#allocation16 + $0x58] sm:$0xff] %vm933_vm1, %v1279_v23  ;;  %961 = vst.msk [vmem:[#allocation17 + $0x58] sm:$0xff] %vm933_vm1, %v1295_v26 }
 0x1a5   :  { %944 = vst.msk [vmem:[#allocation16 + $0x50] sm:$0xff] %vm933_vm1, %v1280_v27  ;;  %v1221_v30 = vpop.f32.mrb[12].mxu0  ;;  %960 = vst.msk [vmem:[#allocation17 + $0x50] sm:$0xff] %vm933_vm1, %v1296_v29  ;;  %v1249_v32 = vpop.f32.mrb[12].mxu1 }
 0x1a6   :  { %v1281_v31 = vadd.f32 %v1221_v30, %v1840_v44  ;;  %v735_v33 = vpop.f32.mrb[13].mxu0  ;;  %v1297_v34 = vadd.f32 %v1249_v32, %v1842_v45  ;;  %v898_v36 = vpop.f32.mrb[13].mxu1 }
 0x1a7   :  { %v1282_v35 = vadd.f32 %v1840_v44, %v735_v33  ;;  %v1298_v37 = vadd.f32 %v1842_v45, %v898_v36 }
 0x1a8   :  { %947 = vst.msk [vmem:[#allocation16 + $0x68] sm:$0xff] %vm933_vm1, %v1281_v31  ;;  %963 = vst.msk [vmem:[#allocation17 + $0x68] sm:$0xff] %vm933_vm1, %v1297_v34 }
 0x1a9   :  { %946 = vst.msk [vmem:[#allocation16 + $0x60] sm:$0xff] %vm933_vm1, %v1282_v35  ;;  %v1224_v38 = vpop.f32.mrb[14].mxu0  ;;  %962 = vst.msk [vmem:[#allocation17 + $0x60] sm:$0xff] %vm933_vm1, %v1298_v37  ;;  %v1252_v40 = vpop.f32.mrb[14].mxu1 }
 0x1aa   :  { %v1283_v39 = vadd.f32 %v1224_v38, %v1840_v44  ;;  %v745_v41 = vpop.f32.mrb[15].mxu0  ;;  %v1299_v42 = vadd.f32 %v1252_v40, %v1842_v45  ;;  %v908_v46 = vpop.f32.mrb[15].mxu1 }
 0x1ab   :  { %v1284_v43 = vadd.f32 %v1840_v44, %v745_v41  ;;  %v1300_v47 = vadd.f32 %v1842_v45, %v908_v46 }
 0x1ac   :  { %949 = vst.msk [vmem:[#allocation16 + $0x78] sm:$0xff] %vm933_vm1, %v1283_v39  ;;  %965 = vst.msk [vmem:[#allocation17 + $0x78] sm:$0xff] %vm933_vm1, %v1299_v42 }
 0x1ad   :  { %948 = vst.msk [vmem:[#allocation16 + $0x70] sm:$0xff] %vm933_vm1, %v1284_v43  ;;  %964 = vst.msk [vmem:[#allocation17 + $0x70] sm:$0xff] %vm933_vm1, %v1300_v47 }
 0x1ae   :  { %1532 = shalt.err (!%p1529_p12)
}
 0x1af   :  { %s1533_s26 = scalar_lea.hbm %s1953_s8, 2048 }
 0x1b0   :  { %p1534_p13 = scmp.ne.s32.totalorder %s1953_s8, %s1533_s26  ;;  %p1537_p0 = scmp.lt.u32.totalorder %s1533_s26, %s1953_s8 }
 0x1b2   :  { %p1539_p1 = pnand %p1537_p0, %p1534_p13 }
 0x1b4   :  { %1542 = shalt.err (!%p1539_p1)
}
 0x1b5   :  { %977 = dma.vmem_to_hbm [thread:$0]  %s972_s16, 2048, %s1953_s8, [#allocation4], %s1581_s21, %s1581_s21, %s1582_s22  }
 0x1b6   :  { %s1543_s17 = scalar_lea.vmem %s1905_s19, 2048  ;;  %p1548_p3 = scmp.lt.s32.totalorder %s1905_s19, %s1905_s19 }
 0x1b7   :  { %p1544_p2 = scmp.ne.s32.totalorder %s1905_s19, %s1543_s17  ;;  %p1549_p4 = scmp.lt.s32.totalorder %s1543_s17, %s1543_s17 }
 0x1b9   :  { %p1550_p5 = por %p1549_p4, %p1548_p3 }
 0x1bb   :  { %p1551_p6 = pnand %p1550_p5, %p1544_p2 }
 0x1bd   :  { %1554 = shalt.err (!%p1551_p6)
}
 0x1be   :  { %s1555_s30 = scalar_lea.hbm %s1954_s9, 2048 }
 0x1bf   :  { %p1556_p7 = scmp.ne.s32.totalorder %s1954_s9, %s1555_s30  ;;  %p1559_p8 = scmp.lt.u32.totalorder %s1555_s30, %s1954_s9 }
 0x1c1   :  { %p1561_p9 = pnand %p1559_p8, %p1556_p7 }
 0x1c3   :  { %1564 = shalt.err (!%p1561_p9)
}
 0x1c4   :  { %989 = dma.vmem_to_hbm [thread:$0]  %s1905_s19, 2048, %s1954_s9, [#allocation18], %s1581_s21, %s1581_s21, %s1582_s22  }
 0x1c5   :  { %1575 = dma.done.wait [#allocation4], 2048  }
 0x1c6   :  { %1576 = vsyncadd [#allocation4], 4294965248 }
 0x1c7   :  { %1577 = dma.done.wait [#allocation18], 2048  }
 0x1c8   :  { %1578 = vsyncadd [#allocation18], 4294965248 }
 0x1c9   :  { %996 = vsyncpa [#allocation3], 1 }
 0x1ca   :  { %997 = vsyncpa [#allocation6], 1 }
 0x1cb   :  { %998 = vsyncpa [#allocation9], 1 }
 0x1cc   :  { %999 = vsyncpa [#allocation12], 1 }
 0x1cd   :  { %1000 = vsyncpa [#allocation15], 1 }
 0x1ce   :  { %1001 = vsyncpa [#allocation4], 1 }
 0x1cf   :  { %1002 = vsyncpa [#allocation18], 1 }

// kernel: jnf_ssf_forward.8
= control target key start
LH: loop header
LB: loop body
LE: loop exit
PB: predicated region body
PF: predicated region fallthrough
CT: control target
= control target key end

     0   :  { %s3922_s0 = inlined_call_operand.hbm [shape: f32[8,16,64], index: 0, kind: input, shape index: {}]   ;;  %s3923_s1 = inlined_call_operand.hbm [shape: f32[8,16,64], index: 1, kind: input, shape index: {}]   ;;  %s3924_s2 = inlined_call_operand.hbm [shape: f32[16,64], index: 2, kind: input, shape index: {}]   ;;  %s3925_s3 = inlined_call_operand.hbm [shape: f32[16,64], index: 3, kind: input, shape index: {}]   ;;  %s3926_s4 = inlined_call_operand.hbm [shape: f32[8,16,16], index: 4, kind: output, shape index: {0}]   ;;  %s3927_s5 = inlined_call_operand.hbm [shape: f32[8,16,16], index: 5, kind: output, shape index: {1}]  }
   0x1   :  { %3938 = sst [smem:[#allocation25_spill]] %s3922_s0 }
   0x2   :  { %3939 = sst [smem:[#allocation26_spill]] %s3924_s2 }
   0x3   :  { %3940 = sst [smem:[#allocation27_spill]] %s3925_s3 }
   0x4   :  { %11 = vsyncpa [#allocation7], 0 }
   0x5   :  { %13 = vsyncpa [#allocation7 + $0x1], 0 }
   0x6   :  { %14 = vsyncpa [#allocation10], 0 }
   0x7   :  { %16 = vsyncpa [#allocation10 + $0x1], 0 }
   0x8   :  { %17 = vsyncpa [#allocation13], 0 }
   0x9   :  { %18 = vsyncpa [#allocation8], 0 }
   0xa   :  { %20 = vsyncpa [#allocation8 + $0x1], 0 }
   0xb   :  { %21 = vsyncpa [#allocation16], 0 }
   0xc   :  { %23 = vsyncpa [#allocation16 + $0x1], 0  ;;  %s3279_s18 = smov 0   ;;  %s3281_s19 = smov 0  }
   0xd   :  { %s3283_s20 = smov 0   ;;  %s3285_s21 = smov 0  }
   0xe   :  { %s3287_s22 = smov 0   ;;  %s3289_s23 = smov 0  }
   0xf LB: > { %s3310_s24 = sadd.s32 4294967295, %s3227_s23   ;;  %s2460_s25 = sadd.s32 4294967294, %s3227_s23   ;;  %s3227_s23 = sphi %s3289_s23, %s29_s23   ;;  %s3223_s22 = sphi %s3287_s22, %s3971_s22   ;;  %s3219_s21 = sphi %s3285_s21, %s3970_s21   ;;  %s3215_s20 = sphi %s3283_s20, %s3969_s20   ;;  %s3211_s19 = sphi %s3281_s19, %s3968_s19   ;;  %s3207_s18 = sphi %s3279_s18, %s3967_s18  }
  0x10   : > { %p57_p0 = scmp.ne.s32.totalorder %s3215_s20, %s3211_s19  ;;  %p58_p1 = scmp.eq.s32.totalorder %s3227_s23, 0 }
  0x11   : > { %p63_p2 = scmp.ne.s32.totalorder %s3211_s19, %s3207_s18  ;;  %p3928_p3 = scmp.eq.s32.totalorder %s3310_s24, 0 }
  0x12   : > { %p161_p4 = scmp.eq.s32.totalorder %s3310_s24, 1  ;;  %p3321_p5 = por %p58_p1, %p57_p0 }
  0x13   : > { %p167_p6 = scmp.eq.s32.totalorder %s2460_s25, 1  ;;  %p3327_p7 = por %p3928_p3, %p63_p2 }
  0x14   : > { %p3331_p8 = por %p161_p4, %p57_p0  ;;  %p2461_p10 = scmp.ge.s32.totalorder %s3227_s23, 1 }
  0x15   : > { %s3942_s28 = scalar_select %p3327_p7, 1, 0 }
  0x16   : > { %s3943_s29 = scalar_select %p3331_p8, 1, 0 }
  0x17   : > { %p3335_p9 = por %p167_p6, %p63_p2  ;;  %p204_p11 = scmp.lt.s32.totalorder %s3227_s23, 3 }
  0x18   : > { %s3229_s7 = smov [#allocation11]   ;;  %p2789_p1 = scmp.lt.s32.totalorder %s3227_s23, 2 }
  0x19   : > { %s3944_s30 = scalar_select %p3335_p9, 1, 0 }
  0x1a   : > { %p3341_p12 = pnand %p2461_p10, %p204_p11  ;;  %s216_s8 = sshll.u32 %s3229_s7, 4  ;;  %s3345_s8 = int_to_ptr.vmem [resolvable:$true] %s216_s8 }
  0x1b   : > { %3945 = sst [smem:[#allocation23_spill]] %s3944_s30  ;;  %s3230_s10 = smov [#allocation12]  }
  0x1c   : > { %p2766_p13 = pneg %p3341_p12  ;;  %s229_s11 = sshll.u32 %s3230_s10, 4  ;;  %s3363_s11 = int_to_ptr.vmem [resolvable:$true] %s229_s11 }
  0x1d   : > { %p3359_p4 = pnand %p2789_p1, %p3321_p5  ;;  %s3949_s2 = sld [smem:[#allocation26_spill]] }
  0x1e   : > { %p3353_p2 = pnand %p2766_p13, %p3928_p3 }
  0x20   : > { %p2987_p10 = pneg %p3353_p2 }
  0x23   : > { %s2985_s15 = scalar_lea.hbm %s3949_s2, 256 }
  0x24   : > { %p2986_p6 = scmp.ne.s32.totalorder %s3949_s2, %s2985_s15  ;;  %p2992_p5 = scmp.lt.u32.totalorder %s2985_s15, %s3949_s2 }
  0x26   : > { %p2988_p11 = pnand %p2987_p10, %p2986_p6 }
  0x28   : > { %p2989_p13 = pneg %p2988_p11 }
  0x2a   : > { %p2994_p1 = pnand %p2992_p5, %p2989_p13 }
  0x2c   : > { %2997 = shalt.err (!%p2994_p1)
}
  0x2d   : > { %s2998_s7 = scalar_lea.vmem %s3345_s8, 256  ;;  %p3006_p8 = scmp.lt.s32.totalorder %s3345_s8, %s3345_s8 }
  0x2e   : > { %p2999_p0 = scmp.ne.s32.totalorder %s3345_s8, %s2998_s7  ;;  %p3007_p6 = scmp.lt.s32.totalorder %s2998_s7, %s2998_s7 }
  0x30   : > { %p3001_p3 = pnand %p2999_p0, %p2987_p10  ;;  %p3008_p11 = por %p3007_p6, %p3006_p8 }
  0x32   : > { %p3002_p9 = pneg %p3001_p3 }
  0x34   : > { %p3009_p7 = pnand %p3008_p11, %p3002_p9 }
  0x36   : > { %3012 = shalt.err (!%p3009_p7)
}
  0x37   : > { %s3932_s10 = smov 128   ;;  %s3934_s13 = smov 8  }
  0x38   : > { %2769 = dma.hbm_to_vmem [thread:$0]  (!%p3353_p2), %s3949_s2, 256, %s3345_s8, [#allocation10], %s3932_s10, %s3932_s10, %s3934_s13  }
  0x39   : > { %s3950_s3 = sld [smem:[#allocation27_spill]] }
  0x3f   : > { %s3013_s25 = scalar_lea.hbm %s3950_s3, 256 }
  0x40   : > { %p3014_p3 = scmp.ne.s32.totalorder %s3950_s3, %s3013_s25  ;;  %p3020_p9 = scmp.lt.u32.totalorder %s3013_s25, %s3950_s3 }
  0x42   : > { %p3016_p7 = pnand %p3014_p3, %p2987_p10 }
  0x44   : > { %p3017_p8 = pneg %p3016_p7 }
  0x46   : > { %p3022_p0 = pnand %p3020_p9, %p3017_p8 }
  0x48   : > { %3025 = shalt.err (!%p3022_p0)
}
  0x49   : > { %s3026_s8 = scalar_lea.vmem %s3363_s11, 256  ;;  %p3034_p6 = scmp.lt.s32.totalorder %s3363_s11, %s3363_s11 }
  0x4a   : > { %p3027_p13 = scmp.ne.s32.totalorder %s3363_s11, %s3026_s8  ;;  %p3035_p11 = scmp.lt.s32.totalorder %s3026_s8, %s3026_s8 }
  0x4c   : > { %p3029_p5 = pnand %p3027_p13, %p2987_p10  ;;  %p3036_p3 = por %p3035_p11, %p3034_p6 }
  0x4e   : > { %p3030_p1 = pneg %p3029_p5 }
  0x50   : > { %p3037_p7 = pnand %p3036_p3, %p3030_p1 }
  0x52   : > { %3040 = shalt.err (!%p3037_p7)
}
  0x53   : > { %2772 = dma.hbm_to_vmem [thread:$0]  (!%p3353_p2), %s3950_s3, 256, %s3363_s11, [#allocation13], %s3932_s10, %s3932_s10, %s3934_s13  }
  0x54   : > { %s41_s14 = sadd.s32 1, %s3223_s22  ;;  %s243_s15 = sand.u32 1, %s3215_s20  }
  0x55   : > { %p43_p10 = scmp.ge.s32.totalorder %s41_s14, 2  ;;  %s3425_s9 = sshll.u32 %s243_s15, 6 }
  0x56   : > { %s3936_s16 = sshll.u32 %s3223_s22, 7  ;;  %s3952_s0 = sld [smem:[#allocation25_spill]] }
  0x57   : > { %s3973_s14 = smov (%p43_p10, %s41_s14), 0  ;;  %s247_s7 = scalar_lea.vmem [#allocation6], %s3425_s9 }
  0x58   : > { %3951 = sst [smem:[#allocation24_spill]] %s3973_s14  ;;  %s46_s11 = ssub.s32 %s3223_s22, %s3973_s14 }
  0x59   : > { %s256_s8 = sshll.u32 %s247_s7, 4  ;;  %p48_p2 = scmp.eq.s32.totalorder %s46_s11, 0  ;;  %s3440_s8 = int_to_ptr.vmem [resolvable:$true] %s256_s8 }
  0x5a   : > { %s3953_s26 = sadd.s32 1, %s3215_s20  ;;  %s3447_s10 = scalar_lea.sflag [#allocation7], %s243_s15 }
  0x5b   : > { %s3445_s30 = scalar_select %p48_p2, %s3215_s20, %s3953_s26  }
  0x5c   : > { %s3435_s27 = scalar_lea.hbm %s3952_s0, %s3936_s16  ;;  %p3043_p9 = pneg %p3359_p4 }
  0x5d   : > { %s3041_s13 = scalar_lea.hbm %s3435_s27, 1024  ;;  %s3046_s7 = scalar_lea.hbm %s3952_s0, 2048 }
  0x5e   : > { %p3042_p8 = scmp.ne.s32.totalorder %s3435_s27, %s3041_s13  ;;  %p3047_p5 = scmp.lt.u32.totalorder %s3435_s27, %s3952_s0 }
  0x5f   : > { %p3048_p1 = scmp.lt.u32.totalorder %s3046_s7, %s3041_s13  ;;  %p3050_p11 = scmp.lt.u32.totalorder %s3041_s13, %s3435_s27 }
  0x60   : > { %p3044_p0 = pnand %p3043_p9, %p3042_p8 }
  0x61   : > { %p3049_p6 = por %p3048_p1, %p3047_p5 }
  0x62   : > { %p3045_p13 = pneg %p3044_p0 }
  0x63   : > { %p3051_p3 = por %p3050_p11, %p3049_p6 }
  0x65   : > { %p3052_p7 = pnand %p3051_p3, %p3045_p13 }
  0x67   : > { %3055 = shalt.err (!%p3052_p7)
}
  0x68   : > { %s3056_s15 = scalar_lea.vmem %s3440_s8, 1024  ;;  %s3233_s26 = smov [#allocation6]  }
  0x69   : > { %p3057_p10 = scmp.ne.s32.totalorder %s3440_s8, %s3056_s15  ;;  %s3061_s17 = sshll.u32 %s3233_s26, 4  ;;  %s3062_s17 = int_to_ptr.vmem [resolvable:$false] %s3061_s17 }
  0x6a   : > { %s3063_s16 = scalar_lea.vmem %s3062_s17, 2048  ;;  %p3064_p0 = scmp.lt.s32.totalorder %s3440_s8, %s3062_s17 }
  0x6b   : > { %p3059_p2 = pnand %p3057_p10, %p3043_p9  ;;  %p3065_p5 = scmp.lt.s32.totalorder %s3063_s16, %s3056_s15 }
  0x6d   : > { %p3060_p8 = pneg %p3059_p2  ;;  %p3066_p1 = por %p3065_p5, %p3064_p0 }
  0x6f   : > { %p3067_p6 = pnand %p3066_p1, %p3060_p8 }
  0x71   : > { %3070 = shalt.err (!%p3067_p6)
}
  0x72   : > { %s3234_s13 = smov 256   ;;  %s3954_s25 = smov 8  }
  0x73   : > { %s3955_s7 = smov 128   ;;  %s3956_s11 = sshll.u32 %s3223_s22, 7 }
  0x74   : > { %2776 = dma.hbm_to_vmem [thread:$0]  (!%p3359_p4), %s3435_s27, 1024, %s3440_s8, %s3447_s10, %s3234_s13, %s3955_s7, %s3954_s25  }
  0x75   : > { %s3483_s17 = scalar_lea.hbm %s3923_s1, %s3956_s11  ;;  %s270_s16 = scalar_lea.vmem [#allocation9], %s3425_s9 }
  0x76   : > { %s280_s0 = sshll.u32 %s270_s16, 4  ;;  %s266_s2 = sand.u32 1, %s3227_s23   ;;  %s3486_s0 = int_to_ptr.vmem [resolvable:$true] %s280_s0 }
  0x77   : > { %s3489_s3 = scalar_lea.sflag [#allocation10], %s266_s2  ;;  %s3071_s14 = scalar_lea.hbm %s3483_s17, 1024 }
  0x78   : > { %p3072_p13 = scmp.ne.s32.totalorder %s3483_s17, %s3071_s14  ;;  %s3076_s8 = scalar_lea.hbm %s3923_s1, 2048 }
  0x79   : > { %p3077_p7 = scmp.lt.u32.totalorder %s3483_s17, %s3923_s1  ;;  %p3078_p10 = scmp.lt.u32.totalorder %s3076_s8, %s3071_s14 }
  0x7a   : > { %p3074_p11 = pnand %p3072_p13, %p3043_p9  ;;  %p3080_p8 = scmp.lt.u32.totalorder %s3071_s14, %s3483_s17 }
  0x7b   : > { %p3079_p2 = por %p3078_p10, %p3077_p7 }
  0x7c   : > { %p3075_p3 = pneg %p3074_p11 }
  0x7d   : > { %p3081_p0 = por %p3080_p8, %p3079_p2 }
  0x7f   : > { %p3082_p5 = pnand %p3081_p0, %p3075_p3 }
  0x81   : > { %3085 = shalt.err (!%p3082_p5)
}
  0x82   : > { %s3086_s2 = scalar_lea.vmem %s3486_s0, 1024  ;;  %s3235_s9 = smov [#allocation9]  }
  0x83   : > { %p3087_p1 = scmp.ne.s32.totalorder %s3486_s0, %s3086_s2  ;;  %s3091_s15 = sshll.u32 %s3235_s9, 4  ;;  %s3092_s15 = int_to_ptr.vmem [resolvable:$false] %s3091_s15 }
  0x84   : > { %s3093_s16 = scalar_lea.vmem %s3092_s15, 2048  ;;  %p3094_p11 = scmp.lt.s32.totalorder %s3486_s0, %s3092_s15 }
  0x85   : > { %p3089_p6 = pnand %p3087_p1, %p3043_p9  ;;  %p3095_p7 = scmp.lt.s32.totalorder %s3093_s16, %s3086_s2 }
  0x87   : > { %p3090_p13 = pneg %p3089_p6  ;;  %p3096_p10 = por %p3095_p7, %p3094_p11 }
  0x89   : > { %p3097_p2 = pnand %p3096_p10, %p3090_p13 }
  0x8b   : > { %3100 = shalt.err (!%p3097_p2)
}
  0x8c   : > { %2779 = dma.hbm_to_vmem [thread:$0]  (!%p3359_p4), %s3483_s17, 1024, %s3486_s0, %s3489_s3, %s3234_s13, %s3955_s7, %s3954_s25  }
  0x8d   : > { %292 = sbr.rel (%p3341_p12) target bundleno = 5880 (0x16f8), region = 36  ;;  %s3521_s14 = sand.u32 (!%p3341_p12), 1, %s3211_s19  }
  0x8e   : > { %s3524_s10 = sshll.u32 (!%p3341_p12), %s3521_s14, 6  ;;  %s295_s12 = scalar_lea.sflag (!%p3341_p12), [#allocation7], %s3521_s14 }
  0x8f   : > { %s3528_s27 = scalar_lea.vmem (!%p3341_p12), [#allocation6], %s3524_s10  ;;  %p3957_p9 = scmp.ne.s32.totalorder (!%p3341_p12), %s3942_s28, 0 }
  0x94   : > { %3182 = dma.done.wait (%p3957_p9), %s295_s12, 1024  }
  0x95   : > { %3184 = vsyncadd (%p3957_p9), %s295_s12, 4294966272  ;;  %s303_s0 = sand.u32 1, %s3310_s24   ;;  %s3536_s6 = scalar_lea.vmem [#allocation9], %s3524_s10 }
  0x96   : > { %s304_s3 = scalar_lea.sflag [#allocation10], %s303_s0 }
  0x97   : > { %3186 = dma.done.wait (%p3957_p9), %s304_s3, 1024  }
  0x98   : > { %3188 = vsyncadd (%p3957_p9), %s304_s3, 4294966272  ;;  %p3958_p12 = scmp.eq.s32.totalorder %s3310_s24, 0 }
  0x9a   : > { %3190 = dma.done.wait (%p3958_p12), [#allocation10], 256   ;;  %p3959_p4 = pmov %p3958_p12 }
  0x9c   : > { %3192 = vsyncadd (%p3959_p4), [#allocation10], 4294967040  ;;  %p3960_p3 = pmov %p3959_p4 }
  0x9e   : > { %3194 = dma.done.wait (%p3960_p3), [#allocation13], 256   ;;  %p3961_p8 = pmov %p3960_p3 }
  0x9f   : > { %vm362_vm0 = vcmask 130048   ;;  %v3236_v0 = vmov 0.0|0.0   ;;  %vm3237_vm1 = vmmov 0   ;;  %v3238_v1 = vmov 0.0   ;;  %v367_v2 = vld [vmem:[#allocation11] sm:$0xff]  ;;  %v368_v3 = vld [vmem:[#allocation11 + $0x8] sm:$0xff] }
  0xa0   : > { %3196 = vsyncadd (%p3961_p8), [#allocation13], 4294967040  ;;  %2702 = vmatprep.subr.bf16.mxu0 %v3236_v0  ;;  %2594 = vmatprep.mubr.msk.f32.mxu0 %vm3237_vm1, %v3238_v1  ;;  %363 = vst.msk [vmem:[#allocation2] sm:$0xff] %vm362_vm0, %v3238_v1  ;;  %v369_v4 = vld [vmem:[#allocation12] sm:$0xff]  ;;  %v3564_v5 = vpack.c.bf16 %v368_v3, %v367_v2  ;;  %v370_v6 = vld [vmem:[#allocation12 + $0x8] sm:$0xff]  ;;  %s3239_s24 = smov 16  }
  0xa1   : > { %364 = vst.msk [vmem:[#allocation4] sm:$0xff] %vm362_vm0, %v3238_v1  ;;  %365 = vst.msk [vmem:[#allocation3] sm:$0xff] %vm362_vm0, %v3238_v1  ;;  %2705 = vmatprep.subr.bf16.mxu1 %v3236_v0  ;;  %2601 = vmatprep.mubr.msk.f32.mxu1 %vm3237_vm1, %v3238_v1  ;;  %v3566_v7 = vpack.c.bf16 %v370_v6, %v369_v4  ;;  %v371_v12 = vld [vmem:[%s3528_s27] sm:$0xff]  ;;  %v2478_v13 = vld [vmem:[%s3536_s6 + $0x38] sm:$0xff]  ;;  %s3240_s28 = smov 96   ;;  %s3241_s13 = smov 32  }
  0xa2   : > { %366 = vst.msk [vmem:[#allocation5] sm:$0xff] %vm362_vm0, %v3238_v1  ;;  %2704 = vmatpush3.bf16.msra.mxu0 %v3564_v5  ;;  %s3242_s25 = smov 80   ;;  %s3243_s7 = smov 112   ;;  %v2482_v54 = vld [vmem:[%s3528_s27 + $0x8] sm:$0xff]  ;;  %v2486_v58 = vld [vmem:[%s3536_s6 + $0x30] sm:$0xff] }
  0xa3   : > { %2707 = vmatpush3.bf16.msra.mxu1 %v3566_v7  ;;  %2708 = vmatprep.subr.bf16.mxu0 %v3236_v0  ;;  %s3598_s17 = scalar_lea.vmem [#allocation14], %s3524_s10  ;;  %s3604_s8 = scalar_lea.vmem [#allocation15], %s3524_s10 }
  0xa4   : > { %2711 = vmatprep.subr.bf16.mxu1 %v3236_v0  ;;  %s2277_s11 = sshll.u32 %s3598_s17, 4  ;;  %s2538_s26 = sshll.u32 %s3219_s21, 7  ;;  %s3818_s11 = int_to_ptr.vmem [resolvable:$true] %s2277_s11 }
  0xa5   : > { %s2296_s2 = sshll.u32 %s3604_s8, 4  ;;  %s3826_s16 = scalar_lea.hbm %s3926_s4, %s2538_s26  ;;  %s3828_s2 = int_to_ptr.vmem [resolvable:$true] %s2296_s2 }
  0xa6   : > { %s2257_s10 = scalar_lea.sflag [#allocation8], %s3521_s14  ;;  %s3101_s12 = scalar_lea.vmem %s3818_s11, 1024 }
  0xa7   : > { %v372_v9 = vld [vmem:[#allocation2] sm:$0xff]  ;;  %p3102_p0 = scmp.ne.s32.totalorder %s3818_s11, %s3101_s12  ;;  %p3962_p5 = scmp.ne.s32.totalorder %s3943_s29, 0 }
  0xa8   : > { %v373_v8 = vld [vmem:[#allocation3] sm:$0xff]  ;;  %v490_v10 = vld [vmem:[#allocation4] sm:$0xff]  ;;  %2595 = vmatmul.mubr.msk.f32.vlgmr.msra.gmra.mrb[0].mxu0 %vm362_vm0, %v372_v9 }
  0xa9   : > { %457 = vrot.lane.b32.xlu1 %v373_v8, %s3239_s24  ;;  %v491_v11 = vld [vmem:[#allocation5] sm:$0xff]  ;;  %2602 = vmatmul.mubr.msk.f32.vlgmr.msra.gmra.mrb[0].mxu1 %vm362_vm0, %v490_v10  ;;  %p3103_p1 = pnand %p3102_p0, %p3962_p5 }
  0xaa   : > { %2710 = vmatpush3.bf16.msra.mxu0 %v3564_v5  ;;  %2608 = vmatprep.mubr.msk.f32.mxu0 %vm3237_vm1, %v3238_v1 }
  0xab   : > { %2713 = vmatpush3.bf16.msra.mxu1 %v3566_v7  ;;  %2615 = vmatprep.mubr.msk.f32.mxu1 %vm3237_vm1, %v3238_v1  ;;  %p3104_p6 = pneg %p3103_p1 }
  0xac   : > { %2714 = vmatprep.subr.bf16.mxu0 %v3236_v0  ;;  %2717 = vmatprep.subr.bf16.mxu1 %v3236_v0 }
  0xad   : > { %574 = vrot.lane.b32.xlu1 %v491_v11, %s3239_s24 }
 0x11b   : > { %v458_v34 = vpop.permute.xlu1 %457 }
 0x11f   : > { %v575_v36 = vpop.permute.xlu1 %574 }
 0x17b   : > { %v444_v14 = vpop.f32.mrb[0].mxu0 }
 0x17c   : > { %v448_v15 = vadd.f32 %v444_v14, %v371_v12  ;;  %v2596_v16 = vpop.f32.mrb[1].mxu0  ;;  %v561_v17 = vpop.f32.mrb[0].mxu1 }
 0x17d   : > { %v565_v18 = vadd.f32 %v2478_v13, %v561_v17  ;;  %v2603_v19 = vpop.f32.mrb[1].mxu1 }
 0x17e   : > { %2857 = vtanh.f32 %v448_v15  ;;  %v2477_v22 = vmul.f32 -1.442695, %v448_v15 }
 0x17f   : > { %2859 = vtanh.f32 %v565_v18  ;;  %v2480_v23 = vmul.f32 -1.442695, %v565_v18 }
 0x180   : > { %2861 = vpow2.f32 %v2477_v22 }
 0x181   : > { %2863 = vpow2.f32 %v2480_v23 }
 0x188   : > { %v2858_v20 = vpop.eup %2857 }
 0x189   : > { %462 = vrot.lane.b32.xlu0 %v2858_v20, %s3240_s28  ;;  %v2860_v21 = vpop.eup %2859 }
 0x18a   : > { %v2862_v24 = vpop.eup %2861 }
 0x18b   : > { %v452_v25 = vadd.f32 1.0, %v2862_v24  ;;  %v2864_v26 = vpop.eup %2863 }
 0x18c   : > { %v569_v27 = vadd.f32 1.0, %v2864_v26 }
 0x18d   : > { %579 = vrot.lane.b32.xlu0 %v2860_v21, %s3240_s28  ;;  %2865 = vrcp.f32 %v452_v25 }
 0x18e   : > { %2867 = vrcp.f32 %v569_v27 }
 0x197   : > { %v2866_v28 = vpop.eup %2865 }
 0x198   : > { %v2868_v31 = vpop.eup %2867  ;;  %v460_v35 = vmul.f32 %v2866_v28, %v458_v34 }
 0x199   : > { %v577_v39 = vmul.f32 %v2868_v31, %v575_v36 }
 0x1fb   : > { %v463_v29 = vpop.permute.xlu0 %462 }
 0x1fc   : > { %v465_v30 = vmul.f32 %v2866_v28, %v463_v29 }
 0x1fe   : > { %467 = vrot.lane.b32.xlu0 %v465_v30, %s3239_s24 }
 0x1ff   : > { %v580_v32 = vpop.permute.xlu0 %579 }
 0x200   : > { %v582_v33 = vmul.f32 %v2868_v31, %v580_v32 }
 0x202   : > { %584 = vrot.lane.b32.xlu1 %v582_v33, %s3239_s24 }
 0x270   : > { %v468_v37 = vpop.permute.xlu0 %467 }
 0x271   : > { %v470_v38 = vadd.f32 %v468_v37, %v460_v35 }
 0x273   : > { %2869 = vtanh.f32 %v470_v38 }
 0x274   : > { %v585_v40 = vpop.permute.xlu1 %584 }
 0x275   : > { %v587_v41 = vadd.f32 %v585_v40, %v577_v39 }
 0x277   : > { %2871 = vtanh.f32 %v587_v41 }
 0x27d   : > { %v2870_v42 = vpop.eup %2869 }
 0x27e   : > { %473 = vrot.lane.b32.xlu0 %v2870_v42, %s3241_s13  ;;  %v2494_v42 = vld [vmem:[%s3536_s6 + $0x28] sm:$0xff] }
 0x281   : > { %v2872_v43 = vpop.eup %2871 }
 0x282   : > { %590 = vrot.lane.b32.xlu1 %v2872_v43, %s3241_s13 }
 0x2f0   : > { %v474_v44 = vpop.permute.xlu0 %473 }
 0x2f1   : > { %v476_v45 = vmul.f32 %v2866_v28, %v474_v44 }
 0x2f3   : > { %478 = vrot.lane.b32.xlu0 %v476_v45, %s3242_s25 }
 0x2f4   : > { %v591_v46 = vpop.permute.xlu1 %590 }
 0x2f5   : > { %v593_v47 = vmul.f32 %v2868_v31, %v591_v46 }
 0x2f7   : > { %595 = vrot.lane.b32.xlu1 %v593_v47, %s3242_s25  ;;  %483 = vrot.lane.b32.xlu0 %v470_v38, %s3243_s7  ;;  %v2490_v38 = vld [vmem:[%s3528_s27 + $0x10] sm:$0xff] }
 0x2fb   : > { %600 = vrot.lane.b32.xlu1 %v587_v41, %s3243_s7 }
 0x365   : > { %v479_v48 = vpop.permute.xlu0 %478 }
 0x366   : > { %481 = vst.msk [vmem:[#allocation2] sm:$0xff] %vm362_vm0, %v479_v48  ;;  %487 = vst.msk [vmem:[%s3598_s17] sm:$0xff] %vm362_vm0, %v479_v48 }
 0x369   : > { %v596_v49 = vpop.permute.xlu1 %595  ;;  %v484_v50 = vpop.permute.xlu0 %483 }
 0x36a   : > { %598 = vst.msk [vmem:[#allocation4] sm:$0xff] %vm362_vm0, %v596_v49  ;;  %2481 = vst.msk [vmem:[%s3604_s8 + $0x38] sm:$0xff] %vm362_vm0, %v596_v49 }
 0x36b   : > { %486 = vst.msk [vmem:[#allocation3] sm:$0xff] %vm362_vm0, %v484_v50 }
 0x36d   : > { %v601_v51 = vpop.permute.xlu1 %600  ;;  %v608_v52 = vld [vmem:[#allocation2] sm:$0xff] }
 0x36e   : > { %603 = vst.msk [vmem:[#allocation5] sm:$0xff] %vm362_vm0, %v601_v51  ;;  %2609 = vmatmul.mubr.msk.f32.vlgmr.msra.gmra.mrb[2].mxu0 %vm362_vm0, %v608_v52 }
 0x36f   : > { %2716 = vmatpush3.bf16.msra.mxu0 %v3564_v5  ;;  %2622 = vmatprep.mubr.msk.f32.mxu0 %vm3237_vm1, %v3238_v1 }
 0x370   : > { %2720 = vmatprep.subr.bf16.mxu0 %v3236_v0 }
 0x371   : > { %v726_v53 = vld [vmem:[#allocation4] sm:$0xff] }
 0x372   : > { %2616 = vmatmul.mubr.msk.f32.vlgmr.msra.gmra.mrb[2].mxu1 %vm362_vm0, %v726_v53  ;;  %v609_v2 = vld [vmem:[#allocation3] sm:$0xff] }
 0x373   : > { %2719 = vmatpush3.bf16.msra.mxu1 %v3566_v7  ;;  %2629 = vmatprep.mubr.msk.f32.mxu1 %vm3237_vm1, %v3238_v1 }
 0x374   : > { %2723 = vmatprep.subr.bf16.mxu1 %v3236_v0 }
 0x375   : > { %v727_v3 = vld [vmem:[#allocation5] sm:$0xff] }
 0x441   : > { %v679_v55 = vpop.f32.mrb[2].mxu0 }
 0x442   : > { %v683_v56 = vadd.f32 %v2482_v54, %v679_v55  ;;  %v2610_v57 = vpop.f32.mrb[3].mxu0 }
 0x444   : > { %2873 = vtanh.f32 %v683_v56  ;;  %v2484_v4 = vmul.f32 -1.442695, %v683_v56 }
 0x445   : > { %v797_v59 = vpop.f32.mrb[2].mxu1 }
 0x446   : > { %v801_v60 = vadd.f32 %v2486_v58, %v797_v59  ;;  %v2617_v61 = vpop.f32.mrb[3].mxu1 }
 0x448   : > { %2875 = vtanh.f32 %v801_v60  ;;  %v2488_v6 = vmul.f32 -1.442695, %v801_v60 }
 0x449   : > { %2877 = vpow2.f32 %v2484_v4 }
 0x44a   : > { %2879 = vpow2.f32 %v2488_v6 }
 0x44e   : > { %v2874_v62 = vpop.eup %2873 }
 0x44f   : > { %697 = vrot.lane.b32.xlu0 %v2874_v62, %s3240_s28 }
 0x452   : > { %v2876_v63 = vpop.eup %2875 }
 0x453   : > { %815 = vrot.lane.b32.xlu1 %v2876_v63, %s3240_s28  ;;  %692 = vrot.lane.b32.xlu0 %v609_v2, %s3239_s24  ;;  %v2878_v8 = vpop.eup %2877 }
 0x454   : > { %v687_v9 = vadd.f32 1.0, %v2878_v8  ;;  %v2880_v10 = vpop.eup %2879 }
 0x455   : > { %v805_v11 = vadd.f32 1.0, %v2880_v10 }
 0x456   : > { %2881 = vrcp.f32 %v687_v9 }
 0x457   : > { %810 = vrot.lane.b32.xlu1 %v727_v3, %s3239_s24  ;;  %2883 = vrcp.f32 %v805_v11 }
 0x460   : > { %v2882_v12 = vpop.eup %2881 }
 0x461   : > { %v2884_v15 = vpop.eup %2883 }
 0x4c1   : > { %v698_v13 = vpop.permute.xlu0 %697 }
 0x4c2   : > { %v700_v14 = vmul.f32 %v2882_v12, %v698_v13 }
 0x4c4   : > { %702 = vrot.lane.b32.xlu0 %v700_v14, %s3239_s24 }
 0x4c5   : > { %v816_v16 = vpop.permute.xlu1 %815  ;;  %v693_v18 = vpop.permute.xlu0 %692 }
 0x4c6   : > { %v818_v17 = vmul.f32 %v2884_v15, %v816_v16  ;;  %v695_v19 = vmul.f32 %v2882_v12, %v693_v18 }
 0x4c8   : > { %820 = vrot.lane.b32.xlu1 %v818_v17, %s3239_s24 }
 0x4c9   : > { %v811_v20 = vpop.permute.xlu1 %810 }
 0x4ca   : > { %v813_v23 = vmul.f32 %v2884_v15, %v811_v20 }
 0x536   : > { %v703_v21 = vpop.permute.xlu0 %702 }
 0x537   : > { %v705_v22 = vadd.f32 %v703_v21, %v695_v19 }
 0x539   : > { %2885 = vtanh.f32 %v705_v22 }
 0x53a   : > { %v821_v24 = vpop.permute.xlu1 %820 }
 0x53b   : > { %v823_v25 = vadd.f32 %v821_v24, %v813_v23 }
 0x53d   : > { %2887 = vtanh.f32 %v823_v25 }
 0x543   : > { %v2886_v26 = vpop.eup %2885 }
 0x544   : > { %708 = vrot.lane.b32.xlu0 %v2886_v26, %s3241_s13  ;;  %v2502_v26 = vld [vmem:[%s3536_s6 + $0x20] sm:$0xff] }
 0x547   : > { %v2888_v27 = vpop.eup %2887 }
 0x548   : > { %826 = vrot.lane.b32.xlu1 %v2888_v27, %s3241_s13 }
 0x5b6   : > { %v709_v28 = vpop.permute.xlu0 %708 }
 0x5b7   : > { %v711_v29 = vmul.f32 %v2882_v12, %v709_v28 }
 0x5b9   : > { %713 = vrot.lane.b32.xlu0 %v711_v29, %s3242_s25 }
 0x5ba   : > { %v827_v30 = vpop.permute.xlu1 %826 }
 0x5bb   : > { %v829_v31 = vmul.f32 %v2884_v15, %v827_v30 }
 0x5bd   : > { %831 = vrot.lane.b32.xlu1 %v829_v31, %s3242_s25  ;;  %718 = vrot.lane.b32.xlu0 %v705_v22, %s3243_s7  ;;  %v2498_v22 = vld [vmem:[%s3528_s27 + $0x18] sm:$0xff] }
 0x5c1   : > { %836 = vrot.lane.b32.xlu1 %v823_v25, %s3243_s7 }
 0x62b   : > { %v714_v32 = vpop.permute.xlu0 %713 }
 0x62c   : > { %716 = vst.msk [vmem:[#allocation2] sm:$0xff] %vm362_vm0, %v714_v32  ;;  %2485 = vst.msk [vmem:[%s3598_s17 + $0x8] sm:$0xff] %vm362_vm0, %v714_v32 }
 0x62f   : > { %v832_v33 = vpop.permute.xlu1 %831  ;;  %v719_v34 = vpop.permute.xlu0 %718 }
 0x630   : > { %834 = vst.msk [vmem:[#allocation4] sm:$0xff] %vm362_vm0, %v832_v33  ;;  %2489 = vst.msk [vmem:[%s3604_s8 + $0x30] sm:$0xff] %vm362_vm0, %v832_v33 }
 0x631   : > { %721 = vst.msk [vmem:[#allocation3] sm:$0xff] %vm362_vm0, %v719_v34 }
 0x633   : > { %v837_v35 = vpop.permute.xlu1 %836  ;;  %v844_v36 = vld [vmem:[#allocation2] sm:$0xff] }
 0x634   : > { %839 = vst.msk [vmem:[#allocation5] sm:$0xff] %vm362_vm0, %v837_v35  ;;  %2623 = vmatmul.mubr.msk.f32.vlgmr.msra.gmra.mrb[4].mxu0 %vm362_vm0, %v844_v36 }
 0x635   : > { %2722 = vmatpush3.bf16.msra.mxu0 %v3564_v5  ;;  %2636 = vmatprep.mubr.msk.f32.mxu0 %vm3237_vm1, %v3238_v1 }
 0x636   : > { %2726 = vmatprep.subr.bf16.mxu0 %v3236_v0 }
 0x637   : > { %v962_v37 = vld [vmem:[#allocation4] sm:$0xff] }
 0x638   : > { %2630 = vmatmul.mubr.msk.f32.vlgmr.msra.gmra.mrb[4].mxu1 %vm362_vm0, %v962_v37  ;;  %v845_v48 = vld [vmem:[#allocation3] sm:$0xff] }
 0x639   : > { %2725 = vmatpush3.bf16.msra.mxu1 %v3566_v7  ;;  %2643 = vmatprep.mubr.msk.f32.mxu1 %vm3237_vm1, %v3238_v1 }
 0x63a   : > { %2729 = vmatprep.subr.bf16.mxu1 %v3236_v0 }
 0x63b   : > { %v963_v49 = vld [vmem:[#allocation5] sm:$0xff] }
 0x707   : > { %v915_v39 = vpop.f32.mrb[4].mxu0 }
 0x708   : > { %v919_v40 = vadd.f32 %v2490_v38, %v915_v39  ;;  %v2624_v41 = vpop.f32.mrb[5].mxu0 }
 0x70a   : > { %2889 = vtanh.f32 %v919_v40  ;;  %v2492_v50 = vmul.f32 -1.442695, %v919_v40 }
 0x70b   : > { %v1033_v43 = vpop.f32.mrb[4].mxu1 }
 0x70c   : > { %v1037_v44 = vadd.f32 %v2494_v42, %v1033_v43  ;;  %v2631_v45 = vpop.f32.mrb[5].mxu1 }
 0x70e   : > { %2891 = vtanh.f32 %v1037_v44  ;;  %v2496_v51 = vmul.f32 -1.442695, %v1037_v44 }
 0x70f   : > { %2893 = vpow2.f32 %v2492_v50 }
 0x710   : > { %2895 = vpow2.f32 %v2496_v51 }
 0x714   : > { %v2890_v46 = vpop.eup %2889 }
 0x715   : > { %933 = vrot.lane.b32.xlu0 %v2890_v46, %s3240_s28 }
 0x718   : > { %v2892_v47 = vpop.eup %2891 }
 0x719   : > { %1051 = vrot.lane.b32.xlu1 %v2892_v47, %s3240_s28  ;;  %928 = vrot.lane.b32.xlu0 %v845_v48, %s3239_s24  ;;  %v2894_v52 = vpop.eup %2893 }
 0x71a   : > { %v923_v53 = vadd.f32 1.0, %v2894_v52  ;;  %v2896_v54 = vpop.eup %2895 }
 0x71b   : > { %v1041_v55 = vadd.f32 1.0, %v2896_v54 }
 0x71c   : > { %2897 = vrcp.f32 %v923_v53 }
 0x71d   : > { %1046 = vrot.lane.b32.xlu1 %v963_v49, %s3239_s24  ;;  %2899 = vrcp.f32 %v1041_v55 }
 0x726   : > { %v2898_v56 = vpop.eup %2897 }
 0x727   : > { %v2900_v59 = vpop.eup %2899 }
 0x787   : > { %v934_v57 = vpop.permute.xlu0 %933 }
 0x788   : > { %v936_v58 = vmul.f32 %v2898_v56, %v934_v57 }
 0x78a   : > { %938 = vrot.lane.b32.xlu0 %v936_v58, %s3239_s24 }
 0x78b   : > { %v1052_v60 = vpop.permute.xlu1 %1051  ;;  %v929_v62 = vpop.permute.xlu0 %928 }
 0x78c   : > { %v1054_v61 = vmul.f32 %v2900_v59, %v1052_v60  ;;  %v931_v63 = vmul.f32 %v2898_v56, %v929_v62 }
 0x78e   : > { %1056 = vrot.lane.b32.xlu1 %v1054_v61, %s3239_s24 }
 0x78f   : > { %v1047_v2 = vpop.permute.xlu1 %1046 }
 0x790   : > { %v1049_v6 = vmul.f32 %v2900_v59, %v1047_v2 }
 0x7fc   : > { %v939_v3 = vpop.permute.xlu0 %938 }
 0x7fd   : > { %v941_v4 = vadd.f32 %v939_v3, %v931_v63 }
 0x7ff   : > { %2901 = vtanh.f32 %v941_v4 }
 0x800   : > { %v1057_v8 = vpop.permute.xlu1 %1056 }
 0x801   : > { %v1059_v9 = vadd.f32 %v1057_v8, %v1049_v6 }
 0x803   : > { %2903 = vtanh.f32 %v1059_v9 }
 0x809   : > { %v2902_v10 = vpop.eup %2901 }
 0x80a   : > { %944 = vrot.lane.b32.xlu0 %v2902_v10, %s3241_s13  ;;  %v2510_v10 = vld [vmem:[%s3536_s6 + $0x18] sm:$0xff] }
 0x80d   : > { %v2904_v11 = vpop.eup %2903 }
 0x80e   : > { %1062 = vrot.lane.b32.xlu1 %v2904_v11, %s3241_s13 }
 0x87c   : > { %v945_v12 = vpop.permute.xlu0 %944 }
 0x87d   : > { %v947_v13 = vmul.f32 %v2898_v56, %v945_v12 }
 0x87f   : > { %949 = vrot.lane.b32.xlu0 %v947_v13, %s3242_s25 }
 0x880   : > { %v1063_v14 = vpop.permute.xlu1 %1062 }
 0x881   : > { %v1065_v15 = vmul.f32 %v2900_v59, %v1063_v14 }
 0x883   : > { %1067 = vrot.lane.b32.xlu1 %v1065_v15, %s3242_s25  ;;  %954 = vrot.lane.b32.xlu0 %v941_v4, %s3243_s7  ;;  %v2506_v4 = vld [vmem:[%s3528_s27 + $0x20] sm:$0xff] }
 0x887   : > { %1072 = vrot.lane.b32.xlu1 %v1059_v9, %s3243_s7 }
 0x8f1   : > { %v950_v16 = vpop.permute.xlu0 %949 }
 0x8f2   : > { %952 = vst.msk [vmem:[#allocation2] sm:$0xff] %vm362_vm0, %v950_v16  ;;  %2493 = vst.msk [vmem:[%s3598_s17 + $0x10] sm:$0xff] %vm362_vm0, %v950_v16 }
 0x8f5   : > { %v1068_v17 = vpop.permute.xlu1 %1067  ;;  %v955_v18 = vpop.permute.xlu0 %954 }
 0x8f6   : > { %1070 = vst.msk [vmem:[#allocation4] sm:$0xff] %vm362_vm0, %v1068_v17  ;;  %2497 = vst.msk [vmem:[%s3604_s8 + $0x28] sm:$0xff] %vm362_vm0, %v1068_v17 }
 0x8f7   : > { %957 = vst.msk [vmem:[#allocation3] sm:$0xff] %vm362_vm0, %v955_v18 }
 0x8f9   : > { %v1073_v19 = vpop.permute.xlu1 %1072  ;;  %v1080_v20 = vld [vmem:[#allocation2] sm:$0xff] }
 0x8fa   : > { %1075 = vst.msk [vmem:[#allocation5] sm:$0xff] %vm362_vm0, %v1073_v19  ;;  %2637 = vmatmul.mubr.msk.f32.vlgmr.msra.gmra.mrb[6].mxu0 %vm362_vm0, %v1080_v20 }
 0x8fb   : > { %2728 = vmatpush3.bf16.msra.mxu0 %v3564_v5  ;;  %2650 = vmatprep.mubr.msk.f32.mxu0 %vm3237_vm1, %v3238_v1 }
 0x8fc   : > { %2732 = vmatprep.subr.bf16.mxu0 %v3236_v0 }
 0x8fd   : > { %v1198_v21 = vld [vmem:[#allocation4] sm:$0xff] }
 0x8fe   : > { %2644 = vmatmul.mubr.msk.f32.vlgmr.msra.gmra.mrb[6].mxu1 %vm362_vm0, %v1198_v21  ;;  %v1081_v32 = vld [vmem:[#allocation3] sm:$0xff] }
 0x8ff   : > { %2731 = vmatpush3.bf16.msra.mxu1 %v3566_v7  ;;  %2657 = vmatprep.mubr.msk.f32.mxu1 %vm3237_vm1, %v3238_v1 }
 0x900   : > { %2735 = vmatprep.subr.bf16.mxu1 %v3236_v0 }
 0x901   : > { %v1199_v33 = vld [vmem:[#allocation5] sm:$0xff] }
 0x9cd   : > { %v1151_v23 = vpop.f32.mrb[6].mxu0 }
 0x9ce   : > { %v1155_v24 = vadd.f32 %v2498_v22, %v1151_v23  ;;  %v2638_v25 = vpop.f32.mrb[7].mxu0 }
 0x9d0   : > { %2905 = vtanh.f32 %v1155_v24  ;;  %v2500_v34 = vmul.f32 -1.442695, %v1155_v24 }
 0x9d1   : > { %v1269_v27 = vpop.f32.mrb[6].mxu1 }
 0x9d2   : > { %v1273_v28 = vadd.f32 %v2502_v26, %v1269_v27  ;;  %v2645_v29 = vpop.f32.mrb[7].mxu1 }
 0x9d4   : > { %2907 = vtanh.f32 %v1273_v28  ;;  %v2504_v35 = vmul.f32 -1.442695, %v1273_v28 }
 0x9d5   : > { %2909 = vpow2.f32 %v2500_v34 }
 0x9d6   : > { %2911 = vpow2.f32 %v2504_v35 }
 0x9da   : > { %v2906_v30 = vpop.eup %2905 }
 0x9db   : > { %1169 = vrot.lane.b32.xlu0 %v2906_v30, %s3240_s28 }
 0x9de   : > { %v2908_v31 = vpop.eup %2907 }
 0x9df   : > { %1287 = vrot.lane.b32.xlu1 %v2908_v31, %s3240_s28  ;;  %1164 = vrot.lane.b32.xlu0 %v1081_v32, %s3239_s24  ;;  %v2910_v36 = vpop.eup %2909 }
 0x9e0   : > { %v1159_v37 = vadd.f32 1.0, %v2910_v36  ;;  %v2912_v38 = vpop.eup %2911 }
 0x9e1   : > { %v1277_v39 = vadd.f32 1.0, %v2912_v38 }
 0x9e2   : > { %2913 = vrcp.f32 %v1159_v37 }
 0x9e3   : > { %1282 = vrot.lane.b32.xlu1 %v1199_v33, %s3239_s24  ;;  %2915 = vrcp.f32 %v1277_v39 }
 0x9ec   : > { %v2914_v40 = vpop.eup %2913 }
 0x9ed   : > { %v2916_v43 = vpop.eup %2915 }
 0xa4d   : > { %v1170_v41 = vpop.permute.xlu0 %1169 }
 0xa4e   : > { %v1172_v42 = vmul.f32 %v2914_v40, %v1170_v41 }
 0xa50   : > { %1174 = vrot.lane.b32.xlu0 %v1172_v42, %s3239_s24 }
 0xa51   : > { %v1288_v44 = vpop.permute.xlu1 %1287  ;;  %v1165_v46 = vpop.permute.xlu0 %1164 }
 0xa52   : > { %v1290_v45 = vmul.f32 %v2916_v43, %v1288_v44  ;;  %v1167_v47 = vmul.f32 %v2914_v40, %v1165_v46 }
 0xa54   : > { %1292 = vrot.lane.b32.xlu1 %v1290_v45, %s3239_s24 }
 0xa55   : > { %v1283_v48 = vpop.permute.xlu1 %1282 }
 0xa56   : > { %v1285_v51 = vmul.f32 %v2916_v43, %v1283_v48 }
 0xac2   : > { %v1175_v49 = vpop.permute.xlu0 %1174 }
 0xac3   : > { %v1177_v50 = vadd.f32 %v1175_v49, %v1167_v47 }
 0xac5   : > { %2917 = vtanh.f32 %v1177_v50 }
 0xac6   : > { %v1293_v52 = vpop.permute.xlu1 %1292 }
 0xac7   : > { %v1295_v53 = vadd.f32 %v1293_v52, %v1285_v51 }
 0xac9   : > { %2919 = vtanh.f32 %v1295_v53 }
 0xacf   : > { %v2918_v54 = vpop.eup %2917 }
 0xad0   : > { %1180 = vrot.lane.b32.xlu0 %v2918_v54, %s3241_s13  ;;  %v2518_v54 = vld [vmem:[%s3536_s6 + $0x10] sm:$0xff] }
 0xad3   : > { %v2920_v55 = vpop.eup %2919 }
 0xad4   : > { %1298 = vrot.lane.b32.xlu1 %v2920_v55, %s3241_s13 }
 0xb42   : > { %v1181_v56 = vpop.permute.xlu0 %1180 }
 0xb43   : > { %v1183_v57 = vmul.f32 %v2914_v40, %v1181_v56 }
 0xb45   : > { %1185 = vrot.lane.b32.xlu0 %v1183_v57, %s3242_s25 }
 0xb46   : > { %v1299_v58 = vpop.permute.xlu1 %1298 }
 0xb47   : > { %v1301_v59 = vmul.f32 %v2916_v43, %v1299_v58 }
 0xb49   : > { %1303 = vrot.lane.b32.xlu1 %v1301_v59, %s3242_s25  ;;  %1190 = vrot.lane.b32.xlu0 %v1177_v50, %s3243_s7  ;;  %v2514_v50 = vld [vmem:[%s3528_s27 + $0x28] sm:$0xff] }
 0xb4d   : > { %1308 = vrot.lane.b32.xlu1 %v1295_v53, %s3243_s7 }
 0xbb7   : > { %v1186_v60 = vpop.permute.xlu0 %1185 }
 0xbb8   : > { %1188 = vst.msk [vmem:[#allocation2] sm:$0xff] %vm362_vm0, %v1186_v60  ;;  %2501 = vst.msk [vmem:[%s3598_s17 + $0x18] sm:$0xff] %vm362_vm0, %v1186_v60 }
 0xbbb   : > { %v1304_v61 = vpop.permute.xlu1 %1303  ;;  %v1191_v62 = vpop.permute.xlu0 %1190 }
 0xbbc   : > { %1306 = vst.msk [vmem:[#allocation4] sm:$0xff] %vm362_vm0, %v1304_v61  ;;  %2505 = vst.msk [vmem:[%s3604_s8 + $0x20] sm:$0xff] %vm362_vm0, %v1304_v61 }
 0xbbd   : > { %1193 = vst.msk [vmem:[#allocation3] sm:$0xff] %vm362_vm0, %v1191_v62 }
 0xbbf   : > { %v1309_v63 = vpop.permute.xlu1 %1308  ;;  %v1316_v2 = vld [vmem:[#allocation2] sm:$0xff] }
 0xbc0   : > { %1311 = vst.msk [vmem:[#allocation5] sm:$0xff] %vm362_vm0, %v1309_v63  ;;  %2651 = vmatmul.mubr.msk.f32.vlgmr.msra.gmra.mrb[8].mxu0 %vm362_vm0, %v1316_v2 }
 0xbc1   : > { %2734 = vmatpush3.bf16.msra.mxu0 %v3564_v5  ;;  %2664 = vmatprep.mubr.msk.f32.mxu0 %vm3237_vm1, %v3238_v1 }
 0xbc2   : > { %2738 = vmatprep.subr.bf16.mxu0 %v3236_v0 }
 0xbc3   : > { %v1434_v3 = vld [vmem:[#allocation4] sm:$0xff] }
 0xbc4   : > { %2658 = vmatmul.mubr.msk.f32.vlgmr.msra.gmra.mrb[8].mxu1 %vm362_vm0, %v1434_v3  ;;  %v1317_v16 = vld [vmem:[#allocation3] sm:$0xff] }
 0xbc5   : > { %2737 = vmatpush3.bf16.msra.mxu1 %v3566_v7  ;;  %2671 = vmatprep.mubr.msk.f32.mxu1 %vm3237_vm1, %v3238_v1 }
 0xbc6   : > { %2741 = vmatprep.subr.bf16.mxu1 %v3236_v0 }
 0xbc7   : > { %v1435_v17 = vld [vmem:[#allocation5] sm:$0xff] }
 0xc93   : > { %v1387_v6 = vpop.f32.mrb[8].mxu0 }
 0xc94   : > { %v1391_v8 = vadd.f32 %v2506_v4, %v1387_v6  ;;  %v2652_v9 = vpop.f32.mrb[9].mxu0 }
 0xc96   : > { %2921 = vtanh.f32 %v1391_v8  ;;  %v2508_v18 = vmul.f32 -1.442695, %v1391_v8 }
 0xc97   : > { %v1505_v11 = vpop.f32.mrb[8].mxu1 }
 0xc98   : > { %v1509_v12 = vadd.f32 %v2510_v10, %v1505_v11  ;;  %v2659_v13 = vpop.f32.mrb[9].mxu1 }
 0xc9a   : > { %2923 = vtanh.f32 %v1509_v12  ;;  %v2512_v19 = vmul.f32 -1.442695, %v1509_v12 }
 0xc9b   : > { %2925 = vpow2.f32 %v2508_v18 }
 0xc9c   : > { %2927 = vpow2.f32 %v2512_v19 }
 0xca0   : > { %v2922_v14 = vpop.eup %2921 }
 0xca1   : > { %1405 = vrot.lane.b32.xlu0 %v2922_v14, %s3240_s28 }
 0xca4   : > { %v2924_v15 = vpop.eup %2923 }
 0xca5   : > { %1523 = vrot.lane.b32.xlu1 %v2924_v15, %s3240_s28  ;;  %1400 = vrot.lane.b32.xlu0 %v1317_v16, %s3239_s24  ;;  %v2926_v20 = vpop.eup %2925 }
 0xca6   : > { %v1395_v21 = vadd.f32 1.0, %v2926_v20  ;;  %v2928_v22 = vpop.eup %2927 }
 0xca7   : > { %v1513_v23 = vadd.f32 1.0, %v2928_v22 }
 0xca8   : > { %2929 = vrcp.f32 %v1395_v21 }
 0xca9   : > { %1518 = vrot.lane.b32.xlu1 %v1435_v17, %s3239_s24  ;;  %2931 = vrcp.f32 %v1513_v23 }
 0xcb2   : > { %v2930_v24 = vpop.eup %2929 }
 0xcb3   : > { %v2932_v27 = vpop.eup %2931 }
 0xd13   : > { %v1406_v25 = vpop.permute.xlu0 %1405 }
 0xd14   : > { %v1408_v26 = vmul.f32 %v2930_v24, %v1406_v25 }
 0xd16   : > { %1410 = vrot.lane.b32.xlu0 %v1408_v26, %s3239_s24 }
 0xd17   : > { %v1524_v28 = vpop.permute.xlu1 %1523  ;;  %v1401_v30 = vpop.permute.xlu0 %1400 }
 0xd18   : > { %v1526_v29 = vmul.f32 %v2932_v27, %v1524_v28  ;;  %v1403_v31 = vmul.f32 %v2930_v24, %v1401_v30 }
 0xd1a   : > { %1528 = vrot.lane.b32.xlu1 %v1526_v29, %s3239_s24 }
 0xd1b   : > { %v1519_v32 = vpop.permute.xlu1 %1518 }
 0xd1c   : > { %v1521_v35 = vmul.f32 %v2932_v27, %v1519_v32 }
 0xd88   : > { %v1411_v33 = vpop.permute.xlu0 %1410 }
 0xd89   : > { %v1413_v34 = vadd.f32 %v1411_v33, %v1403_v31  ;;  %v2522_v33 = vld [vmem:[%s3528_s27 + $0x30] sm:$0xff] }
 0xd8b   : > { %2933 = vtanh.f32 %v1413_v34 }
 0xd8c   : > { %v1529_v36 = vpop.permute.xlu1 %1528 }
 0xd8d   : > { %v1531_v37 = vadd.f32 %v1529_v36, %v1521_v35 }
 0xd8f   : > { %2935 = vtanh.f32 %v1531_v37 }
 0xd95   : > { %v2934_v38 = vpop.eup %2933 }
 0xd96   : > { %1416 = vrot.lane.b32.xlu0 %v2934_v38, %s3241_s13 }
 0xd99   : > { %v2936_v39 = vpop.eup %2935 }
 0xd9a   : > { %1534 = vrot.lane.b32.xlu1 %v2936_v39, %s3241_s13 }
 0xe08   : > { %v1417_v40 = vpop.permute.xlu0 %1416 }
 0xe09   : > { %v1419_v41 = vmul.f32 %v2930_v24, %v1417_v40 }
 0xe0b   : > { %1421 = vrot.lane.b32.xlu0 %v1419_v41, %s3242_s25 }
 0xe0c   : > { %v1535_v42 = vpop.permute.xlu1 %1534 }
 0xe0d   : > { %v1537_v43 = vmul.f32 %v2932_v27, %v1535_v42 }
 0xe0f   : > { %1539 = vrot.lane.b32.xlu1 %v1537_v43, %s3242_s25  ;;  %1426 = vrot.lane.b32.xlu0 %v1413_v34, %s3243_s7 }
 0xe13   : > { %1544 = vrot.lane.b32.xlu1 %v1531_v37, %s3243_s7  ;;  %v2526_v37 = vld [vmem:[%s3536_s6 + $0x8] sm:$0xff] }
 0xe7d   : > { %v1422_v44 = vpop.permute.xlu0 %1421 }
 0xe7e   : > { %1424 = vst.msk [vmem:[#allocation2] sm:$0xff] %vm362_vm0, %v1422_v44  ;;  %2509 = vst.msk [vmem:[%s3598_s17 + $0x20] sm:$0xff] %vm362_vm0, %v1422_v44 }
 0xe81   : > { %v1540_v45 = vpop.permute.xlu1 %1539  ;;  %v1427_v46 = vpop.permute.xlu0 %1426 }
 0xe82   : > { %1542 = vst.msk [vmem:[#allocation4] sm:$0xff] %vm362_vm0, %v1540_v45  ;;  %2513 = vst.msk [vmem:[%s3604_s8 + $0x18] sm:$0xff] %vm362_vm0, %v1540_v45 }
 0xe83   : > { %1429 = vst.msk [vmem:[#allocation3] sm:$0xff] %vm362_vm0, %v1427_v46 }
 0xe85   : > { %v1545_v47 = vpop.permute.xlu1 %1544  ;;  %v1552_v48 = vld [vmem:[#allocation2] sm:$0xff] }
 0xe86   : > { %1547 = vst.msk [vmem:[#allocation5] sm:$0xff] %vm362_vm0, %v1545_v47  ;;  %2665 = vmatmul.mubr.msk.f32.vlgmr.msra.gmra.mrb[10].mxu0 %vm362_vm0, %v1552_v48 }
 0xe87   : > { %2740 = vmatpush3.bf16.msra.mxu0 %v3564_v5  ;;  %2678 = vmatprep.mubr.msk.f32.mxu0 %vm3237_vm1, %v3238_v1 }
 0xe88   : > { %2744 = vmatprep.subr.bf16.mxu0 %v3236_v0 }
 0xe89   : > { %v1670_v49 = vld [vmem:[#allocation4] sm:$0xff] }
 0xe8a   : > { %2672 = vmatmul.mubr.msk.f32.vlgmr.msra.gmra.mrb[10].mxu1 %vm362_vm0, %v1670_v49  ;;  %v1553_v60 = vld [vmem:[#allocation3] sm:$0xff] }
 0xe8b   : > { %2743 = vmatpush3.bf16.msra.mxu1 %v3566_v7  ;;  %2685 = vmatprep.mubr.msk.f32.mxu1 %vm3237_vm1, %v3238_v1 }
 0xe8c   : > { %2747 = vmatprep.subr.bf16.mxu1 %v3236_v0 }
 0xe8d   : > { %v1671_v0 = vld [vmem:[#allocation5] sm:$0xff] }
 0xf59   : > { %v1623_v51 = vpop.f32.mrb[10].mxu0 }
 0xf5a   : > { %v1627_v52 = vadd.f32 %v2514_v50, %v1623_v51  ;;  %v2666_v53 = vpop.f32.mrb[11].mxu0 }
 0xf5c   : > { %2937 = vtanh.f32 %v1627_v52  ;;  %v2516_v61 = vmul.f32 -1.442695, %v1627_v52 }
 0xf5d   : > { %v1741_v55 = vpop.f32.mrb[10].mxu1 }
 0xf5e   : > { %v1745_v56 = vadd.f32 %v2518_v54, %v1741_v55  ;;  %v2673_v57 = vpop.f32.mrb[11].mxu1 }
 0xf60   : > { %2939 = vtanh.f32 %v1745_v56  ;;  %v2520_v62 = vmul.f32 -1.442695, %v1745_v56 }
 0xf61   : > { %2941 = vpow2.f32 %v2516_v61 }
 0xf62   : > { %2943 = vpow2.f32 %v2520_v62 }
 0xf66   : > { %v2938_v58 = vpop.eup %2937 }
 0xf67   : > { %1641 = vrot.lane.b32.xlu0 %v2938_v58, %s3240_s28 }
 0xf6a   : > { %v2940_v59 = vpop.eup %2939 }
 0xf6b   : > { %1759 = vrot.lane.b32.xlu1 %v2940_v59, %s3240_s28  ;;  %1636 = vrot.lane.b32.xlu0 %v1553_v60, %s3239_s24  ;;  %v2942_v63 = vpop.eup %2941 }
 0xf6c   : > { %v1631_v2 = vadd.f32 1.0, %v2942_v63  ;;  %v2944_v3 = vpop.eup %2943 }
 0xf6d   : > { %v1749_v4 = vadd.f32 1.0, %v2944_v3 }
 0xf6e   : > { %2945 = vrcp.f32 %v1631_v2 }
 0xf6f   : > { %1754 = vrot.lane.b32.xlu1 %v1671_v0, %s3239_s24  ;;  %2947 = vrcp.f32 %v1749_v4 }
 0xf78   : > { %v2946_v6 = vpop.eup %2945 }
 0xf79   : > { %v2948_v10 = vpop.eup %2947 }
 0xfd9   : > { %v1642_v8 = vpop.permute.xlu0 %1641 }
 0xfda   : > { %v1644_v9 = vmul.f32 %v2946_v6, %v1642_v8 }
 0xfdc   : > { %1646 = vrot.lane.b32.xlu0 %v1644_v9, %s3239_s24 }
 0xfdd   : > { %v1760_v11 = vpop.permute.xlu1 %1759  ;;  %v1637_v13 = vpop.permute.xlu0 %1636 }
 0xfde   : > { %v1762_v12 = vmul.f32 %v2948_v10, %v1760_v11  ;;  %v1639_v14 = vmul.f32 %v2946_v6, %v1637_v13  ;;  %v2530_v13 = vld [vmem:[%s3528_s27 + $0x38] sm:$0xff]  ;;  %s3244_s27 = smov [#allocation14]  }
 0xfdf   : > { %s3105_s0 = sshll.u32 %s3244_s27, 4  ;;  %s3106_s0 = int_to_ptr.vmem [resolvable:$false] %s3105_s0 }
 0xfe0   : > { %1764 = vrot.lane.b32.xlu1 %v1762_v12, %s3239_s24  ;;  %s3107_s3 = scalar_lea.vmem %s3106_s0, 2048  ;;  %p3108_p13 = scmp.lt.s32.totalorder %s3818_s11, %s3106_s0 }
 0xfe1   : > { %v1755_v15 = vpop.permute.xlu1 %1754  ;;  %p3109_p11 = scmp.lt.s32.totalorder %s3107_s3, %s3101_s12 }
 0xfe2   : > { %v1757_v18 = vmul.f32 %v2948_v10, %v1755_v15 }
 0xfe3   : > { %p3110_p7 = por %p3109_p11, %p3108_p13 }
 0xfe5   : > { %p3111_p10 = pnand %p3110_p7, %p3104_p6 }
0x104e   : > { %v1647_v16 = vpop.permute.xlu0 %1646 }
0x104f   : > { %v1649_v17 = vadd.f32 %v1647_v16, %v1639_v14 }
0x1051   : > { %2949 = vtanh.f32 %v1649_v17 }
0x1052   : > { %v1765_v19 = vpop.permute.xlu1 %1764 }
0x1053   : > { %v1767_v20 = vadd.f32 %v1765_v19, %v1757_v18 }
0x1055   : > { %2951 = vtanh.f32 %v1767_v20 }
0x105b   : > { %v2950_v21 = vpop.eup %2949 }
0x105c   : > { %1652 = vrot.lane.b32.xlu0 %v2950_v21, %s3241_s13 }
0x105f   : > { %v2952_v22 = vpop.eup %2951 }
0x1060   : > { %1770 = vrot.lane.b32.xlu1 %v2952_v22, %s3241_s13 }
0x10ce   : > { %v1653_v23 = vpop.permute.xlu0 %1652 }
0x10cf   : > { %v1655_v24 = vmul.f32 %v2946_v6, %v1653_v23 }
0x10d1   : > { %1657 = vrot.lane.b32.xlu0 %v1655_v24, %s3242_s25 }
0x10d2   : > { %v1771_v25 = vpop.permute.xlu1 %1770 }
0x10d3   : > { %v1773_v26 = vmul.f32 %v2948_v10, %v1771_v25 }
0x10d5   : > { %1775 = vrot.lane.b32.xlu1 %v1773_v26, %s3242_s25  ;;  %1662 = vrot.lane.b32.xlu0 %v1649_v17, %s3243_s7  ;;  %v2140_v17 = vld [vmem:[%s3536_s6] sm:$0xff] }
0x10d9   : > { %1780 = vrot.lane.b32.xlu1 %v1767_v20, %s3243_s7 }
0x1143   : > { %v1658_v27 = vpop.permute.xlu0 %1657 }
0x1144   : > { %1660 = vst.msk [vmem:[#allocation2] sm:$0xff] %vm362_vm0, %v1658_v27  ;;  %2517 = vst.msk [vmem:[%s3598_s17 + $0x28] sm:$0xff] %vm362_vm0, %v1658_v27 }
0x1147   : > { %v1776_v28 = vpop.permute.xlu1 %1775  ;;  %v1663_v29 = vpop.permute.xlu0 %1662 }
0x1148   : > { %1778 = vst.msk [vmem:[#allocation4] sm:$0xff] %vm362_vm0, %v1776_v28  ;;  %2521 = vst.msk [vmem:[%s3604_s8 + $0x10] sm:$0xff] %vm362_vm0, %v1776_v28 }
0x1149   : > { %1665 = vst.msk [vmem:[#allocation3] sm:$0xff] %vm362_vm0, %v1663_v29 }
0x114b   : > { %v1781_v30 = vpop.permute.xlu1 %1780  ;;  %v1788_v31 = vld [vmem:[#allocation2] sm:$0xff] }
0x114c   : > { %1783 = vst.msk [vmem:[#allocation5] sm:$0xff] %vm362_vm0, %v1781_v30  ;;  %2679 = vmatmul.mubr.msk.f32.vlgmr.msra.gmra.mrb[12].mxu0 %vm362_vm0, %v1788_v31 }
0x114d   : > { %2746 = vmatpush3.bf16.msra.mxu0 %v3564_v5  ;;  %2692 = vmatprep.mubr.msk.f32.mxu0 %vm3237_vm1, %v3238_v1 }
0x114f   : > { %v1906_v32 = vld [vmem:[#allocation4] sm:$0xff] }
0x1150   : > { %2686 = vmatmul.mubr.msk.f32.vlgmr.msra.gmra.mrb[12].mxu1 %vm362_vm0, %v1906_v32  ;;  %v1789_v42 = vld [vmem:[#allocation3] sm:$0xff] }
0x1151   : > { %2749 = vmatpush3.bf16.msra.mxu1 %v3566_v7  ;;  %2699 = vmatprep.mubr.msk.f32.mxu1 %vm3237_vm1, %v3238_v1 }
0x1153   : > { %v1907_v1 = vld [vmem:[#allocation5] sm:$0xff] }
0x121f   : > { %v1859_v34 = vpop.f32.mrb[12].mxu0 }
0x1220   : > { %v1863_v35 = vadd.f32 %v2522_v33, %v1859_v34  ;;  %v2680_v36 = vpop.f32.mrb[13].mxu0 }
0x1222   : > { %2953 = vtanh.f32 %v1863_v35  ;;  %v2524_v7 = vmul.f32 -1.442695, %v1863_v35 }
0x1223   : > { %v1977_v38 = vpop.f32.mrb[12].mxu1 }
0x1224   : > { %v1981_v39 = vadd.f32 %v2526_v37, %v1977_v38  ;;  %v2687_v5 = vpop.f32.mrb[13].mxu1 }
0x1226   : > { %2955 = vtanh.f32 %v1981_v39  ;;  %v2528_v43 = vmul.f32 -1.442695, %v1981_v39 }
0x1227   : > { %2957 = vpow2.f32 %v2524_v7 }
0x1228   : > { %2959 = vpow2.f32 %v2528_v43 }
0x122c   : > { %v2954_v40 = vpop.eup %2953 }
0x122d   : > { %1877 = vrot.lane.b32.xlu0 %v2954_v40, %s3240_s28 }
0x1230   : > { %v2956_v41 = vpop.eup %2955 }
0x1231   : > { %1995 = vrot.lane.b32.xlu1 %v2956_v41, %s3240_s28  ;;  %1872 = vrot.lane.b32.xlu0 %v1789_v42, %s3239_s24  ;;  %v2958_v44 = vpop.eup %2957 }
0x1232   : > { %v1867_v45 = vadd.f32 1.0, %v2958_v44  ;;  %v2960_v46 = vpop.eup %2959 }
0x1233   : > { %v1985_v47 = vadd.f32 1.0, %v2960_v46 }
0x1234   : > { %2961 = vrcp.f32 %v1867_v45 }
0x1235   : > { %1990 = vrot.lane.b32.xlu1 %v1907_v1, %s3239_s24  ;;  %2963 = vrcp.f32 %v1985_v47 }
0x123e   : > { %v2962_v48 = vpop.eup %2961 }
0x123f   : > { %v2964_v51 = vpop.eup %2963 }
0x129f   : > { %v1878_v49 = vpop.permute.xlu0 %1877 }
0x12a0   : > { %v1880_v50 = vmul.f32 %v2962_v48, %v1878_v49 }
0x12a2   : > { %1882 = vrot.lane.b32.xlu0 %v1880_v50, %s3239_s24 }
0x12a3   : > { %v1996_v52 = vpop.permute.xlu1 %1995  ;;  %v1873_v54 = vpop.permute.xlu0 %1872 }
0x12a4   : > { %v1998_v53 = vmul.f32 %v2964_v51, %v1996_v52  ;;  %v1875_v55 = vmul.f32 %v2962_v48, %v1873_v54 }
0x12a6   : > { %2000 = vrot.lane.b32.xlu1 %v1998_v53, %s3239_s24 }
0x12a7   : > { %v1991_v56 = vpop.permute.xlu1 %1990 }
0x12a8   : > { %v1993_v59 = vmul.f32 %v2964_v51, %v1991_v56 }
0x1314   : > { %v1883_v57 = vpop.permute.xlu0 %1882 }
0x1315   : > { %v1885_v58 = vadd.f32 %v1883_v57, %v1875_v55 }
0x1317   : > { %2965 = vtanh.f32 %v1885_v58 }
0x1318   : > { %v2001_v60 = vpop.permute.xlu1 %2000 }
0x1319   : > { %v2003_v0 = vadd.f32 %v2001_v60, %v1993_v59 }
0x131b   : > { %2967 = vtanh.f32 %v2003_v0 }
0x1321   : > { %v2966_v61 = vpop.eup %2965 }
0x1322   : > { %1888 = vrot.lane.b32.xlu0 %v2966_v61, %s3241_s13 }
0x1325   : > { %v2968_v62 = vpop.eup %2967 }
0x1326   : > { %2006 = vrot.lane.b32.xlu1 %v2968_v62, %s3241_s13 }
0x1394   : > { %v1889_v63 = vpop.permute.xlu0 %1888 }
0x1395   : > { %v1891_v2 = vmul.f32 %v2962_v48, %v1889_v63 }
0x1397   : > { %1893 = vrot.lane.b32.xlu0 %v1891_v2, %s3242_s25 }
0x1398   : > { %v2007_v3 = vpop.permute.xlu1 %2006 }
0x1399   : > { %v2009_v4 = vmul.f32 %v2964_v51, %v2007_v3 }
0x139b   : > { %2011 = vrot.lane.b32.xlu1 %v2009_v4, %s3242_s25  ;;  %1898 = vrot.lane.b32.xlu0 %v1885_v58, %s3243_s7 }
0x139f   : > { %2016 = vrot.lane.b32.xlu1 %v2003_v0, %s3243_s7 }
0x1409   : > { %v1894_v6 = vpop.permute.xlu0 %1893 }
0x140a   : > { %1896 = vst.msk [vmem:[#allocation2] sm:$0xff] %vm362_vm0, %v1894_v6  ;;  %2525 = vst.msk [vmem:[%s3598_s17 + $0x30] sm:$0xff] %vm362_vm0, %v1894_v6 }
0x140d   : > { %v2012_v8 = vpop.permute.xlu1 %2011  ;;  %v1899_v9 = vpop.permute.xlu0 %1898 }
0x140e   : > { %2014 = vst.msk [vmem:[#allocation4] sm:$0xff] %vm362_vm0, %v2012_v8  ;;  %2529 = vst.msk [vmem:[%s3604_s8 + $0x8] sm:$0xff] %vm362_vm0, %v2012_v8 }
0x140f   : > { %1901 = vst.msk [vmem:[#allocation3] sm:$0xff] %vm362_vm0, %v1899_v9 }
0x1411   : > { %v2017_v10 = vpop.permute.xlu1 %2016  ;;  %v2024_v11 = vld [vmem:[#allocation2] sm:$0xff] }
0x1412   : > { %2019 = vst.msk [vmem:[#allocation5] sm:$0xff] %vm362_vm0, %v2017_v10  ;;  %2693 = vmatmul.mubr.msk.f32.vlgmr.msra.gmra.mrb[14].mxu0 %vm362_vm0, %v2024_v11 }
0x1415   : > { %v2141_v12 = vld [vmem:[#allocation4] sm:$0xff] }
0x1416   : > { %2700 = vmatmul.mubr.msk.f32.vlgmr.msra.gmra.mrb[14].mxu1 %vm362_vm0, %v2141_v12  ;;  %v2025_v23 = vld [vmem:[#allocation3] sm:$0xff] }
0x1419   : > { %v2142_v24 = vld [vmem:[#allocation5] sm:$0xff] }
0x14e5   : > { %v2095_v14 = vpop.f32.mrb[14].mxu0 }
0x14e6   : > { %v2099_v15 = vadd.f32 %v2530_v13, %v2095_v14  ;;  %v2694_v16 = vpop.f32.mrb[15].mxu0 }
0x14e8   : > { %2969 = vtanh.f32 %v2099_v15  ;;  %v2532_v25 = vmul.f32 -1.442695, %v2099_v15 }
0x14e9   : > { %v2212_v18 = vpop.f32.mrb[14].mxu1 }
0x14ea   : > { %v2216_v19 = vadd.f32 %v2212_v18, %v2140_v17  ;;  %v2701_v20 = vpop.f32.mrb[15].mxu1 }
0x14ec   : > { %2971 = vtanh.f32 %v2216_v19  ;;  %v2535_v26 = vmul.f32 -1.442695, %v2216_v19 }
0x14ed   : > { %2973 = vpow2.f32 %v2532_v25 }
0x14ee   : > { %2975 = vpow2.f32 %v2535_v26 }
0x14f2   : > { %v2970_v21 = vpop.eup %2969 }
0x14f3   : > { %2113 = vrot.lane.b32.xlu0 %v2970_v21, %s3240_s28 }
0x14f6   : > { %v2972_v22 = vpop.eup %2971 }
0x14f7   : > { %2230 = vrot.lane.b32.xlu1 %v2972_v22, %s3240_s28  ;;  %2108 = vrot.lane.b32.xlu0 %v2025_v23, %s3239_s24  ;;  %v2974_v27 = vpop.eup %2973 }
0x14f8   : > { %v2103_v28 = vadd.f32 1.0, %v2974_v27  ;;  %v2976_v29 = vpop.eup %2975 }
0x14f9   : > { %v2220_v30 = vadd.f32 1.0, %v2976_v29 }
0x14fa   : > { %2977 = vrcp.f32 %v2103_v28 }
0x14fb   : > { %2225 = vrot.lane.b32.xlu1 %v2142_v24, %s3239_s24  ;;  %2979 = vrcp.f32 %v2220_v30 }
0x1504   : > { %v2978_v31 = vpop.eup %2977 }
0x1505   : > { %v2980_v34 = vpop.eup %2979 }
0x1565   : > { %v2114_v32 = vpop.permute.xlu0 %2113 }
0x1566   : > { %v2116_v33 = vmul.f32 %v2978_v31, %v2114_v32 }
0x1568   : > { %2118 = vrot.lane.b32.xlu0 %v2116_v33, %s3239_s24 }
0x1569   : > { %v2231_v35 = vpop.permute.xlu1 %2230  ;;  %v2109_v37 = vpop.permute.xlu0 %2108 }
0x156a   : > { %v2233_v36 = vmul.f32 %v2980_v34, %v2231_v35  ;;  %v2111_v38 = vmul.f32 %v2978_v31, %v2109_v37 }
0x156c   : > { %2235 = vrot.lane.b32.xlu1 %v2233_v36, %s3239_s24 }
0x156d   : > { %v2226_v39 = vpop.permute.xlu1 %2225 }
0x156e   : > { %v2228_v41 = vmul.f32 %v2980_v34, %v2226_v39 }
0x15da   : > { %v2119_v5 = vpop.permute.xlu0 %2118 }
0x15db   : > { %v2121_v40 = vadd.f32 %v2119_v5, %v2111_v38 }
0x15dd   : > { %2981 = vtanh.f32 %v2121_v40 }
0x15de   : > { %v2236_v42 = vpop.permute.xlu1 %2235 }
0x15df   : > { %v2238_v1 = vadd.f32 %v2236_v42, %v2228_v41 }
0x15e1   : > { %2983 = vtanh.f32 %v2238_v1 }
0x15e7   : > { %v2982_v7 = vpop.eup %2981 }
0x15e8   : > { %2124 = vrot.lane.b32.xlu0 %v2982_v7, %s3241_s13 }
0x15eb   : > { %v2984_v43 = vpop.eup %2983 }
0x15ec   : > { %2241 = vrot.lane.b32.xlu1 %v2984_v43, %s3241_s13 }
0x165a   : > { %v2125_v44 = vpop.permute.xlu0 %2124 }
0x165b   : > { %v2127_v45 = vmul.f32 %v2978_v31, %v2125_v44 }
0x165d   : > { %2129 = vrot.lane.b32.xlu0 %v2127_v45, %s3242_s25 }
0x165e   : > { %v2242_v46 = vpop.permute.xlu1 %2241 }
0x165f   : > { %v2244_v47 = vmul.f32 %v2980_v34, %v2242_v46 }
0x1661   : > { %2246 = vrot.lane.b32.xlu1 %v2244_v47, %s3242_s25  ;;  %2134 = vrot.lane.b32.xlu0 %v2121_v40, %s3243_s7 }
0x1665   : > { %2251 = vrot.lane.b32.xlu1 %v2238_v1, %s3243_s7 }
0x16cf   : > { %v2130_v48 = vpop.permute.xlu0 %2129 }
0x16d0   : > { %2132 = vst.msk [vmem:[#allocation2] sm:$0xff] %vm362_vm0, %v2130_v48  ;;  %2533 = vst.msk [vmem:[%s3598_s17 + $0x38] sm:$0xff] %vm362_vm0, %v2130_v48 }
0x16d1   : > { %3114 = shalt.err (!%p3111_p10)
}
0x16d2   : > { %s3115_s6 = scalar_lea.hbm %s3826_s16, 1024  ;;  %s3119_s13 = scalar_lea.hbm %s3926_s4, 2048 }
0x16d3   : > { %p3116_p2 = scmp.ne.s32.totalorder %s3826_s16, %s3115_s6  ;;  %p3120_p4 = scmp.lt.u32.totalorder %s3826_s16, %s3926_s4 }
0x16d4   : > { %p3121_p3 = scmp.lt.u32.totalorder %s3119_s13, %s3115_s6  ;;  %p3123_p0 = scmp.lt.u32.totalorder %s3115_s6, %s3826_s16 }
0x16d5   : > { %p3117_p9 = pnand %p3116_p2, %p3962_p5 }
0x16d6   : > { %p3122_p8 = por %p3121_p3, %p3120_p4 }
0x16d7   : > { %p3118_p12 = pneg %p3117_p9 }
0x16d8   : > { %p3124_p1 = por %p3123_p0, %p3122_p8 }
0x16da   : > { %p3125_p6 = pnand %p3124_p1, %p3118_p12 }
0x16dc   : > { %3128 = shalt.err (!%p3125_p6)
}
0x16dd   : > { %s3245_s17 = smov 128   ;;  %s3246_s9 = smov 256   ;;  %v2247_v49 = vpop.permute.xlu1 %2246  ;;  %v2135_v50 = vpop.permute.xlu0 %2134 }
0x16de   : > { %s3247_s15 = smov 8   ;;  %s3865_s0 = scalar_lea.hbm %s3927_s5, %s2538_s26  ;;  %2249 = vst.msk [vmem:[#allocation4] sm:$0xff] %vm362_vm0, %v2247_v49  ;;  %2255 = vst.msk [vmem:[%s3604_s8] sm:$0xff] %vm362_vm0, %v2247_v49 }
0x16df   : > { %2762 = dma.vmem_to_hbm [thread:$0]  (%p3962_p5), %s3818_s11, 1024, %s3826_s16, %s2257_s10, %s3245_s17, %s3246_s9, %s3247_s15   ;;  %2137 = vst.msk [vmem:[#allocation3] sm:$0xff] %vm362_vm0, %v2135_v50 }
0x16e0   : > { %s2262_s3 = scalar_lea.sflag [#allocation16], %s3521_s14  ;;  %s3129_s6 = scalar_lea.vmem %s3828_s2, 1024 }
0x16e1   : > { %p3130_p13 = scmp.ne.s32.totalorder %s3828_s2, %s3129_s6  ;;  %s3248_s21 = smov [#allocation15]  }
0x16e2   : > { %s3133_s11 = sshll.u32 %s3248_s21, 4  ;;  %s3134_s11 = int_to_ptr.vmem [resolvable:$false] %s3133_s11 }
0x16e3   : > { %p3131_p11 = pnand %p3130_p13, %p3962_p5  ;;  %s3135_s16 = scalar_lea.vmem %s3134_s11, 2048 }
0x16e4   : > { %p3136_p10 = scmp.lt.s32.totalorder %s3828_s2, %s3134_s11  ;;  %p3137_p2 = scmp.lt.s32.totalorder %s3135_s16, %s3129_s6 }
0x16e5   : > { %p3132_p7 = pneg %p3131_p11 }
0x16e6   : > { %p3138_p9 = por %p3137_p2, %p3136_p10 }
0x16e8   : > { %p3139_p12 = pnand %p3138_p9, %p3132_p7 }
0x16ea   : > { %3142 = shalt.err (!%p3139_p12)
}
0x16eb   : > { %s3143_s8 = scalar_lea.hbm %s3865_s0, 1024  ;;  %s3147_s24 = scalar_lea.hbm %s3927_s5, 2048 }
0x16ec   : > { %p3144_p4 = scmp.ne.s32.totalorder %s3865_s0, %s3143_s8  ;;  %p3148_p0 = scmp.lt.u32.totalorder %s3865_s0, %s3927_s5 }
0x16ed   : > { %p3149_p1 = scmp.lt.u32.totalorder %s3147_s24, %s3143_s8  ;;  %p3151_p13 = scmp.lt.u32.totalorder %s3143_s8, %s3865_s0 }
0x16ee   : > { %p3145_p3 = pnand %p3144_p4, %p3962_p5 }
0x16ef   : > { %p3150_p6 = por %p3149_p1, %p3148_p0 }
0x16f0   : > { %p3146_p8 = pneg %p3145_p3 }
0x16f1   : > { %p3152_p11 = por %p3151_p13, %p3150_p6 }
0x16f3   : > { %p3153_p7 = pnand %p3152_p11, %p3146_p8 }
0x16f5   : > { %3156 = shalt.err (!%p3153_p7)
}
0x16f6   : > { %2763 = dma.vmem_to_hbm [thread:$0]  (%p3962_p5), %s3828_s2, 1024, %s3865_s0, %s2262_s3, %s3245_s17, %s3246_s9, %s3247_s15   ;;  %v2252_v51 = vpop.permute.xlu1 %2251 }
0x16f7   : > { %2254 = vst.msk [vmem:[#allocation5] sm:$0xff] %vm362_vm0, %v2252_v51 }
0x16f8 PF: > { %s3963_s25 = sld [smem:[#allocation23_spill]]  ;;  %s2311_s7 = sand.u32 1, %s3207_s18  }
0x16f9   : > { %p3965_p2 = scmp.ge.s32.totalorder %s3227_s23, 2  ;;  %s2312_s29 = scalar_lea.sflag [#allocation8], %s2311_s7 }
0x16fe   : > { %p3964_p10 = scmp.ne.s32.totalorder %s3963_s25, 0 }
0x1700   : > { %p2781_p9 = pnand %p3965_p2, %p3964_p10 }
0x1702   : > { %3198 = dma.done.wait (!%p2781_p9), %s2312_s29, 1024  }
0x1703   : > { %3200 = vsyncadd (!%p2781_p9), %s2312_s29, 4294966272  ;;  %s2321_s12 = scalar_lea.sflag [#allocation16], %s2311_s7 }
0x1704   : > { %3202 = dma.done.wait (!%p2781_p9), %s2321_s12, 1024  }
0x1705   : > { %3204 = vsyncadd (!%p2781_p9), %s2321_s12, 4294966272  ;;  %s29_s23 = sadd.s32 1, %s3227_s23   ;;  %s3966_s14 = sld [smem:[#allocation24_spill]] }
0x1706   : > { %p26_p5 = scmp.ge.s32.totalorder %s29_s23, 4   ;;  %s3967_s18 = smov %s3211_s19 }
0x1707   : > { %s3968_s19 = smov %s3215_s20  ;;  %s3969_s20 = smov %s3445_s30 }
0x1708   : > { %s3970_s21 = smov %s3223_s22  ;;  %28 = sbr.rel (!%p26_p5) target bundleno = 15 (0xf), region = 151 }
0x170b   : > { %s3971_s22 = smov %s3966_s14 }
0x170f   :  { %2326 = vsyncpa [#allocation7], 1 }
0x1710   :  { %2328 = vsyncpa [#allocation7 + $0x1], 1 }
0x1711   :  { %2329 = vsyncpa [#allocation10], 1 }
0x1712   :  { %2331 = vsyncpa [#allocation10 + $0x1], 1 }
0x1713   :  { %2332 = vsyncpa [#allocation13], 1 }
0x1714   :  { %2333 = vsyncpa [#allocation8], 1 }
0x1715   :  { %2335 = vsyncpa [#allocation8 + $0x1], 1 }
0x1716   :  { %2336 = vsyncpa [#allocation16], 1 }
0x1717   :  { %2338 = vsyncpa [#allocation16 + $0x1], 1 }

// kernel: jnf_ssf_forward.9
= control target key start
LH: loop header
LB: loop body
LE: loop exit
PB: predicated region body
PF: predicated region fallthrough
CT: control target
= control target key end

     0   :  { %s1205_s0 = inlined_call_operand.hbm [shape: f32[128,16], index: 0, kind: input, shape index: {}]   ;;  %s1206_s1 = inlined_call_operand.hbm [shape: f32[128,16], index: 1, kind: input, shape index: {}]   ;;  %s1207_s2 = inlined_call_operand.hbm [shape: f32[16,1], index: 2, kind: input, shape index: {}]   ;;  %s1208_s3 = inlined_call_operand.hbm [shape: f32[16,1], index: 3, kind: input, shape index: {}]   ;;  %s1209_s4 = inlined_call_operand.<no memory space> [shape: f32[1,1], index: 4, kind: input, shape index: {}]   ;;  %s1210_s5 = inlined_call_operand.hbm [shape: f32[128,1], index: 5, kind: output, shape index: {}]  }
   0x1   :  { %v10_v0 = vstv %s1209_s4 }
   0x2   :  { %11 = vst [vmem:[#allocation2] sm:$0x1] %v10_v0 }
   0x3   :  { %12 = vsyncpa [#allocation4], 0 }
   0x4   :  { %13 = vsyncpa [#allocation7], 0 }
   0x5   :  { %14 = vsyncpa [#allocation10], 0 }
   0x6   :  { %15 = vsyncpa [#allocation5], 0  ;;  %s1010_s20 = smov [#allocation6]   ;;  %s1011_s22 = smov [#allocation3]  }
   0x7   :  { %s33_s21 = sshll.u32 %s1010_s20, 4  ;;  %s21_s23 = sshll.u32 %s1011_s22, 4  ;;  %s34_s21 = int_to_ptr.vmem [resolvable:$true] %s33_s21  ;;  %s1050_s23 = int_to_ptr.vmem [resolvable:$true] %s21_s23 }
   0x8   :  { %s892_s26 = scalar_lea.hbm %s1206_s1, 2048 }
   0x9   :  { %p893_p0 = scmp.ne.s32.totalorder %s1206_s1, %s892_s26  ;;  %p896_p1 = scmp.lt.u32.totalorder %s892_s26, %s1206_s1 }
   0xb   :  { %p898_p2 = pnand %p896_p1, %p893_p0 }
   0xd   :  { %901 = shalt.err (!%p898_p2)
}
   0xe   :  { %s902_s30 = scalar_lea.vmem %s34_s21, 2048  ;;  %p907_p4 = scmp.lt.s32.totalorder %s34_s21, %s34_s21 }
   0xf   :  { %p903_p3 = scmp.ne.s32.totalorder %s34_s21, %s902_s30  ;;  %p908_p5 = scmp.lt.s32.totalorder %s902_s30, %s902_s30 }
  0x11   :  { %p909_p6 = por %p908_p5, %p907_p4 }
  0x13   :  { %p910_p7 = pnand %p909_p6, %p903_p3 }
  0x15   :  { %913 = shalt.err (!%p910_p7)
}
  0x16   :  { %s1012_s6 = smov 128   ;;  %s1013_s7 = smov 8  }
  0x17   :  { %39 = dma.hbm_to_vmem [thread:$0]  %s1206_s1, 2048, %s34_s21, [#allocation7], %s1012_s6, %s1012_s6, %s1013_s7  }
  0x18   :  { %s914_s12 = scalar_lea.hbm %s1205_s0, 2048 }
  0x19   :  { %p915_p8 = scmp.ne.s32.totalorder %s1205_s0, %s914_s12  ;;  %p918_p9 = scmp.lt.u32.totalorder %s914_s12, %s1205_s0 }
  0x1b   :  { %p920_p10 = pnand %p918_p9, %p915_p8 }
  0x1d   :  { %923 = shalt.err (!%p920_p10)
}
  0x1e   :  { %s924_s17 = scalar_lea.vmem %s1050_s23, 2048  ;;  %p929_p12 = scmp.lt.s32.totalorder %s1050_s23, %s1050_s23 }
  0x1f   :  { %p925_p11 = scmp.ne.s32.totalorder %s1050_s23, %s924_s17  ;;  %p930_p13 = scmp.lt.s32.totalorder %s924_s17, %s924_s17 }
  0x21   :  { %p931_p0 = por %p930_p13, %p929_p12 }
  0x23   :  { %p932_p1 = pnand %p931_p0, %p925_p11 }
  0x25   :  { %935 = shalt.err (!%p932_p1)
}
  0x26   :  { %27 = dma.hbm_to_vmem [thread:$0]  %s1205_s0, 2048, %s1050_s23, [#allocation4], %s1012_s6, %s1012_s6, %s1013_s7  }
  0x27   :  { %s1014_s19 = smov [#allocation8]   ;;  %s1015_s21 = smov [#allocation9]  }
  0x28   :  { %s45_s20 = sshll.u32 %s1014_s19, 4  ;;  %s57_s22 = sshll.u32 %s1015_s21, 4  ;;  %s46_s20 = int_to_ptr.vmem [resolvable:$true] %s45_s20  ;;  %s1087_s22 = int_to_ptr.vmem [resolvable:$true] %s57_s22 }
  0x29   :  { %s936_s26 = scalar_lea.hbm %s1207_s2, 256 }
  0x2a   :  { %p937_p2 = scmp.ne.s32.totalorder %s1207_s2, %s936_s26  ;;  %p940_p3 = scmp.lt.u32.totalorder %s936_s26, %s1207_s2 }
  0x2c   :  { %p942_p4 = pnand %p940_p3, %p937_p2 }
  0x2e   :  { %945 = shalt.err (!%p942_p4)
}
  0x2f   :  { %s946_s0 = scalar_lea.vmem %s46_s20, 256  ;;  %p951_p6 = scmp.lt.s32.totalorder %s46_s20, %s46_s20 }
  0x30   :  { %p947_p5 = scmp.ne.s32.totalorder %s46_s20, %s946_s0  ;;  %p952_p7 = scmp.lt.s32.totalorder %s946_s0, %s946_s0 }
  0x32   :  { %p953_p8 = por %p952_p7, %p951_p6 }
  0x34   :  { %p954_p9 = pnand %p953_p8, %p947_p5 }
  0x36   :  { %957 = shalt.err (!%p954_p9)
}
  0x37   :  { %51 = dma.hbm_to_vmem [thread:$0]  %s1207_s2, 256, %s46_s20, [#allocation7], %s1012_s6, %s1012_s6, %s1013_s7  }
  0x38   :  { %s958_s10 = scalar_lea.hbm %s1208_s3, 256 }
  0x39   :  { %p959_p10 = scmp.ne.s32.totalorder %s1208_s3, %s958_s10  ;;  %p962_p11 = scmp.lt.u32.totalorder %s958_s10, %s1208_s3 }
  0x3b   :  { %p964_p12 = pnand %p962_p11, %p959_p10 }
  0x3d   :  { %967 = shalt.err (!%p964_p12)
}
  0x3e   :  { %s968_s15 = scalar_lea.vmem %s1087_s22, 256  ;;  %p973_p0 = scmp.lt.s32.totalorder %s1087_s22, %s1087_s22 }
  0x3f   :  { %p969_p13 = scmp.ne.s32.totalorder %s1087_s22, %s968_s15  ;;  %p974_p1 = scmp.lt.s32.totalorder %s968_s15, %s968_s15 }
  0x41   :  { %p975_p2 = por %p974_p1, %p973_p0 }
  0x43   :  { %p976_p3 = pnand %p975_p2, %p969_p13 }
  0x45   :  { %979 = shalt.err (!%p976_p3)
}
  0x46   :  { %63 = dma.hbm_to_vmem [thread:$0]  %s1208_s3, 256, %s1087_s22, [#allocation10], %s1012_s6, %s1012_s6, %s1013_s7  }
  0x47   :  { %1002 = dma.done.wait [#allocation4], 2048  }
  0x48   :  { %1003 = vsyncadd [#allocation4], 4294965248 }
  0x49   :  { %1004 = dma.done.wait [#allocation7], 2304  }
  0x4a   :  { %1005 = vsyncadd [#allocation7], 4294964992 }
  0x4b   :  { %1006 = dma.done.wait [#allocation10], 256  }
  0x4c   :  { %1007 = vsyncadd [#allocation10], 4294967040  ;;  %vm114_vm0 = vcmask 130048   ;;  %v112_v1 = vld [vmem:[#allocation9] sm:$0xff]  ;;  %v113_v2 = vld [vmem:[#allocation9 + $0x8] sm:$0xff]  ;;  %vm620_vm1 = vcmask 7168  }
  0x4d   :  { %v94_v3 = vld [vmem:[#allocation8] sm:$0xff]  ;;  %v797_v4 = vpack.c.bf16 %v113_v2, %v112_v1  ;;  %v95_v5 = vld [vmem:[#allocation8 + $0x8] sm:$0xff]  ;;  %v98_v11 = vld [vmem:[#allocation6 + $0x10] sm:$0xff]  ;;  %s1016_s3 = smov [#allocation11]  }
  0x4e   :  { %v96_v6 = vld [vmem:[#allocation6] sm:$0xff]  ;;  %v801_v8 = vpack.c.bf16 %v95_v5, %v94_v3  ;;  %v97_v9 = vld [vmem:[#allocation6 + $0x8] sm:$0xff]  ;;  %v80_v12 = vld [vmem:[#allocation3 + $0x10] sm:$0xff]  ;;  %s642_s17 = sshll.u32 %s1016_s3, 4  ;;  %s643_s17 = int_to_ptr.vmem [resolvable:$true] %s642_s17 }
  0x4f   :  { %v78_v7 = vld [vmem:[#allocation3] sm:$0xff]  ;;  %745 = vmatprep.mubr.msk.f32.mxu1 %vm114_vm0, %v96_v6  ;;  %798 = vmatprep.subr.bf16.mxu1 %v797_v4  ;;  %v79_v10 = vld [vmem:[#allocation3 + $0x8] sm:$0xff]  ;;  %v99_v13 = vld [vmem:[#allocation6 + $0x18] sm:$0xff]  ;;  %s980_s1 = scalar_lea.vmem %s643_s17, 2048  ;;  %p985_p5 = scmp.lt.s32.totalorder %s643_s17, %s643_s17 }
  0x50   :  { %773 = vmatprep.mubr.msk.f32.mxu0 %vm114_vm0, %v78_v7  ;;  %802 = vmatprep.subr.bf16.mxu0 %v801_v8  ;;  %v81_v14 = vld [vmem:[#allocation3 + $0x18] sm:$0xff]  ;;  %v100_v15 = vld [vmem:[#allocation6 + $0x20] sm:$0xff]  ;;  %v101_v17 = vld [vmem:[#allocation6 + $0x28] sm:$0xff]  ;;  %p981_p4 = scmp.ne.s32.totalorder %s643_s17, %s980_s1  ;;  %p986_p6 = scmp.lt.s32.totalorder %s980_s1, %s980_s1 }
  0x51   :  { %800 = vmatpush3.bf16.msra.mxu1 %v797_v4  ;;  %804 = vmatpush3.bf16.msra.mxu0 %v801_v8  ;;  %v82_v16 = vld [vmem:[#allocation3 + $0x20] sm:$0xff]  ;;  %v83_v18 = vld [vmem:[#allocation3 + $0x28] sm:$0xff]  ;;  %v102_v19 = vld [vmem:[#allocation6 + $0x30] sm:$0xff] }
  0x52   :  { %v84_v20 = vld [vmem:[#allocation3 + $0x30] sm:$0xff]  ;;  %v103_v21 = vld [vmem:[#allocation6 + $0x38] sm:$0xff]  ;;  %v104_v23 = vld [vmem:[#allocation6 + $0x40] sm:$0xff]  ;;  %p987_p7 = por %p986_p6, %p985_p5 }
  0x53   :  { %v85_v22 = vld [vmem:[#allocation3 + $0x38] sm:$0xff]  ;;  %v86_v24 = vld [vmem:[#allocation3 + $0x40] sm:$0xff]  ;;  %v105_v25 = vld [vmem:[#allocation6 + $0x48] sm:$0xff] }
  0x54   :  { %746 = vmatmul.mubr.msk.f32.vlgmr.msra.gmra.mrb[0].mxu1 %vm114_vm0, %v97_v9  ;;  %774 = vmatmul.mubr.msk.f32.vlgmr.msra.gmra.mrb[0].mxu0 %vm114_vm0, %v79_v10  ;;  %v87_v26 = vld [vmem:[#allocation3 + $0x48] sm:$0xff]  ;;  %v106_v27 = vld [vmem:[#allocation6 + $0x50] sm:$0xff]  ;;  %v107_v29 = vld [vmem:[#allocation6 + $0x58] sm:$0xff]  ;;  %p988_p8 = pnand %p987_p7, %p981_p4 }
  0x55   :  { %748 = vmatprep.mubr.msk.f32.mxu1 %vm114_vm0, %v98_v11  ;;  %776 = vmatprep.mubr.msk.f32.mxu0 %vm114_vm0, %v80_v12  ;;  %v88_v28 = vld [vmem:[#allocation3 + $0x50] sm:$0xff]  ;;  %v89_v30 = vld [vmem:[#allocation3 + $0x58] sm:$0xff]  ;;  %v108_v31 = vld [vmem:[#allocation6 + $0x60] sm:$0xff] }
  0x56   :  { %v90_v32 = vld [vmem:[#allocation3 + $0x60] sm:$0xff]  ;;  %v109_v33 = vld [vmem:[#allocation6 + $0x68] sm:$0xff]  ;;  %v110_v35 = vld [vmem:[#allocation6 + $0x70] sm:$0xff] }
  0x57   :  { %v91_v34 = vld [vmem:[#allocation3 + $0x68] sm:$0xff]  ;;  %v92_v36 = vld [vmem:[#allocation3 + $0x70] sm:$0xff]  ;;  %v111_v37 = vld [vmem:[#allocation6 + $0x78] sm:$0xff] }
  0x58   :  { %749 = vmatmul.mubr.msk.f32.gmra.mrb[2].mxu1 %vm114_vm0, %v99_v13  ;;  %777 = vmatmul.mubr.msk.f32.gmra.mrb[2].mxu0 %vm114_vm0, %v81_v14  ;;  %v93_v38 = vld [vmem:[#allocation3 + $0x78] sm:$0xff] }
  0x59   :  { %751 = vmatprep.mubr.msk.f32.mxu1 %vm114_vm0, %v100_v15  ;;  %779 = vmatprep.mubr.msk.f32.mxu0 %vm114_vm0, %v82_v16  ;;  %v1156_v41 = vld [vmem:[#allocation2] ss:$0 sm:$0xff] }
  0x5c   :  { %752 = vmatmul.mubr.msk.f32.gmra.mrb[4].mxu1 %vm114_vm0, %v101_v17  ;;  %780 = vmatmul.mubr.msk.f32.gmra.mrb[4].mxu0 %vm114_vm0, %v83_v18 }
  0x5d   :  { %754 = vmatprep.mubr.msk.f32.mxu1 %vm114_vm0, %v102_v19  ;;  %782 = vmatprep.mubr.msk.f32.mxu0 %vm114_vm0, %v84_v20 }
  0x60   :  { %755 = vmatmul.mubr.msk.f32.gmra.mrb[6].mxu1 %vm114_vm0, %v103_v21  ;;  %783 = vmatmul.mubr.msk.f32.gmra.mrb[6].mxu0 %vm114_vm0, %v85_v22 }
  0x61   :  { %757 = vmatprep.mubr.msk.f32.mxu1 %vm114_vm0, %v104_v23  ;;  %785 = vmatprep.mubr.msk.f32.mxu0 %vm114_vm0, %v86_v24 }
  0x64   :  { %758 = vmatmul.mubr.msk.f32.gmra.mrb[8].mxu1 %vm114_vm0, %v105_v25  ;;  %786 = vmatmul.mubr.msk.f32.gmra.mrb[8].mxu0 %vm114_vm0, %v87_v26 }
  0x65   :  { %760 = vmatprep.mubr.msk.f32.mxu1 %vm114_vm0, %v106_v27  ;;  %788 = vmatprep.mubr.msk.f32.mxu0 %vm114_vm0, %v88_v28 }
  0x68   :  { %761 = vmatmul.mubr.msk.f32.gmra.mrb[10].mxu1 %vm114_vm0, %v107_v29  ;;  %789 = vmatmul.mubr.msk.f32.gmra.mrb[10].mxu0 %vm114_vm0, %v89_v30 }
  0x69   :  { %763 = vmatprep.mubr.msk.f32.mxu1 %vm114_vm0, %v108_v31  ;;  %791 = vmatprep.mubr.msk.f32.mxu0 %vm114_vm0, %v90_v32 }
  0x6c   :  { %764 = vmatmul.mubr.msk.f32.gmra.mrb[12].mxu1 %vm114_vm0, %v109_v33  ;;  %792 = vmatmul.mubr.msk.f32.gmra.mrb[12].mxu0 %vm114_vm0, %v91_v34 }
  0x6d   :  { %766 = vmatprep.mubr.msk.f32.mxu1 %vm114_vm0, %v110_v35  ;;  %794 = vmatprep.mubr.msk.f32.mxu0 %vm114_vm0, %v92_v36 }
  0x70   :  { %767 = vmatmul.mubr.msk.f32.gmra.mrb[14].mxu1 %vm114_vm0, %v111_v37  ;;  %795 = vmatmul.mubr.msk.f32.gmra.mrb[14].mxu0 %vm114_vm0, %v93_v38 }
 0x127   :  { %v747_v39 = vpop.f32.mrb[0].mxu1  ;;  %v775_v40 = vpop.f32.mrb[0].mxu0 }
 0x128   :  { %v229_v42 = vpop.f32.mrb[1].mxu1  ;;  %v428_v43 = vadd.f32 %v775_v40, %v747_v39  ;;  %v422_v44 = vpop.f32.mrb[1].mxu0 }
 0x129   :  { %v423_v45 = vadd.f32 %v422_v44, %v229_v42 }
 0x12a   :  { %v509_v46 = vadd.f32 %v1156_v41, %v428_v43 }
 0x12b   :  { %v750_v47 = vpop.f32.mrb[2].mxu1  ;;  %v508_v48 = vadd.f32 %v1156_v41, %v423_v45  ;;  %v778_v49 = vpop.f32.mrb[2].mxu0 }
 0x12c   :  { %v239_v50 = vpop.f32.mrb[3].mxu1  ;;  %v690_v51 = vmul.f32 -1.442695, %v509_v46  ;;  %v438_v52 = vadd.f32 %v778_v49, %v750_v47  ;;  %v432_v53 = vpop.f32.mrb[3].mxu0 }
 0x12d   :  { %v689_v54 = vmul.f32 -1.442695, %v508_v48  ;;  %v433_v55 = vadd.f32 %v432_v53, %v239_v50 }
 0x12e   :  { %828 = vpow2.f32 %v690_v51  ;;  %v511_v56 = vadd.f32 %v1156_v41, %v438_v52 }
 0x12f   :  { %v753_v57 = vpop.f32.mrb[4].mxu1  ;;  %830 = vpow2.f32 %v689_v54  ;;  %v510_v58 = vadd.f32 %v1156_v41, %v433_v55  ;;  %v781_v59 = vpop.f32.mrb[4].mxu0 }
 0x130   :  { %v249_v60 = vpop.f32.mrb[5].mxu1  ;;  %v692_v61 = vmul.f32 -1.442695, %v511_v56  ;;  %v448_v62 = vadd.f32 %v781_v59, %v753_v57  ;;  %v442_v63 = vpop.f32.mrb[5].mxu0 }
 0x131   :  { %v691_v0 = vmul.f32 -1.442695, %v510_v58  ;;  %v443_v1 = vadd.f32 %v442_v63, %v249_v60 }
 0x132   :  { %832 = vpow2.f32 %v692_v61  ;;  %v513_v2 = vadd.f32 %v1156_v41, %v448_v62 }
 0x133   :  { %v756_v3 = vpop.f32.mrb[6].mxu1  ;;  %834 = vpow2.f32 %v691_v0  ;;  %v512_v4 = vadd.f32 %v1156_v41, %v443_v1  ;;  %v784_v5 = vpop.f32.mrb[6].mxu0 }
 0x134   :  { %v259_v6 = vpop.f32.mrb[7].mxu1  ;;  %v694_v7 = vmul.f32 -1.442695, %v513_v2  ;;  %v458_v8 = vadd.f32 %v784_v5, %v756_v3  ;;  %v452_v9 = vpop.f32.mrb[7].mxu0 }
 0x135   :  { %v693_v10 = vmul.f32 -1.442695, %v512_v4  ;;  %v453_v11 = vadd.f32 %v452_v9, %v259_v6 }
 0x136   :  { %836 = vpow2.f32 %v694_v7  ;;  %v515_v12 = vadd.f32 %v1156_v41, %v458_v8 }
 0x137   :  { %v759_v13 = vpop.f32.mrb[8].mxu1  ;;  %838 = vpow2.f32 %v693_v10  ;;  %v514_v14 = vadd.f32 %v1156_v41, %v453_v11  ;;  %v787_v15 = vpop.f32.mrb[8].mxu0 }
 0x138   :  { %v269_v16 = vpop.f32.mrb[9].mxu1  ;;  %v829_v17 = vpop.eup %828  ;;  %v696_v18 = vmul.f32 -1.442695, %v515_v12  ;;  %v468_v19 = vadd.f32 %v787_v15, %v759_v13 }
 0x139   :  { %v462_v20 = vpop.f32.mrb[9].mxu0  ;;  %v831_v21 = vpop.eup %830  ;;  %v573_v22 = vadd.f32 1.0, %v829_v17  ;;  %v695_v23 = vmul.f32 -1.442695, %v514_v14 }
 0x13a   :  { %v463_v24 = vadd.f32 %v462_v20, %v269_v16  ;;  %v572_v25 = vadd.f32 1.0, %v831_v21  ;;  %840 = vpow2.f32 %v696_v18  ;;  %v517_v26 = vadd.f32 %v1156_v41, %v468_v19 }
 0x13b   :  { %v762_v27 = vpop.f32.mrb[10].mxu1  ;;  %842 = vrcp.f32 %v573_v22  ;;  %v790_v29 = vpop.f32.mrb[10].mxu0 }
 0x13c   :  { %v516_v28 = vadd.f32 %v1156_v41, %v463_v24  ;;  %v279_v30 = vpop.f32.mrb[11].mxu1  ;;  %v833_v31 = vpop.eup %832  ;;  %844 = vrcp.f32 %v572_v25  ;;  %v698_v32 = vmul.f32 -1.442695, %v517_v26  ;;  %v478_v33 = vadd.f32 %v790_v29, %v762_v27 }
 0x13d   :  { %v472_v34 = vpop.f32.mrb[11].mxu0  ;;  %v835_v35 = vpop.eup %834  ;;  %v575_v36 = vadd.f32 1.0, %v833_v31  ;;  %846 = vpow2.f32 %v695_v23 }
 0x13e   :  { %v697_v37 = vmul.f32 -1.442695, %v516_v28  ;;  %v473_v38 = vadd.f32 %v472_v34, %v279_v30  ;;  %v574_v39 = vadd.f32 1.0, %v835_v35  ;;  %848 = vpow2.f32 %v698_v32 }
 0x13f   :  { %v519_v40 = vadd.f32 %v1156_v41, %v478_v33  ;;  %v765_v42 = vpop.f32.mrb[12].mxu1  ;;  %850 = vrcp.f32 %v575_v36  ;;  %v793_v44 = vpop.f32.mrb[12].mxu0 }
 0x140   :  { %v518_v43 = vadd.f32 %v1156_v41, %v473_v38  ;;  %v289_v45 = vpop.f32.mrb[13].mxu1  ;;  %v837_v46 = vpop.eup %836  ;;  %852 = vrcp.f32 %v574_v39  ;;  %v488_v48 = vadd.f32 %v793_v44, %v765_v42 }
 0x141   :  { %v700_v47 = vmul.f32 -1.442695, %v519_v40  ;;  %v482_v49 = vpop.f32.mrb[13].mxu0  ;;  %v839_v50 = vpop.eup %838  ;;  %v577_v51 = vadd.f32 1.0, %v837_v46  ;;  %854 = vpow2.f32 %v697_v37 }
 0x142   :  { %v699_v52 = vmul.f32 -1.442695, %v518_v43  ;;  %v483_v53 = vadd.f32 %v482_v49, %v289_v45  ;;  %v576_v54 = vadd.f32 1.0, %v839_v50  ;;  %v521_v55 = vadd.f32 %v1156_v41, %v488_v48 }
 0x143   :  { %856 = vpow2.f32 %v700_v47  ;;  %v768_v56 = vpop.f32.mrb[14].mxu1  ;;  %v796_v58 = vpop.f32.mrb[14].mxu0 }
 0x144   :  { %858 = vrcp.f32 %v577_v51  ;;  %v520_v57 = vadd.f32 %v1156_v41, %v483_v53  ;;  %v299_v59 = vpop.f32.mrb[15].mxu1  ;;  %v841_v60 = vpop.eup %840  ;;  %v702_v61 = vmul.f32 -1.442695, %v521_v55  ;;  %v498_v62 = vadd.f32 %v796_v58, %v768_v56 }
 0x145   :  { %860 = vrcp.f32 %v576_v54  ;;  %v492_v63 = vpop.f32.mrb[15].mxu0  ;;  %v843_v0 = vpop.eup %842  ;;  %v579_v1 = vadd.f32 1.0, %v841_v60 }
 0x146   :  { %862 = vpow2.f32 %v699_v52  ;;  %v701_v2 = vmul.f32 -1.442695, %v520_v57  ;;  %v493_v3 = vadd.f32 %v492_v63, %v299_v59  ;;  %v845_v4 = vpop.eup %844  ;;  %622 = vst.msk [vmem:[#allocation11 + $0x8] sm:$0xff] %vm620_vm1, %v843_v0  ;;  %v523_v5 = vadd.f32 %v1156_v41, %v498_v62 }
 0x147   :  { %864 = vpow2.f32 %v702_v61  ;;  %v847_v6 = vpop.eup %846  ;;  %621 = vst.msk [vmem:[#allocation11] sm:$0xff] %vm620_vm1, %v845_v4 }
 0x148   :  { %866 = vrcp.f32 %v579_v1  ;;  %v522_v7 = vadd.f32 %v1156_v41, %v493_v3  ;;  %v849_v8 = vpop.eup %848  ;;  %v578_v9 = vadd.f32 1.0, %v847_v6  ;;  %v704_v10 = vmul.f32 -1.442695, %v523_v5 }
 0x149   :  { %868 = vpow2.f32 %v701_v2  ;;  %v851_v11 = vpop.eup %850  ;;  %v581_v12 = vadd.f32 1.0, %v849_v8 }
 0x14a   :  { %v703_v13 = vmul.f32 -1.442695, %v522_v7  ;;  %v853_v14 = vpop.eup %852  ;;  %624 = vst.msk [vmem:[#allocation11 + $0x18] sm:$0xff] %vm620_vm1, %v851_v11  ;;  %870 = vrcp.f32 %v578_v9 }
 0x14b   :  { %v855_v15 = vpop.eup %854  ;;  %623 = vst.msk [vmem:[#allocation11 + $0x10] sm:$0xff] %vm620_vm1, %v853_v14  ;;  %872 = vrcp.f32 %v581_v12 }
 0x14c   :  { %v580_v17 = vadd.f32 1.0, %v855_v15  ;;  %874 = vpow2.f32 %v704_v10 }
 0x14d   :  { %v857_v16 = vpop.eup %856  ;;  %876 = vpow2.f32 %v703_v13 }
 0x14e   :  { %v859_v18 = vpop.eup %858  ;;  %v583_v41 = vadd.f32 1.0, %v857_v16  ;;  %878 = vrcp.f32 %v580_v17 }
 0x14f   :  { %v861_v19 = vpop.eup %860  ;;  %626 = vst.msk [vmem:[#allocation11 + $0x28] sm:$0xff] %vm620_vm1, %v859_v18 }
 0x150   :  { %v863_v20 = vpop.eup %862  ;;  %625 = vst.msk [vmem:[#allocation11 + $0x20] sm:$0xff] %vm620_vm1, %v861_v19  ;;  %880 = vrcp.f32 %v583_v41 }
 0x151   :  { %v865_v21 = vpop.eup %864  ;;  %v582_v22 = vadd.f32 1.0, %v863_v20 }
 0x152   :  { %v867_v23 = vpop.eup %866  ;;  %v585_v24 = vadd.f32 1.0, %v865_v21 }
 0x153   :  { %v869_v25 = vpop.eup %868  ;;  %628 = vst.msk [vmem:[#allocation11 + $0x38] sm:$0xff] %vm620_vm1, %v867_v23  ;;  %882 = vrcp.f32 %v582_v22 }
 0x154   :  { %884 = vrcp.f32 %v585_v24  ;;  %v584_v26 = vadd.f32 1.0, %v869_v25  ;;  %v871_v27 = vpop.eup %870 }
 0x155   :  { %v873_v28 = vpop.eup %872  ;;  %627 = vst.msk [vmem:[#allocation11 + $0x30] sm:$0xff] %vm620_vm1, %v871_v27 }
 0x156   :  { %886 = vrcp.f32 %v584_v26  ;;  %v875_v29 = vpop.eup %874  ;;  %630 = vst.msk [vmem:[#allocation11 + $0x48] sm:$0xff] %vm620_vm1, %v873_v28 }
 0x157   :  { %v877_v30 = vpop.eup %876  ;;  %v587_v31 = vadd.f32 1.0, %v875_v29 }
 0x158   :  { %v879_v32 = vpop.eup %878  ;;  %v586_v33 = vadd.f32 1.0, %v877_v30 }
 0x159   :  { %629 = vst.msk [vmem:[#allocation11 + $0x40] sm:$0xff] %vm620_vm1, %v879_v32  ;;  %888 = vrcp.f32 %v587_v31 }
 0x15a   :  { %v881_v34 = vpop.eup %880  ;;  %890 = vrcp.f32 %v586_v33 }
 0x15b   :  { %632 = vst.msk [vmem:[#allocation11 + $0x58] sm:$0xff] %vm620_vm1, %v881_v34 }
 0x15d   :  { %v883_v35 = vpop.eup %882 }
 0x15e   :  { %v885_v36 = vpop.eup %884  ;;  %631 = vst.msk [vmem:[#allocation11 + $0x50] sm:$0xff] %vm620_vm1, %v883_v35 }
 0x15f   :  { %634 = vst.msk [vmem:[#allocation11 + $0x68] sm:$0xff] %vm620_vm1, %v885_v36 }
 0x160   :  { %v887_v37 = vpop.eup %886 }
 0x161   :  { %633 = vst.msk [vmem:[#allocation11 + $0x60] sm:$0xff] %vm620_vm1, %v887_v37 }
 0x163   :  { %v889_v38 = vpop.eup %888 }
 0x164   :  { %v891_v39 = vpop.eup %890  ;;  %636 = vst.msk [vmem:[#allocation11 + $0x78] sm:$0xff] %vm620_vm1, %v889_v38 }
 0x165   :  { %635 = vst.msk [vmem:[#allocation11 + $0x70] sm:$0xff] %vm620_vm1, %v891_v39 }
 0x166   :  { %991 = shalt.err (!%p988_p8)
}
 0x167   :  { %s992_s20 = scalar_lea.hbm %s1210_s5, 2048 }
 0x168   :  { %p993_p9 = scmp.ne.s32.totalorder %s1210_s5, %s992_s20  ;;  %p996_p10 = scmp.lt.u32.totalorder %s992_s20, %s1210_s5 }
 0x16a   :  { %p998_p11 = pnand %p996_p10, %p993_p9 }
 0x16c   :  { %1001 = shalt.err (!%p998_p11)
}
 0x16d   :  { %648 = dma.vmem_to_hbm [thread:$0]  %s643_s17, 2048, %s1210_s5, [#allocation5], %s1012_s6, %s1012_s6, %s1013_s7  }
 0x16e   :  { %1008 = dma.done.wait [#allocation5], 2048  }
 0x16f   :  { %1009 = vsyncadd [#allocation5], 4294965248 }
 0x170   :  { %652 = vsyncpa [#allocation4], 1 }
 0x171   :  { %653 = vsyncpa [#allocation7], 1 }
 0x172   :  { %654 = vsyncpa [#allocation10], 1 }
 0x173   :  { %655 = vsyncpa [#allocation5], 1 }

// kernel: jnf_ssf_forward.6
= control target key start
LH: loop header
LB: loop body
LE: loop exit
PB: predicated region body
PF: predicated region fallthrough
CT: control target
= control target key end

     0   :  { %s4089_s0 = inlined_call_operand.hbm [shape: f32[8,16,64], index: 0, kind: input, shape index: {}]   ;;  %s4090_s1 = inlined_call_operand.hbm [shape: f32[8,16,64], index: 1, kind: input, shape index: {}]   ;;  %s4091_s2 = inlined_call_operand.hbm [shape: f32[16,64], index: 2, kind: input, shape index: {}]   ;;  %s4092_s3 = inlined_call_operand.hbm [shape: f32[16,64], index: 3, kind: input, shape index: {}]   ;;  %s4093_s4 = inlined_call_operand.hbm [shape: f32[16,16], index: 4, kind: input, shape index: {}]   ;;  %s4094_s5 = inlined_call_operand.hbm [shape: f32[8,16,16], index: 5, kind: output, shape index: {0}]   ;;  %s4095_s6 = inlined_call_operand.hbm [shape: f32[8,16,16], index: 6, kind: output, shape index: {1}]  }
   0x1   :  { %4119 = sst [smem:[#allocation30_spill]] %s4089_s0 }
   0x2   :  { %4120 = sst [smem:[#allocation31_spill]] %s4091_s2 }
   0x3   :  { %4121 = sst [smem:[#allocation32_spill]] %s4094_s5 }
   0x4   :  { %4122 = sst [smem:[#allocation33_spill]] %s4095_s6 }
   0x5   :  { %12 = vsyncpa [#allocation7], 0 }
   0x6   :  { %14 = vsyncpa [#allocation7 + $0x1], 0 }
   0x7   :  { %15 = vsyncpa [#allocation10], 0 }
   0x8   :  { %17 = vsyncpa [#allocation10 + $0x1], 0 }
   0x9   :  { %18 = vsyncpa [#allocation13], 0 }
   0xa   :  { %19 = vsyncpa [#allocation8], 0 }
   0xb   :  { %21 = vsyncpa [#allocation8 + $0x1], 0 }
   0xc   :  { %22 = vsyncpa [#allocation17], 0 }
   0xd   :  { %24 = vsyncpa [#allocation17 + $0x1], 0  ;;  %s3410_s21 = smov 0   ;;  %s3412_s22 = smov 0  }
   0xe   :  { %s3414_s23 = smov 0   ;;  %s3416_s24 = smov 0  }
   0xf   :  { %s3418_s25 = smov 0   ;;  %s3420_s26 = smov 0  }
  0x10 LB: > { %4123 = sst [smem:[#allocation25_spill]] %s3332_s21  ;;  %s3441_s27 = sadd.s32 4294967295, %s3352_s26   ;;  %s3352_s26 = sphi %s3420_s26, %s30_s26   ;;  %s3348_s25 = sphi %s3418_s25, %s4165_s25   ;;  %s3344_s24 = sphi %s3416_s24, %s4164_s24   ;;  %s3340_s23 = sphi %s3414_s23, %s4168_s23   ;;  %s3336_s22 = sphi %s3412_s22, %s4167_s22   ;;  %s3332_s21 = sphi %s3410_s21, %s4166_s21  }
  0x11   : > { %4124 = sst [smem:[#allocation26_spill]] %s3348_s25  ;;  %s2543_s28 = sadd.s32 4294967294, %s3352_s26  }
  0x12   : > { %p58_p0 = scmp.ne.s32.totalorder %s3340_s23, %s3336_s22  ;;  %p59_p1 = scmp.eq.s32.totalorder %s3352_s26, 0 }
  0x13   : > { %p64_p2 = scmp.ne.s32.totalorder %s3336_s22, %s3332_s21  ;;  %p4096_p3 = scmp.eq.s32.totalorder %s3441_s27, 0 }
  0x14   : > { %p188_p4 = scmp.eq.s32.totalorder %s3441_s27, 1  ;;  %p3452_p5 = por %p59_p1, %p58_p0 }
  0x15   : > { %p194_p6 = scmp.eq.s32.totalorder %s2543_s28, 1  ;;  %p3458_p7 = por %p4096_p3, %p64_p2 }
  0x16   : > { %p3462_p8 = por %p188_p4, %p58_p0  ;;  %p2544_p10 = scmp.ge.s32.totalorder %s3352_s26, 1 }
  0x17   : > { %s4126_s7 = scalar_select %p3458_p7, 1, 0 }
  0x18   : > { %s4127_s8 = scalar_select %p3462_p8, 1, 0 }
  0x19   : > { %p3466_p9 = por %p194_p6, %p64_p2  ;;  %p231_p11 = scmp.lt.s32.totalorder %s3352_s26, 3 }
  0x1a   : > { %s3354_s11 = smov [#allocation11]   ;;  %p2880_p1 = scmp.lt.s32.totalorder %s3352_s26, 2 }
  0x1b   : > { %s4128_s9 = scalar_select %p3466_p9, 1, 0 }
  0x1c   : > { %p3472_p12 = pnand %p2544_p10, %p231_p11  ;;  %s243_s12 = sshll.u32 %s3354_s11, 4  ;;  %s3476_s12 = int_to_ptr.vmem [resolvable:$true] %s243_s12 }
  0x1d   : > { %4129 = sst [smem:[#allocation27_spill]] %s4128_s9  ;;  %p3490_p4 = pnand %p2880_p1, %p3452_p5 }
  0x1e   : > { %s4130_s10 = scalar_select %p3472_p12, 1, 0 }
  0x1f   : > { %p2854_p13 = pneg %p3472_p12  ;;  %s42_s15 = sadd.s32 1, %s3348_s25 }
  0x20   : > { %s4132_s14 = scalar_select %p3490_p4, 1, 0 }
  0x21   : > { %p3484_p2 = pnand %p2854_p13, %p4096_p3  ;;  %p3495_p6 = scmp.ge.s32.totalorder %s42_s15, 2 }
  0x22   : > { %s4134_s2 = sld [smem:[#allocation31_spill]] }
  0x23   : > { %s4131_s13 = scalar_select %p3484_p2, 1, 0 }
  0x24   : > { %p4109_p11 = pneg %p3484_p2 }
  0x28   : > { %s3076_s19 = scalar_lea.hbm %s4134_s2, 256 }
  0x29   : > { %p3077_p10 = scmp.ne.s32.totalorder %s4134_s2, %s3076_s19  ;;  %p3083_p1 = scmp.lt.u32.totalorder %s3076_s19, %s4134_s2 }
  0x2b   : > { %p3079_p5 = pnand %p4109_p11, %p3077_p10 }
  0x2d   : > { %p3080_p13 = pneg %p3079_p5 }
  0x2f   : > { %p3085_p0 = pnand %p3083_p1, %p3080_p13 }
  0x31   : > { %3088 = shalt.err (!%p3085_p0)
}
  0x32   : > { %s3089_s17 = scalar_lea.vmem %s3476_s12, 256  ;;  %p3097_p7 = scmp.lt.s32.totalorder %s3476_s12, %s3476_s12 }
  0x33   : > { %p3090_p3 = scmp.ne.s32.totalorder %s3476_s12, %s3089_s17  ;;  %p3098_p10 = scmp.lt.s32.totalorder %s3089_s17, %s3089_s17 }
  0x35   : > { %p3092_p9 = pnand %p3090_p3, %p4109_p11  ;;  %p3099_p5 = por %p3098_p10, %p3097_p7 }
  0x37   : > { %p3093_p8 = pneg %p3092_p9 }
  0x39   : > { %p3100_p12 = pnand %p3099_p5, %p3093_p8 }
  0x3b   : > { %3103 = shalt.err (!%p3100_p12)
}
  0x3c   : > { %s4103_s18 = smov 128   ;;  %s4106_s19 = smov 8  }
  0x3d   : > { %2857 = dma.hbm_to_vmem [thread:$0]  (!%p3484_p2), %s4134_s2, 256, %s3476_s12, [#allocation10], %s4103_s18, %s4103_s18, %s4106_s19  }
  0x3e   : > { %s4108_s30 = sand.u32 1, %s3352_s26   ;;  %s4170_s15 = smov (%p3495_p6, %s42_s15), 0 }
  0x3f   : > { %4135 = sst [smem:[#allocation28_spill]] %s4170_s15  ;;  %s4105_s11 = sand.u32 1, %s3340_s23  }
  0x40   : > { %s47_s17 = ssub.s32 %s3348_s25, %s4170_s15  ;;  %s3539_s29 = sshll.u32 %s4105_s11, 6 }
  0x41   : > { %p49_p3 = scmp.eq.s32.totalorder %s47_s17, 0  ;;  %s3542_s9 = sshll.u32 %s3348_s25, 7 }
  0x42   : > { %s274_s21 = scalar_lea.vmem [#allocation6], %s3539_s29  ;;  %s4136_s20 = sadd.s32 1, %s3340_s23 }
  0x43   : > { %s283_s6 = sshll.u32 %s274_s21, 4  ;;  %s4138_s0 = sld [smem:[#allocation30_spill]]  ;;  %s3556_s6 = int_to_ptr.vmem [resolvable:$true] %s283_s6 }
  0x44   : > { %s3548_s12 = scalar_select %p49_p3, %s3340_s23, %s4136_s20  }
  0x45   : > { %s3560_s17 = scalar_lea.sflag [#allocation7], %s4108_s30  ;;  %p3566_p8 = pneg %p3490_p4 }
  0x46   : > { %4137 = sst [smem:[#allocation29_spill]] %s3548_s12 }
  0x47   : > { %s4139_s21 = scalar_select %p3566_p8, 1, 0 }
  0x49   : > { %s3554_s18 = scalar_lea.hbm %s4138_s0, %s3542_s9  ;;  %s3109_s16 = scalar_lea.hbm %s4138_s0, 2048 }
  0x4a   : > { %s3104_s11 = scalar_lea.hbm %s3554_s18, 1024  ;;  %p3110_p0 = scmp.lt.u32.totalorder %s3554_s18, %s4138_s0 }
  0x4b   : > { %p3105_p7 = scmp.ne.s32.totalorder %s3554_s18, %s3104_s11  ;;  %p3111_p6 = scmp.lt.u32.totalorder %s3109_s16, %s3104_s11 }
  0x4c   : > { %p3113_p1 = scmp.lt.u32.totalorder %s3104_s11, %s3554_s18 }
  0x4d   : > { %p3107_p9 = pnand %p3566_p8, %p3105_p7  ;;  %p3112_p13 = por %p3111_p6, %p3110_p0 }
  0x4f   : > { %p3108_p12 = pneg %p3107_p9  ;;  %p3114_p10 = por %p3113_p1, %p3112_p13 }
  0x51   : > { %p3115_p5 = pnand %p3114_p10, %p3108_p12 }
  0x53   : > { %3118 = shalt.err (!%p3115_p5)
}
  0x54   : > { %s3119_s30 = scalar_lea.vmem %s3556_s6, 1024  ;;  %s3357_s20 = smov [#allocation6]  }
  0x55   : > { %p3120_p3 = scmp.ne.s32.totalorder %s3556_s6, %s3119_s30  ;;  %s3124_s28 = sshll.u32 %s3357_s20, 4  ;;  %s3125_s28 = int_to_ptr.vmem [resolvable:$false] %s3124_s28 }
  0x56   : > { %s3126_s2 = scalar_lea.vmem %s3125_s28, 2048  ;;  %p3127_p11 = scmp.lt.s32.totalorder %s3556_s6, %s3125_s28 }
  0x57   : > { %p3122_p7 = pnand %p3120_p3, %p3566_p8  ;;  %p3128_p2 = scmp.lt.s32.totalorder %s3126_s2, %s3119_s30 }
  0x59   : > { %p3123_p9 = pneg %p3122_p7  ;;  %p3129_p0 = por %p3128_p2, %p3127_p11 }
  0x5b   : > { %p3130_p6 = pnand %p3129_p0, %p3123_p9 }
  0x5d   : > { %3133 = shalt.err (!%p3130_p6)
}
  0x5e   : > { %s3358_s19 = smov 256   ;;  %s4140_s11 = smov 8  }
  0x5f   : > { %s4141_s16 = smov 128   ;;  %s297_s20 = scalar_lea.vmem [#allocation9], %s3539_s29 }
  0x60   : > { %2864 = dma.hbm_to_vmem [thread:$0]  (!%p3490_p4), %s3554_s18, 1024, %s3556_s6, %s3560_s17, %s3358_s19, %s4141_s16, %s4140_s11  }
  0x61   : > { %s307_s0 = sshll.u32 %s297_s20, 4  ;;  %s3359_s15 = smov [#allocation12]   ;;  %s3594_s0 = int_to_ptr.vmem [resolvable:$true] %s307_s0 }
  0x62   : > { %s256_s28 = sshll.u32 %s3359_s15, 4  ;;  %s3134_s25 = scalar_lea.hbm %s4092_s3, 256  ;;  %s257_s28 = int_to_ptr.vmem [resolvable:$true] %s256_s28 }
  0x63   : > { %p3135_p2 = scmp.ne.s32.totalorder %s4092_s3, %s3134_s25  ;;  %p4142_p11 = scmp.ne.s32.totalorder %s4131_s13, 0 }
  0x64   : > { %p3141_p10 = scmp.lt.u32.totalorder %s3134_s25, %s4092_s3 }
  0x65   : > { %p4143_p12 = pneg %p4142_p11 }
  0x67   : > { %p3137_p13 = pnand %p3135_p2, %p4143_p12 }
  0x69   : > { %p3138_p1 = pneg %p3137_p13 }
  0x6b   : > { %p3143_p5 = pnand %p3141_p10, %p3138_p1 }
  0x6d   : > { %3146 = shalt.err (!%p3143_p5)
}
  0x6e   : > { %s3147_s15 = scalar_lea.vmem %s257_s28, 256  ;;  %p4144_p7 = pmov %p4143_p12 }
  0x6f   : > { %p3148_p3 = scmp.ne.s32.totalorder %s257_s28, %s3147_s15  ;;  %p3155_p6 = scmp.lt.s32.totalorder %s257_s28, %s257_s28 }
  0x70   : > { %p3156_p4 = scmp.lt.s32.totalorder %s3147_s15, %s3147_s15 }
  0x71   : > { %p3150_p9 = pnand %p3148_p3, %p4144_p7 }
  0x72   : > { %p3157_p8 = por %p3156_p4, %p3155_p6 }
  0x73   : > { %p3151_p0 = pneg %p3150_p9 }
  0x75   : > { %p3158_p2 = pnand %p3157_p8, %p3151_p0 }
  0x77   : > { %3161 = shalt.err (!%p3158_p2)
}
  0x78   : > { %2860 = dma.hbm_to_vmem [thread:$0]  (!%p4142_p11), %s4092_s3, 256, %s257_s28, [#allocation13], %s4141_s16, %s4141_s16, %s4140_s11  }
  0x79   : > { %s3623_s20 = scalar_lea.hbm %s4090_s1, %s3542_s9  ;;  %s4145_s30 = sand.u32 1, %s3340_s23  }
  0x7a   : > { %s3627_s13 = sshll.u32 %s4145_s30, 3  ;;  %s4146_s2 = sand.u32 1, %s3352_s26  }
  0x7b   : > { %s3631_s6 = scalar_lea.sflag [#allocation10], %s4146_s2  ;;  %s3162_s29 = scalar_lea.hbm %s3623_s20, 1024 }
  0x7c   : > { %p3163_p4 = scmp.ne.s32.totalorder %s3623_s20, %s3162_s29  ;;  %p4147_p8 = scmp.ne.s32.totalorder %s4139_s21, 0 }
  0x7d   : > { %s3167_s5 = scalar_lea.hbm %s4090_s1, 2048  ;;  %p3168_p13 = scmp.lt.u32.totalorder %s3623_s20, %s4090_s1 }
  0x7e   : > { %p3165_p12 = pnand %p3163_p4, %p4147_p8  ;;  %p3169_p1 = scmp.lt.u32.totalorder %s3167_s5, %s3162_s29 }
  0x7f   : > { %p3171_p5 = scmp.lt.u32.totalorder %s3162_s29, %s3623_s20 }
  0x80   : > { %p3166_p11 = pneg %p3165_p12  ;;  %p3170_p10 = por %p3169_p1, %p3168_p13 }
  0x82   : > { %p3172_p3 = por %p3171_p5, %p3170_p10 }
  0x84   : > { %p3173_p7 = pnand %p3172_p3, %p3166_p11 }
  0x86   : > { %3176 = shalt.err (!%p3173_p7)
}
  0x87   : > { %s3177_s12 = scalar_lea.vmem %s3594_s0, 1024  ;;  %s3360_s30 = smov [#allocation9]  }
  0x88   : > { %p3178_p9 = scmp.ne.s32.totalorder %s3594_s0, %s3177_s12  ;;  %s3182_s2 = sshll.u32 %s3360_s30, 4  ;;  %s3183_s2 = int_to_ptr.vmem [resolvable:$false] %s3182_s2 }
  0x89   : > { %s3184_s28 = scalar_lea.vmem %s3183_s2, 2048  ;;  %p3185_p2 = scmp.lt.s32.totalorder %s3594_s0, %s3183_s2 }
  0x8a   : > { %p3180_p0 = pnand %p3178_p9, %p4147_p8  ;;  %p3186_p4 = scmp.lt.s32.totalorder %s3184_s28, %s3177_s12 }
  0x8c   : > { %p3181_p6 = pneg %p3180_p0  ;;  %p3187_p12 = por %p3186_p4, %p3185_p2 }
  0x8e   : > { %p3188_p13 = pnand %p3187_p12, %p3181_p6 }
  0x90   : > { %3191 = shalt.err (!%p3188_p13)
}
  0x91   : > { %p4148_p11 = scmp.ne.s32.totalorder %s4132_s14, 0  ;;  %s3662_s5 = scalar_lea.hbm %s4093_s4, %s3542_s9 }
  0x92   : > { %s321_s25 = scalar_lea.vmem [#allocation14], %s3627_s13  ;;  %s3192_s12 = scalar_lea.hbm %s3662_s5, 128 }
  0x93   : > { %2867 = dma.hbm_to_vmem [thread:$0]  (!%p4148_p11), %s3623_s20, 1024, %s3594_s0, %s3631_s6, %s3358_s19, %s4141_s16, %s4140_s11  }
  0x94   : > { %s328_s18 = sshll.u32 %s321_s25, 4  ;;  %p3193_p1 = scmp.ne.s32.totalorder %s3662_s5, %s3192_s12  ;;  %s329_s18 = int_to_ptr.vmem [resolvable:$true] %s328_s18 }
  0x95   : > { %s3197_s0 = scalar_lea.hbm %s4093_s4, 256  ;;  %p3198_p3 = scmp.lt.u32.totalorder %s3662_s5, %s4093_s4 }
  0x96   : > { %p3195_p10 = pnand %p3193_p1, %p4147_p8  ;;  %p3199_p7 = scmp.lt.u32.totalorder %s3197_s0, %s3192_s12 }
  0x97   : > { %p3201_p0 = scmp.lt.u32.totalorder %s3192_s12, %s3662_s5 }
  0x98   : > { %p3196_p5 = pneg %p3195_p10  ;;  %p3200_p9 = por %p3199_p7, %p3198_p3 }
  0x9a   : > { %p3202_p6 = por %p3201_p0, %p3200_p9 }
  0x9c   : > { %p3203_p2 = pnand %p3202_p6, %p3196_p5 }
  0x9e   : > { %3206 = shalt.err (!%p3203_p2)
}
  0x9f   : > { %s3207_s9 = scalar_lea.vmem %s329_s18, 128  ;;  %s3361_s16 = smov [#allocation14]  }
  0xa0   : > { %p3208_p4 = scmp.ne.s32.totalorder %s329_s18, %s3207_s9  ;;  %s3212_s20 = sshll.u32 %s3361_s16, 4  ;;  %s3213_s20 = int_to_ptr.vmem [resolvable:$false] %s3212_s20 }
  0xa1   : > { %s3214_s13 = scalar_lea.vmem %s3213_s20, 256  ;;  %p3215_p1 = scmp.lt.s32.totalorder %s329_s18, %s3213_s20 }
  0xa2   : > { %p3210_p12 = pnand %p3208_p4, %p4147_p8  ;;  %p3216_p10 = scmp.lt.s32.totalorder %s3214_s13, %s3207_s9 }
  0xa4   : > { %p3211_p13 = pneg %p3210_p12  ;;  %p3217_p11 = por %p3216_p10, %p3215_p1 }
  0xa6   : > { %p3218_p3 = pnand %p3217_p11, %p3211_p13 }
  0xa8   : > { %3221 = shalt.err (!%p3218_p3)
}
  0xa9   : > { %p4149_p7 = scmp.ne.s32.totalorder %s4132_s14, 0  ;;  %p4150_p5 = scmp.ne.s32.totalorder %s4130_s10, 0 }
  0xaa   : > { %s339_s21 = sand.u32 (!%p4150_p5), 1, %s3441_s27   ;;  %s3687_s6 = sand.u32 (!%p4150_p5), 1, %s3336_s22  }
  0xab   : > { %2870 = dma.hbm_to_vmem [thread:$0]  (!%p4149_p7), %s3662_s5, 128, %s329_s18, %s3560_s17  }
  0xac   : > { %337 = sbr.rel (%p4150_p5) target bundleno = 5914 (0x171a), region = 40  ;;  %s3690_s28 = sshll.u32 (!%p4150_p5), %s3687_s6, 6 }
  0xad   : > { %s340_s29 = scalar_lea.sflag (!%p4150_p5), [#allocation7], %s339_s21  ;;  %s3693_s15 = scalar_lea.vmem (!%p4150_p5), [#allocation6], %s3690_s28 }
  0xae   : > { %p4151_p8 = scmp.ne.s32.totalorder (!%p4150_p5), %s4126_s7, 0 }
  0xb3   : > { %3303 = dma.done.wait (%p4151_p8), %s340_s29, 1024  }
  0xb4   : > { %3305 = vsyncadd (%p4151_p8), %s340_s29, 4294966272  ;;  %s349_s10 = scalar_lea.sflag [#allocation10], %s339_s21  ;;  %s3700_s14 = scalar_lea.vmem [#allocation9], %s3690_s28 }
  0xb5   : > { %3307 = dma.done.wait (%p4151_p8), %s349_s10, 1024  }
  0xb6   : > { %3309 = vsyncadd (%p4151_p8), %s349_s10, 4294966272  ;;  %p4152_p11 = scmp.eq.s32.totalorder %s3441_s27, 0 }
  0xb8   : > { %3311 = dma.done.wait (%p4152_p11), [#allocation10], 256   ;;  %p4153_p9 = pmov %p4152_p11 }
  0xba   : > { %3313 = vsyncadd (%p4153_p9), [#allocation10], 4294967040  ;;  %p4154_p0 = pmov %p4153_p9 }
  0xbc   : > { %3315 = dma.done.wait (%p4154_p0), [#allocation13], 256   ;;  %p4155_p6 = pmov %p4154_p0 }
  0xbd   : > { %s2559_s17 = sshll.u32 %s3687_s6, 3 }
  0xbe   : > { %3317 = vsyncadd (%p4155_p6), [#allocation13], 4294967040  ;;  %s369_s5 = scalar_lea.vmem [#allocation14], %s2559_s17 }
  0xbf   : > { %3319 = dma.done.wait (%p4151_p8), %s340_s29, 128  }
  0xc0   : > { %3321 = vsyncadd (%p4151_p8), %s340_s29, 4294967168  ;;  %vm423_vm0 = vcmask 130048   ;;  %v3362_v0 = vmov 0.0|0.0   ;;  %vm3363_vm1 = vmmov 0   ;;  %v3364_v1 = vmov 0.0   ;;  %v430_v2 = vld [vmem:[#allocation11] sm:$0xff] }
  0xc1   : > { %2788 = vmatprep.subr.bf16.mxu0 %v3362_v0  ;;  %2680 = vmatprep.mubr.msk.f32.mxu0 %vm3363_vm1, %v3364_v1  ;;  %424 = vst.msk [vmem:[#allocation2] sm:$0xff] %vm423_vm0, %v3364_v1  ;;  %425 = vst.msk [vmem:[#allocation4] sm:$0xff] %vm423_vm0, %v3364_v1  ;;  %v431_v3 = vld [vmem:[#allocation11 + $0x8] sm:$0xff]  ;;  %v432_v4 = vld [vmem:[#allocation12] sm:$0xff]  ;;  %s3365_s27 = smov 16   ;;  %s3366_s7 = smov 96  }
  0xc2   : > { %2791 = vmatprep.subr.bf16.mxu1 %v3362_v0  ;;  %2687 = vmatprep.mubr.msk.f32.mxu1 %vm3363_vm1, %v3364_v1  ;;  %v3729_v5 = vpack.c.bf16 %v431_v3, %v430_v2  ;;  %v433_v6 = vld [vmem:[#allocation12 + $0x8] sm:$0xff]  ;;  %v426_v8 = vld [vmem:[%s369_s5] sm:$0xff]  ;;  %s3367_s25 = smov 32   ;;  %s3368_s18 = smov 80   ;;  %v2572_v59 = vld [vmem:[%s3700_s14 + $0x30] sm:$0xff] }
  0xc3   : > { %v3731_v7 = vpack.c.bf16 %v433_v6, %v432_v4  ;;  %427 = vst.msk [vmem:[#allocation3] sm:$0xff] %vm423_vm0, %v426_v8  ;;  %429 = vst.msk [vmem:[#allocation5] sm:$0xff] %vm423_vm0, %v426_v8  ;;  %v434_v13 = vld [vmem:[%s3693_s15] sm:$0xff]  ;;  %v2564_v14 = vld [vmem:[%s3700_s14 + $0x38] sm:$0xff]  ;;  %s3369_s12 = smov 112   ;;  %s3765_s30 = scalar_lea.vmem [#allocation15], %s3690_s28 }
  0xc4   : > { %2790 = vmatpush3.bf16.msra.mxu0 %v3729_v5  ;;  %s3771_s2 = scalar_lea.vmem [#allocation16], %s3690_s28  ;;  %v2568_v55 = vld [vmem:[%s3693_s15 + $0x8] sm:$0xff]  ;;  %s2340_s0 = sshll.u32 %s3765_s30, 4  ;;  %s3985_s0 = int_to_ptr.vmem [resolvable:$true] %s2340_s0 }
  0xc5   : > { %2793 = vmatpush3.bf16.msra.mxu1 %v3731_v7  ;;  %2794 = vmatprep.subr.bf16.mxu0 %v3362_v0  ;;  %s2624_s19 = sshll.u32 %s3344_s24, 7  ;;  %s2359_s11 = sshll.u32 %s3771_s2, 4  ;;  %s3995_s11 = int_to_ptr.vmem [resolvable:$true] %s2359_s11 }
  0xc6   : > { %2797 = vmatprep.subr.bf16.mxu1 %v3362_v0  ;;  %s4156_s20 = sld [smem:[#allocation32_spill]]  ;;  %s2320_s21 = scalar_lea.sflag [#allocation8], %s3687_s6 }
  0xc7   : > { %s3222_s28 = scalar_lea.vmem %s3985_s0, 1024  ;;  %p4157_p4 = scmp.ne.s32.totalorder %s4127_s8, 0 }
  0xc8   : > { %v435_v9 = vld [vmem:[#allocation2] sm:$0xff]  ;;  %v553_v10 = vld [vmem:[#allocation4] sm:$0xff]  ;;  %p3223_p2 = scmp.ne.s32.totalorder %s3985_s0, %s3222_s28  ;;  %s3370_s29 = smov [#allocation15]  }
  0xc9   : > { %2681 = vmatmul.mubr.msk.f32.vlgmr.msra.gmra.mrb[0].mxu0 %vm423_vm0, %v435_v9  ;;  %2688 = vmatmul.mubr.msk.f32.vlgmr.msra.gmra.mrb[0].mxu1 %vm423_vm0, %v553_v10 }
  0xca   : > { %2796 = vmatpush3.bf16.msra.mxu0 %v3729_v5  ;;  %2694 = vmatprep.mubr.msk.f32.mxu0 %vm3363_vm1, %v3364_v1  ;;  %v436_v11 = vld [vmem:[#allocation3] sm:$0xff]  ;;  %v554_v12 = vld [vmem:[#allocation5] sm:$0xff]  ;;  %p3224_p12 = pnand %p3223_p2, %p4157_p4 }
  0xcb   : > { %2799 = vmatpush3.bf16.msra.mxu1 %v3731_v7  ;;  %2701 = vmatprep.mubr.msk.f32.mxu1 %vm3363_vm1, %v3364_v1 }
  0xcc   : > { %2800 = vmatprep.subr.bf16.mxu0 %v3362_v0  ;;  %2803 = vmatprep.subr.bf16.mxu1 %v3362_v0  ;;  %s3993_s13 = scalar_lea.hbm %s4156_s20, %s2624_s19  ;;  %p3225_p13 = pneg %p3224_p12 }
  0xcd   : > { %520 = vrot.lane.b32.xlu1 %v436_v11, %s3365_s27 }
  0xd1   : > { %637 = vrot.lane.b32.xlu1 %v554_v12, %s3365_s27 }
 0x13f   : > { %v521_v35 = vpop.permute.xlu1 %520 }
 0x143   : > { %v638_v37 = vpop.permute.xlu1 %637 }
 0x19c   : > { %v507_v15 = vpop.f32.mrb[0].mxu0  ;;  %v624_v18 = vpop.f32.mrb[0].mxu1 }
 0x19d   : > { %v511_v16 = vadd.f32 %v507_v15, %v434_v13  ;;  %v2682_v17 = vpop.f32.mrb[1].mxu0  ;;  %v628_v19 = vadd.f32 %v2564_v14, %v624_v18  ;;  %v2689_v20 = vpop.f32.mrb[1].mxu1 }
 0x19f   : > { %2948 = vtanh.f32 %v511_v16  ;;  %v2563_v23 = vmul.f32 -1.442695, %v511_v16  ;;  %v2566_v24 = vmul.f32 -1.442695, %v628_v19 }
 0x1a0   : > { %2950 = vtanh.f32 %v628_v19 }
 0x1a1   : > { %2952 = vpow2.f32 %v2563_v23 }
 0x1a2   : > { %2954 = vpow2.f32 %v2566_v24 }
 0x1a9   : > { %v2949_v21 = vpop.eup %2948 }
 0x1aa   : > { %525 = vrot.lane.b32.xlu0 %v2949_v21, %s3366_s7  ;;  %v2951_v22 = vpop.eup %2950 }
 0x1ab   : > { %v2953_v25 = vpop.eup %2952 }
 0x1ac   : > { %v515_v26 = vadd.f32 1.0, %v2953_v25  ;;  %v2955_v27 = vpop.eup %2954 }
 0x1ad   : > { %v632_v28 = vadd.f32 1.0, %v2955_v27 }
 0x1ae   : > { %642 = vrot.lane.b32.xlu0 %v2951_v22, %s3366_s7  ;;  %2956 = vrcp.f32 %v515_v26 }
 0x1af   : > { %2958 = vrcp.f32 %v632_v28 }
 0x1b8   : > { %v2957_v29 = vpop.eup %2956 }
 0x1b9   : > { %v2959_v32 = vpop.eup %2958  ;;  %v523_v36 = vmul.f32 %v2957_v29, %v521_v35 }
 0x1ba   : > { %v640_v40 = vmul.f32 %v2959_v32, %v638_v37 }
 0x21c   : > { %v526_v30 = vpop.permute.xlu0 %525 }
 0x21d   : > { %v528_v31 = vmul.f32 %v2957_v29, %v526_v30 }
 0x21f   : > { %530 = vrot.lane.b32.xlu0 %v528_v31, %s3365_s27 }
 0x220   : > { %v643_v33 = vpop.permute.xlu0 %642 }
 0x221   : > { %v645_v34 = vmul.f32 %v2959_v32, %v643_v33 }
 0x223   : > { %647 = vrot.lane.b32.xlu1 %v645_v34, %s3365_s27 }
 0x291   : > { %v531_v38 = vpop.permute.xlu0 %530 }
 0x292   : > { %v533_v39 = vadd.f32 %v531_v38, %v523_v36 }
 0x294   : > { %2960 = vtanh.f32 %v533_v39 }
 0x295   : > { %v648_v41 = vpop.permute.xlu1 %647 }
 0x296   : > { %v650_v42 = vadd.f32 %v648_v41, %v640_v40 }
 0x298   : > { %2962 = vtanh.f32 %v650_v42 }
 0x29e   : > { %v2961_v43 = vpop.eup %2960 }
 0x29f   : > { %536 = vrot.lane.b32.xlu0 %v2961_v43, %s3367_s25  ;;  %v2580_v43 = vld [vmem:[%s3700_s14 + $0x28] sm:$0xff] }
 0x2a2   : > { %v2963_v44 = vpop.eup %2962 }
 0x2a3   : > { %653 = vrot.lane.b32.xlu1 %v2963_v44, %s3367_s25 }
 0x311   : > { %v537_v45 = vpop.permute.xlu0 %536 }
 0x312   : > { %v539_v46 = vmul.f32 %v2957_v29, %v537_v45 }
 0x314   : > { %541 = vrot.lane.b32.xlu0 %v539_v46, %s3368_s18 }
 0x315   : > { %v654_v47 = vpop.permute.xlu1 %653 }
 0x316   : > { %v656_v48 = vmul.f32 %v2959_v32, %v654_v47 }
 0x318   : > { %658 = vrot.lane.b32.xlu1 %v656_v48, %s3368_s18  ;;  %546 = vrot.lane.b32.xlu0 %v533_v39, %s3369_s12  ;;  %v2576_v39 = vld [vmem:[%s3693_s15 + $0x10] sm:$0xff] }
 0x31c   : > { %663 = vrot.lane.b32.xlu1 %v650_v42, %s3369_s12 }
 0x386   : > { %v542_v49 = vpop.permute.xlu0 %541 }
 0x387   : > { %544 = vst.msk [vmem:[#allocation2] sm:$0xff] %vm423_vm0, %v542_v49  ;;  %550 = vst.msk [vmem:[%s3765_s30] sm:$0xff] %vm423_vm0, %v542_v49 }
 0x38a   : > { %v659_v50 = vpop.permute.xlu1 %658  ;;  %v547_v51 = vpop.permute.xlu0 %546 }
 0x38b   : > { %661 = vst.msk [vmem:[#allocation4] sm:$0xff] %vm423_vm0, %v659_v50  ;;  %2567 = vst.msk [vmem:[%s3771_s2 + $0x38] sm:$0xff] %vm423_vm0, %v659_v50 }
 0x38c   : > { %549 = vst.msk [vmem:[#allocation3] sm:$0xff] %vm423_vm0, %v547_v51 }
 0x38e   : > { %v664_v52 = vpop.permute.xlu1 %663  ;;  %v671_v53 = vld [vmem:[#allocation2] sm:$0xff] }
 0x38f   : > { %666 = vst.msk [vmem:[#allocation5] sm:$0xff] %vm423_vm0, %v664_v52  ;;  %2695 = vmatmul.mubr.msk.f32.vlgmr.msra.gmra.mrb[2].mxu0 %vm423_vm0, %v671_v53 }
 0x390   : > { %2802 = vmatpush3.bf16.msra.mxu0 %v3729_v5  ;;  %2708 = vmatprep.mubr.msk.f32.mxu0 %vm3363_vm1, %v3364_v1 }
 0x391   : > { %2806 = vmatprep.subr.bf16.mxu0 %v3362_v0 }
 0x392   : > { %v789_v54 = vld [vmem:[#allocation4] sm:$0xff] }
 0x393   : > { %2702 = vmatmul.mubr.msk.f32.vlgmr.msra.gmra.mrb[2].mxu1 %vm423_vm0, %v789_v54  ;;  %v672_v3 = vld [vmem:[#allocation3] sm:$0xff] }
 0x394   : > { %2805 = vmatpush3.bf16.msra.mxu1 %v3731_v7  ;;  %2715 = vmatprep.mubr.msk.f32.mxu1 %vm3363_vm1, %v3364_v1 }
 0x395   : > { %2809 = vmatprep.subr.bf16.mxu1 %v3362_v0 }
 0x396   : > { %v790_v4 = vld [vmem:[#allocation5] sm:$0xff] }
 0x462   : > { %v742_v56 = vpop.f32.mrb[2].mxu0 }
 0x463   : > { %v746_v57 = vadd.f32 %v2568_v55, %v742_v56  ;;  %v2696_v58 = vpop.f32.mrb[3].mxu0 }
 0x465   : > { %2964 = vtanh.f32 %v746_v57  ;;  %v2570_v6 = vmul.f32 -1.442695, %v746_v57 }
 0x466   : > { %v860_v60 = vpop.f32.mrb[2].mxu1 }
 0x467   : > { %v864_v61 = vadd.f32 %v2572_v59, %v860_v60  ;;  %v2703_v62 = vpop.f32.mrb[3].mxu1 }
 0x469   : > { %2966 = vtanh.f32 %v864_v61  ;;  %v2574_v8 = vmul.f32 -1.442695, %v864_v61 }
 0x46a   : > { %2968 = vpow2.f32 %v2570_v6 }
 0x46b   : > { %2970 = vpow2.f32 %v2574_v8 }
 0x46f   : > { %v2965_v63 = vpop.eup %2964 }
 0x470   : > { %760 = vrot.lane.b32.xlu0 %v2965_v63, %s3366_s7 }
 0x473   : > { %v2967_v2 = vpop.eup %2966 }
 0x474   : > { %878 = vrot.lane.b32.xlu1 %v2967_v2, %s3366_s7  ;;  %755 = vrot.lane.b32.xlu0 %v672_v3, %s3365_s27  ;;  %v2969_v9 = vpop.eup %2968 }
 0x475   : > { %v750_v10 = vadd.f32 1.0, %v2969_v9  ;;  %v2971_v11 = vpop.eup %2970 }
 0x476   : > { %v868_v12 = vadd.f32 1.0, %v2971_v11 }
 0x477   : > { %2972 = vrcp.f32 %v750_v10 }
 0x478   : > { %873 = vrot.lane.b32.xlu1 %v790_v4, %s3365_s27  ;;  %2974 = vrcp.f32 %v868_v12 }
 0x481   : > { %v2973_v13 = vpop.eup %2972 }
 0x482   : > { %v2975_v16 = vpop.eup %2974 }
 0x4e2   : > { %v761_v14 = vpop.permute.xlu0 %760 }
 0x4e3   : > { %v763_v15 = vmul.f32 %v2973_v13, %v761_v14 }
 0x4e5   : > { %765 = vrot.lane.b32.xlu0 %v763_v15, %s3365_s27 }
 0x4e6   : > { %v879_v17 = vpop.permute.xlu1 %878  ;;  %v756_v19 = vpop.permute.xlu0 %755 }
 0x4e7   : > { %v881_v18 = vmul.f32 %v2975_v16, %v879_v17  ;;  %v758_v20 = vmul.f32 %v2973_v13, %v756_v19 }
 0x4e9   : > { %883 = vrot.lane.b32.xlu1 %v881_v18, %s3365_s27 }
 0x4ea   : > { %v874_v21 = vpop.permute.xlu1 %873 }
 0x4eb   : > { %v876_v24 = vmul.f32 %v2975_v16, %v874_v21 }
 0x557   : > { %v766_v22 = vpop.permute.xlu0 %765 }
 0x558   : > { %v768_v23 = vadd.f32 %v766_v22, %v758_v20 }
 0x55a   : > { %2976 = vtanh.f32 %v768_v23 }
 0x55b   : > { %v884_v25 = vpop.permute.xlu1 %883 }
 0x55c   : > { %v886_v26 = vadd.f32 %v884_v25, %v876_v24 }
 0x55e   : > { %2978 = vtanh.f32 %v886_v26 }
 0x564   : > { %v2977_v27 = vpop.eup %2976 }
 0x565   : > { %771 = vrot.lane.b32.xlu0 %v2977_v27, %s3367_s25  ;;  %v2588_v27 = vld [vmem:[%s3700_s14 + $0x20] sm:$0xff] }
 0x568   : > { %v2979_v28 = vpop.eup %2978 }
 0x569   : > { %889 = vrot.lane.b32.xlu1 %v2979_v28, %s3367_s25 }
 0x5d7   : > { %v772_v29 = vpop.permute.xlu0 %771 }
 0x5d8   : > { %v774_v30 = vmul.f32 %v2973_v13, %v772_v29 }
 0x5da   : > { %776 = vrot.lane.b32.xlu0 %v774_v30, %s3368_s18 }
 0x5db   : > { %v890_v31 = vpop.permute.xlu1 %889 }
 0x5dc   : > { %v892_v32 = vmul.f32 %v2975_v16, %v890_v31 }
 0x5de   : > { %894 = vrot.lane.b32.xlu1 %v892_v32, %s3368_s18  ;;  %781 = vrot.lane.b32.xlu0 %v768_v23, %s3369_s12  ;;  %v2584_v23 = vld [vmem:[%s3693_s15 + $0x18] sm:$0xff] }
 0x5e2   : > { %899 = vrot.lane.b32.xlu1 %v886_v26, %s3369_s12 }
 0x64c   : > { %v777_v33 = vpop.permute.xlu0 %776 }
 0x64d   : > { %779 = vst.msk [vmem:[#allocation2] sm:$0xff] %vm423_vm0, %v777_v33  ;;  %2571 = vst.msk [vmem:[%s3765_s30 + $0x8] sm:$0xff] %vm423_vm0, %v777_v33 }
 0x650   : > { %v895_v34 = vpop.permute.xlu1 %894  ;;  %v782_v35 = vpop.permute.xlu0 %781 }
 0x651   : > { %897 = vst.msk [vmem:[#allocation4] sm:$0xff] %vm423_vm0, %v895_v34  ;;  %2575 = vst.msk [vmem:[%s3771_s2 + $0x30] sm:$0xff] %vm423_vm0, %v895_v34 }
 0x652   : > { %784 = vst.msk [vmem:[#allocation3] sm:$0xff] %vm423_vm0, %v782_v35 }
 0x654   : > { %v900_v36 = vpop.permute.xlu1 %899  ;;  %v907_v37 = vld [vmem:[#allocation2] sm:$0xff] }
 0x655   : > { %902 = vst.msk [vmem:[#allocation5] sm:$0xff] %vm423_vm0, %v900_v36  ;;  %2709 = vmatmul.mubr.msk.f32.vlgmr.msra.gmra.mrb[4].mxu0 %vm423_vm0, %v907_v37 }
 0x656   : > { %2808 = vmatpush3.bf16.msra.mxu0 %v3729_v5  ;;  %2722 = vmatprep.mubr.msk.f32.mxu0 %vm3363_vm1, %v3364_v1 }
 0x657   : > { %2812 = vmatprep.subr.bf16.mxu0 %v3362_v0 }
 0x658   : > { %v1025_v38 = vld [vmem:[#allocation4] sm:$0xff] }
 0x659   : > { %2716 = vmatmul.mubr.msk.f32.vlgmr.msra.gmra.mrb[4].mxu1 %vm423_vm0, %v1025_v38  ;;  %v908_v49 = vld [vmem:[#allocation3] sm:$0xff] }
 0x65a   : > { %2811 = vmatpush3.bf16.msra.mxu1 %v3731_v7  ;;  %2729 = vmatprep.mubr.msk.f32.mxu1 %vm3363_vm1, %v3364_v1 }
 0x65b   : > { %2815 = vmatprep.subr.bf16.mxu1 %v3362_v0 }
 0x65c   : > { %v1026_v50 = vld [vmem:[#allocation5] sm:$0xff] }
 0x728   : > { %v978_v40 = vpop.f32.mrb[4].mxu0 }
 0x729   : > { %v982_v41 = vadd.f32 %v2576_v39, %v978_v40  ;;  %v2710_v42 = vpop.f32.mrb[5].mxu0 }
 0x72b   : > { %2980 = vtanh.f32 %v982_v41  ;;  %v2578_v51 = vmul.f32 -1.442695, %v982_v41 }
 0x72c   : > { %v1096_v44 = vpop.f32.mrb[4].mxu1 }
 0x72d   : > { %v1100_v45 = vadd.f32 %v2580_v43, %v1096_v44  ;;  %v2717_v46 = vpop.f32.mrb[5].mxu1 }
 0x72f   : > { %2982 = vtanh.f32 %v1100_v45  ;;  %v2582_v52 = vmul.f32 -1.442695, %v1100_v45 }
 0x730   : > { %2984 = vpow2.f32 %v2578_v51 }
 0x731   : > { %2986 = vpow2.f32 %v2582_v52 }
 0x735   : > { %v2981_v47 = vpop.eup %2980 }
 0x736   : > { %996 = vrot.lane.b32.xlu0 %v2981_v47, %s3366_s7 }
 0x739   : > { %v2983_v48 = vpop.eup %2982 }
 0x73a   : > { %1114 = vrot.lane.b32.xlu1 %v2983_v48, %s3366_s7  ;;  %991 = vrot.lane.b32.xlu0 %v908_v49, %s3365_s27  ;;  %v2985_v53 = vpop.eup %2984 }
 0x73b   : > { %v986_v54 = vadd.f32 1.0, %v2985_v53  ;;  %v2987_v55 = vpop.eup %2986 }
 0x73c   : > { %v1104_v56 = vadd.f32 1.0, %v2987_v55 }
 0x73d   : > { %2988 = vrcp.f32 %v986_v54 }
 0x73e   : > { %1109 = vrot.lane.b32.xlu1 %v1026_v50, %s3365_s27  ;;  %2990 = vrcp.f32 %v1104_v56 }
 0x747   : > { %v2989_v57 = vpop.eup %2988 }
 0x748   : > { %v2991_v60 = vpop.eup %2990 }
 0x7a8   : > { %v997_v58 = vpop.permute.xlu0 %996 }
 0x7a9   : > { %v999_v59 = vmul.f32 %v2989_v57, %v997_v58 }
 0x7ab   : > { %1001 = vrot.lane.b32.xlu0 %v999_v59, %s3365_s27 }
 0x7ac   : > { %v1115_v61 = vpop.permute.xlu1 %1114  ;;  %v992_v63 = vpop.permute.xlu0 %991 }
 0x7ad   : > { %v1117_v62 = vmul.f32 %v2991_v60, %v1115_v61  ;;  %v994_v2 = vmul.f32 %v2989_v57, %v992_v63 }
 0x7af   : > { %1119 = vrot.lane.b32.xlu1 %v1117_v62, %s3365_s27 }
 0x7b0   : > { %v1110_v3 = vpop.permute.xlu1 %1109 }
 0x7b1   : > { %v1112_v8 = vmul.f32 %v2991_v60, %v1110_v3 }
 0x81d   : > { %v1002_v4 = vpop.permute.xlu0 %1001 }
 0x81e   : > { %v1004_v6 = vadd.f32 %v1002_v4, %v994_v2 }
 0x820   : > { %2992 = vtanh.f32 %v1004_v6 }
 0x821   : > { %v1120_v9 = vpop.permute.xlu1 %1119 }
 0x822   : > { %v1122_v10 = vadd.f32 %v1120_v9, %v1112_v8 }
 0x824   : > { %2994 = vtanh.f32 %v1122_v10 }
 0x82a   : > { %v2993_v11 = vpop.eup %2992 }
 0x82b   : > { %1007 = vrot.lane.b32.xlu0 %v2993_v11, %s3367_s25  ;;  %v2596_v11 = vld [vmem:[%s3700_s14 + $0x18] sm:$0xff] }
 0x82e   : > { %v2995_v12 = vpop.eup %2994 }
 0x82f   : > { %1125 = vrot.lane.b32.xlu1 %v2995_v12, %s3367_s25 }
 0x89d   : > { %v1008_v13 = vpop.permute.xlu0 %1007 }
 0x89e   : > { %v1010_v14 = vmul.f32 %v2989_v57, %v1008_v13 }
 0x8a0   : > { %1012 = vrot.lane.b32.xlu0 %v1010_v14, %s3368_s18 }
 0x8a1   : > { %v1126_v15 = vpop.permute.xlu1 %1125 }
 0x8a2   : > { %v1128_v16 = vmul.f32 %v2991_v60, %v1126_v15 }
 0x8a4   : > { %1130 = vrot.lane.b32.xlu1 %v1128_v16, %s3368_s18  ;;  %1017 = vrot.lane.b32.xlu0 %v1004_v6, %s3369_s12  ;;  %v2592_v6 = vld [vmem:[%s3693_s15 + $0x20] sm:$0xff] }
 0x8a8   : > { %1135 = vrot.lane.b32.xlu1 %v1122_v10, %s3369_s12 }
 0x912   : > { %v1013_v17 = vpop.permute.xlu0 %1012 }
 0x913   : > { %1015 = vst.msk [vmem:[#allocation2] sm:$0xff] %vm423_vm0, %v1013_v17  ;;  %2579 = vst.msk [vmem:[%s3765_s30 + $0x10] sm:$0xff] %vm423_vm0, %v1013_v17 }
 0x916   : > { %v1131_v18 = vpop.permute.xlu1 %1130  ;;  %v1018_v19 = vpop.permute.xlu0 %1017 }
 0x917   : > { %1133 = vst.msk [vmem:[#allocation4] sm:$0xff] %vm423_vm0, %v1131_v18  ;;  %2583 = vst.msk [vmem:[%s3771_s2 + $0x28] sm:$0xff] %vm423_vm0, %v1131_v18 }
 0x918   : > { %1020 = vst.msk [vmem:[#allocation3] sm:$0xff] %vm423_vm0, %v1018_v19 }
 0x91a   : > { %v1136_v20 = vpop.permute.xlu1 %1135  ;;  %v1143_v21 = vld [vmem:[#allocation2] sm:$0xff] }
 0x91b   : > { %1138 = vst.msk [vmem:[#allocation5] sm:$0xff] %vm423_vm0, %v1136_v20  ;;  %2723 = vmatmul.mubr.msk.f32.vlgmr.msra.gmra.mrb[6].mxu0 %vm423_vm0, %v1143_v21 }
 0x91c   : > { %2814 = vmatpush3.bf16.msra.mxu0 %v3729_v5  ;;  %2736 = vmatprep.mubr.msk.f32.mxu0 %vm3363_vm1, %v3364_v1 }
 0x91d   : > { %2818 = vmatprep.subr.bf16.mxu0 %v3362_v0 }
 0x91e   : > { %v1261_v22 = vld [vmem:[#allocation4] sm:$0xff] }
 0x91f   : > { %2730 = vmatmul.mubr.msk.f32.vlgmr.msra.gmra.mrb[6].mxu1 %vm423_vm0, %v1261_v22  ;;  %v1144_v33 = vld [vmem:[#allocation3] sm:$0xff] }
 0x920   : > { %2817 = vmatpush3.bf16.msra.mxu1 %v3731_v7  ;;  %2743 = vmatprep.mubr.msk.f32.mxu1 %vm3363_vm1, %v3364_v1 }
 0x921   : > { %2821 = vmatprep.subr.bf16.mxu1 %v3362_v0 }
 0x922   : > { %v1262_v34 = vld [vmem:[#allocation5] sm:$0xff] }
 0x9ee   : > { %v1214_v24 = vpop.f32.mrb[6].mxu0 }
 0x9ef   : > { %v1218_v25 = vadd.f32 %v2584_v23, %v1214_v24  ;;  %v2724_v26 = vpop.f32.mrb[7].mxu0 }
 0x9f1   : > { %2996 = vtanh.f32 %v1218_v25  ;;  %v2586_v35 = vmul.f32 -1.442695, %v1218_v25 }
 0x9f2   : > { %v1332_v28 = vpop.f32.mrb[6].mxu1 }
 0x9f3   : > { %v1336_v29 = vadd.f32 %v2588_v27, %v1332_v28  ;;  %v2731_v30 = vpop.f32.mrb[7].mxu1 }
 0x9f5   : > { %2998 = vtanh.f32 %v1336_v29  ;;  %v2590_v36 = vmul.f32 -1.442695, %v1336_v29 }
 0x9f6   : > { %3000 = vpow2.f32 %v2586_v35 }
 0x9f7   : > { %3002 = vpow2.f32 %v2590_v36 }
 0x9fb   : > { %v2997_v31 = vpop.eup %2996 }
 0x9fc   : > { %1232 = vrot.lane.b32.xlu0 %v2997_v31, %s3366_s7 }
 0x9ff   : > { %v2999_v32 = vpop.eup %2998 }
 0xa00   : > { %1350 = vrot.lane.b32.xlu1 %v2999_v32, %s3366_s7  ;;  %1227 = vrot.lane.b32.xlu0 %v1144_v33, %s3365_s27  ;;  %v3001_v37 = vpop.eup %3000 }
 0xa01   : > { %v1222_v38 = vadd.f32 1.0, %v3001_v37  ;;  %v3003_v39 = vpop.eup %3002 }
 0xa02   : > { %v1340_v40 = vadd.f32 1.0, %v3003_v39 }
 0xa03   : > { %3004 = vrcp.f32 %v1222_v38 }
 0xa04   : > { %1345 = vrot.lane.b32.xlu1 %v1262_v34, %s3365_s27  ;;  %3006 = vrcp.f32 %v1340_v40 }
 0xa0d   : > { %v3005_v41 = vpop.eup %3004 }
 0xa0e   : > { %v3007_v44 = vpop.eup %3006 }
 0xa6e   : > { %v1233_v42 = vpop.permute.xlu0 %1232 }
 0xa6f   : > { %v1235_v43 = vmul.f32 %v3005_v41, %v1233_v42 }
 0xa71   : > { %1237 = vrot.lane.b32.xlu0 %v1235_v43, %s3365_s27 }
 0xa72   : > { %v1351_v45 = vpop.permute.xlu1 %1350  ;;  %v1228_v47 = vpop.permute.xlu0 %1227 }
 0xa73   : > { %v1353_v46 = vmul.f32 %v3007_v44, %v1351_v45  ;;  %v1230_v48 = vmul.f32 %v3005_v41, %v1228_v47 }
 0xa75   : > { %1355 = vrot.lane.b32.xlu1 %v1353_v46, %s3365_s27 }
 0xa76   : > { %v1346_v49 = vpop.permute.xlu1 %1345 }
 0xa77   : > { %v1348_v52 = vmul.f32 %v3007_v44, %v1346_v49 }
 0xae3   : > { %v1238_v50 = vpop.permute.xlu0 %1237 }
 0xae4   : > { %v1240_v51 = vadd.f32 %v1238_v50, %v1230_v48 }
 0xae6   : > { %3008 = vtanh.f32 %v1240_v51 }
 0xae7   : > { %v1356_v53 = vpop.permute.xlu1 %1355 }
 0xae8   : > { %v1358_v54 = vadd.f32 %v1356_v53, %v1348_v52 }
 0xaea   : > { %3010 = vtanh.f32 %v1358_v54 }
 0xaf0   : > { %v3009_v55 = vpop.eup %3008 }
 0xaf1   : > { %1243 = vrot.lane.b32.xlu0 %v3009_v55, %s3367_s25  ;;  %v2604_v55 = vld [vmem:[%s3700_s14 + $0x10] sm:$0xff] }
 0xaf4   : > { %v3011_v56 = vpop.eup %3010 }
 0xaf5   : > { %1361 = vrot.lane.b32.xlu1 %v3011_v56, %s3367_s25 }
 0xb63   : > { %v1244_v57 = vpop.permute.xlu0 %1243 }
 0xb64   : > { %v1246_v58 = vmul.f32 %v3005_v41, %v1244_v57 }
 0xb66   : > { %1248 = vrot.lane.b32.xlu0 %v1246_v58, %s3368_s18 }
 0xb67   : > { %v1362_v59 = vpop.permute.xlu1 %1361 }
 0xb68   : > { %v1364_v60 = vmul.f32 %v3007_v44, %v1362_v59 }
 0xb6a   : > { %1366 = vrot.lane.b32.xlu1 %v1364_v60, %s3368_s18  ;;  %1253 = vrot.lane.b32.xlu0 %v1240_v51, %s3369_s12  ;;  %v2600_v51 = vld [vmem:[%s3693_s15 + $0x28] sm:$0xff] }
 0xb6e   : > { %1371 = vrot.lane.b32.xlu1 %v1358_v54, %s3369_s12 }
 0xbd8   : > { %v1249_v61 = vpop.permute.xlu0 %1248 }
 0xbd9   : > { %1251 = vst.msk [vmem:[#allocation2] sm:$0xff] %vm423_vm0, %v1249_v61  ;;  %2587 = vst.msk [vmem:[%s3765_s30 + $0x18] sm:$0xff] %vm423_vm0, %v1249_v61 }
 0xbdc   : > { %v1367_v62 = vpop.permute.xlu1 %1366  ;;  %v1254_v63 = vpop.permute.xlu0 %1253 }
 0xbdd   : > { %1369 = vst.msk [vmem:[#allocation4] sm:$0xff] %vm423_vm0, %v1367_v62  ;;  %2591 = vst.msk [vmem:[%s3771_s2 + $0x20] sm:$0xff] %vm423_vm0, %v1367_v62 }
 0xbde   : > { %1256 = vst.msk [vmem:[#allocation3] sm:$0xff] %vm423_vm0, %v1254_v63 }
 0xbe0   : > { %v1372_v2 = vpop.permute.xlu1 %1371  ;;  %v1379_v3 = vld [vmem:[#allocation2] sm:$0xff] }
 0xbe1   : > { %1374 = vst.msk [vmem:[#allocation5] sm:$0xff] %vm423_vm0, %v1372_v2  ;;  %2737 = vmatmul.mubr.msk.f32.vlgmr.msra.gmra.mrb[8].mxu0 %vm423_vm0, %v1379_v3 }
 0xbe2   : > { %2820 = vmatpush3.bf16.msra.mxu0 %v3729_v5  ;;  %2750 = vmatprep.mubr.msk.f32.mxu0 %vm3363_vm1, %v3364_v1 }
 0xbe3   : > { %2824 = vmatprep.subr.bf16.mxu0 %v3362_v0 }
 0xbe4   : > { %v1497_v4 = vld [vmem:[#allocation4] sm:$0xff] }
 0xbe5   : > { %2744 = vmatmul.mubr.msk.f32.vlgmr.msra.gmra.mrb[8].mxu1 %vm423_vm0, %v1497_v4  ;;  %v1380_v17 = vld [vmem:[#allocation3] sm:$0xff] }
 0xbe6   : > { %2823 = vmatpush3.bf16.msra.mxu1 %v3731_v7  ;;  %2757 = vmatprep.mubr.msk.f32.mxu1 %vm3363_vm1, %v3364_v1 }
 0xbe7   : > { %2827 = vmatprep.subr.bf16.mxu1 %v3362_v0 }
 0xbe8   : > { %v1498_v18 = vld [vmem:[#allocation5] sm:$0xff] }
 0xcb4   : > { %v1450_v8 = vpop.f32.mrb[8].mxu0 }
 0xcb5   : > { %v1454_v9 = vadd.f32 %v2592_v6, %v1450_v8  ;;  %v2738_v10 = vpop.f32.mrb[9].mxu0 }
 0xcb7   : > { %3012 = vtanh.f32 %v1454_v9  ;;  %v2594_v19 = vmul.f32 -1.442695, %v1454_v9 }
 0xcb8   : > { %v1568_v12 = vpop.f32.mrb[8].mxu1 }
 0xcb9   : > { %v1572_v13 = vadd.f32 %v2596_v11, %v1568_v12  ;;  %v2745_v14 = vpop.f32.mrb[9].mxu1 }
 0xcbb   : > { %3014 = vtanh.f32 %v1572_v13  ;;  %v2598_v20 = vmul.f32 -1.442695, %v1572_v13 }
 0xcbc   : > { %3016 = vpow2.f32 %v2594_v19 }
 0xcbd   : > { %3018 = vpow2.f32 %v2598_v20 }
 0xcc1   : > { %v3013_v15 = vpop.eup %3012 }
 0xcc2   : > { %1468 = vrot.lane.b32.xlu0 %v3013_v15, %s3366_s7 }
 0xcc5   : > { %v3015_v16 = vpop.eup %3014 }
 0xcc6   : > { %1586 = vrot.lane.b32.xlu1 %v3015_v16, %s3366_s7  ;;  %1463 = vrot.lane.b32.xlu0 %v1380_v17, %s3365_s27  ;;  %v3017_v21 = vpop.eup %3016 }
 0xcc7   : > { %v1458_v22 = vadd.f32 1.0, %v3017_v21  ;;  %v3019_v23 = vpop.eup %3018 }
 0xcc8   : > { %v1576_v24 = vadd.f32 1.0, %v3019_v23 }
 0xcc9   : > { %3020 = vrcp.f32 %v1458_v22 }
 0xcca   : > { %1581 = vrot.lane.b32.xlu1 %v1498_v18, %s3365_s27  ;;  %3022 = vrcp.f32 %v1576_v24 }
 0xcd3   : > { %v3021_v25 = vpop.eup %3020 }
 0xcd4   : > { %v3023_v28 = vpop.eup %3022 }
 0xd34   : > { %v1469_v26 = vpop.permute.xlu0 %1468 }
 0xd35   : > { %v1471_v27 = vmul.f32 %v3021_v25, %v1469_v26 }
 0xd37   : > { %1473 = vrot.lane.b32.xlu0 %v1471_v27, %s3365_s27 }
 0xd38   : > { %v1587_v29 = vpop.permute.xlu1 %1586  ;;  %v1464_v31 = vpop.permute.xlu0 %1463 }
 0xd39   : > { %v1589_v30 = vmul.f32 %v3023_v28, %v1587_v29  ;;  %v1466_v32 = vmul.f32 %v3021_v25, %v1464_v31 }
 0xd3b   : > { %1591 = vrot.lane.b32.xlu1 %v1589_v30, %s3365_s27 }
 0xd3c   : > { %v1582_v33 = vpop.permute.xlu1 %1581 }
 0xd3d   : > { %v1584_v36 = vmul.f32 %v3023_v28, %v1582_v33 }
 0xda9   : > { %v1474_v34 = vpop.permute.xlu0 %1473 }
 0xdaa   : > { %v1476_v35 = vadd.f32 %v1474_v34, %v1466_v32  ;;  %v2608_v34 = vld [vmem:[%s3693_s15 + $0x30] sm:$0xff] }
 0xdac   : > { %3024 = vtanh.f32 %v1476_v35 }
 0xdad   : > { %v1592_v37 = vpop.permute.xlu1 %1591 }
 0xdae   : > { %v1594_v38 = vadd.f32 %v1592_v37, %v1584_v36 }
 0xdb0   : > { %3026 = vtanh.f32 %v1594_v38 }
 0xdb6   : > { %v3025_v39 = vpop.eup %3024 }
 0xdb7   : > { %1479 = vrot.lane.b32.xlu0 %v3025_v39, %s3367_s25 }
 0xdba   : > { %v3027_v40 = vpop.eup %3026 }
 0xdbb   : > { %1597 = vrot.lane.b32.xlu1 %v3027_v40, %s3367_s25 }
 0xe29   : > { %v1480_v41 = vpop.permute.xlu0 %1479 }
 0xe2a   : > { %v1482_v42 = vmul.f32 %v3021_v25, %v1480_v41 }
 0xe2c   : > { %1484 = vrot.lane.b32.xlu0 %v1482_v42, %s3368_s18 }
 0xe2d   : > { %v1598_v43 = vpop.permute.xlu1 %1597 }
 0xe2e   : > { %v1600_v44 = vmul.f32 %v3023_v28, %v1598_v43 }
 0xe30   : > { %1602 = vrot.lane.b32.xlu1 %v1600_v44, %s3368_s18  ;;  %1489 = vrot.lane.b32.xlu0 %v1476_v35, %s3369_s12 }
 0xe34   : > { %1607 = vrot.lane.b32.xlu1 %v1594_v38, %s3369_s12  ;;  %v2612_v38 = vld [vmem:[%s3700_s14 + $0x8] sm:$0xff] }
 0xe9e   : > { %v1485_v45 = vpop.permute.xlu0 %1484 }
 0xe9f   : > { %1487 = vst.msk [vmem:[#allocation2] sm:$0xff] %vm423_vm0, %v1485_v45  ;;  %2595 = vst.msk [vmem:[%s3765_s30 + $0x20] sm:$0xff] %vm423_vm0, %v1485_v45 }
 0xea2   : > { %v1603_v46 = vpop.permute.xlu1 %1602  ;;  %v1490_v47 = vpop.permute.xlu0 %1489 }
 0xea3   : > { %1605 = vst.msk [vmem:[#allocation4] sm:$0xff] %vm423_vm0, %v1603_v46  ;;  %2599 = vst.msk [vmem:[%s3771_s2 + $0x18] sm:$0xff] %vm423_vm0, %v1603_v46 }
 0xea4   : > { %1492 = vst.msk [vmem:[#allocation3] sm:$0xff] %vm423_vm0, %v1490_v47 }
 0xea6   : > { %v1608_v48 = vpop.permute.xlu1 %1607  ;;  %v1615_v49 = vld [vmem:[#allocation2] sm:$0xff] }
 0xea7   : > { %1610 = vst.msk [vmem:[#allocation5] sm:$0xff] %vm423_vm0, %v1608_v48  ;;  %2751 = vmatmul.mubr.msk.f32.vlgmr.msra.gmra.mrb[10].mxu0 %vm423_vm0, %v1615_v49 }
 0xea8   : > { %2826 = vmatpush3.bf16.msra.mxu0 %v3729_v5  ;;  %2764 = vmatprep.mubr.msk.f32.mxu0 %vm3363_vm1, %v3364_v1 }
 0xea9   : > { %2830 = vmatprep.subr.bf16.mxu0 %v3362_v0 }
 0xeaa   : > { %v1733_v50 = vld [vmem:[#allocation4] sm:$0xff] }
 0xeab   : > { %2758 = vmatmul.mubr.msk.f32.vlgmr.msra.gmra.mrb[10].mxu1 %vm423_vm0, %v1733_v50  ;;  %v1616_v61 = vld [vmem:[#allocation3] sm:$0xff] }
 0xeac   : > { %2829 = vmatpush3.bf16.msra.mxu1 %v3731_v7  ;;  %2771 = vmatprep.mubr.msk.f32.mxu1 %vm3363_vm1, %v3364_v1 }
 0xead   : > { %2833 = vmatprep.subr.bf16.mxu1 %v3362_v0 }
 0xeae   : > { %v1734_v0 = vld [vmem:[#allocation5] sm:$0xff] }
 0xf7a   : > { %v1686_v52 = vpop.f32.mrb[10].mxu0 }
 0xf7b   : > { %v1690_v53 = vadd.f32 %v2600_v51, %v1686_v52  ;;  %v2752_v54 = vpop.f32.mrb[11].mxu0 }
 0xf7d   : > { %3028 = vtanh.f32 %v1690_v53  ;;  %v2602_v62 = vmul.f32 -1.442695, %v1690_v53 }
 0xf7e   : > { %v1804_v56 = vpop.f32.mrb[10].mxu1 }
 0xf7f   : > { %v1808_v57 = vadd.f32 %v2604_v55, %v1804_v56  ;;  %v2759_v58 = vpop.f32.mrb[11].mxu1 }
 0xf81   : > { %3030 = vtanh.f32 %v1808_v57  ;;  %v2606_v63 = vmul.f32 -1.442695, %v1808_v57 }
 0xf82   : > { %3032 = vpow2.f32 %v2602_v62 }
 0xf83   : > { %3034 = vpow2.f32 %v2606_v63 }
 0xf87   : > { %v3029_v59 = vpop.eup %3028 }
 0xf88   : > { %1704 = vrot.lane.b32.xlu0 %v3029_v59, %s3366_s7 }
 0xf8b   : > { %v3031_v60 = vpop.eup %3030 }
 0xf8c   : > { %1822 = vrot.lane.b32.xlu1 %v3031_v60, %s3366_s7  ;;  %1699 = vrot.lane.b32.xlu0 %v1616_v61, %s3365_s27  ;;  %v3033_v2 = vpop.eup %3032 }
 0xf8d   : > { %v1694_v3 = vadd.f32 1.0, %v3033_v2  ;;  %v3035_v4 = vpop.eup %3034 }
 0xf8e   : > { %v1812_v6 = vadd.f32 1.0, %v3035_v4 }
 0xf8f   : > { %3036 = vrcp.f32 %v1694_v3 }
 0xf90   : > { %1817 = vrot.lane.b32.xlu1 %v1734_v0, %s3365_s27  ;;  %3038 = vrcp.f32 %v1812_v6 }
 0xf99   : > { %v3037_v8 = vpop.eup %3036 }
 0xf9a   : > { %v3039_v11 = vpop.eup %3038 }
 0xffa   : > { %v1705_v9 = vpop.permute.xlu0 %1704 }
 0xffb   : > { %v1707_v10 = vmul.f32 %v3037_v8, %v1705_v9 }
 0xffd   : > { %1709 = vrot.lane.b32.xlu0 %v1707_v10, %s3365_s27 }
 0xffe   : > { %v1823_v12 = vpop.permute.xlu1 %1822  ;;  %v1700_v14 = vpop.permute.xlu0 %1699 }
 0xfff   : > { %v1825_v13 = vmul.f32 %v3039_v11, %v1823_v12  ;;  %v1702_v15 = vmul.f32 %v3037_v8, %v1700_v14  ;;  %v2616_v14 = vld [vmem:[%s3693_s15 + $0x38] sm:$0xff]  ;;  %s3226_s15 = sshll.u32 %s3370_s29, 4  ;;  %s3227_s15 = int_to_ptr.vmem [resolvable:$false] %s3226_s15 }
0x1000   : > { %s3228_s10 = scalar_lea.vmem %s3227_s15, 2048  ;;  %p3229_p1 = scmp.lt.s32.totalorder %s3985_s0, %s3227_s15 }
0x1001   : > { %1827 = vrot.lane.b32.xlu1 %v1825_v13, %s3365_s27  ;;  %p3230_p10 = scmp.lt.s32.totalorder %s3228_s10, %s3222_s28 }
0x1002   : > { %v1818_v16 = vpop.permute.xlu1 %1817 }
0x1003   : > { %v1820_v19 = vmul.f32 %v3039_v11, %v1818_v16  ;;  %p3231_p3 = por %p3230_p10, %p3229_p1 }
0x1005   : > { %p3232_p7 = pnand %p3231_p3, %p3225_p13 }
0x106f   : > { %v1710_v17 = vpop.permute.xlu0 %1709 }
0x1070   : > { %v1712_v18 = vadd.f32 %v1710_v17, %v1702_v15 }
0x1072   : > { %3040 = vtanh.f32 %v1712_v18 }
0x1073   : > { %v1828_v20 = vpop.permute.xlu1 %1827 }
0x1074   : > { %v1830_v21 = vadd.f32 %v1828_v20, %v1820_v19 }
0x1076   : > { %3042 = vtanh.f32 %v1830_v21 }
0x107c   : > { %v3041_v22 = vpop.eup %3040 }
0x107d   : > { %1715 = vrot.lane.b32.xlu0 %v3041_v22, %s3367_s25 }
0x1080   : > { %v3043_v23 = vpop.eup %3042 }
0x1081   : > { %1833 = vrot.lane.b32.xlu1 %v3043_v23, %s3367_s25 }
0x10ef   : > { %v1716_v24 = vpop.permute.xlu0 %1715 }
0x10f0   : > { %v1718_v25 = vmul.f32 %v3037_v8, %v1716_v24 }
0x10f2   : > { %1720 = vrot.lane.b32.xlu0 %v1718_v25, %s3368_s18 }
0x10f3   : > { %v1834_v26 = vpop.permute.xlu1 %1833 }
0x10f4   : > { %v1836_v27 = vmul.f32 %v3039_v11, %v1834_v26 }
0x10f6   : > { %1838 = vrot.lane.b32.xlu1 %v1836_v27, %s3368_s18  ;;  %1725 = vrot.lane.b32.xlu0 %v1712_v18, %s3369_s12  ;;  %v2203_v18 = vld [vmem:[%s3700_s14] sm:$0xff] }
0x10fa   : > { %1843 = vrot.lane.b32.xlu1 %v1830_v21, %s3369_s12 }
0x1164   : > { %v1721_v28 = vpop.permute.xlu0 %1720 }
0x1165   : > { %1723 = vst.msk [vmem:[#allocation2] sm:$0xff] %vm423_vm0, %v1721_v28  ;;  %2603 = vst.msk [vmem:[%s3765_s30 + $0x28] sm:$0xff] %vm423_vm0, %v1721_v28 }
0x1168   : > { %v1839_v29 = vpop.permute.xlu1 %1838  ;;  %v1726_v30 = vpop.permute.xlu0 %1725 }
0x1169   : > { %1841 = vst.msk [vmem:[#allocation4] sm:$0xff] %vm423_vm0, %v1839_v29  ;;  %2607 = vst.msk [vmem:[%s3771_s2 + $0x10] sm:$0xff] %vm423_vm0, %v1839_v29 }
0x116a   : > { %1728 = vst.msk [vmem:[#allocation3] sm:$0xff] %vm423_vm0, %v1726_v30 }
0x116c   : > { %v1844_v31 = vpop.permute.xlu1 %1843  ;;  %v1851_v32 = vld [vmem:[#allocation2] sm:$0xff] }
0x116d   : > { %1846 = vst.msk [vmem:[#allocation5] sm:$0xff] %vm423_vm0, %v1844_v31  ;;  %2765 = vmatmul.mubr.msk.f32.vlgmr.msra.gmra.mrb[12].mxu0 %vm423_vm0, %v1851_v32 }
0x116e   : > { %2832 = vmatpush3.bf16.msra.mxu0 %v3729_v5  ;;  %2778 = vmatprep.mubr.msk.f32.mxu0 %vm3363_vm1, %v3364_v1 }
0x1170   : > { %v1969_v33 = vld [vmem:[#allocation4] sm:$0xff] }
0x1171   : > { %2772 = vmatmul.mubr.msk.f32.vlgmr.msra.gmra.mrb[12].mxu1 %vm423_vm0, %v1969_v33  ;;  %v1852_v43 = vld [vmem:[#allocation3] sm:$0xff] }
0x1172   : > { %2835 = vmatpush3.bf16.msra.mxu1 %v3731_v7  ;;  %2785 = vmatprep.mubr.msk.f32.mxu1 %vm3363_vm1, %v3364_v1 }
0x1174   : > { %v1970_v1 = vld [vmem:[#allocation5] sm:$0xff] }
0x1240   : > { %v1922_v35 = vpop.f32.mrb[12].mxu0 }
0x1241   : > { %v1926_v36 = vadd.f32 %v2608_v34, %v1922_v35  ;;  %v2766_v37 = vpop.f32.mrb[13].mxu0 }
0x1243   : > { %3044 = vtanh.f32 %v1926_v36  ;;  %v2610_v7 = vmul.f32 -1.442695, %v1926_v36 }
0x1244   : > { %v2040_v39 = vpop.f32.mrb[12].mxu1 }
0x1245   : > { %v2044_v40 = vadd.f32 %v2612_v38, %v2040_v39  ;;  %v2773_v5 = vpop.f32.mrb[13].mxu1 }
0x1247   : > { %3046 = vtanh.f32 %v2044_v40  ;;  %v2614_v44 = vmul.f32 -1.442695, %v2044_v40 }
0x1248   : > { %3048 = vpow2.f32 %v2610_v7 }
0x1249   : > { %3050 = vpow2.f32 %v2614_v44 }
0x124d   : > { %v3045_v41 = vpop.eup %3044 }
0x124e   : > { %1940 = vrot.lane.b32.xlu0 %v3045_v41, %s3366_s7 }
0x1251   : > { %v3047_v42 = vpop.eup %3046 }
0x1252   : > { %2058 = vrot.lane.b32.xlu1 %v3047_v42, %s3366_s7  ;;  %1935 = vrot.lane.b32.xlu0 %v1852_v43, %s3365_s27  ;;  %v3049_v45 = vpop.eup %3048 }
0x1253   : > { %v1930_v46 = vadd.f32 1.0, %v3049_v45  ;;  %v3051_v47 = vpop.eup %3050 }
0x1254   : > { %v2048_v48 = vadd.f32 1.0, %v3051_v47 }
0x1255   : > { %3052 = vrcp.f32 %v1930_v46 }
0x1256   : > { %2053 = vrot.lane.b32.xlu1 %v1970_v1, %s3365_s27  ;;  %3054 = vrcp.f32 %v2048_v48 }
0x125f   : > { %v3053_v49 = vpop.eup %3052 }
0x1260   : > { %v3055_v52 = vpop.eup %3054 }
0x12c0   : > { %v1941_v50 = vpop.permute.xlu0 %1940 }
0x12c1   : > { %v1943_v51 = vmul.f32 %v3053_v49, %v1941_v50 }
0x12c3   : > { %1945 = vrot.lane.b32.xlu0 %v1943_v51, %s3365_s27 }
0x12c4   : > { %v2059_v53 = vpop.permute.xlu1 %2058  ;;  %v1936_v55 = vpop.permute.xlu0 %1935 }
0x12c5   : > { %v2061_v54 = vmul.f32 %v3055_v52, %v2059_v53  ;;  %v1938_v56 = vmul.f32 %v3053_v49, %v1936_v55 }
0x12c7   : > { %2063 = vrot.lane.b32.xlu1 %v2061_v54, %s3365_s27 }
0x12c8   : > { %v2054_v57 = vpop.permute.xlu1 %2053 }
0x12c9   : > { %v2056_v60 = vmul.f32 %v3055_v52, %v2054_v57 }
0x1335   : > { %v1946_v58 = vpop.permute.xlu0 %1945 }
0x1336   : > { %v1948_v59 = vadd.f32 %v1946_v58, %v1938_v56 }
0x1338   : > { %3056 = vtanh.f32 %v1948_v59 }
0x1339   : > { %v2064_v61 = vpop.permute.xlu1 %2063 }
0x133a   : > { %v2066_v0 = vadd.f32 %v2064_v61, %v2056_v60 }
0x133c   : > { %3058 = vtanh.f32 %v2066_v0 }
0x1342   : > { %v3057_v62 = vpop.eup %3056 }
0x1343   : > { %1951 = vrot.lane.b32.xlu0 %v3057_v62, %s3367_s25 }
0x1346   : > { %v3059_v63 = vpop.eup %3058 }
0x1347   : > { %2069 = vrot.lane.b32.xlu1 %v3059_v63, %s3367_s25 }
0x13b5   : > { %v1952_v2 = vpop.permute.xlu0 %1951 }
0x13b6   : > { %v1954_v3 = vmul.f32 %v3053_v49, %v1952_v2 }
0x13b8   : > { %1956 = vrot.lane.b32.xlu0 %v1954_v3, %s3368_s18 }
0x13b9   : > { %v2070_v4 = vpop.permute.xlu1 %2069 }
0x13ba   : > { %v2072_v6 = vmul.f32 %v3055_v52, %v2070_v4 }
0x13bc   : > { %2074 = vrot.lane.b32.xlu1 %v2072_v6, %s3368_s18  ;;  %1961 = vrot.lane.b32.xlu0 %v1948_v59, %s3369_s12 }
0x13c0   : > { %2079 = vrot.lane.b32.xlu1 %v2066_v0, %s3369_s12 }
0x142a   : > { %v1957_v8 = vpop.permute.xlu0 %1956 }
0x142b   : > { %1959 = vst.msk [vmem:[#allocation2] sm:$0xff] %vm423_vm0, %v1957_v8  ;;  %2611 = vst.msk [vmem:[%s3765_s30 + $0x30] sm:$0xff] %vm423_vm0, %v1957_v8 }
0x142e   : > { %v2075_v9 = vpop.permute.xlu1 %2074  ;;  %v1962_v10 = vpop.permute.xlu0 %1961 }
0x142f   : > { %2077 = vst.msk [vmem:[#allocation4] sm:$0xff] %vm423_vm0, %v2075_v9  ;;  %2615 = vst.msk [vmem:[%s3771_s2 + $0x8] sm:$0xff] %vm423_vm0, %v2075_v9 }
0x1430   : > { %1964 = vst.msk [vmem:[#allocation3] sm:$0xff] %vm423_vm0, %v1962_v10 }
0x1432   : > { %v2080_v11 = vpop.permute.xlu1 %2079  ;;  %v2087_v12 = vld [vmem:[#allocation2] sm:$0xff] }
0x1433   : > { %2082 = vst.msk [vmem:[#allocation5] sm:$0xff] %vm423_vm0, %v2080_v11  ;;  %2779 = vmatmul.mubr.msk.f32.vlgmr.msra.gmra.mrb[14].mxu0 %vm423_vm0, %v2087_v12 }
0x1436   : > { %v2204_v13 = vld [vmem:[#allocation4] sm:$0xff] }
0x1437   : > { %2786 = vmatmul.mubr.msk.f32.vlgmr.msra.gmra.mrb[14].mxu1 %vm423_vm0, %v2204_v13  ;;  %v2088_v24 = vld [vmem:[#allocation3] sm:$0xff] }
0x143a   : > { %v2205_v25 = vld [vmem:[#allocation5] sm:$0xff] }
0x1506   : > { %v2158_v15 = vpop.f32.mrb[14].mxu0 }
0x1507   : > { %v2162_v16 = vadd.f32 %v2616_v14, %v2158_v15  ;;  %v2780_v17 = vpop.f32.mrb[15].mxu0 }
0x1509   : > { %3060 = vtanh.f32 %v2162_v16  ;;  %v2618_v26 = vmul.f32 -1.442695, %v2162_v16 }
0x150a   : > { %v2275_v19 = vpop.f32.mrb[14].mxu1 }
0x150b   : > { %v2279_v20 = vadd.f32 %v2275_v19, %v2203_v18  ;;  %v2787_v21 = vpop.f32.mrb[15].mxu1 }
0x150d   : > { %3062 = vtanh.f32 %v2279_v20  ;;  %v2621_v27 = vmul.f32 -1.442695, %v2279_v20 }
0x150e   : > { %3064 = vpow2.f32 %v2618_v26 }
0x150f   : > { %3066 = vpow2.f32 %v2621_v27 }
0x1513   : > { %v3061_v22 = vpop.eup %3060 }
0x1514   : > { %2176 = vrot.lane.b32.xlu0 %v3061_v22, %s3366_s7 }
0x1517   : > { %v3063_v23 = vpop.eup %3062 }
0x1518   : > { %2293 = vrot.lane.b32.xlu1 %v3063_v23, %s3366_s7  ;;  %2171 = vrot.lane.b32.xlu0 %v2088_v24, %s3365_s27  ;;  %v3065_v28 = vpop.eup %3064 }
0x1519   : > { %v2166_v29 = vadd.f32 1.0, %v3065_v28  ;;  %v3067_v30 = vpop.eup %3066 }
0x151a   : > { %v2283_v31 = vadd.f32 1.0, %v3067_v30 }
0x151b   : > { %3068 = vrcp.f32 %v2166_v29 }
0x151c   : > { %2288 = vrot.lane.b32.xlu1 %v2205_v25, %s3365_s27  ;;  %3070 = vrcp.f32 %v2283_v31 }
0x1525   : > { %v3069_v32 = vpop.eup %3068 }
0x1526   : > { %v3071_v35 = vpop.eup %3070 }
0x1586   : > { %v2177_v33 = vpop.permute.xlu0 %2176 }
0x1587   : > { %v2179_v34 = vmul.f32 %v3069_v32, %v2177_v33 }
0x1589   : > { %2181 = vrot.lane.b32.xlu0 %v2179_v34, %s3365_s27 }
0x158a   : > { %v2294_v36 = vpop.permute.xlu1 %2293  ;;  %v2172_v38 = vpop.permute.xlu0 %2171 }
0x158b   : > { %v2296_v37 = vmul.f32 %v3071_v35, %v2294_v36  ;;  %v2174_v39 = vmul.f32 %v3069_v32, %v2172_v38 }
0x158d   : > { %2298 = vrot.lane.b32.xlu1 %v2296_v37, %s3365_s27 }
0x158e   : > { %v2289_v40 = vpop.permute.xlu1 %2288 }
0x158f   : > { %v2291_v42 = vmul.f32 %v3071_v35, %v2289_v40 }
0x15fb   : > { %v2182_v5 = vpop.permute.xlu0 %2181 }
0x15fc   : > { %v2184_v41 = vadd.f32 %v2182_v5, %v2174_v39 }
0x15fe   : > { %3072 = vtanh.f32 %v2184_v41 }
0x15ff   : > { %v2299_v43 = vpop.permute.xlu1 %2298 }
0x1600   : > { %v2301_v1 = vadd.f32 %v2299_v43, %v2291_v42 }
0x1602   : > { %3074 = vtanh.f32 %v2301_v1 }
0x1608   : > { %v3073_v7 = vpop.eup %3072 }
0x1609   : > { %2187 = vrot.lane.b32.xlu0 %v3073_v7, %s3367_s25 }
0x160c   : > { %v3075_v44 = vpop.eup %3074 }
0x160d   : > { %2304 = vrot.lane.b32.xlu1 %v3075_v44, %s3367_s25 }
0x167b   : > { %v2188_v45 = vpop.permute.xlu0 %2187 }
0x167c   : > { %v2190_v46 = vmul.f32 %v3069_v32, %v2188_v45 }
0x167e   : > { %2192 = vrot.lane.b32.xlu0 %v2190_v46, %s3368_s18 }
0x167f   : > { %v2305_v47 = vpop.permute.xlu1 %2304 }
0x1680   : > { %v2307_v48 = vmul.f32 %v3071_v35, %v2305_v47 }
0x1682   : > { %2309 = vrot.lane.b32.xlu1 %v2307_v48, %s3368_s18  ;;  %2197 = vrot.lane.b32.xlu0 %v2184_v41, %s3369_s12 }
0x1686   : > { %2314 = vrot.lane.b32.xlu1 %v2301_v1, %s3369_s12 }
0x16f0   : > { %v2193_v49 = vpop.permute.xlu0 %2192 }
0x16f1   : > { %2195 = vst.msk [vmem:[#allocation2] sm:$0xff] %vm423_vm0, %v2193_v49  ;;  %2619 = vst.msk [vmem:[%s3765_s30 + $0x38] sm:$0xff] %vm423_vm0, %v2193_v49 }
0x16f2   : > { %3235 = shalt.err (!%p3232_p7)
}
0x16f3   : > { %s3236_s14 = scalar_lea.hbm %s3993_s13, 1024  ;;  %s3240_s27 = scalar_lea.hbm %s4156_s20, 2048 }
0x16f4   : > { %p3237_p5 = scmp.ne.s32.totalorder %s3993_s13, %s3236_s14  ;;  %p3241_p9 = scmp.lt.u32.totalorder %s3993_s13, %s4156_s20 }
0x16f5   : > { %p3242_p0 = scmp.lt.u32.totalorder %s3240_s27, %s3236_s14  ;;  %p3244_p2 = scmp.lt.u32.totalorder %s3236_s14, %s3993_s13 }
0x16f6   : > { %p3238_p8 = pnand %p3237_p5, %p4157_p4 }
0x16f7   : > { %p3243_p6 = por %p3242_p0, %p3241_p9 }
0x16f8   : > { %p3239_p11 = pneg %p3238_p8 }
0x16f9   : > { %p3245_p12 = por %p3244_p2, %p3243_p6 }
0x16fb   : > { %p3246_p13 = pnand %p3245_p12, %p3239_p11 }
0x16fd   : > { %3249 = shalt.err (!%p3246_p13)
}
0x16fe   : > { %s3371_s18 = smov 128   ;;  %s3372_s12 = smov 256   ;;  %v2310_v50 = vpop.permute.xlu1 %2309  ;;  %v2198_v51 = vpop.permute.xlu0 %2197 }
0x16ff   : > { %s3373_s30 = smov 8   ;;  %s4158_s28 = sld [smem:[#allocation33_spill]]  ;;  %2312 = vst.msk [vmem:[#allocation4] sm:$0xff] %vm423_vm0, %v2310_v50  ;;  %2318 = vst.msk [vmem:[%s3771_s2] sm:$0xff] %vm423_vm0, %v2310_v50 }
0x1700   : > { %2850 = dma.vmem_to_hbm [thread:$0]  (%p4157_p4), %s3985_s0, 1024, %s3993_s13, %s2320_s21, %s3371_s18, %s3372_s12, %s3373_s30   ;;  %2200 = vst.msk [vmem:[#allocation3] sm:$0xff] %vm423_vm0, %v2198_v51 }
0x1701   : > { %s2325_s15 = scalar_lea.sflag [#allocation17], %s3687_s6  ;;  %s3250_s10 = scalar_lea.vmem %s3995_s11, 1024 }
0x1702   : > { %p3251_p1 = scmp.ne.s32.totalorder %s3995_s11, %s3250_s10  ;;  %s3374_s24 = smov [#allocation16]  }
0x1703   : > { %s3254_s0 = sshll.u32 %s3374_s24, 4  ;;  %s3255_s0 = int_to_ptr.vmem [resolvable:$false] %s3254_s0 }
0x1704   : > { %p3252_p10 = pnand %p3251_p1, %p4157_p4  ;;  %s3256_s13 = scalar_lea.vmem %s3255_s0, 2048 }
0x1705   : > { %s4032_s29 = scalar_lea.hbm %s4158_s28, %s2624_s19  ;;  %p3257_p7 = scmp.lt.s32.totalorder %s3995_s11, %s3255_s0 }
0x1706   : > { %p3253_p3 = pneg %p3252_p10  ;;  %p3258_p5 = scmp.lt.s32.totalorder %s3256_s13, %s3250_s10 }
0x1708   : > { %p3259_p8 = por %p3258_p5, %p3257_p7 }
0x170a   : > { %p3260_p11 = pnand %p3259_p8, %p3253_p3 }
0x170c   : > { %3263 = shalt.err (!%p3260_p11)
}
0x170d   : > { %s3264_s2 = scalar_lea.hbm %s4032_s29, 1024  ;;  %s3268_s14 = scalar_lea.hbm %s4158_s28, 2048 }
0x170e   : > { %p3265_p9 = scmp.ne.s32.totalorder %s4032_s29, %s3264_s2  ;;  %p3269_p2 = scmp.lt.u32.totalorder %s4032_s29, %s4158_s28 }
0x170f   : > { %p3270_p12 = scmp.lt.u32.totalorder %s3268_s14, %s3264_s2  ;;  %p3272_p1 = scmp.lt.u32.totalorder %s3264_s2, %s4032_s29 }
0x1710   : > { %p3266_p0 = pnand %p3265_p9, %p4157_p4 }
0x1711   : > { %p3271_p13 = por %p3270_p12, %p3269_p2 }
0x1712   : > { %p3267_p6 = pneg %p3266_p0 }
0x1713   : > { %p3273_p10 = por %p3272_p1, %p3271_p13 }
0x1715   : > { %p3274_p3 = pnand %p3273_p10, %p3267_p6 }
0x1717   : > { %3277 = shalt.err (!%p3274_p3)
}
0x1718   : > { %2851 = dma.vmem_to_hbm [thread:$0]  (%p4157_p4), %s3995_s11, 1024, %s4032_s29, %s2325_s15, %s3371_s18, %s3372_s12, %s3373_s30   ;;  %v2315_v52 = vpop.permute.xlu1 %2314 }
0x1719   : > { %2317 = vst.msk [vmem:[#allocation5] sm:$0xff] %vm423_vm0, %v2315_v52 }
0x171a PF: > { %s4159_s27 = sld [smem:[#allocation25_spill]]  ;;  %s4160_s7 = sld [smem:[#allocation27_spill]] }
0x171b   : > { %p4162_p5 = scmp.ge.s32.totalorder %s3352_s26, 2 }
0x1720   : > { %s2374_s25 = sand.u32 1, %s4159_s27   ;;  %p4161_p7 = scmp.ne.s32.totalorder %s4160_s7, 0 }
0x1721   : > { %s2375_s8 = scalar_lea.sflag [#allocation8], %s2374_s25 }
0x1722   : > { %p2872_p8 = pnand %p4162_p5, %p4161_p7 }
0x1724   : > { %3323 = dma.done.wait (!%p2872_p8), %s2375_s8, 1024  }
0x1725   : > { %3325 = vsyncadd (!%p2872_p8), %s2375_s8, 4294966272  ;;  %s2384_s9 = scalar_lea.sflag [#allocation17], %s2374_s25 }
0x1726   : > { %3327 = dma.done.wait (!%p2872_p8), %s2384_s9, 1024  }
0x1727   : > { %3329 = vsyncadd (!%p2872_p8), %s2384_s9, 4294966272  ;;  %s30_s26 = sadd.s32 1, %s3352_s26   ;;  %s4163_s6 = sld [smem:[#allocation29_spill]] }
0x1728   : > { %p27_p4 = scmp.ge.s32.totalorder %s30_s26, 4   ;;  %s4164_s24 = sld [smem:[#allocation26_spill]] }
0x1729   : > { %s4165_s25 = sld [smem:[#allocation28_spill]]  ;;  %s4166_s21 = smov %s3336_s22 }
0x172a   : > { %s4167_s22 = smov %s3340_s23  ;;  %29 = sbr.rel (!%p27_p4) target bundleno = 16 (0x10), region = 166 }
0x172d   : > { %s4168_s23 = smov %s4163_s6 }
0x1731   :  { %2389 = vsyncpa [#allocation7], 1 }
0x1732   :  { %2391 = vsyncpa [#allocation7 + $0x1], 1 }
0x1733   :  { %2392 = vsyncpa [#allocation10], 1 }
0x1734   :  { %2394 = vsyncpa [#allocation10 + $0x1], 1 }
0x1735   :  { %2395 = vsyncpa [#allocation13], 1 }
0x1736   :  { %2396 = vsyncpa [#allocation8], 1 }
0x1737   :  { %2398 = vsyncpa [#allocation8 + $0x1], 1 }
0x1738   :  { %2399 = vsyncpa [#allocation17], 1 }
0x1739   :  { %2401 = vsyncpa [#allocation17 + $0x1], 1 }

</bundles_post_ra>
